<compile_context>
chip_gen: v6e
topology: v6e:2x2x1
jax: 0.10.0
libtpu: 0.0.40
codegen_flags: <defaults>
</compile_context>

<pallas_src>
import functools
from collections import namedtuple

import jax
import jax.numpy as jnp
from jax.experimental import pallas as pl
from jax.experimental.pallas import tpu as pltpu

Genotype = namedtuple("Genotype", "normal normal_concat reduce reduce_concat")

GENOTYPE = Genotype(
    normal=[("sep_conv_3x3", 0), ("skip_connect", 1),
            ("max_pool_3x3", 0), ("sep_conv_3x3", 1),
            ("avg_pool_3x3", 2), ("skip_connect", 0),
            ("sep_conv_3x3", 3), ("max_pool_3x3", 2)],
    normal_concat=[2, 3, 4, 5],
    reduce=[], reduce_concat=[])

BN_EPS = 1e-5
_WPAD = 8   # halo width along W: multiple of 8 keeps the sublane concat aligned


# ----------------------------------------------------------------------------
# Fused cell kernel (one batch element per grid step, NHWC, channels on lanes)
# ----------------------------------------------------------------------------
def _cell_kernel(s0_ref, s1_ref, pre0_w_ref, pre0_sb_ref, pre1_w_ref,
                 pre1_sb_ref, dw_ref, pw_ref, sb_ref, *out_refs, genotype):

    def pad3(x, val):
        # (H, W, C) -> (H+2, W+2*_WPAD, C); W pads are 8 columns wide so the
        # sublane-axis concat stays tile aligned; H pads live on the untiled
        # major dim.
        h, w, c = x.shape
        side = jnp.full((h, _WPAD, c), val, jnp.float32)
        xw = jnp.concatenate([side, x, side], axis=1)
        row = jnp.full((1, w + 2 * _WPAD, c), val, jnp.float32)
        return jnp.concatenate([row, xw, row], axis=0)

    def window(xp, dy, dx, h, w):
        return xp[dy:dy + h, _WPAD - 1 + dx:_WPAD - 1 + dx + w, :]

    def conv1x1_bn(x, w, sb, relu_in):
        # (H,W,Cin) -> (H,W,Cout); folded eval-mode BatchNorm.
        h, wd, cin = x.shape
        if relu_in:
            x = jnp.maximum(x, 0.0)
        y = jnp.dot(x.reshape(h * wd, cin), w,
                    preferred_element_type=jnp.float32)
        y = y * sb[0:1, :] + sb[1:2, :]
        return y.reshape(h, wd, w.shape[1])

    def dw_conv3x3(x, w9c):                       # ReLU precedes every dw conv
        x = jnp.maximum(x, 0.0)
        h, wd, c = x.shape
        xp = pad3(x, 0.0)
        acc = jnp.zeros((h, wd, c), jnp.float32)
        for dy in range(3):
            for dx in range(3):
                acc = acc + window(xp, dy, dx, h, wd) * w9c[dy * 3 + dx]
        return acc

    def max_pool3(x):
        h, wd, c = x.shape
        xp = pad3(x, -jnp.inf)
        acc = window(xp, 0, 0, h, wd)
        for dy in range(3):
            for dx in range(3):
                if dy == 0 and dx == 0:
                    continue
                acc = jnp.maximum(acc, window(xp, dy, dx, h, wd))
        return acc

    def avg_pool3(x):                             # count_include_pad=False
        h, wd, c = x.shape
        xp = pad3(x, 0.0)
        onep = pad3(jnp.ones((h, wd, c), jnp.float32), 0.0)
        acc = jnp.zeros((h, wd, c), jnp.float32)
        cnt = jnp.zeros((h, wd, c), jnp.float32)
        for dy in range(3):
            for dx in range(3):
                acc = acc + window(xp, dy, dx, h, wd)
                cnt = cnt + window(onep, dy, dx, h, wd)
        return acc / cnt

    def sep_conv3x3(x, slot):                     # (ReLU, dw3x3, pw1x1, BN) x 2
        y = dw_conv3x3(x, dw_ref[slot, 0])
        y = conv1x1_bn(y, pw_ref[slot, 0], sb_ref[slot, 0], relu_in=False)
        y = dw_conv3x3(y, dw_ref[slot, 1])
        y = conv1x1_bn(y, pw_ref[slot, 1], sb_ref[slot, 1], relu_in=False)
        return y

    # preprocess0 / preprocess1 (ReLUConvBN 1x1)
    s0 = conv1x1_bn(s0_ref[0], pre0_w_ref[...], pre0_sb_ref[...], relu_in=True)
    s1 = conv1x1_bn(s1_ref[0], pre1_w_ref[...], pre1_sb_ref[...], relu_in=True)

    states = [s0, s1]
    op_names, indices = zip(*genotype.normal)
    slot = 0
    for i in range(len(op_names) // 2):
        hs = []
        for j in (2 * i, 2 * i + 1):
            name, x = op_names[j], states[indices[j]]
            if name == "skip_connect":            # stride 1 -> Identity
                h = x
            elif name == "max_pool_3x3":
                h = max_pool3(x)
            elif name == "avg_pool_3x3":
                h = avg_pool3(x)
            elif name == "sep_conv_3x3":
                h = sep_conv3x3(x, slot)
                slot += 1
            else:
                raise NotImplementedError(name)
            hs.append(h)
        states.append(hs[0] + hs[1])              # pairwise add fused in-kernel

    for r, idx in zip(out_refs, genotype.normal_concat):
        r[0] = states[idx]


# ----------------------------------------------------------------------------
# Wrapper: NCHW in / NCHW out, one fused pallas_call for the whole cell
# ----------------------------------------------------------------------------
def cell_forward(params, genotype, s0_nchw, s1_nchw, drop_prob=0.0):
    # TODO(synk): drop_path (training-only stochastic depth) not implemented;
    # eval path (drop_prob == 0) only.
    assert drop_prob == 0.0
    N, C_pp, H, W = s0_nchw.shape
    C_p = s1_nchw.shape[1]
    C = params["pw_w"].shape[-1]
    n_out = len(genotype.normal_concat)

    s0 = jnp.transpose(s0_nchw, (0, 2, 3, 1)).astype(jnp.float32)
    s1 = jnp.transpose(s1_nchw, (0, 2, 3, 1)).astype(jnp.float32)

    kernel = functools.partial(_cell_kernel, genotype=genotype)
    outs = pl.pallas_call(
        kernel,
        out_shape=tuple(jax.ShapeDtypeStruct((N, H, W, C), jnp.float32)
                        for _ in range(n_out)),
        grid=(N,),
        in_specs=[
            pl.BlockSpec((1, H, W, C_pp), lambda n: (n, 0, 0, 0)),
            pl.BlockSpec((1, H, W, C_p), lambda n: (n, 0, 0, 0)),
            pl.BlockSpec(params["pre0_w"].shape, lambda n: (0, 0)),
            pl.BlockSpec(params["pre0_sb"].shape, lambda n: (0, 0)),
            pl.BlockSpec(params["pre1_w"].shape, lambda n: (0, 0)),
            pl.BlockSpec(params["pre1_sb"].shape, lambda n: (0, 0)),
            pl.BlockSpec(params["dw_w"].shape, lambda n: (0, 0, 0, 0)),
            pl.BlockSpec(params["pw_w"].shape, lambda n: (0, 0, 0, 0)),
            pl.BlockSpec(params["pw_sb"].shape, lambda n: (0, 0, 0, 0)),
        ],
        out_specs=tuple(pl.BlockSpec((1, H, W, C), lambda n: (n, 0, 0, 0))
                        for _ in range(n_out)),
        compiler_params=pltpu.CompilerParams(
            dimension_semantics=("parallel",)),
    )(s0, s1, params["pre0_w"], params["pre0_sb"],
      params["pre1_w"], params["pre1_sb"],
      params["dw_w"], params["pw_w"], params["pw_sb"])

    # single fused XLA copy: channel concat + NHWC->NCHW (external contract)
    out = jnp.concatenate(outs, axis=-1)
    return jnp.transpose(out, (0, 3, 1, 2))


# ----------------------------------------------------------------------------
# Parameter init (deterministic, synthetic; eval-mode BN folded)
# ----------------------------------------------------------------------------
def _fold_bn(key, c):
    kg, kb, km, kv = jax.random.split(key, 4)
    gamma = 1.0 + 0.1 * jax.random.normal(kg, (c,), jnp.float32)
    beta = 0.1 * jax.random.normal(kb, (c,), jnp.float32)
    mean = 0.1 * jax.random.normal(km, (c,), jnp.float32)
    var = 1.0 + jnp.abs(jax.random.normal(kv, (c,), jnp.float32))
    scale = gamma / jnp.sqrt(var + BN_EPS)
    bias = beta - mean * scale
    return jnp.stack([scale, bias], axis=0)          # (2, C)


def init_cell_params(key, genotype, C_pp, C_p, C):
    op_names, _ = zip(*genotype.normal)
    n_sep = max(1, sum(n == "sep_conv_3x3" for n in op_names))
    keys = jax.random.split(key, 4 + 6 * n_sep)
    pre0_w = 0.1 * jax.random.normal(keys[0], (C_pp, C), jnp.float32)
    pre0_sb = _fold_bn(keys[1], C)
    pre1_w = 0.1 * jax.random.normal(keys[2], (C_p, C), jnp.float32)
    pre1_sb = _fold_bn(keys[3], C)
    dw, pw, sb = [], [], []
    k = 4
    for _ in range(n_sep):
        dws, pws, sbs = [], [], []
        for _ in range(2):
            dws.append(0.1 * jax.random.normal(keys[k], (9, C), jnp.float32))
            pws.append(0.1 * jax.random.normal(keys[k + 1], (C, C), jnp.float32))
            sbs.append(_fold_bn(keys[k + 2], C))
            k += 3
        dw.append(jnp.stack(dws))
        pw.append(jnp.stack(pws))
        sb.append(jnp.stack(sbs))
    return {"pre0_w": pre0_w, "pre0_sb": pre0_sb,
            "pre1_w": pre1_w, "pre1_sb": pre1_sb,
            "dw_w": jnp.stack(dw),        # (n_sep, 2, 9, C)
            "pw_w": jnp.stack(pw),        # (n_sep, 2, C, C)
            "pw_sb": jnp.stack(sb)}       # (n_sep, 2, 2, C)


# ----------------------------------------------------------------------------
# Pure-JAX reference (same math, no Pallas) for correctness check
# ----------------------------------------------------------------------------
def _ref_conv1x1_bn(x, w, sb, relu_in):
    if relu_in:
        x = jnp.maximum(x, 0.0)
    y = jnp.einsum("nhwc,cd->nhwd", x, w)
    return y * sb[0] + sb[1]


def _ref_dw_conv3x3(x, w9c):
    x = jnp.maximum(x, 0.0)
    N, H, W, C = x.shape
    xp = jnp.pad(x, ((0, 0), (1, 1), (1, 1), (0, 0)))
    acc = jnp.zeros_like(x)
    for dy in range(3):
        for dx in range(3):
            acc = acc + xp[:, dy:dy + H, dx:dx + W, :] * w9c[dy * 3 + dx]
    return acc


def _ref_max_pool3(x):
    N, H, W, C = x.shape
    xp = jnp.pad(x, ((0, 0), (1, 1), (1, 1), (0, 0)), constant_values=-jnp.inf)
    acc = jnp.full_like(x, -jnp.inf)
    for dy in range(3):
        for dx in range(3):
            acc = jnp.maximum(acc, xp[:, dy:dy + H, dx:dx + W, :])
    return acc


def _ref_avg_pool3(x):
    N, H, W, C = x.shape
    xp = jnp.pad(x, ((0, 0), (1, 1), (1, 1), (0, 0)))
    onep = jnp.pad(jnp.ones_like(x), ((0, 0), (1, 1), (1, 1), (0, 0)))
    acc = jnp.zeros_like(x)
    cnt = jnp.zeros_like(x)
    for dy in range(3):
        for dx in range(3):
            acc = acc + xp[:, dy:dy + H, dx:dx + W, :]
            cnt = cnt + onep[:, dy:dy + H, dx:dx + W, :]
    return acc / cnt


def _ref_sep_conv(x, params, slot):
    y = _ref_dw_conv3x3(x, params["dw_w"][slot, 0])
    y = _ref_conv1x1_bn(y, params["pw_w"][slot, 0], params["pw_sb"][slot, 0], False)
    y = _ref_dw_conv3x3(y, params["dw_w"][slot, 1])
    y = _ref_conv1x1_bn(y, params["pw_w"][slot, 1], params["pw_sb"][slot, 1], False)
    return y


def cell_forward_ref(params, genotype, s0_nchw, s1_nchw):
    s0 = jnp.transpose(s0_nchw, (0, 2, 3, 1)).astype(jnp.float32)
    s1 = jnp.transpose(s1_nchw, (0, 2, 3, 1)).astype(jnp.float32)
    s0 = _ref_conv1x1_bn(s0, params["pre0_w"], params["pre0_sb"], True)
    s1 = _ref_conv1x1_bn(s1, params["pre1_w"], params["pre1_sb"], True)
    states = [s0, s1]
    op_names, indices = zip(*genotype.normal)
    slot = 0
    for i in range(len(op_names) // 2):
        hs = []
        for j in (2 * i, 2 * i + 1):
            name, x = op_names[j], states[indices[j]]
            if name == "skip_connect":
                h = x
            elif name == "max_pool_3x3":
                h = _ref_max_pool3(x)
            elif name == "avg_pool_3x3":
                h = _ref_avg_pool3(x)
            elif name == "sep_conv_3x3":
                h = _ref_sep_conv(x, params, slot)
                slot += 1
            else:
                raise NotImplementedError(name)
            hs.append(h)
        states.append(hs[0] + hs[1])
    out = jnp.concatenate([states[i] for i in genotype.normal_concat], axis=-1)
    return jnp.transpose(out, (0, 3, 1, 2))


# ----------------------------------------------------------------------------
if __name__ == "__main__":
    key = jax.random.PRNGKey(0)
    kp, k0, k1 = jax.random.split(key, 3)
    N, C_pp, C_p, C, H, W = 2, 16, 16, 16, 8, 8

    params = init_cell_params(kp, GENOTYPE, C_pp, C_p, C)
    s0 = jax.random.normal(k0, (N, C_pp, H, W), jnp.float32)
    s1 = jax.random.normal(k1, (N, C_p, H, W), jnp.float32)

    out = cell_forward(params, GENOTYPE, s0, s1, drop_prob=0.0)
    out = jax.block_until_ready(out)

    ref = cell_forward_ref(params, GENOTYPE, s0, s1)
    assert out.shape == (N, len(GENOTYPE.normal_concat) * C, H, W), out.shape
    assert bool(jnp.all(jnp.isfinite(out)))
    assert bool(jnp.allclose(out, ref, atol=2e-4, rtol=2e-4))

    print("KERNEL_OK")
</pallas_src>

<mosaic_0001>
module attributes {stable_mosaic.version = 11 : i64} {
  func.func @_cell_kernel(%arg0: i32, %arg1: memref<1x8x8x16xf32, #tpu.memory_space<vmem>>, %arg2: memref<1x8x8x16xf32, #tpu.memory_space<vmem>>, %arg3: memref<16x16xf32, #tpu.memory_space<vmem>>, %arg4: memref<2x16xf32, #tpu.memory_space<vmem>>, %arg5: memref<16x16xf32, #tpu.memory_space<vmem>>, %arg6: memref<2x16xf32, #tpu.memory_space<vmem>>, %arg7: memref<3x2x9x16xf32, #tpu.memory_space<vmem>>, %arg8: memref<3x2x16x16xf32, #tpu.memory_space<vmem>>, %arg9: memref<3x2x2x16xf32, #tpu.memory_space<vmem>>, %arg10: memref<1x8x8x16xf32, #tpu.memory_space<vmem>>, %arg11: memref<1x8x8x16xf32, #tpu.memory_space<vmem>>, %arg12: memref<1x8x8x16xf32, #tpu.memory_space<vmem>>, %arg13: memref<1x8x8x16xf32, #tpu.memory_space<vmem>>) attributes {dimension_semantics = [#tpu.dimension_semantics<parallel>], iteration_bounds = array<i64: 2>, scalar_prefetch = 0 : i64, scratch_operands = 0 : i64, tpu.core_type = #tpu.core_type<tc>, window_params = [{transform_indices = @transform_0, window_bounds = array<i64: 1, 8, 8, 16>}, {transform_indices = @transform_1, window_bounds = array<i64: 1, 8, 8, 16>}, {pipeline_mode = #tpu.pipeline_mode<synchronous>, transform_indices = @transform_2, window_bounds = array<i64: 16, 16>}, {pipeline_mode = #tpu.pipeline_mode<synchronous>, transform_indices = @transform_3, window_bounds = array<i64: 2, 16>}, {pipeline_mode = #tpu.pipeline_mode<synchronous>, transform_indices = @transform_4, window_bounds = array<i64: 16, 16>}, {pipeline_mode = #tpu.pipeline_mode<synchronous>, transform_indices = @transform_5, window_bounds = array<i64: 2, 16>}, {pipeline_mode = #tpu.pipeline_mode<synchronous>, transform_indices = @transform_6, window_bounds = array<i64: 3, 2, 9, 16>}, {pipeline_mode = #tpu.pipeline_mode<synchronous>, transform_indices = @transform_7, window_bounds = array<i64: 3, 2, 16, 16>}, {pipeline_mode = #tpu.pipeline_mode<synchronous>, transform_indices = @transform_8, window_bounds = array<i64: 3, 2, 2, 16>}, {transform_indices = @transform_9, window_bounds = array<i64: 1, 8, 8, 16>}, {transform_indices = @transform_10, window_bounds = array<i64: 1, 8, 8, 16>}, {transform_indices = @transform_11, window_bounds = array<i64: 1, 8, 8, 16>}, {transform_indices = @transform_12, window_bounds = array<i64: 1, 8, 8, 16>}]} {
    %c0 = arith.constant 0 : index
    %c0_0 = arith.constant 0 : index
    %c0_1 = arith.constant 0 : index
    %c0_2 = arith.constant 0 : index
    %0 = vector.load %arg1[%c0, %c0_0, %c0_1, %c0_2] : memref<1x8x8x16xf32, #tpu.memory_space<vmem>>, vector<1x8x8x16xf32>
    %1 = vector.shape_cast %0 : vector<1x8x8x16xf32> to vector<8x8x16xf32>
    %c0_3 = arith.constant 0 : index
    %c0_4 = arith.constant 0 : index
    %2 = vector.load %arg3[%c0_3, %c0_4] : memref<16x16xf32, #tpu.memory_space<vmem>>, vector<16x16xf32>
    %c0_5 = arith.constant 0 : index
    %c0_6 = arith.constant 0 : index
    %3 = vector.load %arg4[%c0_5, %c0_6] : memref<2x16xf32, #tpu.memory_space<vmem>>, vector<2x16xf32>
    %cst = arith.constant 0.000000e+00 : f32
    %4 = vector.broadcast %cst : f32 to vector<8x8x16xf32>
    %5 = arith.maximumf %1, %4 : vector<8x8x16xf32>
    %6 = vector.shape_cast %5 : vector<8x8x16xf32> to vector<64x16xf32>
    %cst_7 = arith.constant dense<0.000000e+00> : vector<64x16xf32>
    %7 = tpu.matmul %6, %2, %cst_7 {dimension_numbers = #tpu.dot_dimension_numbers<[1], [0], [0], [1], [0, 0, 1, 1], [], []>} : vector<64x16xf32>, vector<16x16xf32>, vector<64x16xf32> -> vector<64x16xf32>
    %8 = vector.extract_strided_slice %3 {offsets = [0, 0], sizes = [1, 16], strides = [1, 1]} : vector<2x16xf32> to vector<1x16xf32>
    %9 = vector.broadcast %8 : vector<1x16xf32> to vector<64x16xf32>
    %10 = arith.mulf %7, %9 : vector<64x16xf32>
    %11 = vector.extract_strided_slice %3 {offsets = [1, 0], sizes = [1, 16], strides = [1, 1]} : vector<2x16xf32> to vector<1x16xf32>
    %12 = vector.broadcast %11 : vector<1x16xf32> to vector<64x16xf32>
    %13 = arith.addf %10, %12 : vector<64x16xf32>
    %14 = vector.shape_cast %13 : vector<64x16xf32> to vector<8x8x16xf32>
    %c0_8 = arith.constant 0 : index
    %c0_9 = arith.constant 0 : index
    %c0_10 = arith.constant 0 : index
    %c0_11 = arith.constant 0 : index
    %15 = vector.load %arg2[%c0_8, %c0_9, %c0_10, %c0_11] : memref<1x8x8x16xf32, #tpu.memory_space<vmem>>, vector<1x8x8x16xf32>
    %16 = vector.shape_cast %15 : vector<1x8x8x16xf32> to vector<8x8x16xf32>
    %c0_12 = arith.constant 0 : index
    %c0_13 = arith.constant 0 : index
    %17 = vector.load %arg5[%c0_12, %c0_13] : memref<16x16xf32, #tpu.memory_space<vmem>>, vector<16x16xf32>
    %c0_14 = arith.constant 0 : index
    %c0_15 = arith.constant 0 : index
    %18 = vector.load %arg6[%c0_14, %c0_15] : memref<2x16xf32, #tpu.memory_space<vmem>>, vector<2x16xf32>
    %cst_16 = arith.constant 0.000000e+00 : f32
    %19 = vector.broadcast %cst_16 : f32 to vector<8x8x16xf32>
    %20 = arith.maximumf %16, %19 : vector<8x8x16xf32>
    %21 = vector.shape_cast %20 : vector<8x8x16xf32> to vector<64x16xf32>
    %cst_17 = arith.constant dense<0.000000e+00> : vector<64x16xf32>
    %22 = tpu.matmul %21, %17, %cst_17 {dimension_numbers = #tpu.dot_dimension_numbers<[1], [0], [0], [1], [0, 0, 1, 1], [], []>} : vector<64x16xf32>, vector<16x16xf32>, vector<64x16xf32> -> vector<64x16xf32>
    %23 = vector.extract_strided_slice %18 {offsets = [0, 0], sizes = [1, 16], strides = [1, 1]} : vector<2x16xf32> to vector<1x16xf32>
    %24 = vector.broadcast %23 : vector<1x16xf32> to vector<64x16xf32>
    %25 = arith.mulf %22, %24 : vector<64x16xf32>
    %26 = vector.extract_strided_slice %18 {offsets = [1, 0], sizes = [1, 16], strides = [1, 1]} : vector<2x16xf32> to vector<1x16xf32>
    %27 = vector.broadcast %26 : vector<1x16xf32> to vector<64x16xf32>
    %28 = arith.addf %25, %27 : vector<64x16xf32>
    %29 = vector.shape_cast %28 : vector<64x16xf32> to vector<8x8x16xf32>
    %c0_18 = arith.constant 0 : index
    %c0_19 = arith.constant 0 : index
    %c0_20 = arith.constant 0 : index
    %c0_21 = arith.constant 0 : index
    %30 = vector.load %arg7[%c0_18, %c0_19, %c0_20, %c0_21] : memref<3x2x9x16xf32, #tpu.memory_space<vmem>>, vector<1x1x9x16xf32>
    %31 = vector.shape_cast %30 : vector<1x1x9x16xf32> to vector<9x16xf32>
    %cst_22 = arith.constant 0.000000e+00 : f32
    %32 = vector.broadcast %cst_22 : f32 to vector<8x8x16xf32>
    %33 = arith.maximumf %14, %32 : vector<8x8x16xf32>
    %cst_23 = arith.constant 0.000000e+00 : f32
    %34 = vector.broadcast %cst_23 : f32 to vector<8x8x16xf32>
    %35 = tpu.concatenate %34, %33, %34 in 1 : vector<8x8x16xf32>, vector<8x8x16xf32>, vector<8x8x16xf32> -> vector<8x24x16xf32>
    %cst_24 = arith.constant 0.000000e+00 : f32
    %36 = vector.broadcast %cst_24 : f32 to vector<1x24x16xf32>
    %37 = tpu.concatenate %36, %35, %36 in 0 : vector<1x24x16xf32>, vector<8x24x16xf32>, vector<1x24x16xf32> -> vector<10x24x16xf32>
    %cst_25 = arith.constant 0.000000e+00 : f32
    %38 = vector.broadcast %cst_25 : f32 to vector<8x8x16xf32>
    %39 = vector.extract_strided_slice %37 {offsets = [0, 7, 0], sizes = [8, 8, 16], strides = [1, 1, 1]} : vector<10x24x16xf32> to vector<8x8x16xf32>
    %40 = vector.extract_strided_slice %31 {offsets = [0, 0], sizes = [1, 16], strides = [1, 1]} : vector<9x16xf32> to vector<1x16xf32>
    %41 = vector.shape_cast %40 : vector<1x16xf32> to vector<16xf32>
    %42 = vector.shape_cast %41 : vector<16xf32> to vector<1x1x16xf32>
    %43 = vector.broadcast %42 : vector<1x1x16xf32> to vector<8x8x16xf32>
    %44 = arith.mulf %39, %43 : vector<8x8x16xf32>
    %45 = arith.addf %38, %44 : vector<8x8x16xf32>
    %46 = vector.extract_strided_slice %37 {offsets = [0, 8, 0], sizes = [8, 8, 16], strides = [1, 1, 1]} : vector<10x24x16xf32> to vector<8x8x16xf32>
    %47 = vector.extract_strided_slice %31 {offsets = [1, 0], sizes = [1, 16], strides = [1, 1]} : vector<9x16xf32> to vector<1x16xf32>
    %48 = vector.shape_cast %47 : vector<1x16xf32> to vector<16xf32>
    %49 = vector.shape_cast %48 : vector<16xf32> to vector<1x1x16xf32>
    %50 = vector.broadcast %49 : vector<1x1x16xf32> to vector<8x8x16xf32>
    %51 = arith.mulf %46, %50 : vector<8x8x16xf32>
    %52 = arith.addf %45, %51 : vector<8x8x16xf32>
    %53 = vector.extract_strided_slice %37 {offsets = [0, 9, 0], sizes = [8, 8, 16], strides = [1, 1, 1]} : vector<10x24x16xf32> to vector<8x8x16xf32>
    %54 = vector.extract_strided_slice %31 {offsets = [2, 0], sizes = [1, 16], strides = [1, 1]} : vector<9x16xf32> to vector<1x16xf32>
    %55 = vector.shape_cast %54 : vector<1x16xf32> to vector<16xf32>
    %56 = vector.shape_cast %55 : vector<16xf32> to vector<1x1x16xf32>
    %57 = vector.broadcast %56 : vector<1x1x16xf32> to vector<8x8x16xf32>
    %58 = arith.mulf %53, %57 : vector<8x8x16xf32>
    %59 = arith.addf %52, %58 : vector<8x8x16xf32>
    %60 = vector.extract_strided_slice %37 {offsets = [1, 7, 0], sizes = [8, 8, 16], strides = [1, 1, 1]} : vector<10x24x16xf32> to vector<8x8x16xf32>
    %61 = vector.extract_strided_slice %31 {offsets = [3, 0], sizes = [1, 16], strides = [1, 1]} : vector<9x16xf32> to vector<1x16xf32>
    %62 = vector.shape_cast %61 : vector<1x16xf32> to vector<16xf32>
    %63 = vector.shape_cast %62 : vector<16xf32> to vector<1x1x16xf32>
    %64 = vector.broadcast %63 : vector<1x1x16xf32> to vector<8x8x16xf32>
    %65 = arith.mulf %60, %64 : vector<8x8x16xf32>
    %66 = arith.addf %59, %65 : vector<8x8x16xf32>
    %67 = vector.extract_strided_slice %37 {offsets = [1, 8, 0], sizes = [8, 8, 16], strides = [1, 1, 1]} : vector<10x24x16xf32> to vector<8x8x16xf32>
    %68 = vector.extract_strided_slice %31 {offsets = [4, 0], sizes = [1, 16], strides = [1, 1]} : vector<9x16xf32> to vector<1x16xf32>
    %69 = vector.shape_cast %68 : vector<1x16xf32> to vector<16xf32>
    %70 = vector.shape_cast %69 : vector<16xf32> to vector<1x1x16xf32>
    %71 = vector.broadcast %70 : vector<1x1x16xf32> to vector<8x8x16xf32>
    %72 = arith.mulf %67, %71 : vector<8x8x16xf32>
    %73 = arith.addf %66, %72 : vector<8x8x16xf32>
    %74 = vector.extract_strided_slice %37 {offsets = [1, 9, 0], sizes = [8, 8, 16], strides = [1, 1, 1]} : vector<10x24x16xf32> to vector<8x8x16xf32>
    %75 = vector.extract_strided_slice %31 {offsets = [5, 0], sizes = [1, 16], strides = [1, 1]} : vector<9x16xf32> to vector<1x16xf32>
    %76 = vector.shape_cast %75 : vector<1x16xf32> to vector<16xf32>
    %77 = vector.shape_cast %76 : vector<16xf32> to vector<1x1x16xf32>
    %78 = vector.broadcast %77 : vector<1x1x16xf32> to vector<8x8x16xf32>
    %79 = arith.mulf %74, %78 : vector<8x8x16xf32>
    %80 = arith.addf %73, %79 : vector<8x8x16xf32>
    %81 = vector.extract_strided_slice %37 {offsets = [2, 7, 0], sizes = [8, 8, 16], strides = [1, 1, 1]} : vector<10x24x16xf32> to vector<8x8x16xf32>
    %82 = vector.extract_strided_slice %31 {offsets = [6, 0], sizes = [1, 16], strides = [1, 1]} : vector<9x16xf32> to vector<1x16xf32>
    %83 = vector.shape_cast %82 : vector<1x16xf32> to vector<16xf32>
    %84 = vector.shape_cast %83 : vector<16xf32> to vector<1x1x16xf32>
    %85 = vector.broadcast %84 : vector<1x1x16xf32> to vector<8x8x16xf32>
    %86 = arith.mulf %81, %85 : vector<8x8x16xf32>
    %87 = arith.addf %80, %86 : vector<8x8x16xf32>
    %88 = vector.extract_strided_slice %37 {offsets = [2, 8, 0], sizes = [8, 8, 16], strides = [1, 1, 1]} : vector<10x24x16xf32> to vector<8x8x16xf32>
    %89 = vector.extract_strided_slice %31 {offsets = [7, 0], sizes = [1, 16], strides = [1, 1]} : vector<9x16xf32> to vector<1x16xf32>
    %90 = vector.shape_cast %89 : vector<1x16xf32> to vector<16xf32>
    %91 = vector.shape_cast %90 : vector<16xf32> to vector<1x1x16xf32>
    %92 = vector.broadcast %91 : vector<1x1x16xf32> to vector<8x8x16xf32>
    %93 = arith.mulf %88, %92 : vector<8x8x16xf32>
    %94 = arith.addf %87, %93 : vector<8x8x16xf32>
    %95 = vector.extract_strided_slice %37 {offsets = [2, 9, 0], sizes = [8, 8, 16], strides = [1, 1, 1]} : vector<10x24x16xf32> to vector<8x8x16xf32>
    %96 = vector.extract_strided_slice %31 {offsets = [8, 0], sizes = [1, 16], strides = [1, 1]} : vector<9x16xf32> to vector<1x16xf32>
    %97 = vector.shape_cast %96 : vector<1x16xf32> to vector<16xf32>
    %98 = vector.shape_cast %97 : vector<16xf32> to vector<1x1x16xf32>
    %99 = vector.broadcast %98 : vector<1x1x16xf32> to vector<8x8x16xf32>
    %100 = arith.mulf %95, %99 : vector<8x8x16xf32>
    %101 = arith.addf %94, %100 : vector<8x8x16xf32>
    %c0_26 = arith.constant 0 : index
    %c0_27 = arith.constant 0 : index
    %c0_28 = arith.constant 0 : index
    %c0_29 = arith.constant 0 : index
    %102 = vector.load %arg8[%c0_26, %c0_27, %c0_28, %c0_29] : memref<3x2x16x16xf32, #tpu.memory_space<vmem>>, vector<1x1x16x16xf32>
    %103 = vector.shape_cast %102 : vector<1x1x16x16xf32> to vector<16x16xf32>
    %c0_30 = arith.constant 0 : index
    %c0_31 = arith.constant 0 : index
    %c0_32 = arith.constant 0 : index
    %c0_33 = arith.constant 0 : index
    %104 = vector.load %arg9[%c0_30, %c0_31, %c0_32, %c0_33] : memref<3x2x2x16xf32, #tpu.memory_space<vmem>>, vector<1x1x2x16xf32>
    %105 = vector.shape_cast %104 : vector<1x1x2x16xf32> to vector<2x16xf32>
    %106 = vector.shape_cast %101 : vector<8x8x16xf32> to vector<64x16xf32>
    %cst_34 = arith.constant dense<0.000000e+00> : vector<64x16xf32>
    %107 = tpu.matmul %106, %103, %cst_34 {dimension_numbers = #tpu.dot_dimension_numbers<[1], [0], [0], [1], [0, 0, 1, 1], [], []>} : vector<64x16xf32>, vector<16x16xf32>, vector<64x16xf32> -> vector<64x16xf32>
    %108 = vector.extract_strided_slice %105 {offsets = [0, 0], sizes = [1, 16], strides = [1, 1]} : vector<2x16xf32> to vector<1x16xf32>
    %109 = vector.broadcast %108 : vector<1x16xf32> to vector<64x16xf32>
    %110 = arith.mulf %107, %109 : vector<64x16xf32>
    %111 = vector.extract_strided_slice %105 {offsets = [1, 0], sizes = [1, 16], strides = [1, 1]} : vector<2x16xf32> to vector<1x16xf32>
    %112 = vector.broadcast %111 : vector<1x16xf32> to vector<64x16xf32>
    %113 = arith.addf %110, %112 : vector<64x16xf32>
    %114 = vector.shape_cast %113 : vector<64x16xf32> to vector<8x8x16xf32>
    %c0_35 = arith.constant 0 : index
    %c1 = arith.constant 1 : index
    %c0_36 = arith.constant 0 : index
    %c0_37 = arith.constant 0 : index
    %115 = vector.load %arg7[%c0_35, %c1, %c0_36, %c0_37] : memref<3x2x9x16xf32, #tpu.memory_space<vmem>>, vector<1x1x9x16xf32>
    %116 = vector.shape_cast %115 : vector<1x1x9x16xf32> to vector<9x16xf32>
    %cst_38 = arith.constant 0.000000e+00 : f32
    %117 = vector.broadcast %cst_38 : f32 to vector<8x8x16xf32>
    %118 = arith.maximumf %114, %117 : vector<8x8x16xf32>
    %cst_39 = arith.constant 0.000000e+00 : f32
    %119 = vector.broadcast %cst_39 : f32 to vector<8x8x16xf32>
    %120 = tpu.concatenate %119, %118, %119 in 1 : vector<8x8x16xf32>, vector<8x8x16xf32>, vector<8x8x16xf32> -> vector<8x24x16xf32>
    %cst_40 = arith.constant 0.000000e+00 : f32
    %121 = vector.broadcast %cst_40 : f32 to vector<1x24x16xf32>
    %122 = tpu.concatenate %121, %120, %121 in 0 : vector<1x24x16xf32>, vector<8x24x16xf32>, vector<1x24x16xf32> -> vector<10x24x16xf32>
    %cst_41 = arith.constant 0.000000e+00 : f32
    %123 = vector.broadcast %cst_41 : f32 to vector<8x8x16xf32>
    %124 = vector.extract_strided_slice %122 {offsets = [0, 7, 0], sizes = [8, 8, 16], strides = [1, 1, 1]} : vector<10x24x16xf32> to vector<8x8x16xf32>
    %125 = vector.extract_strided_slice %116 {offsets = [0, 0], sizes = [1, 16], strides = [1, 1]} : vector<9x16xf32> to vector<1x16xf32>
    %126 = vector.shape_cast %125 : vector<1x16xf32> to vector<16xf32>
    %127 = vector.shape_cast %126 : vector<16xf32> to vector<1x1x16xf32>
    %128 = vector.broadcast %127 : vector<1x1x16xf32> to vector<8x8x16xf32>
    %129 = arith.mulf %124, %128 : vector<8x8x16xf32>
    %130 = arith.addf %123, %129 : vector<8x8x16xf32>
    %131 = vector.extract_strided_slice %122 {offsets = [0, 8, 0], sizes = [8, 8, 16], strides = [1, 1, 1]} : vector<10x24x16xf32> to vector<8x8x16xf32>
    %132 = vector.extract_strided_slice %116 {offsets = [1, 0], sizes = [1, 16], strides = [1, 1]} : vector<9x16xf32> to vector<1x16xf32>
    %133 = vector.shape_cast %132 : vector<1x16xf32> to vector<16xf32>
    %134 = vector.shape_cast %133 : vector<16xf32> to vector<1x1x16xf32>
    %135 = vector.broadcast %134 : vector<1x1x16xf32> to vector<8x8x16xf32>
    %136 = arith.mulf %131, %135 : vector<8x8x16xf32>
    %137 = arith.addf %130, %136 : vector<8x8x16xf32>
    %138 = vector.extract_strided_slice %122 {offsets = [0, 9, 0], sizes = [8, 8, 16], strides = [1, 1, 1]} : vector<10x24x16xf32> to vector<8x8x16xf32>
    %139 = vector.extract_strided_slice %116 {offsets = [2, 0], sizes = [1, 16], strides = [1, 1]} : vector<9x16xf32> to vector<1x16xf32>
    %140 = vector.shape_cast %139 : vector<1x16xf32> to vector<16xf32>
    %141 = vector.shape_cast %140 : vector<16xf32> to vector<1x1x16xf32>
    %142 = vector.broadcast %141 : vector<1x1x16xf32> to vector<8x8x16xf32>
    %143 = arith.mulf %138, %142 : vector<8x8x16xf32>
    %144 = arith.addf %137, %143 : vector<8x8x16xf32>
    %145 = vector.extract_strided_slice %122 {offsets = [1, 7, 0], sizes = [8, 8, 16], strides = [1, 1, 1]} : vector<10x24x16xf32> to vector<8x8x16xf32>
    %146 = vector.extract_strided_slice %116 {offsets = [3, 0], sizes = [1, 16], strides = [1, 1]} : vector<9x16xf32> to vector<1x16xf32>
    %147 = vector.shape_cast %146 : vector<1x16xf32> to vector<16xf32>
    %148 = vector.shape_cast %147 : vector<16xf32> to vector<1x1x16xf32>
    %149 = vector.broadcast %148 : vector<1x1x16xf32> to vector<8x8x16xf32>
    %150 = arith.mulf %145, %149 : vector<8x8x16xf32>
    %151 = arith.addf %144, %150 : vector<8x8x16xf32>
    %152 = vector.extract_strided_slice %122 {offsets = [1, 8, 0], sizes = [8, 8, 16], strides = [1, 1, 1]} : vector<10x24x16xf32> to vector<8x8x16xf32>
    %153 = vector.extract_strided_slice %116 {offsets = [4, 0], sizes = [1, 16], strides = [1, 1]} : vector<9x16xf32> to vector<1x16xf32>
    %154 = vector.shape_cast %153 : vector<1x16xf32> to vector<16xf32>
    %155 = vector.shape_cast %154 : vector<16xf32> to vector<1x1x16xf32>
    %156 = vector.broadcast %155 : vector<1x1x16xf32> to vector<8x8x16xf32>
    %157 = arith.mulf %152, %156 : vector<8x8x16xf32>
    %158 = arith.addf %151, %157 : vector<8x8x16xf32>
    %159 = vector.extract_strided_slice %122 {offsets = [1, 9, 0], sizes = [8, 8, 16], strides = [1, 1, 1]} : vector<10x24x16xf32> to vector<8x8x16xf32>
    %160 = vector.extract_strided_slice %116 {offsets = [5, 0], sizes = [1, 16], strides = [1, 1]} : vector<9x16xf32> to vector<1x16xf32>
    %161 = vector.shape_cast %160 : vector<1x16xf32> to vector<16xf32>
    %162 = vector.shape_cast %161 : vector<16xf32> to vector<1x1x16xf32>
    %163 = vector.broadcast %162 : vector<1x1x16xf32> to vector<8x8x16xf32>
    %164 = arith.mulf %159, %163 : vector<8x8x16xf32>
    %165 = arith.addf %158, %164 : vector<8x8x16xf32>
    %166 = vector.extract_strided_slice %122 {offsets = [2, 7, 0], sizes = [8, 8, 16], strides = [1, 1, 1]} : vector<10x24x16xf32> to vector<8x8x16xf32>
    %167 = vector.extract_strided_slice %116 {offsets = [6, 0], sizes = [1, 16], strides = [1, 1]} : vector<9x16xf32> to vector<1x16xf32>
    %168 = vector.shape_cast %167 : vector<1x16xf32> to vector<16xf32>
    %169 = vector.shape_cast %168 : vector<16xf32> to vector<1x1x16xf32>
    %170 = vector.broadcast %169 : vector<1x1x16xf32> to vector<8x8x16xf32>
    %171 = arith.mulf %166, %170 : vector<8x8x16xf32>
    %172 = arith.addf %165, %171 : vector<8x8x16xf32>
    %173 = vector.extract_strided_slice %122 {offsets = [2, 8, 0], sizes = [8, 8, 16], strides = [1, 1, 1]} : vector<10x24x16xf32> to vector<8x8x16xf32>
    %174 = vector.extract_strided_slice %116 {offsets = [7, 0], sizes = [1, 16], strides = [1, 1]} : vector<9x16xf32> to vector<1x16xf32>
    %175 = vector.shape_cast %174 : vector<1x16xf32> to vector<16xf32>
    %176 = vector.shape_cast %175 : vector<16xf32> to vector<1x1x16xf32>
    %177 = vector.broadcast %176 : vector<1x1x16xf32> to vector<8x8x16xf32>
    %178 = arith.mulf %173, %177 : vector<8x8x16xf32>
    %179 = arith.addf %172, %178 : vector<8x8x16xf32>
    %180 = vector.extract_strided_slice %122 {offsets = [2, 9, 0], sizes = [8, 8, 16], strides = [1, 1, 1]} : vector<10x24x16xf32> to vector<8x8x16xf32>
    %181 = vector.extract_strided_slice %116 {offsets = [8, 0], sizes = [1, 16], strides = [1, 1]} : vector<9x16xf32> to vector<1x16xf32>
    %182 = vector.shape_cast %181 : vector<1x16xf32> to vector<16xf32>
    %183 = vector.shape_cast %182 : vector<16xf32> to vector<1x1x16xf32>
    %184 = vector.broadcast %183 : vector<1x1x16xf32> to vector<8x8x16xf32>
    %185 = arith.mulf %180, %184 : vector<8x8x16xf32>
    %186 = arith.addf %179, %185 : vector<8x8x16xf32>
    %c0_42 = arith.constant 0 : index
    %c1_43 = arith.constant 1 : index
    %c0_44 = arith.constant 0 : index
    %c0_45 = arith.constant 0 : index
    %187 = vector.load %arg8[%c0_42, %c1_43, %c0_44, %c0_45] : memref<3x2x16x16xf32, #tpu.memory_space<vmem>>, vector<1x1x16x16xf32>
    %188 = vector.shape_cast %187 : vector<1x1x16x16xf32> to vector<16x16xf32>
    %c0_46 = arith.constant 0 : index
    %c1_47 = arith.constant 1 : index
    %c0_48 = arith.constant 0 : index
    %c0_49 = arith.constant 0 : index
    %189 = vector.load %arg9[%c0_46, %c1_47, %c0_48, %c0_49] : memref<3x2x2x16xf32, #tpu.memory_space<vmem>>, vector<1x1x2x16xf32>
    %190 = vector.shape_cast %189 : vector<1x1x2x16xf32> to vector<2x16xf32>
    %191 = vector.shape_cast %186 : vector<8x8x16xf32> to vector<64x16xf32>
    %cst_50 = arith.constant dense<0.000000e+00> : vector<64x16xf32>
    %192 = tpu.matmul %191, %188, %cst_50 {dimension_numbers = #tpu.dot_dimension_numbers<[1], [0], [0], [1], [0, 0, 1, 1], [], []>} : vector<64x16xf32>, vector<16x16xf32>, vector<64x16xf32> -> vector<64x16xf32>
    %193 = vector.extract_strided_slice %190 {offsets = [0, 0], sizes = [1, 16], strides = [1, 1]} : vector<2x16xf32> to vector<1x16xf32>
    %194 = vector.broadcast %193 : vector<1x16xf32> to vector<64x16xf32>
    %195 = arith.mulf %192, %194 : vector<64x16xf32>
    %196 = vector.extract_strided_slice %190 {offsets = [1, 0], sizes = [1, 16], strides = [1, 1]} : vector<2x16xf32> to vector<1x16xf32>
    %197 = vector.broadcast %196 : vector<1x16xf32> to vector<64x16xf32>
    %198 = arith.addf %195, %197 : vector<64x16xf32>
    %199 = vector.shape_cast %198 : vector<64x16xf32> to vector<8x8x16xf32>
    %200 = arith.addf %199, %29 : vector<8x8x16xf32>
    %cst_51 = arith.constant 0xFF800000 : f32
    %201 = vector.broadcast %cst_51 : f32 to vector<8x8x16xf32>
    %202 = tpu.concatenate %201, %14, %201 in 1 : vector<8x8x16xf32>, vector<8x8x16xf32>, vector<8x8x16xf32> -> vector<8x24x16xf32>
    %cst_52 = arith.constant 0xFF800000 : f32
    %203 = vector.broadcast %cst_52 : f32 to vector<1x24x16xf32>
    %204 = tpu.concatenate %203, %202, %203 in 0 : vector<1x24x16xf32>, vector<8x24x16xf32>, vector<1x24x16xf32> -> vector<10x24x16xf32>
    %205 = vector.extract_strided_slice %204 {offsets = [0, 7, 0], sizes = [8, 8, 16], strides = [1, 1, 1]} : vector<10x24x16xf32> to vector<8x8x16xf32>
    %206 = vector.extract_strided_slice %204 {offsets = [0, 8, 0], sizes = [8, 8, 16], strides = [1, 1, 1]} : vector<10x24x16xf32> to vector<8x8x16xf32>
    %207 = arith.maximumf %205, %206 : vector<8x8x16xf32>
    %208 = vector.extract_strided_slice %204 {offsets = [0, 9, 0], sizes = [8, 8, 16], strides = [1, 1, 1]} : vector<10x24x16xf32> to vector<8x8x16xf32>
    %209 = arith.maximumf %207, %208 : vector<8x8x16xf32>
    %210 = vector.extract_strided_slice %204 {offsets = [1, 7, 0], sizes = [8, 8, 16], strides = [1, 1, 1]} : vector<10x24x16xf32> to vector<8x8x16xf32>
    %211 = arith.maximumf %209, %210 : vector<8x8x16xf32>
    %212 = vector.extract_strided_slice %204 {offsets = [1, 8, 0], sizes = [8, 8, 16], strides = [1, 1, 1]} : vector<10x24x16xf32> to vector<8x8x16xf32>
    %213 = arith.maximumf %211, %212 : vector<8x8x16xf32>
    %214 = vector.extract_strided_slice %204 {offsets = [1, 9, 0], sizes = [8, 8, 16], strides = [1, 1, 1]} : vector<10x24x16xf32> to vector<8x8x16xf32>
    %215 = arith.maximumf %213, %214 : vector<8x8x16xf32>
    %216 = vector.extract_strided_slice %204 {offsets = [2, 7, 0], sizes = [8, 8, 16], strides = [1, 1, 1]} : vector<10x24x16xf32> to vector<8x8x16xf32>
    %217 = arith.maximumf %215, %216 : vector<8x8x16xf32>
    %218 = vector.extract_strided_slice %204 {offsets = [2, 8, 0], sizes = [8, 8, 16], strides = [1, 1, 1]} : vector<10x24x16xf32> to vector<8x8x16xf32>
    %219 = arith.maximumf %217, %218 : vector<8x8x16xf32>
    %220 = vector.extract_strided_slice %204 {offsets = [2, 9, 0], sizes = [8, 8, 16], strides = [1, 1, 1]} : vector<10x24x16xf32> to vector<8x8x16xf32>
    %221 = arith.maximumf %219, %220 : vector<8x8x16xf32>
    %c1_53 = arith.constant 1 : index
    %c0_54 = arith.constant 0 : index
    %c0_55 = arith.constant 0 : index
    %c0_56 = arith.constant 0 : index
    %222 = vector.load %arg7[%c1_53, %c0_54, %c0_55, %c0_56] : memref<3x2x9x16xf32, #tpu.memory_space<vmem>>, vector<1x1x9x16xf32>
    %223 = vector.shape_cast %222 : vector<1x1x9x16xf32> to vector<9x16xf32>
    %cst_57 = arith.constant 0.000000e+00 : f32
    %224 = vector.broadcast %cst_57 : f32 to vector<8x8x16xf32>
    %225 = arith.maximumf %29, %224 : vector<8x8x16xf32>
    %cst_58 = arith.constant 0.000000e+00 : f32
    %226 = vector.broadcast %cst_58 : f32 to vector<8x8x16xf32>
    %227 = tpu.concatenate %226, %225, %226 in 1 : vector<8x8x16xf32>, vector<8x8x16xf32>, vector<8x8x16xf32> -> vector<8x24x16xf32>
    %cst_59 = arith.constant 0.000000e+00 : f32
    %228 = vector.broadcast %cst_59 : f32 to vector<1x24x16xf32>
    %229 = tpu.concatenate %228, %227, %228 in 0 : vector<1x24x16xf32>, vector<8x24x16xf32>, vector<1x24x16xf32> -> vector<10x24x16xf32>
    %cst_60 = arith.constant 0.000000e+00 : f32
    %230 = vector.broadcast %cst_60 : f32 to vector<8x8x16xf32>
    %231 = vector.extract_strided_slice %229 {offsets = [0, 7, 0], sizes = [8, 8, 16], strides = [1, 1, 1]} : vector<10x24x16xf32> to vector<8x8x16xf32>
    %232 = vector.extract_strided_slice %223 {offsets = [0, 0], sizes = [1, 16], strides = [1, 1]} : vector<9x16xf32> to vector<1x16xf32>
    %233 = vector.shape_cast %232 : vector<1x16xf32> to vector<16xf32>
    %234 = vector.shape_cast %233 : vector<16xf32> to vector<1x1x16xf32>
    %235 = vector.broadcast %234 : vector<1x1x16xf32> to vector<8x8x16xf32>
    %236 = arith.mulf %231, %235 : vector<8x8x16xf32>
    %237 = arith.addf %230, %236 : vector<8x8x16xf32>
    %238 = vector.extract_strided_slice %229 {offsets = [0, 8, 0], sizes = [8, 8, 16], strides = [1, 1, 1]} : vector<10x24x16xf32> to vector<8x8x16xf32>
    %239 = vector.extract_strided_slice %223 {offsets = [1, 0], sizes = [1, 16], strides = [1, 1]} : vector<9x16xf32> to vector<1x16xf32>
    %240 = vector.shape_cast %239 : vector<1x16xf32> to vector<16xf32>
    %241 = vector.shape_cast %240 : vector<16xf32> to vector<1x1x16xf32>
    %242 = vector.broadcast %241 : vector<1x1x16xf32> to vector<8x8x16xf32>
    %243 = arith.mulf %238, %242 : vector<8x8x16xf32>
    %244 = arith.addf %237, %243 : vector<8x8x16xf32>
    %245 = vector.extract_strided_slice %229 {offsets = [0, 9, 0], sizes = [8, 8, 16], strides = [1, 1, 1]} : vector<10x24x16xf32> to vector<8x8x16xf32>
    %246 = vector.extract_strided_slice %223 {offsets = [2, 0], sizes = [1, 16], strides = [1, 1]} : vector<9x16xf32> to vector<1x16xf32>
    %247 = vector.shape_cast %246 : vector<1x16xf32> to vector<16xf32>
    %248 = vector.shape_cast %247 : vector<16xf32> to vector<1x1x16xf32>
    %249 = vector.broadcast %248 : vector<1x1x16xf32> to vector<8x8x16xf32>
    %250 = arith.mulf %245, %249 : vector<8x8x16xf32>
    %251 = arith.addf %244, %250 : vector<8x8x16xf32>
    %252 = vector.extract_strided_slice %229 {offsets = [1, 7, 0], sizes = [8, 8, 16], strides = [1, 1, 1]} : vector<10x24x16xf32> to vector<8x8x16xf32>
    %253 = vector.extract_strided_slice %223 {offsets = [3, 0], sizes = [1, 16], strides = [1, 1]} : vector<9x16xf32> to vector<1x16xf32>
    %254 = vector.shape_cast %253 : vector<1x16xf32> to vector<16xf32>
    %255 = vector.shape_cast %254 : vector<16xf32> to vector<1x1x16xf32>
    %256 = vector.broadcast %255 : vector<1x1x16xf32> to vector<8x8x16xf32>
    %257 = arith.mulf %252, %256 : vector<8x8x16xf32>
    %258 = arith.addf %251, %257 : vector<8x8x16xf32>
    %259 = vector.extract_strided_slice %229 {offsets = [1, 8, 0], sizes = [8, 8, 16], strides = [1, 1, 1]} : vector<10x24x16xf32> to vector<8x8x16xf32>
    %260 = vector.extract_strided_slice %223 {offsets = [4, 0], sizes = [1, 16], strides = [1, 1]} : vector<9x16xf32> to vector<1x16xf32>
    %261 = vector.shape_cast %260 : vector<1x16xf32> to vector<16xf32>
    %262 = vector.shape_cast %261 : vector<16xf32> to vector<1x1x16xf32>
    %263 = vector.broadcast %262 : vector<1x1x16xf32> to vector<8x8x16xf32>
    %264 = arith.mulf %259, %263 : vector<8x8x16xf32>
    %265 = arith.addf %258, %264 : vector<8x8x16xf32>
    %266 = vector.extract_strided_slice %229 {offsets = [1, 9, 0], sizes = [8, 8, 16], strides = [1, 1, 1]} : vector<10x24x16xf32> to vector<8x8x16xf32>
    %267 = vector.extract_strided_slice %223 {offsets = [5, 0], sizes = [1, 16], strides = [1, 1]} : vector<9x16xf32> to vector<1x16xf32>
    %268 = vector.shape_cast %267 : vector<1x16xf32> to vector<16xf32>
    %269 = vector.shape_cast %268 : vector<16xf32> to vector<1x1x16xf32>
    %270 = vector.broadcast %269 : vector<1x1x16xf32> to vector<8x8x16xf32>
    %271 = arith.mulf %266, %270 : vector<8x8x16xf32>
    %272 = arith.addf %265, %271 : vector<8x8x16xf32>
    %273 = vector.extract_strided_slice %229 {offsets = [2, 7, 0], sizes = [8, 8, 16], strides = [1, 1, 1]} : vector<10x24x16xf32> to vector<8x8x16xf32>
    %274 = vector.extract_strided_slice %223 {offsets = [6, 0], sizes = [1, 16], strides = [1, 1]} : vector<9x16xf32> to vector<1x16xf32>
    %275 = vector.shape_cast %274 : vector<1x16xf32> to vector<16xf32>
    %276 = vector.shape_cast %275 : vector<16xf32> to vector<1x1x16xf32>
    %277 = vector.broadcast %276 : vector<1x1x16xf32> to vector<8x8x16xf32>
    %278 = arith.mulf %273, %277 : vector<8x8x16xf32>
    %279 = arith.addf %272, %278 : vector<8x8x16xf32>
    %280 = vector.extract_strided_slice %229 {offsets = [2, 8, 0], sizes = [8, 8, 16], strides = [1, 1, 1]} : vector<10x24x16xf32> to vector<8x8x16xf32>
    %281 = vector.extract_strided_slice %223 {offsets = [7, 0], sizes = [1, 16], strides = [1, 1]} : vector<9x16xf32> to vector<1x16xf32>
    %282 = vector.shape_cast %281 : vector<1x16xf32> to vector<16xf32>
    %283 = vector.shape_cast %282 : vector<16xf32> to vector<1x1x16xf32>
    %284 = vector.broadcast %283 : vector<1x1x16xf32> to vector<8x8x16xf32>
    %285 = arith.mulf %280, %284 : vector<8x8x16xf32>
    %286 = arith.addf %279, %285 : vector<8x8x16xf32>
    %287 = vector.extract_strided_slice %229 {offsets = [2, 9, 0], sizes = [8, 8, 16], strides = [1, 1, 1]} : vector<10x24x16xf32> to vector<8x8x16xf32>
    %288 = vector.extract_strided_slice %223 {offsets = [8, 0], sizes = [1, 16], strides = [1, 1]} : vector<9x16xf32> to vector<1x16xf32>
    %289 = vector.shape_cast %288 : vector<1x16xf32> to vector<16xf32>
    %290 = vector.shape_cast %289 : vector<16xf32> to vector<1x1x16xf32>
    %291 = vector.broadcast %290 : vector<1x1x16xf32> to vector<8x8x16xf32>
    %292 = arith.mulf %287, %291 : vector<8x8x16xf32>
    %293 = arith.addf %286, %292 : vector<8x8x16xf32>
    %c1_61 = arith.constant 1 : index
    %c0_62 = arith.constant 0 : index
    %c0_63 = arith.constant 0 : index
    %c0_64 = arith.constant 0 : index
    %294 = vector.load %arg8[%c1_61, %c0_62, %c0_63, %c0_64] : memref<3x2x16x16xf32, #tpu.memory_space<vmem>>, vector<1x1x16x16xf32>
    %295 = vector.shape_cast %294 : vector<1x1x16x16xf32> to vector<16x16xf32>
    %c1_65 = arith.constant 1 : index
    %c0_66 = arith.constant 0 : index
    %c0_67 = arith.constant 0 : index
    %c0_68 = arith.constant 0 : index
    %296 = vector.load %arg9[%c1_65, %c0_66, %c0_67, %c0_68] : memref<3x2x2x16xf32, #tpu.memory_space<vmem>>, vector<1x1x2x16xf32>
    %297 = vector.shape_cast %296 : vector<1x1x2x16xf32> to vector<2x16xf32>
    %298 = vector.shape_cast %293 : vector<8x8x16xf32> to vector<64x16xf32>
    %cst_69 = arith.constant dense<0.000000e+00> : vector<64x16xf32>
    %299 = tpu.matmul %298, %295, %cst_69 {dimension_numbers = #tpu.dot_dimension_numbers<[1], [0], [0], [1], [0, 0, 1, 1], [], []>} : vector<64x16xf32>, vector<16x16xf32>, vector<64x16xf32> -> vector<64x16xf32>
    %300 = vector.extract_strided_slice %297 {offsets = [0, 0], sizes = [1, 16], strides = [1, 1]} : vector<2x16xf32> to vector<1x16xf32>
    %301 = vector.broadcast %300 : vector<1x16xf32> to vector<64x16xf32>
    %302 = arith.mulf %299, %301 : vector<64x16xf32>
    %303 = vector.extract_strided_slice %297 {offsets = [1, 0], sizes = [1, 16], strides = [1, 1]} : vector<2x16xf32> to vector<1x16xf32>
    %304 = vector.broadcast %303 : vector<1x16xf32> to vector<64x16xf32>
    %305 = arith.addf %302, %304 : vector<64x16xf32>
    %306 = vector.shape_cast %305 : vector<64x16xf32> to vector<8x8x16xf32>
    %c1_70 = arith.constant 1 : index
    %c1_71 = arith.constant 1 : index
    %c0_72 = arith.constant 0 : index
    %c0_73 = arith.constant 0 : index
    %307 = vector.load %arg7[%c1_70, %c1_71, %c0_72, %c0_73] : memref<3x2x9x16xf32, #tpu.memory_space<vmem>>, vector<1x1x9x16xf32>
    %308 = vector.shape_cast %307 : vector<1x1x9x16xf32> to vector<9x16xf32>
    %cst_74 = arith.constant 0.000000e+00 : f32
    %309 = vector.broadcast %cst_74 : f32 to vector<8x8x16xf32>
    %310 = arith.maximumf %306, %309 : vector<8x8x16xf32>
    %cst_75 = arith.constant 0.000000e+00 : f32
    %311 = vector.broadcast %cst_75 : f32 to vector<8x8x16xf32>
    %312 = tpu.concatenate %311, %310, %311 in 1 : vector<8x8x16xf32>, vector<8x8x16xf32>, vector<8x8x16xf32> -> vector<8x24x16xf32>
    %cst_76 = arith.constant 0.000000e+00 : f32
    %313 = vector.broadcast %cst_76 : f32 to vector<1x24x16xf32>
    %314 = tpu.concatenate %313, %312, %313 in 0 : vector<1x24x16xf32>, vector<8x24x16xf32>, vector<1x24x16xf32> -> vector<10x24x16xf32>
    %cst_77 = arith.constant 0.000000e+00 : f32
    %315 = vector.broadcast %cst_77 : f32 to vector<8x8x16xf32>
    %316 = vector.extract_strided_slice %314 {offsets = [0, 7, 0], sizes = [8, 8, 16], strides = [1, 1, 1]} : vector<10x24x16xf32> to vector<8x8x16xf32>
    %317 = vector.extract_strided_slice %308 {offsets = [0, 0], sizes = [1, 16], strides = [1, 1]} : vector<9x16xf32> to vector<1x16xf32>
    %318 = vector.shape_cast %317 : vector<1x16xf32> to vector<16xf32>
    %319 = vector.shape_cast %318 : vector<16xf32> to vector<1x1x16xf32>
    %320 = vector.broadcast %319 : vector<1x1x16xf32> to vector<8x8x16xf32>
    %321 = arith.mulf %316, %320 : vector<8x8x16xf32>
    %322 = arith.addf %315, %321 : vector<8x8x16xf32>
    %323 = vector.extract_strided_slice %314 {offsets = [0, 8, 0], sizes = [8, 8, 16], strides = [1, 1, 1]} : vector<10x24x16xf32> to vector<8x8x16xf32>
    %324 = vector.extract_strided_slice %308 {offsets = [1, 0], sizes = [1, 16], strides = [1, 1]} : vector<9x16xf32> to vector<1x16xf32>
    %325 = vector.shape_cast %324 : vector<1x16xf32> to vector<16xf32>
    %326 = vector.shape_cast %325 : vector<16xf32> to vector<1x1x16xf32>
    %327 = vector.broadcast %326 : vector<1x1x16xf32> to vector<8x8x16xf32>
    %328 = arith.mulf %323, %327 : vector<8x8x16xf32>
    %329 = arith.addf %322, %328 : vector<8x8x16xf32>
    %330 = vector.extract_strided_slice %314 {offsets = [0, 9, 0], sizes = [8, 8, 16], strides = [1, 1, 1]} : vector<10x24x16xf32> to vector<8x8x16xf32>
    %331 = vector.extract_strided_slice %308 {offsets = [2, 0], sizes = [1, 16], strides = [1, 1]} : vector<9x16xf32> to vector<1x16xf32>
    %332 = vector.shape_cast %331 : vector<1x16xf32> to vector<16xf32>
    %333 = vector.shape_cast %332 : vector<16xf32> to vector<1x1x16xf32>
    %334 = vector.broadcast %333 : vector<1x1x16xf32> to vector<8x8x16xf32>
    %335 = arith.mulf %330, %334 : vector<8x8x16xf32>
    %336 = arith.addf %329, %335 : vector<8x8x16xf32>
    %337 = vector.extract_strided_slice %314 {offsets = [1, 7, 0], sizes = [8, 8, 16], strides = [1, 1, 1]} : vector<10x24x16xf32> to vector<8x8x16xf32>
    %338 = vector.extract_strided_slice %308 {offsets = [3, 0], sizes = [1, 16], strides = [1, 1]} : vector<9x16xf32> to vector<1x16xf32>
    %339 = vector.shape_cast %338 : vector<1x16xf32> to vector<16xf32>
    %340 = vector.shape_cast %339 : vector<16xf32> to vector<1x1x16xf32>
    %341 = vector.broadcast %340 : vector<1x1x16xf32> to vector<8x8x16xf32>
    %342 = arith.mulf %337, %341 : vector<8x8x16xf32>
    %343 = arith.addf %336, %342 : vector<8x8x16xf32>
    %344 = vector.extract_strided_slice %314 {offsets = [1, 8, 0], sizes = [8, 8, 16], strides = [1, 1, 1]} : vector<10x24x16xf32> to vector<8x8x16xf32>
    %345 = vector.extract_strided_slice %308 {offsets = [4, 0], sizes = [1, 16], strides = [1, 1]} : vector<9x16xf32> to vector<1x16xf32>
    %346 = vector.shape_cast %345 : vector<1x16xf32> to vector<16xf32>
    %347 = vector.shape_cast %346 : vector<16xf32> to vector<1x1x16xf32>
    %348 = vector.broadcast %347 : vector<1x1x16xf32> to vector<8x8x16xf32>
    %349 = arith.mulf %344, %348 : vector<8x8x16xf32>
    %350 = arith.addf %343, %349 : vector<8x8x16xf32>
    %351 = vector.extract_strided_slice %314 {offsets = [1, 9, 0], sizes = [8, 8, 16], strides = [1, 1, 1]} : vector<10x24x16xf32> to vector<8x8x16xf32>
    %352 = vector.extract_strided_slice %308 {offsets = [5, 0], sizes = [1, 16], strides = [1, 1]} : vector<9x16xf32> to vector<1x16xf32>
    %353 = vector.shape_cast %352 : vector<1x16xf32> to vector<16xf32>
    %354 = vector.shape_cast %353 : vector<16xf32> to vector<1x1x16xf32>
    %355 = vector.broadcast %354 : vector<1x1x16xf32> to vector<8x8x16xf32>
    %356 = arith.mulf %351, %355 : vector<8x8x16xf32>
    %357 = arith.addf %350, %356 : vector<8x8x16xf32>
    %358 = vector.extract_strided_slice %314 {offsets = [2, 7, 0], sizes = [8, 8, 16], strides = [1, 1, 1]} : vector<10x24x16xf32> to vector<8x8x16xf32>
    %359 = vector.extract_strided_slice %308 {offsets = [6, 0], sizes = [1, 16], strides = [1, 1]} : vector<9x16xf32> to vector<1x16xf32>
    %360 = vector.shape_cast %359 : vector<1x16xf32> to vector<16xf32>
    %361 = vector.shape_cast %360 : vector<16xf32> to vector<1x1x16xf32>
    %362 = vector.broadcast %361 : vector<1x1x16xf32> to vector<8x8x16xf32>
    %363 = arith.mulf %358, %362 : vector<8x8x16xf32>
    %364 = arith.addf %357, %363 : vector<8x8x16xf32>
    %365 = vector.extract_strided_slice %314 {offsets = [2, 8, 0], sizes = [8, 8, 16], strides = [1, 1, 1]} : vector<10x24x16xf32> to vector<8x8x16xf32>
    %366 = vector.extract_strided_slice %308 {offsets = [7, 0], sizes = [1, 16], strides = [1, 1]} : vector<9x16xf32> to vector<1x16xf32>
    %367 = vector.shape_cast %366 : vector<1x16xf32> to vector<16xf32>
    %368 = vector.shape_cast %367 : vector<16xf32> to vector<1x1x16xf32>
    %369 = vector.broadcast %368 : vector<1x1x16xf32> to vector<8x8x16xf32>
    %370 = arith.mulf %365, %369 : vector<8x8x16xf32>
    %371 = arith.addf %364, %370 : vector<8x8x16xf32>
    %372 = vector.extract_strided_slice %314 {offsets = [2, 9, 0], sizes = [8, 8, 16], strides = [1, 1, 1]} : vector<10x24x16xf32> to vector<8x8x16xf32>
    %373 = vector.extract_strided_slice %308 {offsets = [8, 0], sizes = [1, 16], strides = [1, 1]} : vector<9x16xf32> to vector<1x16xf32>
    %374 = vector.shape_cast %373 : vector<1x16xf32> to vector<16xf32>
    %375 = vector.shape_cast %374 : vector<16xf32> to vector<1x1x16xf32>
    %376 = vector.broadcast %375 : vector<1x1x16xf32> to vector<8x8x16xf32>
    %377 = arith.mulf %372, %376 : vector<8x8x16xf32>
    %378 = arith.addf %371, %377 : vector<8x8x16xf32>
    %c1_78 = arith.constant 1 : index
    %c1_79 = arith.constant 1 : index
    %c0_80 = arith.constant 0 : index
    %c0_81 = arith.constant 0 : index
    %379 = vector.load %arg8[%c1_78, %c1_79, %c0_80, %c0_81] : memref<3x2x16x16xf32, #tpu.memory_space<vmem>>, vector<1x1x16x16xf32>
    %380 = vector.shape_cast %379 : vector<1x1x16x16xf32> to vector<16x16xf32>
    %c1_82 = arith.constant 1 : index
    %c1_83 = arith.constant 1 : index
    %c0_84 = arith.constant 0 : index
    %c0_85 = arith.constant 0 : index
    %381 = vector.load %arg9[%c1_82, %c1_83, %c0_84, %c0_85] : memref<3x2x2x16xf32, #tpu.memory_space<vmem>>, vector<1x1x2x16xf32>
    %382 = vector.shape_cast %381 : vector<1x1x2x16xf32> to vector<2x16xf32>
    %383 = vector.shape_cast %378 : vector<8x8x16xf32> to vector<64x16xf32>
    %cst_86 = arith.constant dense<0.000000e+00> : vector<64x16xf32>
    %384 = tpu.matmul %383, %380, %cst_86 {dimension_numbers = #tpu.dot_dimension_numbers<[1], [0], [0], [1], [0, 0, 1, 1], [], []>} : vector<64x16xf32>, vector<16x16xf32>, vector<64x16xf32> -> vector<64x16xf32>
    %385 = vector.extract_strided_slice %382 {offsets = [0, 0], sizes = [1, 16], strides = [1, 1]} : vector<2x16xf32> to vector<1x16xf32>
    %386 = vector.broadcast %385 : vector<1x16xf32> to vector<64x16xf32>
    %387 = arith.mulf %384, %386 : vector<64x16xf32>
    %388 = vector.extract_strided_slice %382 {offsets = [1, 0], sizes = [1, 16], strides = [1, 1]} : vector<2x16xf32> to vector<1x16xf32>
    %389 = vector.broadcast %388 : vector<1x16xf32> to vector<64x16xf32>
    %390 = arith.addf %387, %389 : vector<64x16xf32>
    %391 = vector.shape_cast %390 : vector<64x16xf32> to vector<8x8x16xf32>
    %392 = arith.addf %221, %391 : vector<8x8x16xf32>
    %cst_87 = arith.constant 0.000000e+00 : f32
    %393 = vector.broadcast %cst_87 : f32 to vector<8x8x16xf32>
    %394 = tpu.concatenate %393, %200, %393 in 1 : vector<8x8x16xf32>, vector<8x8x16xf32>, vector<8x8x16xf32> -> vector<8x24x16xf32>
    %cst_88 = arith.constant 0.000000e+00 : f32
    %395 = vector.broadcast %cst_88 : f32 to vector<1x24x16xf32>
    %396 = tpu.concatenate %395, %394, %395 in 0 : vector<1x24x16xf32>, vector<8x24x16xf32>, vector<1x24x16xf32> -> vector<10x24x16xf32>
    %cst_89 = arith.constant 1.000000e+00 : f32
    %397 = vector.broadcast %cst_89 : f32 to vector<8x8x16xf32>
    %cst_90 = arith.constant 0.000000e+00 : f32
    %398 = vector.broadcast %cst_90 : f32 to vector<8x8x16xf32>
    %399 = tpu.concatenate %398, %397, %398 in 1 : vector<8x8x16xf32>, vector<8x8x16xf32>, vector<8x8x16xf32> -> vector<8x24x16xf32>
    %cst_91 = arith.constant 0.000000e+00 : f32
    %400 = vector.broadcast %cst_91 : f32 to vector<1x24x16xf32>
    %401 = tpu.concatenate %400, %399, %400 in 0 : vector<1x24x16xf32>, vector<8x24x16xf32>, vector<1x24x16xf32> -> vector<10x24x16xf32>
    %cst_92 = arith.constant 0.000000e+00 : f32
    %402 = vector.broadcast %cst_92 : f32 to vector<8x8x16xf32>
    %cst_93 = arith.constant 0.000000e+00 : f32
    %403 = vector.broadcast %cst_93 : f32 to vector<8x8x16xf32>
    %404 = vector.extract_strided_slice %396 {offsets = [0, 7, 0], sizes = [8, 8, 16], strides = [1, 1, 1]} : vector<10x24x16xf32> to vector<8x8x16xf32>
    %405 = arith.addf %402, %404 : vector<8x8x16xf32>
    %406 = vector.extract_strided_slice %401 {offsets = [0, 7, 0], sizes = [8, 8, 16], strides = [1, 1, 1]} : vector<10x24x16xf32> to vector<8x8x16xf32>
    %407 = arith.addf %403, %406 : vector<8x8x16xf32>
    %408 = vector.extract_strided_slice %396 {offsets = [0, 8, 0], sizes = [8, 8, 16], strides = [1, 1, 1]} : vector<10x24x16xf32> to vector<8x8x16xf32>
    %409 = arith.addf %405, %408 : vector<8x8x16xf32>
    %410 = vector.extract_strided_slice %401 {offsets = [0, 8, 0], sizes = [8, 8, 16], strides = [1, 1, 1]} : vector<10x24x16xf32> to vector<8x8x16xf32>
    %411 = arith.addf %407, %410 : vector<8x8x16xf32>
    %412 = vector.extract_strided_slice %396 {offsets = [0, 9, 0], sizes = [8, 8, 16], strides = [1, 1, 1]} : vector<10x24x16xf32> to vector<8x8x16xf32>
    %413 = arith.addf %409, %412 : vector<8x8x16xf32>
    %414 = vector.extract_strided_slice %401 {offsets = [0, 9, 0], sizes = [8, 8, 16], strides = [1, 1, 1]} : vector<10x24x16xf32> to vector<8x8x16xf32>
    %415 = arith.addf %411, %414 : vector<8x8x16xf32>
    %416 = vector.extract_strided_slice %396 {offsets = [1, 7, 0], sizes = [8, 8, 16], strides = [1, 1, 1]} : vector<10x24x16xf32> to vector<8x8x16xf32>
    %417 = arith.addf %413, %416 : vector<8x8x16xf32>
    %418 = vector.extract_strided_slice %401 {offsets = [1, 7, 0], sizes = [8, 8, 16], strides = [1, 1, 1]} : vector<10x24x16xf32> to vector<8x8x16xf32>
    %419 = arith.addf %415, %418 : vector<8x8x16xf32>
    %420 = vector.extract_strided_slice %396 {offsets = [1, 8, 0], sizes = [8, 8, 16], strides = [1, 1, 1]} : vector<10x24x16xf32> to vector<8x8x16xf32>
    %421 = arith.addf %417, %420 : vector<8x8x16xf32>
    %422 = vector.extract_strided_slice %401 {offsets = [1, 8, 0], sizes = [8, 8, 16], strides = [1, 1, 1]} : vector<10x24x16xf32> to vector<8x8x16xf32>
    %423 = arith.addf %419, %422 : vector<8x8x16xf32>
    %424 = vector.extract_strided_slice %396 {offsets = [1, 9, 0], sizes = [8, 8, 16], strides = [1, 1, 1]} : vector<10x24x16xf32> to vector<8x8x16xf32>
    %425 = arith.addf %421, %424 : vector<8x8x16xf32>
    %426 = vector.extract_strided_slice %401 {offsets = [1, 9, 0], sizes = [8, 8, 16], strides = [1, 1, 1]} : vector<10x24x16xf32> to vector<8x8x16xf32>
    %427 = arith.addf %423, %426 : vector<8x8x16xf32>
    %428 = vector.extract_strided_slice %396 {offsets = [2, 7, 0], sizes = [8, 8, 16], strides = [1, 1, 1]} : vector<10x24x16xf32> to vector<8x8x16xf32>
    %429 = arith.addf %425, %428 : vector<8x8x16xf32>
    %430 = vector.extract_strided_slice %401 {offsets = [2, 7, 0], sizes = [8, 8, 16], strides = [1, 1, 1]} : vector<10x24x16xf32> to vector<8x8x16xf32>
    %431 = arith.addf %427, %430 : vector<8x8x16xf32>
    %432 = vector.extract_strided_slice %396 {offsets = [2, 8, 0], sizes = [8, 8, 16], strides = [1, 1, 1]} : vector<10x24x16xf32> to vector<8x8x16xf32>
    %433 = arith.addf %429, %432 : vector<8x8x16xf32>
    %434 = vector.extract_strided_slice %401 {offsets = [2, 8, 0], sizes = [8, 8, 16], strides = [1, 1, 1]} : vector<10x24x16xf32> to vector<8x8x16xf32>
    %435 = arith.addf %431, %434 : vector<8x8x16xf32>
    %436 = vector.extract_strided_slice %396 {offsets = [2, 9, 0], sizes = [8, 8, 16], strides = [1, 1, 1]} : vector<10x24x16xf32> to vector<8x8x16xf32>
    %437 = arith.addf %433, %436 : vector<8x8x16xf32>
    %438 = vector.extract_strided_slice %401 {offsets = [2, 9, 0], sizes = [8, 8, 16], strides = [1, 1, 1]} : vector<10x24x16xf32> to vector<8x8x16xf32>
    %439 = arith.addf %435, %438 : vector<8x8x16xf32>
    %440 = arith.divf %437, %439 : vector<8x8x16xf32>
    %441 = arith.addf %440, %14 : vector<8x8x16xf32>
    %c2 = arith.constant 2 : index
    %c0_94 = arith.constant 0 : index
    %c0_95 = arith.constant 0 : index
    %c0_96 = arith.constant 0 : index
    %442 = vector.load %arg7[%c2, %c0_94, %c0_95, %c0_96] : memref<3x2x9x16xf32, #tpu.memory_space<vmem>>, vector<1x1x9x16xf32>
    %443 = vector.shape_cast %442 : vector<1x1x9x16xf32> to vector<9x16xf32>
    %cst_97 = arith.constant 0.000000e+00 : f32
    %444 = vector.broadcast %cst_97 : f32 to vector<8x8x16xf32>
    %445 = arith.maximumf %392, %444 : vector<8x8x16xf32>
    %cst_98 = arith.constant 0.000000e+00 : f32
    %446 = vector.broadcast %cst_98 : f32 to vector<8x8x16xf32>
    %447 = tpu.concatenate %446, %445, %446 in 1 : vector<8x8x16xf32>, vector<8x8x16xf32>, vector<8x8x16xf32> -> vector<8x24x16xf32>
    %cst_99 = arith.constant 0.000000e+00 : f32
    %448 = vector.broadcast %cst_99 : f32 to vector<1x24x16xf32>
    %449 = tpu.concatenate %448, %447, %448 in 0 : vector<1x24x16xf32>, vector<8x24x16xf32>, vector<1x24x16xf32> -> vector<10x24x16xf32>
    %cst_100 = arith.constant 0.000000e+00 : f32
    %450 = vector.broadcast %cst_100 : f32 to vector<8x8x16xf32>
    %451 = vector.extract_strided_slice %449 {offsets = [0, 7, 0], sizes = [8, 8, 16], strides = [1, 1, 1]} : vector<10x24x16xf32> to vector<8x8x16xf32>
    %452 = vector.extract_strided_slice %443 {offsets = [0, 0], sizes = [1, 16], strides = [1, 1]} : vector<9x16xf32> to vector<1x16xf32>
    %453 = vector.shape_cast %452 : vector<1x16xf32> to vector<16xf32>
    %454 = vector.shape_cast %453 : vector<16xf32> to vector<1x1x16xf32>
    %455 = vector.broadcast %454 : vector<1x1x16xf32> to vector<8x8x16xf32>
    %456 = arith.mulf %451, %455 : vector<8x8x16xf32>
    %457 = arith.addf %450, %456 : vector<8x8x16xf32>
    %458 = vector.extract_strided_slice %449 {offsets = [0, 8, 0], sizes = [8, 8, 16], strides = [1, 1, 1]} : vector<10x24x16xf32> to vector<8x8x16xf32>
    %459 = vector.extract_strided_slice %443 {offsets = [1, 0], sizes = [1, 16], strides = [1, 1]} : vector<9x16xf32> to vector<1x16xf32>
    %460 = vector.shape_cast %459 : vector<1x16xf32> to vector<16xf32>
    %461 = vector.shape_cast %460 : vector<16xf32> to vector<1x1x16xf32>
    %462 = vector.broadcast %461 : vector<1x1x16xf32> to vector<8x8x16xf32>
    %463 = arith.mulf %458, %462 : vector<8x8x16xf32>
    %464 = arith.addf %457, %463 : vector<8x8x16xf32>
    %465 = vector.extract_strided_slice %449 {offsets = [0, 9, 0], sizes = [8, 8, 16], strides = [1, 1, 1]} : vector<10x24x16xf32> to vector<8x8x16xf32>
    %466 = vector.extract_strided_slice %443 {offsets = [2, 0], sizes = [1, 16], strides = [1, 1]} : vector<9x16xf32> to vector<1x16xf32>
    %467 = vector.shape_cast %466 : vector<1x16xf32> to vector<16xf32>
    %468 = vector.shape_cast %467 : vector<16xf32> to vector<1x1x16xf32>
    %469 = vector.broadcast %468 : vector<1x1x16xf32> to vector<8x8x16xf32>
    %470 = arith.mulf %465, %469 : vector<8x8x16xf32>
    %471 = arith.addf %464, %470 : vector<8x8x16xf32>
    %472 = vector.extract_strided_slice %449 {offsets = [1, 7, 0], sizes = [8, 8, 16], strides = [1, 1, 1]} : vector<10x24x16xf32> to vector<8x8x16xf32>
    %473 = vector.extract_strided_slice %443 {offsets = [3, 0], sizes = [1, 16], strides = [1, 1]} : vector<9x16xf32> to vector<1x16xf32>
    %474 = vector.shape_cast %473 : vector<1x16xf32> to vector<16xf32>
    %475 = vector.shape_cast %474 : vector<16xf32> to vector<1x1x16xf32>
    %476 = vector.broadcast %475 : vector<1x1x16xf32> to vector<8x8x16xf32>
    %477 = arith.mulf %472, %476 : vector<8x8x16xf32>
    %478 = arith.addf %471, %477 : vector<8x8x16xf32>
    %479 = vector.extract_strided_slice %449 {offsets = [1, 8, 0], sizes = [8, 8, 16], strides = [1, 1, 1]} : vector<10x24x16xf32> to vector<8x8x16xf32>
    %480 = vector.extract_strided_slice %443 {offsets = [4, 0], sizes = [1, 16], strides = [1, 1]} : vector<9x16xf32> to vector<1x16xf32>
    %481 = vector.shape_cast %480 : vector<1x16xf32> to vector<16xf32>
    %482 = vector.shape_cast %481 : vector<16xf32> to vector<1x1x16xf32>
    %483 = vector.broadcast %482 : vector<1x1x16xf32> to vector<8x8x16xf32>
    %484 = arith.mulf %479, %483 : vector<8x8x16xf32>
    %485 = arith.addf %478, %484 : vector<8x8x16xf32>
    %486 = vector.extract_strided_slice %449 {offsets = [1, 9, 0], sizes = [8, 8, 16], strides = [1, 1, 1]} : vector<10x24x16xf32> to vector<8x8x16xf32>
    %487 = vector.extract_strided_slice %443 {offsets = [5, 0], sizes = [1, 16], strides = [1, 1]} : vector<9x16xf32> to vector<1x16xf32>
    %488 = vector.shape_cast %487 : vector<1x16xf32> to vector<16xf32>
    %489 = vector.shape_cast %488 : vector<16xf32> to vector<1x1x16xf32>
    %490 = vector.broadcast %489 : vector<1x1x16xf32> to vector<8x8x16xf32>
    %491 = arith.mulf %486, %490 : vector<8x8x16xf32>
    %492 = arith.addf %485, %491 : vector<8x8x16xf32>
    %493 = vector.extract_strided_slice %449 {offsets = [2, 7, 0], sizes = [8, 8, 16], strides = [1, 1, 1]} : vector<10x24x16xf32> to vector<8x8x16xf32>
    %494 = vector.extract_strided_slice %443 {offsets = [6, 0], sizes = [1, 16], strides = [1, 1]} : vector<9x16xf32> to vector<1x16xf32>
    %495 = vector.shape_cast %494 : vector<1x16xf32> to vector<16xf32>
    %496 = vector.shape_cast %495 : vector<16xf32> to vector<1x1x16xf32>
    %497 = vector.broadcast %496 : vector<1x1x16xf32> to vector<8x8x16xf32>
    %498 = arith.mulf %493, %497 : vector<8x8x16xf32>
    %499 = arith.addf %492, %498 : vector<8x8x16xf32>
    %500 = vector.extract_strided_slice %449 {offsets = [2, 8, 0], sizes = [8, 8, 16], strides = [1, 1, 1]} : vector<10x24x16xf32> to vector<8x8x16xf32>
    %501 = vector.extract_strided_slice %443 {offsets = [7, 0], sizes = [1, 16], strides = [1, 1]} : vector<9x16xf32> to vector<1x16xf32>
    %502 = vector.shape_cast %501 : vector<1x16xf32> to vector<16xf32>
    %503 = vector.shape_cast %502 : vector<16xf32> to vector<1x1x16xf32>
    %504 = vector.broadcast %503 : vector<1x1x16xf32> to vector<8x8x16xf32>
    %505 = arith.mulf %500, %504 : vector<8x8x16xf32>
    %506 = arith.addf %499, %505 : vector<8x8x16xf32>
    %507 = vector.extract_strided_slice %449 {offsets = [2, 9, 0], sizes = [8, 8, 16], strides = [1, 1, 1]} : vector<10x24x16xf32> to vector<8x8x16xf32>
    %508 = vector.extract_strided_slice %443 {offsets = [8, 0], sizes = [1, 16], strides = [1, 1]} : vector<9x16xf32> to vector<1x16xf32>
    %509 = vector.shape_cast %508 : vector<1x16xf32> to vector<16xf32>
    %510 = vector.shape_cast %509 : vector<16xf32> to vector<1x1x16xf32>
    %511 = vector.broadcast %510 : vector<1x1x16xf32> to vector<8x8x16xf32>
    %512 = arith.mulf %507, %511 : vector<8x8x16xf32>
    %513 = arith.addf %506, %512 : vector<8x8x16xf32>
    %c2_101 = arith.constant 2 : index
    %c0_102 = arith.constant 0 : index
    %c0_103 = arith.constant 0 : index
    %c0_104 = arith.constant 0 : index
    %514 = vector.load %arg8[%c2_101, %c0_102, %c0_103, %c0_104] : memref<3x2x16x16xf32, #tpu.memory_space<vmem>>, vector<1x1x16x16xf32>
    %515 = vector.shape_cast %514 : vector<1x1x16x16xf32> to vector<16x16xf32>
    %c2_105 = arith.constant 2 : index
    %c0_106 = arith.constant 0 : index
    %c0_107 = arith.constant 0 : index
    %c0_108 = arith.constant 0 : index
    %516 = vector.load %arg9[%c2_105, %c0_106, %c0_107, %c0_108] : memref<3x2x2x16xf32, #tpu.memory_space<vmem>>, vector<1x1x2x16xf32>
    %517 = vector.shape_cast %516 : vector<1x1x2x16xf32> to vector<2x16xf32>
    %518 = vector.shape_cast %513 : vector<8x8x16xf32> to vector<64x16xf32>
    %cst_109 = arith.constant dense<0.000000e+00> : vector<64x16xf32>
    %519 = tpu.matmul %518, %515, %cst_109 {dimension_numbers = #tpu.dot_dimension_numbers<[1], [0], [0], [1], [0, 0, 1, 1], [], []>} : vector<64x16xf32>, vector<16x16xf32>, vector<64x16xf32> -> vector<64x16xf32>
    %520 = vector.extract_strided_slice %517 {offsets = [0, 0], sizes = [1, 16], strides = [1, 1]} : vector<2x16xf32> to vector<1x16xf32>
    %521 = vector.broadcast %520 : vector<1x16xf32> to vector<64x16xf32>
    %522 = arith.mulf %519, %521 : vector<64x16xf32>
    %523 = vector.extract_strided_slice %517 {offsets = [1, 0], sizes = [1, 16], strides = [1, 1]} : vector<2x16xf32> to vector<1x16xf32>
    %524 = vector.broadcast %523 : vector<1x16xf32> to vector<64x16xf32>
    %525 = arith.addf %522, %524 : vector<64x16xf32>
    %526 = vector.shape_cast %525 : vector<64x16xf32> to vector<8x8x16xf32>
    %c2_110 = arith.constant 2 : index
    %c1_111 = arith.constant 1 : index
    %c0_112 = arith.constant 0 : index
    %c0_113 = arith.constant 0 : index
    %527 = vector.load %arg7[%c2_110, %c1_111, %c0_112, %c0_113] : memref<3x2x9x16xf32, #tpu.memory_space<vmem>>, vector<1x1x9x16xf32>
    %528 = vector.shape_cast %527 : vector<1x1x9x16xf32> to vector<9x16xf32>
    %cst_114 = arith.constant 0.000000e+00 : f32
    %529 = vector.broadcast %cst_114 : f32 to vector<8x8x16xf32>
    %530 = arith.maximumf %526, %529 : vector<8x8x16xf32>
    %cst_115 = arith.constant 0.000000e+00 : f32
    %531 = vector.broadcast %cst_115 : f32 to vector<8x8x16xf32>
    %532 = tpu.concatenate %531, %530, %531 in 1 : vector<8x8x16xf32>, vector<8x8x16xf32>, vector<8x8x16xf32> -> vector<8x24x16xf32>
    %cst_116 = arith.constant 0.000000e+00 : f32
    %533 = vector.broadcast %cst_116 : f32 to vector<1x24x16xf32>
    %534 = tpu.concatenate %533, %532, %533 in 0 : vector<1x24x16xf32>, vector<8x24x16xf32>, vector<1x24x16xf32> -> vector<10x24x16xf32>
    %cst_117 = arith.constant 0.000000e+00 : f32
    %535 = vector.broadcast %cst_117 : f32 to vector<8x8x16xf32>
    %536 = vector.extract_strided_slice %534 {offsets = [0, 7, 0], sizes = [8, 8, 16], strides = [1, 1, 1]} : vector<10x24x16xf32> to vector<8x8x16xf32>
    %537 = vector.extract_strided_slice %528 {offsets = [0, 0], sizes = [1, 16], strides = [1, 1]} : vector<9x16xf32> to vector<1x16xf32>
    %538 = vector.shape_cast %537 : vector<1x16xf32> to vector<16xf32>
    %539 = vector.shape_cast %538 : vector<16xf32> to vector<1x1x16xf32>
    %540 = vector.broadcast %539 : vector<1x1x16xf32> to vector<8x8x16xf32>
    %541 = arith.mulf %536, %540 : vector<8x8x16xf32>
    %542 = arith.addf %535, %541 : vector<8x8x16xf32>
    %543 = vector.extract_strided_slice %534 {offsets = [0, 8, 0], sizes = [8, 8, 16], strides = [1, 1, 1]} : vector<10x24x16xf32> to vector<8x8x16xf32>
    %544 = vector.extract_strided_slice %528 {offsets = [1, 0], sizes = [1, 16], strides = [1, 1]} : vector<9x16xf32> to vector<1x16xf32>
    %545 = vector.shape_cast %544 : vector<1x16xf32> to vector<16xf32>
    %546 = vector.shape_cast %545 : vector<16xf32> to vector<1x1x16xf32>
    %547 = vector.broadcast %546 : vector<1x1x16xf32> to vector<8x8x16xf32>
    %548 = arith.mulf %543, %547 : vector<8x8x16xf32>
    %549 = arith.addf %542, %548 : vector<8x8x16xf32>
    %550 = vector.extract_strided_slice %534 {offsets = [0, 9, 0], sizes = [8, 8, 16], strides = [1, 1, 1]} : vector<10x24x16xf32> to vector<8x8x16xf32>
    %551 = vector.extract_strided_slice %528 {offsets = [2, 0], sizes = [1, 16], strides = [1, 1]} : vector<9x16xf32> to vector<1x16xf32>
    %552 = vector.shape_cast %551 : vector<1x16xf32> to vector<16xf32>
    %553 = vector.shape_cast %552 : vector<16xf32> to vector<1x1x16xf32>
    %554 = vector.broadcast %553 : vector<1x1x16xf32> to vector<8x8x16xf32>
    %555 = arith.mulf %550, %554 : vector<8x8x16xf32>
    %556 = arith.addf %549, %555 : vector<8x8x16xf32>
    %557 = vector.extract_strided_slice %534 {offsets = [1, 7, 0], sizes = [8, 8, 16], strides = [1, 1, 1]} : vector<10x24x16xf32> to vector<8x8x16xf32>
    %558 = vector.extract_strided_slice %528 {offsets = [3, 0], sizes = [1, 16], strides = [1, 1]} : vector<9x16xf32> to vector<1x16xf32>
    %559 = vector.shape_cast %558 : vector<1x16xf32> to vector<16xf32>
    %560 = vector.shape_cast %559 : vector<16xf32> to vector<1x1x16xf32>
    %561 = vector.broadcast %560 : vector<1x1x16xf32> to vector<8x8x16xf32>
    %562 = arith.mulf %557, %561 : vector<8x8x16xf32>
    %563 = arith.addf %556, %562 : vector<8x8x16xf32>
    %564 = vector.extract_strided_slice %534 {offsets = [1, 8, 0], sizes = [8, 8, 16], strides = [1, 1, 1]} : vector<10x24x16xf32> to vector<8x8x16xf32>
    %565 = vector.extract_strided_slice %528 {offsets = [4, 0], sizes = [1, 16], strides = [1, 1]} : vector<9x16xf32> to vector<1x16xf32>
    %566 = vector.shape_cast %565 : vector<1x16xf32> to vector<16xf32>
    %567 = vector.shape_cast %566 : vector<16xf32> to vector<1x1x16xf32>
    %568 = vector.broadcast %567 : vector<1x1x16xf32> to vector<8x8x16xf32>
    %569 = arith.mulf %564, %568 : vector<8x8x16xf32>
    %570 = arith.addf %563, %569 : vector<8x8x16xf32>
    %571 = vector.extract_strided_slice %534 {offsets = [1, 9, 0], sizes = [8, 8, 16], strides = [1, 1, 1]} : vector<10x24x16xf32> to vector<8x8x16xf32>
    %572 = vector.extract_strided_slice %528 {offsets = [5, 0], sizes = [1, 16], strides = [1, 1]} : vector<9x16xf32> to vector<1x16xf32>
    %573 = vector.shape_cast %572 : vector<1x16xf32> to vector<16xf32>
    %574 = vector.shape_cast %573 : vector<16xf32> to vector<1x1x16xf32>
    %575 = vector.broadcast %574 : vector<1x1x16xf32> to vector<8x8x16xf32>
    %576 = arith.mulf %571, %575 : vector<8x8x16xf32>
    %577 = arith.addf %570, %576 : vector<8x8x16xf32>
    %578 = vector.extract_strided_slice %534 {offsets = [2, 7, 0], sizes = [8, 8, 16], strides = [1, 1, 1]} : vector<10x24x16xf32> to vector<8x8x16xf32>
    %579 = vector.extract_strided_slice %528 {offsets = [6, 0], sizes = [1, 16], strides = [1, 1]} : vector<9x16xf32> to vector<1x16xf32>
    %580 = vector.shape_cast %579 : vector<1x16xf32> to vector<16xf32>
    %581 = vector.shape_cast %580 : vector<16xf32> to vector<1x1x16xf32>
    %582 = vector.broadcast %581 : vector<1x1x16xf32> to vector<8x8x16xf32>
    %583 = arith.mulf %578, %582 : vector<8x8x16xf32>
    %584 = arith.addf %577, %583 : vector<8x8x16xf32>
    %585 = vector.extract_strided_slice %534 {offsets = [2, 8, 0], sizes = [8, 8, 16], strides = [1, 1, 1]} : vector<10x24x16xf32> to vector<8x8x16xf32>
    %586 = vector.extract_strided_slice %528 {offsets = [7, 0], sizes = [1, 16], strides = [1, 1]} : vector<9x16xf32> to vector<1x16xf32>
    %587 = vector.shape_cast %586 : vector<1x16xf32> to vector<16xf32>
    %588 = vector.shape_cast %587 : vector<16xf32> to vector<1x1x16xf32>
    %589 = vector.broadcast %588 : vector<1x1x16xf32> to vector<8x8x16xf32>
    %590 = arith.mulf %585, %589 : vector<8x8x16xf32>
    %591 = arith.addf %584, %590 : vector<8x8x16xf32>
    %592 = vector.extract_strided_slice %534 {offsets = [2, 9, 0], sizes = [8, 8, 16], strides = [1, 1, 1]} : vector<10x24x16xf32> to vector<8x8x16xf32>
    %593 = vector.extract_strided_slice %528 {offsets = [8, 0], sizes = [1, 16], strides = [1, 1]} : vector<9x16xf32> to vector<1x16xf32>
    %594 = vector.shape_cast %593 : vector<1x16xf32> to vector<16xf32>
    %595 = vector.shape_cast %594 : vector<16xf32> to vector<1x1x16xf32>
    %596 = vector.broadcast %595 : vector<1x1x16xf32> to vector<8x8x16xf32>
    %597 = arith.mulf %592, %596 : vector<8x8x16xf32>
    %598 = arith.addf %591, %597 : vector<8x8x16xf32>
    %c2_118 = arith.constant 2 : index
    %c1_119 = arith.constant 1 : index
    %c0_120 = arith.constant 0 : index
    %c0_121 = arith.constant 0 : index
    %599 = vector.load %arg8[%c2_118, %c1_119, %c0_120, %c0_121] : memref<3x2x16x16xf32, #tpu.memory_space<vmem>>, vector<1x1x16x16xf32>
    %600 = vector.shape_cast %599 : vector<1x1x16x16xf32> to vector<16x16xf32>
    %c2_122 = arith.constant 2 : index
    %c1_123 = arith.constant 1 : index
    %c0_124 = arith.constant 0 : index
    %c0_125 = arith.constant 0 : index
    %601 = vector.load %arg9[%c2_122, %c1_123, %c0_124, %c0_125] : memref<3x2x2x16xf32, #tpu.memory_space<vmem>>, vector<1x1x2x16xf32>
    %602 = vector.shape_cast %601 : vector<1x1x2x16xf32> to vector<2x16xf32>
    %603 = vector.shape_cast %598 : vector<8x8x16xf32> to vector<64x16xf32>
    %cst_126 = arith.constant dense<0.000000e+00> : vector<64x16xf32>
    %604 = tpu.matmul %603, %600, %cst_126 {dimension_numbers = #tpu.dot_dimension_numbers<[1], [0], [0], [1], [0, 0, 1, 1], [], []>} : vector<64x16xf32>, vector<16x16xf32>, vector<64x16xf32> -> vector<64x16xf32>
    %605 = vector.extract_strided_slice %602 {offsets = [0, 0], sizes = [1, 16], strides = [1, 1]} : vector<2x16xf32> to vector<1x16xf32>
    %606 = vector.broadcast %605 : vector<1x16xf32> to vector<64x16xf32>
    %607 = arith.mulf %604, %606 : vector<64x16xf32>
    %608 = vector.extract_strided_slice %602 {offsets = [1, 0], sizes = [1, 16], strides = [1, 1]} : vector<2x16xf32> to vector<1x16xf32>
    %609 = vector.broadcast %608 : vector<1x16xf32> to vector<64x16xf32>
    %610 = arith.addf %607, %609 : vector<64x16xf32>
    %611 = vector.shape_cast %610 : vector<64x16xf32> to vector<8x8x16xf32>
    %cst_127 = arith.constant 0xFF800000 : f32
    %612 = vector.broadcast %cst_127 : f32 to vector<8x8x16xf32>
    %613 = tpu.concatenate %612, %200, %612 in 1 : vector<8x8x16xf32>, vector<8x8x16xf32>, vector<8x8x16xf32> -> vector<8x24x16xf32>
    %cst_128 = arith.constant 0xFF800000 : f32
    %614 = vector.broadcast %cst_128 : f32 to vector<1x24x16xf32>
    %615 = tpu.concatenate %614, %613, %614 in 0 : vector<1x24x16xf32>, vector<8x24x16xf32>, vector<1x24x16xf32> -> vector<10x24x16xf32>
    %616 = vector.extract_strided_slice %615 {offsets = [0, 7, 0], sizes = [8, 8, 16], strides = [1, 1, 1]} : vector<10x24x16xf32> to vector<8x8x16xf32>
    %617 = vector.extract_strided_slice %615 {offsets = [0, 8, 0], sizes = [8, 8, 16], strides = [1, 1, 1]} : vector<10x24x16xf32> to vector<8x8x16xf32>
    %618 = arith.maximumf %616, %617 : vector<8x8x16xf32>
    %619 = vector.extract_strided_slice %615 {offsets = [0, 9, 0], sizes = [8, 8, 16], strides = [1, 1, 1]} : vector<10x24x16xf32> to vector<8x8x16xf32>
    %620 = arith.maximumf %618, %619 : vector<8x8x16xf32>
    %621 = vector.extract_strided_slice %615 {offsets = [1, 7, 0], sizes = [8, 8, 16], strides = [1, 1, 1]} : vector<10x24x16xf32> to vector<8x8x16xf32>
    %622 = arith.maximumf %620, %621 : vector<8x8x16xf32>
    %623 = vector.extract_strided_slice %615 {offsets = [1, 8, 0], sizes = [8, 8, 16], strides = [1, 1, 1]} : vector<10x24x16xf32> to vector<8x8x16xf32>
    %624 = arith.maximumf %622, %623 : vector<8x8x16xf32>
    %625 = vector.extract_strided_slice %615 {offsets = [1, 9, 0], sizes = [8, 8, 16], strides = [1, 1, 1]} : vector<10x24x16xf32> to vector<8x8x16xf32>
    %626 = arith.maximumf %624, %625 : vector<8x8x16xf32>
    %627 = vector.extract_strided_slice %615 {offsets = [2, 7, 0], sizes = [8, 8, 16], strides = [1, 1, 1]} : vector<10x24x16xf32> to vector<8x8x16xf32>
    %628 = arith.maximumf %626, %627 : vector<8x8x16xf32>
    %629 = vector.extract_strided_slice %615 {offsets = [2, 8, 0], sizes = [8, 8, 16], strides = [1, 1, 1]} : vector<10x24x16xf32> to vector<8x8x16xf32>
    %630 = arith.maximumf %628, %629 : vector<8x8x16xf32>
    %631 = vector.extract_strided_slice %615 {offsets = [2, 9, 0], sizes = [8, 8, 16], strides = [1, 1, 1]} : vector<10x24x16xf32> to vector<8x8x16xf32>
    %632 = arith.maximumf %630, %631 : vector<8x8x16xf32>
    %633 = arith.addf %611, %632 : vector<8x8x16xf32>
    %c0_129 = arith.constant 0 : index
    %c0_130 = arith.constant 0 : index
    %c0_131 = arith.constant 0 : index
    %c0_132 = arith.constant 0 : index
    %634 = vector.load %arg10[%c0_129, %c0_130, %c0_131, %c0_132] : memref<1x8x8x16xf32, #tpu.memory_space<vmem>>, vector<1x8x8x16xf32>
    %635 = vector.shape_cast %634 : vector<1x8x8x16xf32> to vector<8x8x16xf32>
    %636 = vector.shape_cast %200 : vector<8x8x16xf32> to vector<1x8x8x16xf32>
    tpu.vector_store %arg10[%c0_129, %c0_130, %c0_131, %c0_132], %636 {strides = array<i32>} : memref<1x8x8x16xf32, #tpu.memory_space<vmem>>, vector<1x8x8x16xf32>,
    %c0_133 = arith.constant 0 : index
    %c0_134 = arith.constant 0 : index
    %c0_135 = arith.constant 0 : index
    %c0_136 = arith.constant 0 : index
    %637 = vector.load %arg11[%c0_133, %c0_134, %c0_135, %c0_136] : memref<1x8x8x16xf32, #tpu.memory_space<vmem>>, vector<1x8x8x16xf32>
    %638 = vector.shape_cast %637 : vector<1x8x8x16xf32> to vector<8x8x16xf32>
    %639 = vector.shape_cast %392 : vector<8x8x16xf32> to vector<1x8x8x16xf32>
    tpu.vector_store %arg11[%c0_133, %c0_134, %c0_135, %c0_136], %639 {strides = array<i32>} : memref<1x8x8x16xf32, #tpu.memory_space<vmem>>, vector<1x8x8x16xf32>,
    %c0_137 = arith.constant 0 : index
    %c0_138 = arith.constant 0 : index
    %c0_139 = arith.constant 0 : index
    %c0_140 = arith.constant 0 : index
    %640 = vector.load %arg12[%c0_137, %c0_138, %c0_139, %c0_140] : memref<1x8x8x16xf32, #tpu.memory_space<vmem>>, vector<1x8x8x16xf32>
    %641 = vector.shape_cast %640 : vector<1x8x8x16xf32> to vector<8x8x16xf32>
    %642 = vector.shape_cast %441 : vector<8x8x16xf32> to vector<1x8x8x16xf32>
    tpu.vector_store %arg12[%c0_137, %c0_138, %c0_139, %c0_140], %642 {strides = array<i32>} : memref<1x8x8x16xf32, #tpu.memory_space<vmem>>, vector<1x8x8x16xf32>,
    %c0_141 = arith.constant 0 : index
    %c0_142 = arith.constant 0 : index
    %c0_143 = arith.constant 0 : index
    %c0_144 = arith.constant 0 : index
    %643 = vector.load %arg13[%c0_141, %c0_142, %c0_143, %c0_144] : memref<1x8x8x16xf32, #tpu.memory_space<vmem>>, vector<1x8x8x16xf32>
    %644 = vector.shape_cast %643 : vector<1x8x8x16xf32> to vector<8x8x16xf32>
    %645 = vector.shape_cast %633 : vector<8x8x16xf32> to vector<1x8x8x16xf32>
    tpu.vector_store %arg13[%c0_141, %c0_142, %c0_143, %c0_144], %645 {strides = array<i32>} : memref<1x8x8x16xf32, #tpu.memory_space<vmem>>, vector<1x8x8x16xf32>,
    return
  }
  func.func @transform_0(%arg0: i32) -> (i32, i32, i32, i32) {
    %c0_i32 = arith.constant 0 : i32
    %c0_i32_0 = arith.constant 0 : i32
    %c0_i32_1 = arith.constant 0 : i32
    %c0_i32_2 = arith.constant 0 : i32
    return %arg0, %c0_i32, %c0_i32_0, %c0_i32_1 : i32, i32, i32, i32
  }
  func.func @transform_1(%arg0: i32) -> (i32, i32, i32, i32) {
    %c0_i32 = arith.constant 0 : i32
    %c0_i32_0 = arith.constant 0 : i32
    %c0_i32_1 = arith.constant 0 : i32
    %c0_i32_2 = arith.constant 0 : i32
    return %arg0, %c0_i32, %c0_i32_0, %c0_i32_1 : i32, i32, i32, i32
  }
  func.func @transform_2(%arg0: i32) -> (i32, i32) {
    %c0_i32 = arith.constant 0 : i32
    %c0_i32_0 = arith.constant 0 : i32
    %c0_i32_1 = arith.constant 0 : i32
    return %c0_i32, %c0_i32_0 : i32, i32
  }
  func.func @transform_3(%arg0: i32) -> (i32, i32) {
    %c0_i32 = arith.constant 0 : i32
    %c0_i32_0 = arith.constant 0 : i32
    %c0_i32_1 = arith.constant 0 : i32
    return %c0_i32, %c0_i32_0 : i32, i32
  }
  func.func @transform_4(%arg0: i32) -> (i32, i32) {
    %c0_i32 = arith.constant 0 : i32
    %c0_i32_0 = arith.constant 0 : i32
    %c0_i32_1 = arith.constant 0 : i32
    return %c0_i32, %c0_i32_0 : i32, i32
  }
  func.func @transform_5(%arg0: i32) -> (i32, i32) {
    %c0_i32 = arith.constant 0 : i32
    %c0_i32_0 = arith.constant 0 : i32
    %c0_i32_1 = arith.constant 0 : i32
    return %c0_i32, %c0_i32_0 : i32, i32
  }
  func.func @transform_6(%arg0: i32) -> (i32, i32, i32, i32) {
    %c0_i32 = arith.constant 0 : i32
    %c0_i32_0 = arith.constant 0 : i32
    %c0_i32_1 = arith.constant 0 : i32
    %c0_i32_2 = arith.constant 0 : i32
    %c0_i32_3 = arith.constant 0 : i32
    return %c0_i32, %c0_i32_0, %c0_i32_1, %c0_i32_2 : i32, i32, i32, i32
  }
  func.func @transform_7(%arg0: i32) -> (i32, i32, i32, i32) {
    %c0_i32 = arith.constant 0 : i32
    %c0_i32_0 = arith.constant 0 : i32
    %c0_i32_1 = arith.constant 0 : i32
    %c0_i32_2 = arith.constant 0 : i32
    %c0_i32_3 = arith.constant 0 : i32
    return %c0_i32, %c0_i32_0, %c0_i32_1, %c0_i32_2 : i32, i32, i32, i32
  }
  func.func @transform_8(%arg0: i32) -> (i32, i32, i32, i32) {
    %c0_i32 = arith.constant 0 : i32
    %c0_i32_0 = arith.constant 0 : i32
    %c0_i32_1 = arith.constant 0 : i32
    %c0_i32_2 = arith.constant 0 : i32
    %c0_i32_3 = arith.constant 0 : i32
    return %c0_i32, %c0_i32_0, %c0_i32_1, %c0_i32_2 : i32, i32, i32, i32
  }
  func.func @transform_9(%arg0: i32) -> (i32, i32, i32, i32) {
    %c0_i32 = arith.constant 0 : i32
    %c0_i32_0 = arith.constant 0 : i32
    %c0_i32_1 = arith.constant 0 : i32
    %c0_i32_2 = arith.constant 0 : i32
    return %arg0, %c0_i32, %c0_i32_0, %c0_i32_1 : i32, i32, i32, i32
  }
  func.func @transform_10(%arg0: i32) -> (i32, i32, i32, i32) {
    %c0_i32 = arith.constant 0 : i32
    %c0_i32_0 = arith.constant 0 : i32
    %c0_i32_1 = arith.constant 0 : i32
    %c0_i32_2 = arith.constant 0 : i32
    return %arg0, %c0_i32, %c0_i32_0, %c0_i32_1 : i32, i32, i32, i32
  }
  func.func @transform_11(%arg0: i32) -> (i32, i32, i32, i32) {
    %c0_i32 = arith.constant 0 : i32
    %c0_i32_0 = arith.constant 0 : i32
    %c0_i32_1 = arith.constant 0 : i32
    %c0_i32_2 = arith.constant 0 : i32
    return %arg0, %c0_i32, %c0_i32_0, %c0_i32_1 : i32, i32, i32, i32
  }
  func.func @transform_12(%arg0: i32) -> (i32, i32, i32, i32) {
    %c0_i32 = arith.constant 0 : i32
    %c0_i32_0 = arith.constant 0 : i32
    %c0_i32_1 = arith.constant 0 : i32
    %c0_i32_2 = arith.constant 0 : i32
    return %arg0, %c0_i32, %c0_i32_0, %c0_i32_1 : i32, i32, i32, i32
  }
}

</mosaic_0001>

<bundles_post_ra>
// kernel: tpu_custom_call.1
= control target key start
LH: loop header
LB: loop body
LE: loop exit
PB: predicated region body
PF: predicated region fallthrough
CT: control target
= control target key end

     0   :  { %s9762_s0 = inlined_call_operand.vmem [shape: f32[2,8,8,16], index: 0, kind: input, shape index: {}]   ;;  %s9763_s1 = inlined_call_operand.hbm [shape: f32[2,8,8,16], index: 1, kind: input, shape index: {}]   ;;  %s9764_s2 = inlined_call_operand.vmem [shape: f32[16,16], index: 2, kind: input, shape index: {}]   ;;  %s9765_s3 = inlined_call_operand.hbm [shape: f32[2,16], index: 3, kind: input, shape index: {}]   ;;  %s9766_s4 = inlined_call_operand.hbm [shape: f32[16,16], index: 4, kind: input, shape index: {}]   ;;  %s9767_s5 = inlined_call_operand.vmem [shape: f32[2,16], index: 5, kind: input, shape index: {}]   ;;  %s9768_s6 = inlined_call_operand.vmem [shape: f32[3,2,9,16], index: 6, kind: input, shape index: {}]   ;;  %s9769_s7 = inlined_call_operand.hbm [shape: f32[3,2,16,16], index: 7, kind: input, shape index: {}]   ;;  %s9770_s8 = inlined_call_operand.vmem [shape: f32[3,2,2,16], index: 8, kind: input, shape index: {}]   ;;  %s9771_s9 = inlined_call_operand.hbm [shape: f32[2,8,8,16], index: 9, kind: output, shape index: {0}]   ;;  %s9772_s10 = inlined_call_operand.hbm [shape: f32[2,8,8,16], index: 10, kind: output, shape index: {1}]   ;;  %s9773_s11 = inlined_call_operand.hbm [shape: f32[2,8,8,16], index: 11, kind: output, shape index: {2}]   ;;  %s9774_s12 = inlined_call_operand.hbm [shape: f32[2,8,8,16], index: 12, kind: output, shape index: {3}]  }
   0x1   :  { %9918 = sst [smem:[#allocation79_spill]] %s9762_s0 }
   0x2   :  { %9919 = sst [smem:[#allocation80_spill]] %s9763_s1 }
   0x3   :  { %9920 = sst [smem:[#allocation81_spill]] %s9764_s2 }
   0x4   :  { %9921 = sst [smem:[#allocation82_spill]] %s9765_s3 }
   0x5   :  { %9922 = sst [smem:[#allocation83_spill]] %s9766_s4 }
   0x6   :  { %9923 = sst [smem:[#allocation84_spill]] %s9769_s7 }
   0x7   :  { %18 = vsyncpa [#allocation3], 0 }
   0x8   :  { %20 = vsyncpa [#allocation3 + $0x1], 0 }
   0x9   :  { %21 = vsyncpa [#allocation6], 0 }
   0xa   :  { %22 = vsyncpa [#allocation9], 0 }
   0xb   :  { %23 = vsyncpa [#allocation4], 0 }
   0xc   :  { %25 = vsyncpa [#allocation4 + $0x1], 0 }
   0xd   :  { %26 = vsyncpa [#allocation12], 0 }
   0xe   :  { %28 = vsyncpa [#allocation12 + $0x1], 0 }
   0xf   :  { %29 = vsyncpa [#allocation15], 0 }
  0x10   :  { %31 = vsyncpa [#allocation15 + $0x1], 0  ;;  %s6548_s21 = smov 0   ;;  %s6550_s22 = smov 0  }
  0x11   :  { %s6552_s23 = smov 0   ;;  %s6554_s24 = smov 0  }
  0x12 LB: > { %9924 = sst [smem:[#allocation22_spill]] %s6462_s23  ;;  %s6569_s25 = sadd.s32 4294967295, %s6466_s24   ;;  %s6466_s24 = sphi %s6554_s24, %s10168_s24   ;;  %s6462_s23 = sphi %s6552_s23, %s10170_s23   ;;  %s6458_s22 = sphi %s6550_s22, %s10172_s22   ;;  %s6454_s21 = sphi %s6548_s21, %s10171_s21  }
  0x13   : > { %s9778_s26 = sadd.s32 4294967294, %s6466_s24   ;;  %p83_p0 = scmp.ne.s32.totalorder %s6458_s22, %s6454_s21 }
  0x14   : > { %p9775_p1 = scmp.eq.s32.totalorder %s6569_s25, 0  ;;  %p260_p3 = scmp.eq.s32.totalorder %s9778_s26, 1 }
  0x15   : > { %p5756_p5 = scmp.ge.s32.totalorder %s6466_s24, 1  ;;  %p345_p7 = scmp.lt.s32.totalorder %s6466_s24, 3 }
  0x16   : > { %p6580_p4 = por %p9775_p1, %p83_p0  ;;  %p6585_p6 = por %p260_p3, %p83_p0 }
  0x17   : > { %p6590_p8 = pnand %p5756_p5, %p345_p7  ;;  %s6468_s30 = smov [#allocation5]  }
  0x18   : > { %s9925_s27 = scalar_select %p6580_p4, 1, 0 }
  0x19   : > { %s9926_s28 = scalar_select %p6585_p6, 1, 0 }
  0x1a   : > { %s9927_s29 = scalar_select %p6590_p8, 1, 0 }
  0x1b   : > { %s361_s13 = sshll.u32 %s6468_s30, 4  ;;  %p6110_p10 = pneg %p6590_p8  ;;  %s362_s13 = int_to_ptr.vmem [resolvable:$true] %s361_s13 }
  0x1c   : > { %s6469_s14 = smov [#allocation7]   ;;  %s6470_s17 = smov [#allocation8]  }
  0x1d   : > { %s371_s15 = sshll.u32 %s6469_s14, 4  ;;  %p6599_p11 = pnand %p6110_p10, %p9775_p1  ;;  %s372_s15 = int_to_ptr.vmem [resolvable:$true] %s371_s15 }
  0x1e   : > { %s390_s18 = sshll.u32 %s6470_s17, 4  ;;  %s6213_s19 = scalar_lea.vmem %s362_s13, 32  ;;  %s391_s18 = int_to_ptr.vmem [resolvable:$true] %s390_s18 }
  0x1f   : > { %p6204_p12 = pneg %p6599_p11  ;;  %p6214_p13 = scmp.ne.s32.totalorder %s362_s13, %s6213_s19 }
  0x20   : > { %p6221_p5 = scmp.lt.s32.totalorder %s362_s13, %s362_s13  ;;  %p6222_p7 = scmp.lt.s32.totalorder %s6213_s19, %s6213_s19 }
  0x21   : > { %p6216_p0 = pnand %p6214_p13, %p6204_p12 }
  0x22   : > { %p6223_p9 = por %p6222_p7, %p6221_p5 }
  0x23   : > { %p6217_p3 = pneg %p6216_p0 }
  0x25   : > { %p6224_p10 = pnand %p6223_p9, %p6217_p3 }
  0x27   : > { %6227 = shalt.err (!%p6224_p10)
}
  0x28   : > { %s9929_s3 = sld [smem:[#allocation82_spill]]  ;;  %s6239_s14 = scalar_lea.vmem %s372_s15, 256 }
  0x29   : > { %p6240_p1 = scmp.ne.s32.totalorder %s372_s15, %s6239_s14  ;;  %p6247_p13 = scmp.lt.s32.totalorder %s372_s15, %s372_s15 }
  0x2a   : > { %p6248_p0 = scmp.lt.s32.totalorder %s6239_s14, %s6239_s14 }
  0x2b   : > { %p6242_p2 = pnand %p6240_p1, %p6204_p12 }
  0x2c   : > { %p6249_p4 = por %p6248_p0, %p6247_p13 }
  0x2d   : > { %p6243_p6 = pneg %p6242_p2 }
  0x2e   : > { %6113 = dma.hbm_to_vmem [thread:$0]  (!%p6599_p11), %s9929_s3, 32, %s362_s13, [#allocation6]  }
  0x2f   : > { %p6250_p8 = pnand %p6249_p4, %p6243_p6 }
  0x31   : > { %6253 = shalt.err (!%p6250_p8)
}
  0x32   : > { %s9779_s17 = smov 128   ;;  %s9780_s19 = smov 8  }
  0x33   : > { %s9930_s4 = sld [smem:[#allocation83_spill]]  ;;  %s6265_s30 = scalar_lea.vmem %s391_s18, 1536 }
  0x34   : > { %p6266_p1 = scmp.ne.s32.totalorder %s391_s18, %s6265_s30  ;;  %p6273_p6 = scmp.lt.s32.totalorder %s391_s18, %s391_s18 }
  0x35   : > { %p6274_p8 = scmp.lt.s32.totalorder %s6265_s30, %s6265_s30 }
  0x36   : > { %p6268_p2 = pnand %p6266_p1, %p6204_p12 }
  0x37   : > { %p6275_p9 = por %p6274_p8, %p6273_p6 }
  0x38   : > { %p6269_p4 = pneg %p6268_p2 }
  0x39   : > { %6116 = dma.hbm_to_vmem [thread:$0]  (!%p6599_p11), %s9930_s4, 256, %s372_s15, [#allocation6], %s9779_s17, %s9779_s17, %s9780_s19  }
  0x3a   : > { %p6276_p3 = pnand %p6275_p9, %p6269_p4 }
  0x3c   : > { %6279 = shalt.err (!%p6276_p3)
}
  0x3d   : > { %s9931_s7 = sld [smem:[#allocation84_spill]]  ;;  %s6636_s15 = sadd.s32 1, %s6466_s24  }
  0x3e   : > { %9932 = sst [smem:[#allocation23_spill]] %s6636_s15  ;;  %s67_s16 = ssub.s32 %s6466_s24, %s6636_s15 }
  0x3f   : > { %s70_s20 = sadd.s32 1, %s6462_s23  ;;  %p68_p12 = scmp.eq.s32.totalorder %s67_s16, 0 }
  0x40   : > { %p77_p5 = scmp.ne.s32.totalorder %s6462_s23, %s6458_s22  ;;  %p78_p7 = scmp.eq.s32.totalorder %s6466_s24, 0 }
  0x41   : > { %p6140_p10 = scmp.lt.s32.totalorder %s6466_s24, 2  ;;  %p9934_p0 = scmp.eq.s32.totalorder %s6569_s25, 1 }
  0x42   : > { %s6646_s30 = scalar_select %p68_p12, %s6462_s23, %s70_s20  }
  0x43   : > { %6119 = dma.hbm_to_vmem [thread:$0]  (!%p6599_p11), %s9931_s7, 1536, %s391_s18, [#allocation9], %s9779_s17, %s9779_s17, %s9780_s19  }
  0x44   : > { %9933 = sst [smem:[#allocation24_spill]] %s6646_s30  ;;  %p79_p13 = por %p78_p7, %p77_p5 }
  0x45   : > { %p6650_p1 = por %p9934_p0, %p77_p5  ;;  %s415_s13 = sand.u32 1, %s6462_s23  }
  0x46   : > { %s5874_s26 = sshll.u32 %s6466_s24, 10  ;;  %s5761_s18 = sshll.u32 %s415_s13, 6 }
  0x47   : > { %s9935_s14 = scalar_select %p6650_p1, 1, 0 }
  0x48   : > { %s9936_s1 = sld [smem:[#allocation80_spill]]  ;;  %s419_s16 = scalar_lea.vmem [#allocation2], %s5761_s18 }
  0x49   : > { %s426_s20 = sshll.u32 %s419_s16, 4  ;;  %p6661_p11 = pnand %p6140_p10, %p79_p13  ;;  %s6665_s20 = int_to_ptr.vmem [resolvable:$true] %s426_s20 }
  0x4a   : > { %s6667_s7 = scalar_lea.sflag [#allocation3], %s415_s13 }
  0x4b   : > { %p6282_p4 = pneg %p6661_p11 }
  0x4e   : > { %s6659_s3 = scalar_lea.hbm %s9936_s1, %s5874_s26  ;;  %s6285_s19 = scalar_lea.hbm %s9936_s1, 2048 }
  0x4f   : > { %s6280_s30 = scalar_lea.hbm %s6659_s3, 1024  ;;  %p6286_p9 = scmp.lt.s32.totalorder %s6659_s3, %s9936_s1 }
  0x50   : > { %p6281_p2 = scmp.ne.s32.totalorder %s6659_s3, %s6280_s30  ;;  %p6287_p3 = scmp.lt.s32.totalorder %s6285_s19, %s6280_s30 }
  0x52   : > { %p6283_p6 = pnand %p6282_p4, %p6281_p2  ;;  %p6288_p12 = por %p6287_p3, %p6286_p9 }
  0x54   : > { %p6284_p8 = pneg %p6283_p6 }
  0x56   : > { %p6289_p5 = pnand %p6288_p12, %p6284_p8 }
  0x58   : > { %6292 = shalt.err (!%p6289_p5)
}
  0x59   : > { %s6293_s13 = scalar_lea.vmem %s6665_s20, 1024  ;;  %s6473_s23 = smov [#allocation2]  }
  0x5a   : > { %p6294_p7 = scmp.ne.s32.totalorder %s6665_s20, %s6293_s13  ;;  %s6298_s15 = sshll.u32 %s6473_s23, 4  ;;  %s6299_s15 = int_to_ptr.vmem [resolvable:$false] %s6298_s15 }
  0x5b   : > { %s6300_s26 = scalar_lea.vmem %s6299_s15, 2048  ;;  %p6301_p0 = scmp.lt.s32.totalorder %s6665_s20, %s6299_s15 }
  0x5c   : > { %p6296_p10 = pnand %p6294_p7, %p6282_p4  ;;  %p6302_p2 = scmp.lt.s32.totalorder %s6300_s26, %s6293_s13 }
  0x5e   : > { %p6297_p13 = pneg %p6296_p10  ;;  %p6303_p6 = por %p6302_p2, %p6301_p0 }
  0x60   : > { %p6304_p1 = pnand %p6303_p6, %p6297_p13 }
  0x62   : > { %6307 = shalt.err (!%p6304_p1)
}
  0x63   : > { %s9938_s30 = smov 8   ;;  %s9939_s17 = smov 128  }
  0x64   : > { %6123 = dma.hbm_to_vmem [thread:$0]  (!%p6661_p11), %s6659_s3, 1024, %s6665_s20, %s6667_s7, %s9939_s17, %s9939_s17, %s9938_s30  }
  0x65   : > { %p9940_p4 = scmp.ne.s32.totalorder %s9927_s29, 0 }
  0x67   : > { %438 = sbr.rel (%p9940_p4) target bundleno = 1423 (0x58f), region = 56 }
  0x6c   : > { %s6694_s23 = sand.u32 1, %s6458_s22   ;;  %p9941_p1 = scmp.ne.s32.totalorder %s9925_s27, 0 }
  0x6d   : > { %s6697_s15 = sshll.u32 %s6694_s23, 6  ;;  %s441_s4 = scalar_lea.sflag [#allocation3], %s6694_s23 }
  0x6e   : > { %s6701_s19 = scalar_lea.vmem [#allocation2], %s6697_s15 }
  0x6f   : > { %6429 = dma.done.wait (%p9941_p1), %s441_s4, 1024  }
  0x70   : > { %6431 = vsyncadd (%p9941_p1), %s441_s4, 4294966272  ;;  %p9942_p11 = scmp.eq.s32.totalorder %s6569_s25, 0 }
  0x72   : > { %6433 = dma.done.wait (%p9942_p11), [#allocation6], 288   ;;  %p9943_p8 = pmov %p9942_p11 }
  0x74   : > { %6435 = vsyncadd (%p9943_p8), [#allocation6], 4294967008  ;;  %p9944_p9 = pmov %p9943_p8 }
  0x75   : > { %p9945_p3 = pmov %p9943_p8 }
  0x76   : > { %6437 = dma.done.wait (%p9944_p9), [#allocation9], 1536  }
  0x77   : > { %6439 = vsyncadd (%p9945_p3), [#allocation9], 4294965760  ;;  %p517_p12 = scmp.lt.s32.totalorder %s6569_s25, 1  ;;  %s9946_s0 = sld [smem:[#allocation79_spill]]  ;;  %vm541_vm0 = vcmask 130048   ;;  %v704_v5 = vld [vmem:[#allocation7 + $0x8] sm:$0xff]  ;;  %v671_v39 = vlaneseq }
  0x78   : > { %s9947_s2 = sld [smem:[#allocation81_spill]]  ;;  %v703_v6 = vld [vmem:[#allocation7] sm:$0xff]  ;;  %5976 = vmatprep.subr.mxu1 %v704_v5  ;;  %v697_v15 = vld [vmem:[%s6701_s19 + $0x10] sm:$0xff]  ;;  %v698_v19 = vld [vmem:[%s6701_s19 + $0x18] sm:$0xff]  ;;  %vm968_vm1 = vcmask 1045504   ;;  %vm1336_vm2 = vcmask 1040384  }
  0x79   : > { %s518_s3 = scalar_select %p517_p12, %s6569_s25, 1  ;;  %v695_v9 = vld [vmem:[%s6701_s19] sm:$0xff]  ;;  %v696_v13 = vld [vmem:[%s6701_s19 + $0x8] sm:$0xff]  ;;  %5977 = vmatpush3.msra.mxu1 %v704_v5  ;;  %v708_v18 = vmax.f32 %v697_v15, 0.0  ;;  %v709_v24 = vmax.f32 %v698_v19, 0.0  ;;  %v701_v30 = vld [vmem:[%s6701_s19 + $0x30] sm:$0xff] }
  0x7a   : > { %v706_v12 = vmax.f32 %v695_v9, 0.0  ;;  %v707_v16 = vmax.f32 %v696_v13, 0.0  ;;  %5978 = vmatprep.subr.mxu1 %v703_v6  ;;  %v699_v22 = vld [vmem:[%s6701_s19 + $0x20] sm:$0xff]  ;;  %v700_v27 = vld [vmem:[%s6701_s19 + $0x28] sm:$0xff]  ;;  %v712_v33 = vmax.f32 %v701_v30, 0.0  ;;  %v702_v34 = vld [vmem:[%s6701_s19 + $0x38] sm:$0xff] }
  0x7b   : > { %s5875_s7 = sshll.u32 %s518_s3, 6  ;;  %5979 = vmatpush3.msra.mxu1 %v703_v6  ;;  %v710_v26 = vmax.f32 %v699_v22, 0.0  ;;  %v711_v31 = vmax.f32 %v700_v27, 0.0  ;;  %v713_v35 = vmax.f32 %v702_v34, 0.0  ;;  %v1318_v36 = vld [vmem:[#allocation8 + $0x8] sm:$0xff]  ;;  %v1317_v37 = vld [vmem:[#allocation8] sm:$0xff] }
  0x7c   : > { %5980 = vmatprep.mubr.msk.f32.mxu1 %vm541_vm0, %v706_v12  ;;  %v6760_v38 = vld [vmem:[#allocation8 + $0x28] sm:$0xff]  ;;  %v672_v40 = vshrl.u32 %v671_v39, 7  ;;  %s8330_s4 = scalar_lea.vmem [#allocation10], %s6697_s15  ;;  %vm5429_vm3 = vcmask 130055   ;;  %vm5431_vm4 = vcmask 129024   ;;  %s8883_s16 = scalar_lea.vmem [#allocation11], %s6697_s15 }
  0x7d   : > { %s6720_s20 = scalar_lea.vmem %s9946_s0, %s5875_s7  ;;  %5981 = vmatmul.mubr.msk.f32.vlgmr.msra.gmra.mxu1 %vm541_vm0, %v707_v16  ;;  %v867_v42 = vld [vmem:[%s9768_s6] sm:$0xff]  ;;  %s8456_s7 = scalar_lea.vmem [#allocation13], %s6697_s15 }
  0x7e   : > { %v531_v0 = vld [vmem:[%s9947_s2 + $0x8] sm:$0xff]  ;;  %v530_v1 = vld [vmem:[%s9947_s2] sm:$0xff]  ;;  %v524_v8 = vld [vmem:[%s6720_s20 + $0x10] sm:$0xff]  ;;  %5983 = vmatprep.mubr.msk.f32.mxu1 %vm541_vm0, %v708_v18  ;;  %v6763_v41 = vsub.s32 1, %v672_v40  ;;  %v6768_v43 = vsub.s32 2, %v672_v40  ;;  %v6773_v45 = vsub.s32 0, %v672_v40 }
  0x7f   : > { %v522_v2 = vld [vmem:[%s6720_s20] sm:$0xff]  ;;  %5960 = vmatprep.subr.mxu0 %v531_v0  ;;  %v523_v4 = vld [vmem:[%s6720_s20 + $0x8] sm:$0xff]  ;;  %v525_v10 = vld [vmem:[%s6720_s20 + $0x18] sm:$0xff]  ;;  %v535_v11 = vmax.f32 %v524_v8, 0.0  ;;  %v6795_v54 = vsub.s32 5, %v672_v40  ;;  %v6806_v58 = vsub.s32 3, %v672_v40 }
  0x80   : > { %v533_v3 = vmax.f32 %v522_v2, 0.0  ;;  %5961 = vmatpush3.msra.mxu0 %v531_v0  ;;  %v534_v7 = vmax.f32 %v523_v4, 0.0  ;;  %v526_v14 = vld [vmem:[%s6720_s20 + $0x20] sm:$0xff]  ;;  %v536_v17 = vmax.f32 %v525_v10, 0.0  ;;  %v527_v21 = vld [vmem:[%s6720_s20 + $0x28] sm:$0xff]  ;;  %v528_v23 = vld [vmem:[%s6720_s20 + $0x30] sm:$0xff]  ;;  %v6771_v44 = vrot.slane %v867_v42, %v6763_v41 }
  0x81   : > { %5962 = vmatprep.subr.mxu0 %v530_v1  ;;  %v537_v20 = vmax.f32 %v526_v14, 0.0  ;;  %v538_v25 = vmax.f32 %v527_v21, 0.0  ;;  %v539_v28 = vmax.f32 %v528_v23, 0.0  ;;  %v529_v29 = vld [vmem:[%s6720_s20 + $0x38] sm:$0xff]  ;;  %5984 = vmatmul.mubr.msk.f32.gmra.mxu1 %vm541_vm0, %v709_v24  ;;  %9948 = vst [vmem:[#allocation25_spill] sm:$0xff] %v6763_v41  ;;  %9949 = vst [vmem:[#allocation26_spill] sm:$0xff] %v6768_v43  ;;  %v6781_v47 = vrot.slane %v867_v42, %v6773_v45 }
  0x82   : > { %5964 = vmatprep.mubr.msk.f32.mxu0 %vm541_vm0, %v533_v3  ;;  %5963 = vmatpush3.msra.mxu0 %v530_v1  ;;  %v540_v32 = vmax.f32 %v529_v29, 0.0  ;;  %9950 = vst [vmem:[#allocation27_spill] sm:$0xff] %v6773_v45  ;;  %v6778_v46 = vld [vmem:[%s9768_s6 + $0x20] sm:$0xff]  ;;  %v901_v48 = vmul.f32 0.0, %v6771_v44  ;;  %v6785_v49 = vrot.slane %v867_v42, %v6768_v43  ;;  %9952 = vst [vmem:[#allocation29_spill] sm:$0xff] %v6795_v54  ;;  %v6837_v8 = vsub.s32 6, %v672_v40 }
  0x83   : > { %5965 = vmatmul.mubr.msk.f32.vlgmr.msra.gmra.mxu0 %vm541_vm0, %v534_v7  ;;  %5986 = vmatprep.mubr.msk.f32.mxu1 %vm541_vm0, %v710_v26  ;;  %v6789_v50 = vrot.slane %v6778_v46, %v6763_v41  ;;  %v6792_v51 = vmul.f32 0.0, %v6781_v47  ;;  %v6799_v55 = vrot.slane %v6778_v46, %v6773_v45  ;;  %v6803_v56 = vrot.slane %v6778_v46, %v6768_v43  ;;  %v532_v61 = vld [vmem:[#allocation5] sm:$0x3]  ;;  %v6820_v0 = vld [vmem:[%s9768_s6 + $0x8] ss:$0 sm:$0xff]  ;;  %s5476_s20 = sand.u32 1, %s6569_s25  }
  0x84   : > { %5967 = vmatprep.mubr.msk.f32.mxu0 %vm541_vm0, %v535_v11  ;;  %5992 = vmatprep.subr.mxu0 %v1318_v36  ;;  %v917_v52 = vrot.slane %v901_v48, 1  ;;  %v952_v53 = vmul.f32 0.0, %v6785_v49  ;;  %9955 = vst [vmem:[#allocation32_spill] sm:$0xff] %v6806_v58  ;;  %v6812_v62 = vrot.slane %v867_v42, %v6795_v54  ;;  %v6824_v3 = vrot.slane %v867_v42, %v6806_v58  ;;  %v705_v5 = vld [vmem:[%s9767_s5] sm:$0x3]  ;;  %s9499_s18 = sshll.u32 %s6569_s25, 10 }
  0x85   : > { %5987 = vmatmul.mubr.msk.f32.gmra.mxu1 %vm541_vm0, %v711_v31  ;;  %5993 = vmatpush3.msra.mxu0 %v1318_v36  ;;  %9951 = vst [vmem:[#allocation28_spill] sm:$0xff] %v6789_v50  ;;  %9953 = vst [vmem:[#allocation30_spill] sm:$0xff] %v6799_v55  ;;  %v2354_v57 = vmul.f32 0.0, %v6789_v50  ;;  %v6815_v63 = vmul.f32 0.0, %v6799_v55  ;;  %v2405_v2 = vmul.f32 0.0, %v6803_v56  ;;  %v6827_v4 = vrot.slane %v532_v61, %v6773_v45  ;;  %s9505_s30 = scalar_lea.hbm %s9772_s10, %s9499_s18  ;;  %s5516_s17 = sshll.u32 %s8883_s16, 4  ;;  %s9514_s17 = int_to_ptr.vmem [resolvable:$true] %s5516_s17 }
  0x86   : > { %5989 = vmatprep.mubr.msk.f32.mxu1 %vm541_vm0, %v712_v33  ;;  %5994 = vmatprep.subr.mxu0 %v1317_v37  ;;  %9954 = vst [vmem:[#allocation31_spill] sm:$0xff] %v6803_v56  ;;  %v933_v59 = vadd.f32 %v917_v52, %v6792_v51  ;;  %v6809_v60 = vrot.slane %v952_v53, 2  ;;  %v6835_v7 = vsub.s32 4, %v672_v40  ;;  %9958 = vst [vmem:[#allocation35_spill] sm:$0xff] %v6837_v8  ;;  %v6840_v10 = vmul.f32 0.0, %v6824_v3  ;;  %s9512_s27 = scalar_lea.hbm %s9773_s11, %s9499_s18  ;;  %s9516_s25 = scalar_lea.sflag [#allocation12], %s5476_s20 }
  0x87   : > { %5968 = vmatmul.mubr.msk.f32.gmra.mxu0 %vm541_vm0, %v536_v17  ;;  %9956 = vst [vmem:[#allocation33_spill] sm:$0xff] %v6815_v63  ;;  %v2370_v1 = vrot.slane %v2354_v57, 1  ;;  %v1103_v11 = vmul.f32 0.0, %v6812_v62  ;;  %v6843_v12 = vsub.s32 7, %v672_v40  ;;  %v1254_v13 = vmul.f32 0.0, %v6820_v0  ;;  %s6308_s29 = scalar_lea.vmem %s9514_s17, 1024 }
  0x88   : > { %5970 = vmatprep.mubr.msk.f32.mxu0 %vm541_vm0, %v537_v20  ;;  %5995 = vmatpush3.msra.mxu0 %v1317_v37  ;;  %v6833_v6 = vadd.f32 %v6809_v60, %v933_v59  ;;  %9957 = vst [vmem:[#allocation34_spill] sm:$0xff] %v6835_v7  ;;  %v6847_v15 = vrot.slane %v2405_v2, 2  ;;  %v6851_v16 = vrot.slane %v6778_v46, %v6806_v58  ;;  %v6886_v31 = vld [vmem:[%s9768_s6 + $0x28] ss:$0 sm:$0xff]  ;;  %p6309_p5 = scmp.ne.s32.totalorder %s9514_s17, %s6308_s29  ;;  %p10149_p7 = scmp.ne.s32.totalorder %s9935_s14, 0 }
  0x89   : > { %5990 = vmatmul.mubr.msk.f32.gmra.mxu1 %vm541_vm0, %v713_v35  ;;  %6024 = vmatprep.subr.mxu0 %v6760_v38  ;;  %9959 = vst [vmem:[#allocation36_spill] sm:$0xff] %v6843_v12  ;;  %v2386_v14 = vadd.f32 %v2370_v1, %v6815_v63  ;;  %v6855_v17 = vrot.slane %v6778_v46, %v6795_v54  ;;  %v6878_v29 = vrot.slane %v1103_v11, 2  ;;  %v6888_v33 = vrot.slane %v1254_v13, 2  ;;  %s6477_s13 = smov [#allocation11]  }
  0x8a   : > { %v6858_v18 = vrot.slane %v532_v61, %v6763_v41  ;;  %v6861_v20 = vrot.slane %v705_v5, %v6773_v45  ;;  %v6865_v23 = vrot.slane %v705_v5, %v6763_v41  ;;  %v6868_v24 = vrot.slane %v867_v42, %v6835_v7  ;;  %p6310_p10 = pnand %p6309_p5, %p10149_p7  ;;  %s6312_s26 = sshll.u32 %s6477_s13, 4  ;;  %s6313_s26 = int_to_ptr.vmem [resolvable:$false] %s6312_s26 }
  0x8b   : > { %5971 = vmatmul.mubr.msk.f32.gmra.mxu0 %vm541_vm0, %v538_v25  ;;  %v6871_v25 = vrot.slane %v867_v42, %v6837_v8  ;;  %v6881_v30 = vrot.slane %v867_v42, %v6843_v12  ;;  %v6891_v34 = vadd.f32 %v6847_v15, %v2386_v14  ;;  %v6894_v35 = vmul.f32 0.0, %v6851_v16  ;;  %p6315_p0 = scmp.lt.s32.totalorder %s9514_s17, %s6313_s26 }
  0x8c   : > { %5973 = vmatprep.mubr.msk.f32.mxu0 %vm541_vm0, %v539_v28  ;;  %v6876_v28 = vadd.f32 %v6840_v10, %v6833_v6  ;;  %v2555_v36 = vmul.f32 0.0, %v6855_v17  ;;  %v6906_v48 = vrot.slane %v6778_v46, %v6837_v8  ;;  %v6914_v59 = vrot.slane %v6778_v46, %v6835_v7  ;;  %p6311_p13 = pneg %p6310_p10 }
  0x8d   : > { %9960 = vst [vmem:[#allocation37_spill] sm:$0xff] %v6894_v35  ;;  %v6899_v40 = vmul.f32 0.0, %v6871_v25  ;;  %v6902_v42 = vmul.f32 0.0, %v6881_v30  ;;  %v2706_v61 = vmul.f32 0.0, %v6886_v31 }
  0x8f   : > { %5974 = vmatmul.mubr.msk.f32.gmra.mxu0 %vm541_vm0, %v540_v32  ;;  %9961 = vst [vmem:[#allocation38_spill] sm:$0xff] %v6902_v42  ;;  %v6951_v8 = vrot.slane %v2706_v61, 2 }
 0x13d   : > { %v5982_v22 = vpop.f32.mrf.mxu1 }
 0x13e   : > { %v848_v53 = vmul.f32 %v5982_v22, %v6861_v20  ;;  %v6931_v22 = vrot.slane %v2555_v36, 2 }
 0x13f   : > { %v804_v32 = vpop.f32.mrf.mxu1 }
 0x140   : > { %v847_v39 = vmul.f32 %v6861_v20, %v804_v32 }
 0x141   : > { %v5985_v57 = vpop.f32.mrf.mxu1 }
 0x142   : > { %v850_v14 = vmul.f32 %v5985_v57, %v6861_v20 }
 0x143   : > { %v5966_v9 = vpop.f32.mrf.mxu0 }
 0x144   : > { %v676_v21 = vmul.f32 %v5966_v9, %v6827_v4  ;;  %v6923_v9 = vadd.f32 %v6865_v23, %v847_v39  ;;  %v6942_v39 = vrot.slane %v6778_v46, %v6843_v12 }
 0x145   : > { %v632_v19 = vpop.f32.mrf.mxu0 }
 0x146   : > { %v675_v26 = vmul.f32 %v6827_v4, %v632_v19  ;;  %v6909_v52 = vadd.f32 %v6858_v18, %v676_v21  ;;  %9964 = vst [vmem:[#allocation41_spill] sm:$0xff] %v6923_v9  ;;  %v814_v19 = vpop.f32.mrf.mxu1  ;;  %v6929_v21 = vadd.f32 %v6894_v35, %v6891_v34 }
 0x147   : > { %v5969_v27 = vpop.f32.mrf.mxu0  ;;  %v849_v54 = vmul.f32 %v6861_v20, %v814_v19 }
 0x148   : > { %9962 = vst [vmem:[#allocation39_spill] sm:$0xff] %v6909_v52  ;;  %v6918_v1 = vadd.f32 %v6858_v18, %v675_v26  ;;  %v678_v2 = vmul.f32 %v5969_v27, %v6827_v4  ;;  %v6934_v26 = vmax.f32 %v6923_v9, 0.0  ;;  %v6945_v57 = vmax.f32 %v6909_v52, 0.0  ;;  %v5988_v9 = vpop.f32.mrf.mxu1 }
 0x149   : > { %v642_v37 = vpop.f32.mrf.mxu0 }
 0x14a   : > { %9963 = vst [vmem:[#allocation40_spill] sm:$0xff] %v6918_v1  ;;  %v677_v5 = vmul.f32 %v6827_v4, %v642_v37  ;;  %v6938_v37 = vmul.f32 0.0, %v6906_v48  ;;  %v869_v32 = vmax.f32 %v6918_v1, 0.0  ;;  %v6955_v7 = vadd.f32 %v6858_v18, %v678_v2  ;;  %v824_v1 = vpop.f32.mrf.mxu1 }
 0x14b   : > { %v5972_v11 = vpop.f32.mrf.mxu0  ;;  %v2355_v46 = vmul.f32 %v6789_v50, %v6934_v26  ;;  %v6972_v2 = vadd.f32 %v6865_v23, %v850_v14  ;;  %v851_v50 = vmul.f32 %v6861_v20, %v824_v1 }
 0x14c   : > { %v680_v13 = vmul.f32 %v5972_v11, %v6827_v4  ;;  %9965 = vst [vmem:[#allocation42_spill] sm:$0xff] %v6938_v37  ;;  %v6948_v11 = vadd.f32 %v6865_v23, %v848_v53  ;;  %9967 = vst [vmem:[#allocation44_spill] sm:$0xff] %v6955_v7  ;;  %v6958_v58 = vadd.f32 %v6858_v18, %v677_v5  ;;  %v5991_v14 = vpop.f32.mrf.mxu1 }
 0x14d   : > { %v652_v27 = vpop.f32.mrf.mxu0  ;;  %v2335_v53 = vmul.f32 %v6799_v55, %v6934_v26  ;;  %9970 = vst [vmem:[#allocation47_spill] sm:$0xff] %v6972_v2  ;;  %v2371_v5 = vrot.slane %v2355_v46, 1  ;;  %v6984_v55 = vmax.f32 %v6955_v7, 0.0  ;;  %v6994_v46 = vadd.f32 %v6865_v23, %v849_v54 }
 0x14e   : > { %9966 = vst [vmem:[#allocation43_spill] sm:$0xff] %v6948_v11  ;;  %v679_v36 = vmul.f32 %v6827_v4, %v652_v27  ;;  %9968 = vst [vmem:[#allocation45_spill] sm:$0xff] %v6958_v58  ;;  %v6966_v27 = vmul.f32 %v6803_v56, %v6934_v26  ;;  %v6969_v61 = vadd.f32 %v6858_v18, %v680_v13  ;;  %v6990_v19 = vmax.f32 %v6958_v58, 0.0 }
 0x14f   : > { %v5975_v52 = vpop.f32.mrf.mxu0  ;;  %v852_v56 = vmul.f32 %v5988_v9, %v6861_v20  ;;  %9972 = vst [vmem:[#allocation49_spill] sm:$0xff] %v6994_v46  ;;  %v834_v9 = vpop.f32.mrf.mxu1  ;;  %v854_v7 = vmul.f32 %v5991_v14, %v6861_v20  ;;  %v7013_v58 = vadd.f32 %v2371_v5, %v2335_v53 }
 0x150   : > { %9969 = vst [vmem:[#allocation46_spill] sm:$0xff] %v6969_v61  ;;  %v6975_v12 = vadd.f32 %v6858_v18, %v679_v36  ;;  %v682_v43 = vmul.f32 %v5975_v52, %v6827_v4  ;;  %v6987_v36 = vmax.f32 %v6948_v11, 0.0  ;;  %v2387_v52 = vadd.f32 %v2371_v5, %v6815_v63 }
 0x151   : > { %v662_v45 = vpop.f32.mrf.mxu0  ;;  %v7006_v41 = vmax.f32 %v6969_v61, 0.0  ;;  %v7009_v11 = vadd.f32 %v6865_v23, %v851_v50  ;;  %v853_v54 = vmul.f32 %v6861_v20, %v834_v9  ;;  %9977 = vst [vmem:[#allocation54_spill] sm:$0xff] %v7013_v58  ;;  %v7026_v61 = vmax.f32 %v6994_v46, 0.0 }
 0x152   : > { %9971 = vst [vmem:[#allocation48_spill] sm:$0xff] %v6975_v12  ;;  %v681_v13 = vmul.f32 %v6827_v4, %v662_v45  ;;  %v6997_v45 = vadd.f32 %v6858_v18, %v682_v43  ;;  %v7000_v4 = vadd.f32 %v6865_v23, %v852_v56  ;;  %v9978_v43 = vrot.slane %v6966_v27, 2 }
 0x153   : > { %9976 = vst [vmem:[#allocation53_spill] sm:$0xff] %v7009_v11  ;;  %9981 = vst [vmem:[#allocation57_spill] sm:$0xff] %v7026_v61  ;;  %v7038_v5 = vmax.f32 %v7009_v11, 0.0  ;;  %v7041_v14 = vadd.f32 %v6865_v23, %v854_v7  ;;  %v1050_v9 = vmul.f32 %v6868_v24, %v869_v32  ;;  %v1102_v46 = vmul.f32 %v6812_v62, %v869_v32 }
 0x154   : > { %9973 = vst [vmem:[#allocation50_spill] sm:$0xff] %v6997_v45  ;;  %9974 = vst [vmem:[#allocation51_spill] sm:$0xff] %v7000_v4  ;;  %v7003_v1 = vadd.f32 %v6858_v18, %v681_v13  ;;  %v7017_v56 = vadd.f32 %v9978_v43, %v2387_v52  ;;  %v7020_v18 = vmax.f32 %v6972_v2, 0.0  ;;  %v7023_v13 = vmax.f32 %v6975_v12, 0.0 }
 0x155   : > { %v7029_v50 = vmax.f32 %v6997_v45, 0.0  ;;  %v7032_v20 = vmax.f32 %v7000_v4, 0.0  ;;  %9983 = vst [vmem:[#allocation59_spill] sm:$0xff] %v7038_v5  ;;  %9984 = vst [vmem:[#allocation60_spill] sm:$0xff] %v7041_v14  ;;  %v1022_v52 = vmul.f32 %v6824_v3, %v869_v32  ;;  %v7046_v43 = vadd.f32 %v6865_v23, %v853_v54 }
 0x156   : > { %9975 = vst [vmem:[#allocation52_spill] sm:$0xff] %v7003_v1  ;;  %9979 = vst [vmem:[#allocation55_spill] sm:$0xff] %v7017_v56  ;;  %v7035_v53 = vmax.f32 %v7003_v1, 0.0  ;;  %v1201_v4 = vmul.f32 %v6881_v30, %v6945_v57  ;;  %v1253_v2 = vmul.f32 %v6820_v0, %v6945_v57  ;;  %v7054_v11 = vmax.f32 %v7041_v14, 0.0 }
 0x157   : > { %9980 = vst [vmem:[#allocation56_spill] sm:$0xff] %v7020_v18  ;;  %9982 = vst [vmem:[#allocation58_spill] sm:$0xff] %v7032_v20  ;;  %v1031_v7 = vadd.f32 %v1022_v52, %v6833_v6  ;;  %v1066_v1 = vrot.slane %v1050_v9, 1  ;;  %v1174_v45 = vmul.f32 %v6871_v25, %v6945_v57  ;;  %v1120_v12 = vrot.slane %v1102_v46, 2 }
 0x158   : > { %9985 = vst [vmem:[#allocation61_spill] sm:$0xff] %v7046_v43  ;;  %9986 = vst [vmem:[#allocation62_spill] sm:$0xff] %v7054_v11  ;;  %v1217_v23 = vrot.slane %v1201_v4, 1  ;;  %v1269_v54 = vrot.slane %v1253_v2, 2  ;;  %v882_v20 = vmul.f32 %v6781_v47, %v869_v32  ;;  %v902_v63 = vmul.f32 %v6771_v44, %v869_v32 }
 0x159   : > { %v1082_v5 = vadd.f32 %v1066_v1, %v6876_v28  ;;  %v1083_v18 = vadd.f32 %v1066_v1, %v1031_v7  ;;  %v953_v43 = vmul.f32 %v6785_v49, %v869_v32  ;;  %v1122_v14 = vsel %vm968_vm1, %v1120_v12, %v6878_v29 }
 0x15a   : > { %v1271_v6 = vsel %vm968_vm1, %v1269_v54, %v6888_v33  ;;  %v1023_v46 = vmul.f32 %v6824_v3, %v6945_v57  ;;  %v1051_v2 = vmul.f32 %v6868_v24, %v6945_v57  ;;  %v918_v1 = vrot.slane %v902_v63, 1 }
 0x15b   : > { %v1153_v4 = vadd.f32 %v1120_v12, %v1082_v5  ;;  %v1154_v28 = vadd.f32 %v1122_v14, %v1083_v18  ;;  %v971_v52 = vrot.slane %v953_v43, 2  ;;  %v1104_v32 = vmul.f32 %v6812_v62, %v6945_v57 }
 0x15c   : > { %v1067_v9 = vrot.slane %v1051_v2, 1  ;;  %v1175_v7 = vmul.f32 %v6871_v25, %v6990_v19  ;;  %v1202_v11 = vmul.f32 %v6881_v30, %v6990_v19  ;;  %v934_v35 = vadd.f32 %v918_v1, %v6792_v51 }
 0x15d   : > { %v1181_v61 = vadd.f32 %v6899_v40, %v1153_v4  ;;  %v1182_v42 = vadd.f32 %v1174_v45, %v1154_v28  ;;  %v935_v56 = vadd.f32 %v918_v1, %v882_v20  ;;  %v972_v63 = vsel %vm968_vm1, %v971_v52, %v6809_v60 }
 0x15e   : > { %v1123_v12 = vrot.slane %v1104_v32, 2  ;;  %v1218_v18 = vrot.slane %v1202_v11, 1  ;;  %v1255_v5 = vmul.f32 %v6820_v0, %v6990_v19  ;;  %v1003_v2 = vadd.f32 %v971_v52, %v934_v35 }
 0x15f   : > { %v1233_v14 = vadd.f32 %v1217_v23, %v1181_v61  ;;  %v1234_v43 = vadd.f32 %v1217_v23, %v1182_v42  ;;  %v1004_v37 = vadd.f32 %v972_v63, %v935_v56  ;;  %v883_v45 = vmul.f32 %v6781_v47, %v6945_v57 }
 0x160   : > { %v1124_v58 = vsel %vm968_vm1, %v1123_v12, %v6878_v29  ;;  %v1272_v4 = vrot.slane %v1255_v5, 2  ;;  %v903_v20 = vmul.f32 %v6771_v44, %v6945_v57  ;;  %v1032_v11 = vadd.f32 %v6840_v10, %v1003_v2 }
 0x161   : > { %v1301_v28 = vadd.f32 %v1269_v54, %v1233_v14  ;;  %v1302_v1 = vadd.f32 %v1271_v6, %v1234_v43  ;;  %v1033_v32 = vadd.f32 %v1023_v46, %v1004_v37  ;;  %v954_v61 = vmul.f32 %v6785_v49, %v6945_v57 }
 0x162   : > { %v1273_v42 = vsel %vm968_vm1, %v1272_v4, %v6888_v33  ;;  %v919_v35 = vrot.slane %v903_v20, 1  ;;  %v1024_v56 = vmul.f32 %v6824_v3, %v6990_v19  ;;  %v1084_v63 = vadd.f32 %v1067_v9, %v1032_v11 }
 0x163   : > { %v1337_v23 = vrot.slane %v1301_v28, 7  ;;  %v1338_v52 = vrot.slane %v1302_v1, 7  ;;  %v1085_v5 = vadd.f32 %v1067_v9, %v1033_v32  ;;  %v973_v14 = vrot.slane %v954_v61, 2 }
 0x164   : > { %v936_v54 = vadd.f32 %v919_v35, %v6792_v51  ;;  %v937_v6 = vadd.f32 %v919_v35, %v883_v45  ;;  %v1052_v37 = vmul.f32 %v6868_v24, %v6990_v19  ;;  %v1155_v43 = vadd.f32 %v1123_v12, %v1084_v63 }
 0x165   : > { %v1339_v46 = vsel %vm1336_vm2, %v1337_v23, %v1338_v52  ;;  %v1156_v2 = vadd.f32 %v1124_v58, %v1085_v5  ;;  %v1105_v57 = vmul.f32 %v6812_v62, %v6990_v19  ;;  %v974_v20 = vsel %vm968_vm1, %v973_v14, %v6809_v60 }
 0x166   : > { %5996 = vmatprep.mubr.msk.f32.mxu0 %vm541_vm0, %v1339_v46  ;;  %v1005_v9 = vadd.f32 %v973_v14, %v936_v54  ;;  %v1068_v28 = vrot.slane %v1052_v37, 1  ;;  %v1176_v45 = vmul.f32 %v6871_v25, %v6984_v55  ;;  %v1183_v1 = vadd.f32 %v6899_v40, %v1155_v43 }
 0x167   : > { %v1184_v11 = vadd.f32 %v1175_v7, %v1156_v2  ;;  %v1006_v32 = vadd.f32 %v974_v20, %v937_v6  ;;  %v1125_v35 = vrot.slane %v1105_v57, 2  ;;  %v1203_v12 = vmul.f32 %v6881_v30, %v6984_v55 }
 0x168   : > { %v1034_v58 = vadd.f32 %v6840_v10, %v1005_v9  ;;  %v1256_v61 = vmul.f32 %v6820_v0, %v6984_v55  ;;  %v884_v23 = vmul.f32 %v6781_v47, %v6990_v19  ;;  %v1235_v52 = vadd.f32 %v1218_v18, %v1183_v1 }
 0x169   : > { %v1236_v63 = vadd.f32 %v1218_v18, %v1184_v11  ;;  %v1035_v5 = vadd.f32 %v1024_v56, %v1006_v32  ;;  %v1126_v54 = vsel %vm968_vm1, %v1125_v35, %v6878_v29  ;;  %v1219_v6 = vrot.slane %v1203_v12, 1 }
 0x16a   : > { %v1086_v7 = vadd.f32 %v1068_v28, %v1034_v58  ;;  %v1274_v14 = vrot.slane %v1256_v61, 2  ;;  %v904_v37 = vmul.f32 %v6771_v44, %v6990_v19  ;;  %v1303_v46 = vadd.f32 %v1272_v4, %v1235_v52 }
 0x16b   : > { %v1304_v43 = vadd.f32 %v1273_v42, %v1236_v63  ;;  %v1087_v2 = vadd.f32 %v1068_v28, %v1035_v5  ;;  %v955_v57 = vmul.f32 %v6785_v49, %v6990_v19  ;;  %v1025_v9 = vmul.f32 %v6824_v3, %v6984_v55  ;;  %v2770_v63 = vld [vmem:[#allocation8 + $0x20] sm:$0xff] }
 0x16c   : > { %v1157_v20 = vadd.f32 %v1125_v35, %v1086_v7  ;;  %v1275_v18 = vsel %vm968_vm1, %v1274_v14, %v6888_v33  ;;  %v920_v56 = vrot.slane %v904_v37, 1  ;;  %v1340_v1 = vrot.slane %v1303_v46, 7 }
 0x16d   : > { %v1341_v11 = vrot.slane %v1304_v43, 7  ;;  %v1158_v32 = vadd.f32 %v1126_v54, %v1087_v2  ;;  %v975_v58 = vrot.slane %v955_v57, 2  ;;  %v1053_v19 = vmul.f32 %v6868_v24, %v6984_v55 }
 0x16e   : > { %v1185_v12 = vadd.f32 %v6899_v40, %v1157_v20  ;;  %v938_v4 = vadd.f32 %v920_v56, %v6792_v51  ;;  %v939_v42 = vadd.f32 %v920_v56, %v884_v23  ;;  %v1106_v52 = vmul.f32 %v6812_v62, %v6984_v55 }
 0x16f   : > { %v1342_v28 = vsel %vm1336_vm2, %v1340_v1, %v1341_v11  ;;  %v1186_v35 = vadd.f32 %v1176_v45, %v1158_v32  ;;  %v976_v61 = vsel %vm968_vm1, %v975_v58, %v6809_v60  ;;  %v1069_v37 = vrot.slane %v1053_v19, 1 }
 0x170   : > { %5997 = vmatmul.mubr.msk.f32.vlgmr.msra.gmra.mxu0 %vm541_vm0, %v1342_v28  ;;  %v1237_v5 = vadd.f32 %v1219_v6, %v1185_v12  ;;  %v1007_v54 = vadd.f32 %v975_v58, %v938_v4  ;;  %v1008_v7 = vadd.f32 %v976_v61, %v939_v42  ;;  %v1127_v46 = vrot.slane %v1106_v52, 2 }
 0x171   : > { %6025 = vmatpush3.msra.mxu0 %v6760_v38  ;;  %v1238_v23 = vadd.f32 %v1219_v6, %v1186_v35  ;;  %v1177_v45 = vmul.f32 %v6871_v25, %v7023_v13  ;;  %v1204_v43 = vmul.f32 %v6881_v30, %v7023_v13  ;;  %v1257_v56 = vmul.f32 %v6820_v0, %v7023_v13 }
 0x172   : > { %v1305_v2 = vadd.f32 %v1274_v14, %v1237_v5  ;;  %v1036_v57 = vadd.f32 %v6840_v10, %v1007_v54  ;;  %v1037_v20 = vadd.f32 %v1025_v9, %v1008_v7  ;;  %6026 = vmatprep.subr.mxu0 %v2770_v63  ;;  %v1128_v38 = vsel %vm968_vm1, %v1127_v46, %v6878_v29 }
 0x173   : > { %v1306_v1 = vadd.f32 %v1275_v18, %v1238_v23  ;;  %v1220_v6 = vrot.slane %v1204_v43, 1  ;;  %v885_v11 = vmul.f32 %v6781_v47, %v6984_v55  ;;  %6027 = vmatpush3.msra.mxu0 %v2770_v63  ;;  %v1276_v14 = vrot.slane %v1257_v56, 2 }
 0x174   : > { %v1343_v32 = vrot.slane %v1305_v2, 7  ;;  %v1088_v58 = vadd.f32 %v1069_v37, %v1036_v57  ;;  %v1089_v12 = vadd.f32 %v1069_v37, %v1037_v20  ;;  %v905_v9 = vmul.f32 %v6771_v44, %v6984_v55 }
 0x175   : > { %v1344_v4 = vrot.slane %v1306_v1, 7  ;;  %v956_v42 = vmul.f32 %v6785_v49, %v6984_v55  ;;  %v1026_v18 = vmul.f32 %v6824_v3, %v7023_v13  ;;  %v1277_v35 = vsel %vm968_vm1, %v1276_v14, %v6888_v33 }
 0x176   : > { %v1159_v19 = vadd.f32 %v1127_v46, %v1088_v58  ;;  %v1160_v28 = vadd.f32 %v1128_v38, %v1089_v12  ;;  %v1054_v61 = vmul.f32 %v6868_v24, %v7023_v13  ;;  %v921_v63 = vrot.slane %v905_v9, 1 }
 0x177   : > { %v1345_v52 = vsel %vm1336_vm2, %v1343_v32, %v1344_v4  ;;  %v977_v5 = vrot.slane %v956_v42, 2  ;;  %v1107_v54 = vmul.f32 %v6812_v62, %v7023_v13  ;;  %v1178_v23 = vmul.f32 %v6871_v25, %v7006_v41 }
 0x178   : > { %5999 = vmatprep.mubr.msk.f32.mxu0 %vm541_vm0, %v1345_v52  ;;  %v1187_v55 = vadd.f32 %v6899_v40, %v1159_v19  ;;  %v1188_v7 = vadd.f32 %v1177_v45, %v1160_v28  ;;  %v1070_v37 = vrot.slane %v1054_v61, 1  ;;  %v940_v46 = vadd.f32 %v921_v63, %v6792_v51 }
 0x179   : > { %v941_v43 = vadd.f32 %v921_v63, %v885_v11  ;;  %v978_v2 = vsel %vm968_vm1, %v977_v5, %v6809_v60  ;;  %v1129_v57 = vrot.slane %v1107_v54, 2  ;;  %v1205_v1 = vmul.f32 %v6881_v30, %v7006_v41 }
 0x17a   : > { %v1239_v20 = vadd.f32 %v1220_v6, %v1187_v55  ;;  %v1240_v56 = vadd.f32 %v1220_v6, %v1188_v7  ;;  %v1258_v38 = vmul.f32 %v6820_v0, %v7006_v41  ;;  %v1009_v45 = vadd.f32 %v977_v5, %v940_v46 }
 0x17b   : > { %v1010_v32 = vadd.f32 %v978_v2, %v941_v43  ;;  %v1130_v58 = vsel %vm968_vm1, %v1129_v57, %v6878_v29  ;;  %v886_v11 = vmul.f32 %v6781_v47, %v7023_v13  ;;  %v1221_v9 = vrot.slane %v1205_v1, 1 }
 0x17c   : > { %v1307_v12 = vadd.f32 %v1276_v14, %v1239_v20  ;;  %v1308_v4 = vadd.f32 %v1277_v35, %v1240_v56  ;;  %v1278_v42 = vrot.slane %v1258_v38, 2  ;;  %v1038_v6 = vadd.f32 %v6840_v10, %v1009_v45 }
 0x17d   : > { %v1039_v19 = vadd.f32 %v1026_v18, %v1010_v32  ;;  %v906_v28 = vmul.f32 %v6771_v44, %v7023_v13  ;;  %v957_v61 = vmul.f32 %v6785_v49, %v7023_v13  ;;  %v1027_v14 = vmul.f32 %v6824_v3, %v7006_v41 }
 0x17e   : > { %v1346_v52 = vrot.slane %v1307_v12, 7  ;;  %v1347_v63 = vrot.slane %v1308_v4, 7  ;;  %v1279_v5 = vsel %vm968_vm1, %v1278_v42, %v6888_v33  ;;  %v1090_v35 = vadd.f32 %v1070_v37, %v1038_v6 }
 0x17f   : > { %v1091_v54 = vadd.f32 %v1070_v37, %v1039_v19  ;;  %v922_v55 = vrot.slane %v906_v28, 1  ;;  %v979_v7 = vrot.slane %v957_v61, 2  ;;  %v1055_v46 = vmul.f32 %v6868_v24, %v7006_v41 }
 0x180   : > { %v1348_v18 = vsel %vm1336_vm2, %v1346_v52, %v1347_v63  ;;  %v1108_v13 = vmul.f32 %v6812_v62, %v7006_v41  ;;  %v1179_v43 = vmul.f32 %v6871_v25, %v7035_v53  ;;  %v1161_v2 = vadd.f32 %v1129_v57, %v1090_v35 }
 0x181   : > { %6000 = vmatmul.mubr.msk.f32.gmra.mxu0 %vm541_vm0, %v1348_v18  ;;  %v1162_v20 = vadd.f32 %v1130_v58, %v1091_v54  ;;  %v942_v56 = vadd.f32 %v922_v55, %v6792_v51  ;;  %v943_v37 = vadd.f32 %v922_v55, %v886_v11  ;;  %v980_v1 = vsel %vm968_vm1, %v979_v7, %v6809_v60 }
 0x182   : > { %v1071_v38 = vrot.slane %v1055_v46, 1  ;;  %v1131_v45 = vrot.slane %v1108_v13, 2  ;;  %v1206_v32 = vmul.f32 %v6881_v30, %v7035_v53  ;;  %v1189_v12 = vadd.f32 %v6899_v40, %v1161_v2 }
 0x183   : > { %v1190_v4 = vadd.f32 %v1178_v23, %v1162_v20  ;;  %v1011_v6 = vadd.f32 %v979_v7, %v942_v56  ;;  %v1012_v19 = vadd.f32 %v980_v1, %v943_v37  ;;  %v1259_v11 = vmul.f32 %v6820_v0, %v7035_v53 }
 0x184   : > { %v1132_v57 = vsel %vm968_vm1, %v1131_v45, %v6878_v29  ;;  %v1222_v58 = vrot.slane %v1206_v32, 1  ;;  %v887_v28 = vmul.f32 %v6781_v47, %v7006_v41  ;;  %v1241_v61 = vadd.f32 %v1221_v9, %v1189_v12 }
 0x185   : > { %v1242_v52 = vadd.f32 %v1221_v9, %v1190_v4  ;;  %v1040_v63 = vadd.f32 %v6840_v10, %v1011_v6  ;;  %v1041_v35 = vadd.f32 %v1027_v14, %v1012_v19  ;;  %v1280_v54 = vrot.slane %v1259_v11, 2 }
 0x186   : > { %v907_v23 = vmul.f32 %v6771_v44, %v7006_v41  ;;  %v958_v55 = vmul.f32 %v6785_v49, %v7006_v41  ;;  %v1028_v7 = vmul.f32 %v6824_v3, %v7035_v53  ;;  %v1309_v18 = vadd.f32 %v1278_v42, %v1241_v61 }
 0x187   : > { %v1310_v46 = vadd.f32 %v1279_v5, %v1242_v52  ;;  %v1092_v13 = vadd.f32 %v1071_v38, %v1040_v63  ;;  %v1093_v2 = vadd.f32 %v1071_v38, %v1041_v35  ;;  %v1281_v9 = vsel %vm968_vm1, %v1280_v54, %v6888_v33 }
 0x188   : > { %v923_v20 = vrot.slane %v907_v23, 1  ;;  %v981_v56 = vrot.slane %v958_v55, 2  ;;  %v1056_v14 = vmul.f32 %v6868_v24, %v7035_v53  ;;  %v1349_v37 = vrot.slane %v1309_v18, 7 }
 0x189   : > { %v1350_v1 = vrot.slane %v1310_v46, 7  ;;  %v1163_v32 = vadd.f32 %v1131_v45, %v1092_v13  ;;  %v1164_v12 = vadd.f32 %v1132_v57, %v1093_v2  ;;  %v1109_v11 = vmul.f32 %v6812_v62, %v7035_v53 }
 0x18a   : > { %v944_v41 = vadd.f32 %v923_v20, %v6792_v51  ;;  %v945_v4 = vadd.f32 %v923_v20, %v887_v28  ;;  %v982_v42 = vsel %vm968_vm1, %v981_v56, %v6809_v60  ;;  %v1072_v5 = vrot.slane %v1056_v14, 1 }
 0x18b   : > { %v1351_v38 = vsel %vm1336_vm2, %v1349_v37, %v1350_v1  ;;  %v1191_v6 = vadd.f32 %v6899_v40, %v1163_v32  ;;  %v1192_v19 = vadd.f32 %v1179_v43, %v1164_v12  ;;  %v1180_v57 = vmul.f32 %v6871_v25, %v7029_v50 }
 0x18c   : > { %6002 = vmatprep.mubr.msk.f32.mxu0 %vm541_vm0, %v1351_v38  ;;  %v1013_v61 = vadd.f32 %v981_v56, %v944_v41  ;;  %v1014_v45 = vadd.f32 %v982_v42, %v945_v4  ;;  %v1207_v28 = vmul.f32 %v6881_v30, %v7029_v50  ;;  %v1133_v35 = vrot.slane %v1109_v11, 2 }
 0x18d   : > { %v1243_v52 = vadd.f32 %v1222_v58, %v1191_v6  ;;  %v1244_v63 = vadd.f32 %v1222_v58, %v1192_v19  ;;  %v1260_v23 = vmul.f32 %v6820_v0, %v7029_v50  ;;  %v888_v46 = vmul.f32 %v6781_v47, %v7035_v53 }
 0x18e   : > { %v1042_v43 = vadd.f32 %v6840_v10, %v1013_v61  ;;  %v1043_v55 = vadd.f32 %v1028_v7, %v1014_v45  ;;  %v1223_v18 = vrot.slane %v1207_v28, 1  ;;  %v1134_v25 = vsel %vm968_vm1, %v1133_v35, %v6878_v29 }
 0x18f   : > { %v1311_v13 = vadd.f32 %v1280_v54, %v1243_v52  ;;  %v1312_v2 = vadd.f32 %v1281_v9, %v1244_v63  ;;  %v1282_v20 = vrot.slane %v1260_v23, 2  ;;  %v908_v58 = vmul.f32 %v6771_v44, %v7035_v53 }
 0x190   : > { %v1094_v30 = vadd.f32 %v1072_v5, %v1042_v43  ;;  %v1095_v56 = vadd.f32 %v1072_v5, %v1043_v55  ;;  %v959_v0 = vmul.f32 %v6785_v49, %v7035_v53  ;;  %v1029_v47 = vmul.f32 %v6824_v3, %v7029_v50 }
 0x191   : > { %v1352_v14 = vrot.slane %v1311_v13, 7  ;;  %v1353_v7 = vrot.slane %v1312_v2, 7  ;;  %v1283_v37 = vsel %vm968_vm1, %v1282_v20, %v6888_v33  ;;  %v924_v1 = vrot.slane %v908_v58, 1 }
 0x192   : > { %v1165_v54 = vadd.f32 %v1133_v35, %v1094_v30  ;;  %v1166_v9 = vadd.f32 %v1134_v25, %v1095_v56  ;;  %v983_v32 = vrot.slane %v959_v0, 2  ;;  %v1057_v44 = vmul.f32 %v6868_v24, %v7029_v50 }
 0x193   : > { %v1354_v12 = vsel %vm1336_vm2, %v1352_v14, %v1353_v7  ;;  %v1110_v49 = vmul.f32 %v6812_v62, %v7029_v50  ;;  %v2474_v53 = vmul.f32 %v6851_v16, %v6934_v26  ;;  %v946_v4 = vadd.f32 %v924_v1, %v6792_v51 }
 0x194   : > { %6003 = vmatmul.mubr.msk.f32.gmra.mxu0 %vm541_vm0, %v1354_v12  ;;  %v1193_v41 = vadd.f32 %v6899_v40, %v1165_v54  ;;  %v1194_v3 = vadd.f32 %v1180_v57, %v1166_v9  ;;  %v947_v42 = vadd.f32 %v924_v1, %v888_v46  ;;  %v984_v5 = vsel %vm968_vm1, %v983_v32, %v6809_v60  ;;  %v9988_v9 = vld [vmem:[#allocation54_spill] sm:$0xff] }
 0x195   : > { %v1073_v38 = vrot.slane %v1057_v44, 1  ;;  %v1135_v6 = vrot.slane %v1110_v49, 2  ;;  %v2483_v24 = vadd.f32 %v2474_v53, %v6891_v34  ;;  %v1015_v50 = vadd.f32 %v983_v32, %v946_v4  ;;  %v9989_v32 = vld [vmem:[#allocation42_spill] sm:$0xff]  ;;  %v9990_v49 = vld [vmem:[#allocation55_spill] sm:$0xff]  ;;  %v9991_v53 = vld [vmem:[#allocation37_spill] sm:$0xff] }
 0x196   : > { %v1245_v19 = vadd.f32 %v1223_v18, %v1193_v41  ;;  %v1246_v62 = vadd.f32 %v1223_v18, %v1194_v3  ;;  %v1016_v11 = vadd.f32 %v984_v5, %v947_v42  ;;  %v2502_v45 = vmul.f32 %v6914_v59, %v6934_v26  ;;  %v9992_v3 = vld [vmem:[#allocation38_spill] sm:$0xff] }
 0x197   : > { %v1136_v61 = vsel %vm968_vm1, %v1135_v6, %v6878_v29  ;;  %v2554_v51 = vmul.f32 %v6855_v17, %v6934_v26  ;;  %v2626_v60 = vmul.f32 %v6906_v48, %v6987_v36  ;;  %v1044_v34 = vadd.f32 %v6840_v10, %v1015_v50  ;;  %v9995_v50 = vld [vmem:[#allocation57_spill] sm:$0xff] }
 0x198   : > { %v1313_v57 = vadd.f32 %v1282_v20, %v1245_v19  ;;  %v1314_v28 = vadd.f32 %v1283_v37, %v1246_v62  ;;  %v1045_v52 = vadd.f32 %v1029_v47, %v1016_v11  ;;  %v2518_v63 = vrot.slane %v2502_v45, 1 }
 0x199   : > { %v2572_v35 = vrot.slane %v2554_v51, 2  ;;  %v2653_v23 = vmul.f32 %v6942_v39, %v6987_v36  ;;  %v2705_v29 = vmul.f32 %v6886_v31, %v6987_v36  ;;  %v1096_v18 = vadd.f32 %v1073_v38, %v1044_v34 }
 0x19a   : > { %v1355_v43 = vrot.slane %v1313_v57, 7  ;;  %v1356_v55 = vrot.slane %v1314_v28, 7  ;;  %v1097_v26 = vadd.f32 %v1073_v38, %v1045_v52  ;;  %v2534_v46 = vadd.f32 %v2518_v63, %v6929_v21 }
 0x19b   : > { %v2535_v13 = vadd.f32 %v2518_v63, %v2483_v24  ;;  %v2574_v2 = vsel %vm968_vm1, %v2572_v35, %v6931_v22  ;;  %v2669_v10 = vrot.slane %v2653_v23, 1  ;;  %v1167_v20 = vadd.f32 %v1135_v6, %v1096_v18 }
 0x19c   : > { %v1357_v25 = vsel %vm1336_vm2, %v1355_v43, %v1356_v55  ;;  %v1168_v30 = vadd.f32 %v1136_v61, %v1097_v26  ;;  %v2721_v56 = vrot.slane %v2705_v29, 2  ;;  %v2605_v58 = vadd.f32 %v2572_v35, %v2534_v46 }
 0x19d   : > { %6005 = vmatprep.mubr.msk.f32.mxu0 %vm541_vm0, %v1357_v25  ;;  %v2606_v0 = vadd.f32 %v2574_v2, %v2535_v13  ;;  %v9987_v14 = vrot.slane %v6966_v27, 2  ;;  %v2475_v21 = vmul.f32 %v6851_v16, %v6987_v36  ;;  %v1195_v37 = vadd.f32 %v6899_v40, %v1167_v20  ;;  %v9996_v13 = vld [vmem:[#allocation30_spill] sm:$0xff] }
 0x19e   : > { %v1196_v47 = vadd.f32 %v6899_v40, %v1168_v30  ;;  %v2723_v54 = vsel %vm968_vm1, %v2721_v56, %v6951_v8  ;;  %v2633_v12 = vadd.f32 %v9989_v32, %v2605_v58  ;;  %v2484_v27 = vadd.f32 %v9991_v53, %v9990_v49  ;;  %v9998_v58 = vld [vmem:[#allocation31_spill] sm:$0xff] }
 0x19f   : > { %v2424_v7 = vsel %vm968_vm1, %v9987_v14, %v6847_v15  ;;  %v2634_v44 = vadd.f32 %v2626_v60, %v2606_v0  ;;  %v2503_v41 = vmul.f32 %v6914_v59, %v6987_v36  ;;  %v9993_v4 = vrot.slane %v9992_v3, 1  ;;  %v9999_v14 = vld [vmem:[#allocation61_spill] sm:$0xff] }
 0x1a0   : > { %v2456_v1 = vadd.f32 %v2424_v7, %v9988_v9  ;;  %v2556_v6 = vmul.f32 %v6855_v17, %v6987_v36  ;;  %v2685_v24 = vadd.f32 %v2669_v10, %v2633_v12  ;;  %v2627_v11 = vmul.f32 %v6906_v48, %v9995_v50 }
 0x1a1   : > { %v1247_v42 = vadd.f32 %v9993_v4, %v1195_v37  ;;  %v9994_v5 = vmov %v9993_v4  ;;  %v2686_v19 = vadd.f32 %v2669_v10, %v2634_v44  ;;  %v2519_v62 = vrot.slane %v2503_v41, 1  ;;  %v9997_v10 = vld [vmem:[#allocation28_spill] sm:$0xff] }
 0x1a2   : > { %v1248_v40 = vadd.f32 %v9994_v5, %v1196_v47  ;;  %v2485_v38 = vadd.f32 %v2475_v21, %v2456_v1  ;;  %v2575_v51 = vrot.slane %v2556_v6, 2  ;;  %v2654_v60 = vmul.f32 %v6942_v39, %v9995_v50 }
 0x1a3   : > { %v1315_v61 = vadd.f32 %v6888_v33, %v1247_v42  ;;  %v2753_v57 = vadd.f32 %v2721_v56, %v2685_v24  ;;  %v2754_v28 = vadd.f32 %v2723_v54, %v2686_v19  ;;  %v2536_v34 = vadd.f32 %v2519_v62, %v2484_v27  ;;  %v10001_v24 = vld [vmem:[#allocation56_spill] sm:$0xff] }
 0x1a4   : > { %v1316_v45 = vadd.f32 %v6888_v33, %v1248_v40  ;;  %v2537_v52 = vadd.f32 %v2519_v62, %v2485_v38  ;;  %v2576_v23 = vsel %vm968_vm1, %v2575_v51, %v6931_v22  ;;  %v2670_v29 = vrot.slane %v2654_v60, 1 }
 0x1a5   : > { %v1358_v63 = vrot.slane %v1315_v61, 7  ;;  %v2790_v43 = vrot.slane %v2753_v57, 7  ;;  %v2791_v55 = vrot.slane %v2754_v28, 7  ;;  %v2607_v18 = vadd.f32 %v2575_v51, %v2536_v34 }
 0x1a6   : > { %v1359_v35 = vrot.slane %v1316_v45, 7  ;;  %v2608_v26 = vadd.f32 %v2576_v23, %v2537_v52  ;;  %v2707_v46 = vmul.f32 %v6886_v31, %v9995_v50  ;;  %v2336_v2 = vmul.f32 %v9996_v13, %v6987_v36 }
 0x1a7   : > { %v2356_v25 = vmul.f32 %v9997_v10, %v6987_v36  ;;  %v2792_v20 = vsel %vm1336_vm2, %v2790_v43, %v2791_v55  ;;  %v2635_v30 = vadd.f32 %v9989_v32, %v2607_v18  ;;  %v2407_v0 = vmul.f32 %v9998_v58, %v6987_v36  ;;  %v10000_v36 = vld [vmem:[#allocation33_spill] sm:$0xff] }
 0x1a8   : > { %v1360_v33 = vsel %vm1336_vm2, %v1358_v63, %v1359_v35  ;;  %v2636_v56 = vadd.f32 %v2627_v11, %v2608_v26  ;;  %v7316_v7 = vmax.f32 %v9999_v14, 0.0  ;;  %v2724_v21 = vrot.slane %v2707_v46, 2 }
 0x1a9   : > { %6006 = vmatmul.mubr.msk.f32.gmra.mxu0 %vm541_vm0, %v1360_v33  ;;  %v2372_v37 = vrot.slane %v2356_v25, 1  ;;  %v2504_v47 = vmul.f32 %v6914_v59, %v9995_v50  ;;  %v2687_v54 = vadd.f32 %v2670_v29, %v2635_v30  ;;  %v2425_v1 = vrot.slane %v2407_v0, 2 }
 0x1aa   : > { %6028 = vmatprep.mubr.msk.f32.mxu0 %vm541_vm0, %v2792_v20  ;;  %v2688_v9 = vadd.f32 %v2670_v29, %v2636_v56  ;;  %v2557_v12 = vmul.f32 %v6855_v17, %v9995_v50  ;;  %v2725_v44 = vsel %vm968_vm1, %v2724_v21, %v6951_v8  ;;  %v2476_v41 = vmul.f32 %v6851_v16, %v9995_v50 }
 0x1ab   : > { %v2389_v49 = vadd.f32 %v2372_v37, %v10000_v36  ;;  %v2390_v27 = vadd.f32 %v2372_v37, %v2336_v2  ;;  %v2755_v3 = vadd.f32 %v2724_v21, %v2687_v54  ;;  %v2426_v42 = vsel %vm968_vm1, %v2425_v1, %v6847_v15  ;;  %v10002_v54 = vld [vmem:[#allocation59_spill] sm:$0xff] }
 0x1ac   : > { %v2756_v4 = vadd.f32 %v2725_v44, %v2688_v9  ;;  %v2577_v5 = vrot.slane %v2557_v12, 2  ;;  %v2520_v6 = vrot.slane %v2504_v47, 1  ;;  %v2655_v19 = vmul.f32 %v6942_v39, %v10001_v24 }
 0x1ad   : > { %v2457_v40 = vadd.f32 %v2425_v1, %v2389_v49  ;;  %v2458_v38 = vadd.f32 %v2426_v42, %v2390_v27  ;;  %v2793_v62 = vrot.slane %v2755_v3, 7  ;;  %v2628_v61 = vmul.f32 %v6906_v48, %v10001_v24 }
 0x1ae   : > { %v2794_v11 = vrot.slane %v2756_v4, 7  ;;  %v2708_v45 = vmul.f32 %v6886_v31, %v10001_v24  ;;  %v2578_v57 = vsel %vm968_vm1, %v2577_v5, %v6931_v22  ;;  %v2337_v28 = vmul.f32 %v9996_v13, %v9995_v50 }
 0x1af   : > { %v2486_v51 = vadd.f32 %v9991_v53, %v2457_v40  ;;  %v2487_v60 = vadd.f32 %v2476_v41, %v2458_v38  ;;  %v2357_v63 = vmul.f32 %v9997_v10, %v9995_v50  ;;  %v2408_v35 = vmul.f32 %v9998_v58, %v9995_v50 }
 0x1b0   : > { %v2795_v34 = vsel %vm1336_vm2, %v2793_v62, %v2794_v11  ;;  %v2726_v52 = vrot.slane %v2708_v45, 2  ;;  %v2671_v43 = vrot.slane %v2655_v19, 1  ;;  %v2505_v55 = vmul.f32 %v6914_v59, %v10001_v24 }
 0x1b1   : > { %6029 = vmatmul.mubr.msk.f32.vlgmr.msra.gmra.mxu0 %vm541_vm0, %v2795_v34  ;;  %v2538_v23 = vadd.f32 %v2520_v6, %v2486_v51  ;;  %v2539_v29 = vadd.f32 %v2520_v6, %v2487_v60  ;;  %v2373_v18 = vrot.slane %v2357_v63, 1  ;;  %v2427_v26 = vrot.slane %v2408_v35, 2 }
 0x1b2   : > { %v2477_v33 = vmul.f32 %v6851_v16, %v10001_v24  ;;  %v2558_v46 = vmul.f32 %v6855_v17, %v10001_v24  ;;  %v2727_v50 = vsel %vm968_vm1, %v2726_v52, %v6951_v8  ;;  %v2521_v20 = vrot.slane %v2505_v55, 1 }
 0x1b3   : > { %v2609_v2 = vadd.f32 %v2577_v5, %v2538_v23  ;;  %v2610_v25 = vadd.f32 %v2578_v57, %v2539_v29  ;;  %v2391_v30 = vadd.f32 %v2373_v18, %v10000_v36  ;;  %v2392_v56 = vadd.f32 %v2373_v18, %v2337_v28 }
 0x1b4   : > { %v2428_v0 = vsel %vm968_vm1, %v2427_v26, %v6847_v15  ;;  %v2579_v21 = vrot.slane %v2558_v46, 2  ;;  %v2656_v9 = vmul.f32 %v6942_v39, %v10002_v54  ;;  %v2709_v1 = vmul.f32 %v6886_v31, %v10002_v54 }
 0x1b5   : > { %v2637_v37 = vadd.f32 %v9989_v32, %v2609_v2  ;;  %v2638_v47 = vadd.f32 %v2628_v61, %v2610_v25  ;;  %v2459_v12 = vadd.f32 %v2427_v26, %v2391_v30  ;;  %v2460_v44 = vadd.f32 %v2428_v0, %v2392_v56  ;;  %v7395_v56 = vld [vmem:[%s9768_s6 + $0x28] ss:$0 sm:$0xff] }
 0x1b6   : > { %v2580_v49 = vsel %vm968_vm1, %v2579_v21, %v6931_v22  ;;  %v2629_v27 = vmul.f32 %v6906_v48, %v10002_v54  ;;  %v2672_v4 = vrot.slane %v2656_v9, 1  ;;  %v2338_v42 = vmul.f32 %v9996_v13, %v10001_v24 }
 0x1b7   : > { %v2689_v41 = vadd.f32 %v2671_v43, %v2637_v37  ;;  %v2690_v3 = vadd.f32 %v2671_v43, %v2638_v47  ;;  %v2488_v5 = vadd.f32 %v9991_v53, %v2459_v12  ;;  %v2489_v40 = vadd.f32 %v2477_v33, %v2460_v44 }
 0x1b8   : > { %v2358_v31 = vmul.f32 %v9997_v10, %v10001_v24  ;;  %v2409_v38 = vmul.f32 %v9998_v58, %v10001_v24  ;;  %v2728_v62 = vrot.slane %v2709_v1, 2  ;;  %v2478_v11 = vmul.f32 %v6851_v16, %v10002_v54 }
 0x1b9   : > { %v2757_v6 = vadd.f32 %v2726_v52, %v2689_v41  ;;  %v2758_v19 = vadd.f32 %v2727_v50, %v2690_v3  ;;  %v2540_v61 = vadd.f32 %v2521_v20, %v2488_v5  ;;  %v2541_v45 = vadd.f32 %v2521_v20, %v2489_v40  ;;  %v10003_v20 = vld [vmem:[#allocation58_spill] sm:$0xff] }
 0x1ba   : > { %v2374_v51 = vrot.slane %v2358_v31, 1  ;;  %v2429_v60 = vrot.slane %v2409_v38, 2  ;;  %v2506_v34 = vmul.f32 %v6914_v59, %v10002_v54  ;;  %v2559_v63 = vmul.f32 %v6855_v17, %v10002_v54 }
 0x1bb   : > { %v2796_v57 = vrot.slane %v2757_v6, 7  ;;  %v2797_v28 = vrot.slane %v2758_v19, 7  ;;  %v2611_v35 = vadd.f32 %v2579_v21, %v2540_v61  ;;  %v2612_v24 = vadd.f32 %v2580_v49, %v2541_v45 }
 0x1bc   : > { %v2393_v52 = vadd.f32 %v2374_v51, %v10000_v36  ;;  %v2394_v23 = vadd.f32 %v2374_v51, %v2338_v42  ;;  %v2430_v43 = vsel %vm968_vm1, %v2429_v60, %v6847_v15  ;;  %v2522_v55 = vrot.slane %v2506_v34, 1 }
 0x1bd   : > { %v2798_v29 = vsel %vm1336_vm2, %v2796_v57, %v2797_v28  ;;  %v2581_v18 = vrot.slane %v2559_v63, 2  ;;  %v2639_v26 = vadd.f32 %v9989_v32, %v2611_v35  ;;  %v2640_v33 = vadd.f32 %v2629_v27, %v2612_v24 }
 0x1be   : > { %6031 = vmatprep.mubr.msk.f32.mxu0 %vm541_vm0, %v2798_v29  ;;  %v2461_v46 = vadd.f32 %v2429_v60, %v2393_v52  ;;  %v2462_v2 = vadd.f32 %v2430_v43, %v2394_v23  ;;  %v2729_v25 = vsel %vm968_vm1, %v2728_v62, %v6951_v8  ;;  %v2657_v30 = vmul.f32 %v6942_v39, %v10003_v20 }
 0x1bf   : > { %v2582_v50 = vsel %vm968_vm1, %v2581_v18, %v6931_v22  ;;  %v2710_v0 = vmul.f32 %v7395_v56, %v10003_v20  ;;  %v2691_v21 = vadd.f32 %v2672_v4, %v2639_v26  ;;  %v2692_v37 = vadd.f32 %v2672_v4, %v2640_v33 }
 0x1c0   : > { %v2490_v47 = vadd.f32 %v9991_v53, %v2461_v46  ;;  %v2491_v9 = vadd.f32 %v2478_v11, %v2462_v2  ;;  %v2630_v1 = vmul.f32 %v6906_v48, %v10003_v20  ;;  %v2673_v12 = vrot.slane %v2657_v30, 1 }
 0x1c1   : > { %v2339_v44 = vmul.f32 %v9996_v13, %v10002_v54  ;;  %v2359_v49 = vmul.f32 %v9997_v10, %v10002_v54  ;;  %v2759_v27 = vadd.f32 %v2728_v62, %v2691_v21  ;;  %v2760_v41 = vadd.f32 %v2729_v25, %v2692_v37 }
 0x1c2   : > { %v2542_v3 = vadd.f32 %v2522_v55, %v2490_v47  ;;  %v2543_v42 = vadd.f32 %v2522_v55, %v2491_v9  ;;  %v2730_v5 = vrot.slane %v2710_v0, 2  ;;  %v2410_v4 = vmul.f32 %v9998_v58, %v10002_v54 }
 0x1c3   : > { %v2375_v40 = vrot.slane %v2359_v49, 1  ;;  %v2479_v31 = vmul.f32 %v6851_v16, %v10003_v20  ;;  %v2799_v38 = vrot.slane %v2759_v27, 7  ;;  %v2800_v6 = vrot.slane %v2760_v41, 7 }
 0x1c4   : > { %v2613_v19 = vadd.f32 %v2581_v18, %v2542_v3  ;;  %v2614_v11 = vadd.f32 %v2582_v50, %v2543_v42  ;;  %v2431_v51 = vrot.slane %v2410_v4, 2  ;;  %v2507_v62 = vmul.f32 %v6914_v59, %v10003_v20 }
 0x1c5   : > { %v2395_v61 = vadd.f32 %v2375_v40, %v10000_v36  ;;  %v2396_v45 = vadd.f32 %v2375_v40, %v2339_v44  ;;  %v2801_v60 = vsel %vm1336_vm2, %v2799_v38, %v2800_v6  ;;  %v2560_v54 = vmul.f32 %v6855_v17, %v10003_v20 }
 0x1c6   : > { %v2641_v57 = vadd.f32 %v9989_v32, %v2613_v19  ;;  %v2642_v28 = vadd.f32 %v2630_v1, %v2614_v11  ;;  %6032 = vmatmul.mubr.msk.f32.gmra.mxu0 %vm541_vm0, %v2801_v60  ;;  %v2731_v34 = vsel %vm968_vm1, %v2730_v5, %v6951_v8  ;;  %v2432_v63 = vsel %vm968_vm1, %v2431_v51, %v6847_v15 }
 0x1c7   : > { %v2463_v35 = vadd.f32 %v2431_v51, %v2395_v61  ;;  %v2523_v24 = vrot.slane %v2507_v62, 1  ;;  %v2464_v29 = vadd.f32 %v2432_v63, %v2396_v45  ;;  %v2583_v43 = vrot.slane %v2560_v54, 2 }
 0x1c8   : > { %v2693_v52 = vadd.f32 %v2673_v12, %v2641_v57  ;;  %v2694_v23 = vadd.f32 %v2673_v12, %v2642_v28  ;;  %v2631_v18 = vmul.f32 %v6906_v48, %v7316_v7  ;;  %v2658_v26 = vmul.f32 %v6942_v39, %v7316_v7  ;;  %v10004_v28 = vld [vmem:[#allocation62_spill] sm:$0xff] }
 0x1c9   : > { %v2492_v55 = vadd.f32 %v9991_v53, %v2463_v35  ;;  %v2711_v33 = vmul.f32 %v7395_v56, %v7316_v7  ;;  %v2493_v25 = vadd.f32 %v2479_v31, %v2464_v29  ;;  %v2340_v50 = vmul.f32 %v9996_v13, %v10003_v20 }
 0x1ca   : > { %v2761_v46 = vadd.f32 %v2730_v5, %v2693_v52  ;;  %v2762_v2 = vadd.f32 %v2731_v34, %v2694_v23  ;;  %v2584_v0 = vsel %vm968_vm1, %v2583_v43, %v6931_v22  ;;  %v2360_v37 = vmul.f32 %v9997_v10, %v10003_v20 }
 0x1cb   : > { %v2544_v30 = vadd.f32 %v2523_v24, %v2492_v55  ;;  %v2732_v21 = vrot.slane %v2711_v33, 2  ;;  %v2545_v1 = vadd.f32 %v2523_v24, %v2493_v25  ;;  %v2411_v12 = vmul.f32 %v9998_v58, %v10003_v20 }
 0x1cc   : > { %v2802_v47 = vrot.slane %v2761_v46, 7  ;;  %v2803_v9 = vrot.slane %v2762_v2, 7  ;;  %v2674_v49 = vrot.slane %v2658_v26, 1  ;;  %v2376_v27 = vrot.slane %v2360_v37, 1 }
 0x1cd   : > { %v2615_v44 = vadd.f32 %v2583_v43, %v2544_v30  ;;  %v2480_v41 = vmul.f32 %v6851_v16, %v7316_v7  ;;  %v2616_v42 = vadd.f32 %v2584_v0, %v2545_v1  ;;  %v2433_v5 = vrot.slane %v2411_v12, 2 }
 0x1ce   : > { %v2804_v3 = vsel %vm1336_vm2, %v2802_v47, %v2803_v9  ;;  %v2508_v40 = vmul.f32 %v6914_v59, %v7316_v7  ;;  %v2397_v31 = vadd.f32 %v2376_v27, %v10000_v36  ;;  %v2398_v20 = vadd.f32 %v2376_v27, %v2340_v50 }
 0x1cf   : > { %6034 = vmatprep.mubr.msk.f32.mxu0 %vm541_vm0, %v2804_v3  ;;  %v2643_v4 = vadd.f32 %v9989_v32, %v2615_v44  ;;  %v2561_v38 = vmul.f32 %v6855_v17, %v7316_v7  ;;  %v2644_v6 = vadd.f32 %v2631_v18, %v2616_v42  ;;  %v2733_v19 = vsel %vm968_vm1, %v2732_v21, %v6951_v8 }
 0x1d0   : > { %v2434_v11 = vsel %vm968_vm1, %v2433_v5, %v6847_v15  ;;  %v2524_v61 = vrot.slane %v2508_v40, 1  ;;  %v2465_v51 = vadd.f32 %v2433_v5, %v2397_v31  ;;  %v2632_v54 = vmul.f32 %v6906_v48, %v10004_v28 }
 0x1d1   : > { %v2695_v45 = vadd.f32 %v2674_v49, %v2643_v4  ;;  %v2466_v62 = vadd.f32 %v2434_v11, %v2398_v20  ;;  %v2585_v60 = vrot.slane %v2561_v38, 2  ;;  %v2696_v57 = vadd.f32 %v2674_v49, %v2644_v6 }
 0x1d2   : > { %v2659_v34 = vmul.f32 %v6942_v39, %v10004_v28  ;;  %v2712_v63 = vmul.f32 %v7395_v56, %v10004_v28  ;;  %v2494_v24 = vadd.f32 %v9991_v53, %v2465_v51  ;;  %v2341_v23 = vmul.f32 %v9996_v13, %v7316_v7 }
 0x1d3   : > { %v2763_v35 = vadd.f32 %v2732_v21, %v2695_v45  ;;  %v2495_v52 = vadd.f32 %v2480_v41, %v2466_v62  ;;  %v2764_v29 = vadd.f32 %v2733_v19, %v2696_v57  ;;  %v2586_v43 = vsel %vm968_vm1, %v2585_v60, %v6931_v22 }
 0x1d4   : > { %v2734_v55 = vrot.slane %v2712_v63, 2  ;;  %v2361_v48 = vmul.f32 %v9997_v10, %v7316_v7  ;;  %v2546_v26 = vadd.f32 %v2524_v61, %v2494_v24  ;;  %v2412_v56 = vmul.f32 %v9998_v58, %v7316_v7 }
 0x1d5   : > { %v2805_v18 = vrot.slane %v2763_v35, 7  ;;  %v2547_v33 = vadd.f32 %v2524_v61, %v2495_v52  ;;  %v2806_v46 = vrot.slane %v2764_v29, 7  ;;  %v2675_v2 = vrot.slane %v2659_v34, 1  ;;  %v10005_v34 = vld [vmem:[#allocation25_spill] sm:$0xff]  ;;  %v10006_v35 = vld [vmem:[#allocation27_spill] sm:$0xff]  ;;  %v10007_v52 = vld [vmem:[#allocation26_spill] sm:$0xff] }
 0x1d6   : > { %v2377_v25 = vrot.slane %v2361_v48, 1  ;;  %v2481_v13 = vmul.f32 %v6851_v16, %v10004_v28  ;;  %v2617_v50 = vadd.f32 %v2585_v60, %v2546_v26  ;;  %v2435_v0 = vrot.slane %v2412_v56, 2  ;;  %v1319_v26 = vld [vmem:[%s9770_s8] sm:$0x3] }
 0x1d7   : > { %v2618_v30 = vadd.f32 %v2586_v43, %v2547_v33  ;;  %v2509_v21 = vmul.f32 %v6914_v59, %v10004_v28  ;;  %v2807_v10 = vsel %vm1336_vm2, %v2805_v18, %v2806_v46  ;;  %v2562_v58 = vmul.f32 %v6855_v17, %v10004_v28  ;;  %v1958_v28 = vld [vmem:[#allocation8 + $0x18] sm:$0xff] }
 0x1d8   : > { %v2399_v37 = vadd.f32 %v2377_v25, %v10000_v36  ;;  %v2400_v47 = vadd.f32 %v2377_v25, %v2341_v23  ;;  %6035 = vmatmul.mubr.msk.f32.gmra.mxu0 %vm541_vm0, %v2807_v10  ;;  %v2645_v7 = vadd.f32 %v9989_v32, %v2617_v50  ;;  %v2735_v16 = vsel %vm968_vm1, %v2734_v55, %v6951_v8 }
 0x1d9   : > { %v2646_v9 = vadd.f32 %v2632_v54, %v2618_v30  ;;  %v2436_v1 = vsel %vm968_vm1, %v2435_v0, %v6847_v15  ;;  %v2525_v44 = vrot.slane %v2509_v21, 1  ;;  %v2587_v49 = vrot.slane %v2562_v58, 2  ;;  %6008 = vmatprep.subr.mxu1 %v1958_v28  ;;  %v1957_v54 = vld [vmem:[#allocation8 + $0x10] sm:$0xff]  ;;  %v10009_v58 = vld [vmem:[#allocation32_spill] sm:$0xff] }
 0x1da   : > { %v2467_v59 = vadd.f32 %v2435_v0, %v2399_v37  ;;  %v2468_v12 = vadd.f32 %v2436_v1, %v2400_v47  ;;  %v2697_v36 = vadd.f32 %v2675_v2, %v2645_v7  ;;  %v2660_v3 = vmul.f32 0.0, %v6942_v39  ;;  %6009 = vmatpush3.msra.mxu1 %v1958_v28  ;;  %v5815_v30 = vld [vmem:[%s9770_s8 + $0x4] sm:$0x3]  ;;  %v7539_v0 = vld [vmem:[%s9768_s6 + $0x18] ss:$0 sm:$0xff] }
 0x1db   : > { %v2698_v27 = vadd.f32 %v2675_v2, %v2646_v9  ;;  %v2588_v40 = vsel %vm968_vm1, %v2587_v49, %v6931_v22  ;;  %6010 = vmatprep.subr.mxu1 %v1957_v54  ;;  %v10008_v2 = vld [vmem:[#allocation29_spill] sm:$0xff]  ;;  %v7543_v10 = vrot.slane %v1319_v26, %v10005_v34 }
 0x1dc   : > { %v2496_v41 = vadd.f32 %v9991_v53, %v2467_v59  ;;  %v2497_v17 = vadd.f32 %v2481_v13, %v2468_v12  ;;  %v2765_v42 = vadd.f32 %v2734_v55, %v2697_v36  ;;  %v2676_v19 = vrot.slane %v2660_v3, 1  ;;  %6011 = vmatpush3.msra.mxu1 %v1957_v54  ;;  %v7573_v3 = vld [vmem:[%s9768_s6 + $0x38] ss:$0 sm:$0xff] }
 0x1dd   : > { %v2766_v5 = vadd.f32 %v2735_v16, %v2698_v27  ;;  %v7529_v13 = vrot.slane %v1319_v26, %v10006_v35  ;;  %v7556_v59 = vrot.slane %v5815_v30, %v10006_v35  ;;  %v7562_v36 = vrot.slane %v5815_v30, %v10005_v34  ;;  %10010 = vst [vmem:[#allocation54_spill] sm:$0xff] %v7573_v3 }
 0x1de   : > { %v2548_v4 = vadd.f32 %v2525_v44, %v2496_v41  ;;  %v2549_v31 = vadd.f32 %v2525_v44, %v2497_v17  ;;  %v2808_v20 = vrot.slane %v2765_v42, 7  ;;  %v1893_v44 = vmul.f32 0.0, %v7539_v0  ;;  %v7568_v17 = vld [vmem:[#allocation8 + $0x38] sm:$0xff] }
 0x1df   : > { %v2809_v15 = vrot.slane %v2766_v5, 7  ;;  %6040 = vmatprep.subr.mxu1 %v7568_v17 }
 0x1e0   : > { %v2619_v38 = vadd.f32 %v2587_v49, %v2548_v4  ;;  %v2620_v6 = vadd.f32 %v2588_v40, %v2549_v31  ;;  %v10011_v40 = vld [vmem:[#allocation34_spill] sm:$0xff]  ;;  %v10012_v31 = vld [vmem:[#allocation35_spill] sm:$0xff] }
 0x1e1   : > { %v2810_v11 = vsel %vm1336_vm2, %v2808_v20, %v2809_v15  ;;  %v10013_v15 = vld [vmem:[#allocation36_spill] sm:$0xff] }
 0x1e2   : > { %6037 = vmatprep.mubr.msk.f32.mxu0 %vm541_vm0, %v2810_v11  ;;  %v2647_v53 = vadd.f32 %v9989_v32, %v2619_v38  ;;  %v2648_v39 = vadd.f32 %v9989_v32, %v2620_v6  ;;  %v5800_v32 = vld [vmem:[%s9768_s6 + $0x10] sm:$0xff] }
 0x1e3   : > { %v7496_v63 = vrot.slane %v5800_v32, %v10005_v34  ;;  %v7502_v24 = vrot.slane %v5800_v32, %v10006_v35  ;;  %v7505_v23 = vrot.slane %v5800_v32, %v10007_v52  ;;  %v7526_v25 = vrot.slane %v5800_v32, %v10008_v2 }
 0x1e4   : > { %v2699_v61 = vadd.f32 %v2676_v19, %v2647_v53  ;;  %v2700_v45 = vadd.f32 %v2676_v19, %v2648_v39  ;;  %v7550_v7 = vrot.slane %v5800_v32, %v10009_v58  ;;  %v7578_v4 = vrot.slane %v5800_v32, %v10011_v40 }
 0x1e5   : > { %v1541_v29 = vmul.f32 0.0, %v7496_v63  ;;  %v7512_v55 = vmul.f32 0.0, %v7502_v24  ;;  %v1592_v48 = vmul.f32 0.0, %v7505_v23  ;;  %v1742_v12 = vmul.f32 0.0, %v7526_v25 }
 0x1e6   : > { %v2767_v51 = vadd.f32 %v6951_v8, %v2699_v61  ;;  %v2768_v22 = vadd.f32 %v6951_v8, %v2700_v45  ;;  %v5824_v8 = vld [vmem:[%s9768_s6 + $0x30] sm:$0xff]  ;;  %v7566_v41 = vmul.f32 0.0, %v7550_v7  ;;  %v7581_v20 = vrot.slane %v5800_v32, %v10012_v31 }
 0x1e7   : > { %v7509_v43 = vrot.slane %v5824_v8, %v10005_v34  ;;  %v1557_v18 = vrot.slane %v1541_v29, 1  ;;  %v7519_v33 = vrot.slane %v5824_v8, %v10007_v52  ;;  %v7522_v56 = vrot.slane %v5824_v8, %v10006_v35 }
 0x1e8   : > { %v2811_v62 = vrot.slane %v2767_v51, 7  ;;  %v2812_v60 = vrot.slane %v2768_v22, 7  ;;  %v7531_v50 = vrot.slane %v1592_v48, 2  ;;  %v7553_v16 = vrot.slane %v5824_v8, %v10008_v2 }
 0x1e9   : > { %v2994_v46 = vmul.f32 0.0, %v7509_v43  ;;  %v1573_v21 = vadd.f32 %v1557_v18, %v7512_v55  ;;  %v3045_v37 = vmul.f32 0.0, %v7519_v33  ;;  %v7547_v47 = vmul.f32 0.0, %v7522_v56 }
 0x1ea   : > { %v2813_v57 = vsel %vm1336_vm2, %v2811_v62, %v2812_v60  ;;  %v7584_v38 = vrot.slane %v5800_v32, %v10013_v15  ;;  %v3195_v53 = vmul.f32 0.0, %v7553_v16  ;;  %v7591_v39 = vrot.slane %v1742_v12, 2 }
 0x1eb   : > { %6038 = vmatmul.mubr.msk.f32.gmra.mxu0 %vm541_vm0, %v2813_v57  ;;  %v3010_v9 = vrot.slane %v2994_v46, 1  ;;  %v1640_v27 = vadd.f32 %v7531_v50, %v1573_v21  ;;  %v7575_v5 = vrot.slane %v3045_v37, 2  ;;  %v7594_v61 = vmul.f32 0.0, %v7581_v20 }
 0x1ec   : > { %v7596_v45 = vrot.slane %v1893_v44, 2  ;;  %v3346_v51 = vmul.f32 0.0, %v7573_v3  ;;  %v7602_v57 = vrot.slane %v5824_v8, %v10009_v58  ;;  %v7605_v28 = vmul.f32 0.0, %v7584_v38 }
 0x1ed   : > { %v3026_v11 = vadd.f32 %v3010_v9, %v7547_v47  ;;  %v1669_v60 = vadd.f32 %v7566_v41, %v1640_v27  ;;  %v7608_v54 = vrot.slane %v5824_v8, %v10011_v40  ;;  %v7611_v32 = vrot.slane %v5824_v8, %v10012_v31 }
 0x1ee   : > { %v7614_v29 = vrot.slane %v5824_v8, %v10013_v15  ;;  %v7620_v26 = vmul.f32 0.0, %v7602_v57  ;;  %v7622_v46 = vrot.slane %v3195_v53, 2  ;;  %v7629_v9 = vrot.slane %v3346_v51, 2 }
 0x1ef   : > { %10014 = vst [vmem:[#allocation42_spill] sm:$0xff] %v7611_v32  ;;  %v7617_v18 = vadd.f32 %v7575_v5, %v3026_v11  ;;  %v7627_v37 = vmul.f32 0.0, %v7611_v32 }
 0x1f0   : > { %10015 = vst [vmem:[#allocation55_spill] sm:$0xff] %v7614_v29  ;;  %10016 = vst [vmem:[#allocation37_spill] sm:$0xff] %v7622_v46 }
 0x1f1   : > { %10017 = vst [vmem:[#allocation38_spill] sm:$0xff] %v7627_v37  ;;  %10018 = vst [vmem:[#allocation57_spill] sm:$0xff] %v7629_v9 }
 0x230   : > { %v5998_v1 = vpop.f32.mrf.mxu0 }
 0x231   : > { %v1487_v49 = vmul.f32 %v5998_v1, %v7529_v13 }
 0x232   : > { %v1443_v42 = vpop.f32.mrf.mxu0 }
 0x233   : > { %v1499_v6 = vadd.f32 %v7543_v10, %v1487_v49  ;;  %v1486_v19 = vmul.f32 %v7529_v13, %v1443_v42 }
 0x235   : > { %v1510_v22 = vmax.f32 %v1499_v6, 0.0  ;;  %v1498_v62 = vadd.f32 %v7543_v10, %v1486_v19 }
 0x237   : > { %v1509_v48 = vmax.f32 %v1498_v62, 0.0  ;;  %v1813_v30 = vmul.f32 %v7581_v20, %v1510_v22  ;;  %v1840_v21 = vmul.f32 %v7584_v38, %v1510_v22  ;;  %v1892_v44 = vmul.f32 %v7539_v0, %v1510_v22 }
 0x238   : > { %v1662_v6 = vmul.f32 %v7550_v7, %v1510_v22  ;;  %v1690_v19 = vmul.f32 %v7578_v4, %v1510_v22  ;;  %v1743_v31 = vmul.f32 %v7526_v25, %v1510_v22  ;;  %v1523_v2 = vmul.f32 %v7502_v24, %v1510_v22 }
 0x239   : > { %v1542_v8 = vmul.f32 %v7496_v63, %v1509_v48  ;;  %v1593_v1 = vmul.f32 %v7505_v23, %v1509_v48  ;;  %v1661_v12 = vmul.f32 %v7550_v7, %v1509_v48  ;;  %v1689_v49 = vmul.f32 %v7578_v4, %v1509_v48 }
 0x23a   : > { %v1741_v42 = vmul.f32 %v7526_v25, %v1509_v48  ;;  %v1522_v11 = vmul.f32 %v7502_v24, %v1509_v48  ;;  %v1543_v34 = vmul.f32 %v7496_v63, %v1510_v22  ;;  %v1856_v46 = vrot.slane %v1840_v21, 1 }
 0x23b   : > { %v1558_v53 = vrot.slane %v1542_v8, 1  ;;  %v1610_v51 = vrot.slane %v1593_v1, 2  ;;  %v1670_v62 = vadd.f32 %v1661_v12, %v1640_v27  ;;  %v1705_v14 = vrot.slane %v1689_v49, 1 }
 0x23c   : > { %v1759_v15 = vrot.slane %v1741_v42, 2  ;;  %v1908_v27 = vrot.slane %v1892_v44, 2  ;;  %v1559_v12 = vrot.slane %v1543_v34, 1  ;;  %v1594_v49 = vmul.f32 %v7505_v23, %v1510_v22 }
 0x23d   : > { %v1574_v40 = vadd.f32 %v1558_v53, %v7512_v55  ;;  %v1575_v58 = vadd.f32 %v1558_v53, %v1522_v11  ;;  %v1611_v52 = vsel %vm968_vm1, %v1610_v51, %v7531_v50  ;;  %v1721_v35 = vadd.f32 %v1705_v14, %v1669_v60 }
 0x23e   : > { %v1722_v9 = vadd.f32 %v1705_v14, %v1670_v62  ;;  %v1761_v48 = vsel %vm968_vm1, %v1759_v15, %v7591_v39  ;;  %v1706_v11 = vrot.slane %v1690_v19, 1  ;;  %v1762_v32 = vrot.slane %v1743_v31, 2 }
 0x23f   : > { %v1642_v8 = vadd.f32 %v1610_v51, %v1574_v40  ;;  %v1643_v1 = vadd.f32 %v1611_v52, %v1575_v58  ;;  %v1792_v42 = vadd.f32 %v1759_v15, %v1721_v35  ;;  %v1576_v14 = vadd.f32 %v1559_v12, %v7512_v55 }
 0x240   : > { %v1793_v37 = vadd.f32 %v1761_v48, %v1722_v9  ;;  %v1612_v52 = vrot.slane %v1594_v49, 2  ;;  %v1910_v35 = vsel %vm968_vm1, %v1908_v27, %v7596_v45  ;;  %v1577_v22 = vadd.f32 %v1559_v12, %v1523_v2 }
 0x241   : > { %v6001_v53 = vpop.f32.mrf.mxu0  ;;  %v1671_v3 = vadd.f32 %v7566_v41, %v1642_v8  ;;  %v1672_v29 = vadd.f32 %v1662_v6, %v1643_v1  ;;  %v1820_v44 = vadd.f32 %v7594_v61, %v1792_v42  ;;  %v1763_v19 = vsel %vm968_vm1, %v1762_v32, %v7591_v39 }
 0x242   : > { %v1489_v60 = vmul.f32 %v6001_v53, %v7529_v13  ;;  %v1821_v40 = vadd.f32 %v1813_v30, %v1793_v37  ;;  %v1613_v30 = vsel %vm968_vm1, %v1612_v52, %v7531_v50  ;;  %v1644_v37 = vadd.f32 %v1612_v52, %v1576_v14 }
 0x243   : > { %v1453_v34 = vpop.f32.mrf.mxu0  ;;  %v1723_v58 = vadd.f32 %v1706_v11, %v1671_v3  ;;  %v1724_v15 = vadd.f32 %v1706_v11, %v1672_v29  ;;  %v1872_v31 = vadd.f32 %v1856_v46, %v1820_v44  ;;  %v1645_v1 = vadd.f32 %v1613_v30, %v1577_v22 }
 0x244   : > { %v1501_v21 = vadd.f32 %v7543_v10, %v1489_v60  ;;  %v1488_v9 = vmul.f32 %v7529_v13, %v1453_v34  ;;  %v1873_v6 = vadd.f32 %v1856_v46, %v1821_v40  ;;  %v1863_v46 = vrot.slane %v7605_v28, 1 }
 0x245   : > { %v1794_v51 = vadd.f32 %v1762_v32, %v1723_v58  ;;  %v1940_v29 = vadd.f32 %v1908_v27, %v1872_v31  ;;  %v1795_v48 = vadd.f32 %v1763_v19, %v1724_v15  ;;  %v1673_v32 = vadd.f32 %v7566_v41, %v1644_v37 }
 0x246   : > { %v7661_v62 = vmax.f32 %v1501_v21, 0.0  ;;  %v1500_v3 = vadd.f32 %v7543_v10, %v1488_v9  ;;  %v1941_v2 = vadd.f32 %v1910_v35, %v1873_v6 }
 0x247   : > { %v1822_v8 = vadd.f32 %v7594_v61, %v1794_v51  ;;  %v1977_v49 = vrot.slane %v1940_v29, 7 }
 0x248   : > { %v1511_v12 = vmax.f32 %v1500_v3, 0.0  ;;  %v1978_v42 = vrot.slane %v1941_v2, 7  ;;  %v1815_v11 = vmul.f32 %v7581_v20, %v7661_v62  ;;  %v1842_v53 = vmul.f32 %v7584_v38, %v7661_v62 }
 0x249   : > { %v7673_v27 = vmul.f32 %v7539_v0, %v7661_v62  ;;  %v7677_v14 = vmul.f32 %v7550_v7, %v7661_v62  ;;  %v7689_v15 = vmul.f32 %v7578_v4, %v7661_v62 }
 0x24a   : > { %v1979_v60 = vsel %vm1336_vm2, %v1977_v49, %v1978_v42  ;;  %v1814_v44 = vmul.f32 %v7581_v20, %v1511_v12  ;;  %v1841_v40 = vmul.f32 %v7584_v38, %v1511_v12  ;;  %v1894_v52 = vmul.f32 %v7539_v0, %v1511_v12 }
 0x24b   : > { %6012 = vmatprep.mubr.msk.f32.mxu1 %vm541_vm0, %v1979_v60  ;;  %v1663_v34 = vmul.f32 %v7550_v7, %v1511_v12  ;;  %v1691_v35 = vmul.f32 %v7578_v4, %v1511_v12  ;;  %v1744_v58 = vmul.f32 %v7526_v25, %v1511_v12  ;;  %v1913_v31 = vrot.slane %v7673_v27, 2 }
 0x24c   : > { %v1823_v22 = vadd.f32 %v1814_v44, %v1795_v48  ;;  %v1857_v21 = vrot.slane %v1841_v40, 1  ;;  %v1911_v9 = vrot.slane %v1894_v52, 2  ;;  %v1858_v30 = vrot.slane %v1842_v53, 1 }
 0x24d   : > { %v1674_v6 = vadd.f32 %v1663_v34, %v1645_v1  ;;  %v1707_v19 = vrot.slane %v1691_v35, 1  ;;  %v1764_v51 = vrot.slane %v1744_v58, 2  ;;  %v1524_v2 = vmul.f32 %v7502_v24, %v1511_v12 }
 0x24e   : > { %v1874_v37 = vadd.f32 %v1857_v21, %v1822_v8  ;;  %v1875_v3 = vadd.f32 %v1857_v21, %v1823_v22  ;;  %v1912_v29 = vsel %vm968_vm1, %v1911_v9, %v7596_v45  ;;  %v1544_v60 = vmul.f32 %v7496_v63, %v1511_v12 }
 0x24f   : > { %v1725_v49 = vadd.f32 %v1707_v19, %v1673_v32  ;;  %v1726_v42 = vadd.f32 %v1707_v19, %v1674_v6  ;;  %v1765_v48 = vsel %vm968_vm1, %v1764_v51, %v7591_v39  ;;  %v1914_v1 = vsel %vm968_vm1, %v1913_v31, %v7596_v45 }
 0x250   : > { %v1942_v44 = vadd.f32 %v1911_v9, %v1874_v37  ;;  %v1943_v27 = vadd.f32 %v1912_v29, %v1875_v3  ;;  %v1595_v8 = vmul.f32 %v7505_v23, %v1511_v12  ;;  %v1560_v52 = vrot.slane %v1544_v60, 1  ;;  %v3410_v29 = vld [vmem:[#allocation8 + $0x30] sm:$0xff] }
 0x251   : > { %v1796_v53 = vadd.f32 %v1764_v51, %v1725_v49  ;;  %v1797_v40 = vadd.f32 %v1765_v48, %v1726_v42  ;;  %v1708_v34 = vrot.slane %v7689_v15, 1  ;;  %v1745_v22 = vmul.f32 %v7526_v25, %v7661_v62 }
 0x252   : > { %v1980_v35 = vrot.slane %v1942_v44, 7  ;;  %v1981_v32 = vrot.slane %v1943_v27, 7  ;;  %v1614_v58 = vrot.slane %v1595_v8, 2  ;;  %v1578_v6 = vadd.f32 %v1560_v52, %v7512_v55 }
 0x253   : > { %v1824_v21 = vadd.f32 %v7594_v61, %v1796_v53  ;;  %v1825_v9 = vadd.f32 %v1815_v11, %v1797_v40  ;;  %v1579_v19 = vadd.f32 %v1560_v52, %v1524_v2  ;;  %v1525_v15 = vmul.f32 %v7502_v24, %v7661_v62 }
 0x254   : > { %v6004_v37 = vpop.f32.mrf.mxu0  ;;  %v1982_v12 = vsel %vm1336_vm2, %v1980_v35, %v1981_v32  ;;  %v1615_v51 = vsel %vm968_vm1, %v1614_v58, %v7531_v50  ;;  %v1545_v3 = vmul.f32 %v7496_v63, %v7661_v62  ;;  %v1646_v2 = vadd.f32 %v1614_v58, %v1578_v6 }
 0x255   : > { %v1491_v49 = vmul.f32 %v6004_v37, %v7529_v13  ;;  %6013 = vmatmul.mubr.msk.f32.vlgmr.msra.gmra.mxu1 %vm541_vm0, %v1982_v12  ;;  %v1876_v11 = vadd.f32 %v1858_v30, %v1824_v21  ;;  %v1877_v42 = vadd.f32 %v1858_v30, %v1825_v9  ;;  %v1647_v60 = vadd.f32 %v1615_v51, %v1579_v19 }
 0x256   : > { %v1463_v48 = vpop.f32.mrf.mxu0  ;;  %6041 = vmatpush3.msra.mxu1 %v7568_v17  ;;  %v1766_v44 = vrot.slane %v1745_v22, 2  ;;  %v1561_v27 = vrot.slane %v1545_v3, 1  ;;  %v1596_v8 = vmul.f32 %v7505_v23, %v7661_v62  ;;  %v1675_v32 = vadd.f32 %v7566_v41, %v1646_v2 }
 0x257   : > { %v1503_v53 = vadd.f32 %v7543_v10, %v1491_v49  ;;  %v1490_v40 = vmul.f32 %v7529_v13, %v1463_v48  ;;  %v1944_v52 = vadd.f32 %v1913_v31, %v1876_v11  ;;  %v1945_v35 = vadd.f32 %v1914_v1, %v1877_v42  ;;  %6042 = vmatprep.subr.mxu1 %v3410_v29 }
 0x258   : > { %v1676_v30 = vadd.f32 %v7677_v14, %v1647_v60  ;;  %v1580_v58 = vadd.f32 %v1561_v27, %v7512_v55  ;;  %v1581_v17 = vadd.f32 %v1561_v27, %v1525_v15  ;;  %6043 = vmatpush3.msra.mxu1 %v3410_v29  ;;  %v1727_v6 = vadd.f32 %v1708_v34, %v1675_v32 }
 0x259   : > { %v7723_v22 = vmax.f32 %v1503_v53, 0.0  ;;  %v1502_v21 = vadd.f32 %v7543_v10, %v1490_v40  ;;  %v1983_v62 = vrot.slane %v1944_v52, 7  ;;  %v1984_v9 = vrot.slane %v1945_v35, 7 }
 0x25a   : > { %v1728_v19 = vadd.f32 %v1708_v34, %v1676_v30  ;;  %v1616_v37 = vrot.slane %v1596_v8, 2  ;;  %v7728_v31 = vadd.f32 %v7620_v26, %v7617_v18  ;;  %v1767_v12 = vsel %vm968_vm1, %v1766_v44, %v7591_v39 }
 0x25b   : > { %v1513_v1 = vmax.f32 %v1502_v21, 0.0  ;;  %v1985_v14 = vsel %vm1336_vm2, %v1983_v62, %v1984_v9  ;;  %v1844_v51 = vmul.f32 %v7584_v38, %v7723_v22  ;;  %v1798_v15 = vadd.f32 %v1766_v44, %v1727_v6 }
 0x25c   : > { %6015 = vmatprep.mubr.msk.f32.mxu1 %vm541_vm0, %v1985_v14  ;;  %v1799_v3 = vadd.f32 %v1767_v12, %v1728_v19  ;;  %v1617_v34 = vsel %vm968_vm1, %v1616_v37, %v7531_v50  ;;  %v1648_v29 = vadd.f32 %v1616_v37, %v1580_v58  ;;  %v1817_v30 = vmul.f32 %v7581_v20, %v7723_v22 }
 0x25d   : > { %v1816_v49 = vmul.f32 %v7581_v20, %v1513_v1  ;;  %v1843_v11 = vmul.f32 %v7584_v38, %v1513_v1  ;;  %v1896_v42 = vmul.f32 %v7539_v0, %v1513_v1  ;;  %v1649_v2 = vadd.f32 %v1617_v34, %v1581_v17 }
 0x25e   : > { %v1826_v48 = vadd.f32 %v7594_v61, %v1798_v15  ;;  %v1665_v60 = vmul.f32 %v7550_v7, %v1513_v1  ;;  %v1677_v27 = vadd.f32 %v7566_v41, %v1648_v29  ;;  %v1693_v44 = vmul.f32 %v7578_v4, %v1513_v1 }
 0x25f   : > { %v1827_v8 = vadd.f32 %v1816_v49, %v1799_v3  ;;  %v1859_v53 = vrot.slane %v1843_v11, 1  ;;  %v1915_v40 = vrot.slane %v1896_v42, 2  ;;  %v1746_v52 = vmul.f32 %v7526_v25, %v1513_v1 }
 0x260   : > { %v1678_v35 = vadd.f32 %v1665_v60, %v1649_v2  ;;  %v1709_v32 = vrot.slane %v1693_v44, 1  ;;  %v1897_v58 = vmul.f32 %v7539_v0, %v7723_v22  ;;  %v1860_v9 = vrot.slane %v1844_v51, 1 }
 0x261   : > { %v1878_v17 = vadd.f32 %v1859_v53, %v1826_v48  ;;  %v1879_v21 = vadd.f32 %v1859_v53, %v1827_v8  ;;  %v1768_v62 = vrot.slane %v1746_v52, 2  ;;  %v1916_v6 = vsel %vm968_vm1, %v1915_v40, %v7596_v45 }
 0x262   : > { %v1729_v19 = vadd.f32 %v1709_v32, %v1677_v27  ;;  %v1730_v37 = vadd.f32 %v1709_v32, %v1678_v35  ;;  %v1917_v14 = vrot.slane %v1897_v58, 2  ;;  %v1546_v34 = vmul.f32 %v7496_v63, %v1513_v1 }
 0x263   : > { %v1946_v12 = vadd.f32 %v1915_v40, %v1878_v17  ;;  %v1947_v15 = vadd.f32 %v1916_v6, %v1879_v21  ;;  %v1769_v3 = vsel %vm968_vm1, %v1768_v62, %v7591_v39  ;;  %v1526_v11 = vmul.f32 %v7502_v24, %v1513_v1 }
 0x264   : > { %v1800_v29 = vadd.f32 %v1768_v62, %v1729_v19  ;;  %v1801_v49 = vadd.f32 %v1769_v3, %v1730_v37  ;;  %v1597_v42 = vmul.f32 %v7505_v23, %v1513_v1  ;;  %v1918_v48 = vsel %vm968_vm1, %v1917_v14, %v7596_v45 }
 0x265   : > { %v1986_v51 = vrot.slane %v1946_v12, 7  ;;  %v1987_v2 = vrot.slane %v1947_v15, 7  ;;  %v1562_v60 = vrot.slane %v1546_v34, 1  ;;  %v1694_v53 = vmul.f32 %v7578_v4, %v7723_v22 }
 0x266   : > { %v1828_v27 = vadd.f32 %v7594_v61, %v1800_v29  ;;  %v1829_v44 = vadd.f32 %v1817_v30, %v1801_v49  ;;  %v1618_v8 = vrot.slane %v1597_v42, 2  ;;  %v1747_v1 = vmul.f32 %v7526_v25, %v7723_v22 }
 0x267   : > { %v1988_v52 = vsel %vm1336_vm2, %v1986_v51, %v1987_v2  ;;  %v1582_v35 = vadd.f32 %v1562_v60, %v7512_v55  ;;  %v1583_v32 = vadd.f32 %v1562_v60, %v1526_v11  ;;  %v1666_v37 = vmul.f32 %v7550_v7, %v7723_v22 }
 0x268   : > { %6016 = vmatmul.mubr.msk.f32.gmra.mxu1 %vm541_vm0, %v1988_v52  ;;  %v1880_v17 = vadd.f32 %v1860_v9, %v1828_v27  ;;  %v1881_v21 = vadd.f32 %v1860_v9, %v1829_v44  ;;  %v1619_v30 = vsel %vm968_vm1, %v1618_v8, %v7531_v50  ;;  %v1770_v12 = vrot.slane %v1747_v1, 2 }
 0x269   : > { %v6007_v40 = vpop.f32.mrf.mxu0  ;;  %v1650_v6 = vadd.f32 %v1618_v8, %v1582_v35  ;;  %v1651_v19 = vadd.f32 %v1619_v30, %v1583_v32  ;;  %v1710_v9 = vrot.slane %v1694_v53, 1 }
 0x26a   : > { %v1493_v58 = vmul.f32 %v6007_v40, %v7529_v13  ;;  %v1948_v34 = vadd.f32 %v1917_v14, %v1880_v17  ;;  %v1949_v29 = vadd.f32 %v1918_v48, %v1881_v21  ;;  %v1771_v42 = vsel %vm968_vm1, %v1770_v12, %v7591_v39 }
 0x26b   : > { %v1473_v62 = vpop.f32.mrf.mxu0  ;;  %v1679_v49 = vadd.f32 %v7566_v41, %v1650_v6  ;;  %v1680_v11 = vadd.f32 %v1666_v37, %v1651_v19  ;;  %v1598_v14 = vmul.f32 %v7505_v23, %v7723_v22  ;;  %v1527_v40 = vmul.f32 %v7502_v24, %v7723_v22 }
 0x26c   : > { %v1505_v15 = vadd.f32 %v7543_v10, %v1493_v58  ;;  %v1492_v3 = vmul.f32 %v7529_v13, %v1473_v62  ;;  %v1989_v60 = vrot.slane %v1948_v34, 7  ;;  %v1990_v27 = vrot.slane %v1949_v29, 7 }
 0x26d   : > { %v1731_v44 = vadd.f32 %v1710_v9, %v1679_v49  ;;  %v1732_v8 = vadd.f32 %v1710_v9, %v1680_v11  ;;  %v1547_v13 = vmul.f32 %v7496_v63, %v7723_v22  ;;  %v1620_v1 = vrot.slane %v1598_v14, 2 }
 0x26e   : > { %v7777_v51 = vmax.f32 %v1505_v15, 0.0  ;;  %v1504_v2 = vadd.f32 %v7543_v10, %v1492_v3  ;;  %v1991_v53 = vsel %vm1336_vm2, %v1989_v60, %v1990_v27 }
 0x26f   : > { %6018 = vmatprep.mubr.msk.f32.mxu1 %vm541_vm0, %v1991_v53  ;;  %v1802_v10 = vadd.f32 %v1770_v12, %v1731_v44  ;;  %v1803_v35 = vadd.f32 %v1771_v42, %v1732_v8  ;;  %v1563_v32 = vrot.slane %v1547_v13, 1  ;;  %v1621_v29 = vsel %vm968_vm1, %v1620_v1, %v7531_v50 }
 0x270   : > { %v1515_v48 = vmax.f32 %v1504_v2, 0.0  ;;  %v7789_v52 = vmul.f32 %v7584_v38, %v7777_v51  ;;  %v1819_v27 = vmul.f32 %v7581_v20, %v7777_v51 }
 0x271   : > { %v6030_v58 = vpop.f32.mrf.mxu0  ;;  %v1830_v6 = vadd.f32 %v7594_v61, %v1802_v10  ;;  %v1584_v19 = vadd.f32 %v1563_v32, %v7512_v55  ;;  %v1585_v37 = vadd.f32 %v1563_v32, %v1527_v40 }
 0x272   : > { %v1818_v17 = vmul.f32 %v7581_v20, %v1515_v48  ;;  %v1845_v21 = vmul.f32 %v7584_v38, %v1515_v48  ;;  %v1898_v30 = vmul.f32 %v7539_v0, %v1515_v48  ;;  %v1667_v62 = vmul.f32 %v7550_v7, %v1515_v48 }
 0x273   : > { %v2940_v22 = vmul.f32 %v6030_v58, %v7556_v59  ;;  %v2896_v12 = vpop.f32.mrf.mxu0  ;;  %v1652_v11 = vadd.f32 %v1620_v1, %v1584_v19  ;;  %v1653_v9 = vadd.f32 %v1621_v29, %v1585_v37  ;;  %v1695_v60 = vmul.f32 %v7578_v4, %v1515_v48 }
 0x274   : > { %v1831_v15 = vadd.f32 %v1818_v17, %v1803_v35  ;;  %v1861_v3 = vrot.slane %v1845_v21, 1  ;;  %v1919_v34 = vrot.slane %v1898_v30, 2  ;;  %v2939_v49 = vmul.f32 %v7556_v59, %v2896_v12 }
 0x275   : > { %v2952_v38 = vadd.f32 %v7562_v36, %v2940_v22  ;;  %v1681_v13 = vadd.f32 %v7566_v41, %v1652_v11  ;;  %v1682_v14 = vadd.f32 %v1667_v62, %v1653_v9  ;;  %v1711_v10 = vrot.slane %v1695_v60, 1 }
 0x276   : > { %v1882_v42 = vadd.f32 %v1861_v3, %v1830_v6  ;;  %v1883_v2 = vadd.f32 %v1861_v3, %v1831_v15  ;;  %v2951_v44 = vadd.f32 %v7562_v36, %v2939_v49  ;;  %v1920_v8 = vsel %vm968_vm1, %v1919_v34, %v7596_v45 }
 0x277   : > { %v1748_v35 = vmul.f32 %v7526_v25, %v1515_v48  ;;  %v7811_v32 = vmax.f32 %v2952_v38, 0.0  ;;  %v1862_v58 = vrot.slane %v7789_v52, 1  ;;  %v1899_v20 = vmul.f32 %v7539_v0, %v7777_v51 }
 0x278   : > { %v1950_v53 = vadd.f32 %v1919_v34, %v1882_v42  ;;  %v1951_v40 = vadd.f32 %v1920_v8, %v1883_v2  ;;  %v2962_v1 = vmax.f32 %v2951_v44, 0.0  ;;  %v1733_v30 = vadd.f32 %v1711_v10, %v1681_v13 }
 0x279   : > { %v1734_v22 = vadd.f32 %v1711_v10, %v1682_v14  ;;  %v1772_v37 = vrot.slane %v1748_v35, 2  ;;  %v1921_v15 = vrot.slane %v1899_v20, 2  ;;  %v1548_v3 = vmul.f32 %v7496_v63, %v1515_v48 }
 0x27a   : > { %v1992_v17 = vrot.slane %v1950_v53, 7  ;;  %v1993_v21 = vrot.slane %v1951_v40, 7  ;;  %v2975_v6 = vmul.f32 %v7522_v56, %v2962_v1  ;;  %v2995_v62 = vmul.f32 %v7509_v43, %v2962_v1 }
 0x27b   : > { %v3046_v19 = vmul.f32 %v7519_v33, %v2962_v1  ;;  %v1599_v52 = vmul.f32 %v7505_v23, %v1515_v48  ;;  %v1773_v29 = vsel %vm968_vm1, %v1772_v37, %v7591_v39  ;;  %v1804_v38 = vadd.f32 %v1772_v37, %v1733_v30 }
 0x27c   : > { %v1994_v12 = vsel %vm1336_vm2, %v1992_v17, %v1993_v21  ;;  %v3011_v34 = vrot.slane %v2995_v62, 1  ;;  %v1805_v49 = vadd.f32 %v1773_v29, %v1734_v22  ;;  %v1528_v11 = vmul.f32 %v7502_v24, %v1515_v48 }
 0x27d   : > { %v3063_v0 = vrot.slane %v3046_v19, 2  ;;  %6019 = vmatmul.mubr.msk.f32.gmra.mxu1 %vm541_vm0, %v1994_v12  ;;  %v1564_v9 = vrot.slane %v1548_v3, 1  ;;  %v1622_v42 = vrot.slane %v1599_v52, 2  ;;  %v1832_v63 = vadd.f32 %v7594_v61, %v1804_v38 }
 0x27e   : > { %v3027_v2 = vadd.f32 %v3011_v34, %v7547_v47  ;;  %v3028_v60 = vadd.f32 %v3011_v34, %v2975_v6  ;;  %v1922_v23 = vsel %vm968_vm1, %v1921_v15, %v7596_v45  ;;  %v1833_v44 = vadd.f32 %v1819_v27, %v1805_v49 }
 0x27f   : > { %v1586_v8 = vadd.f32 %v1564_v9, %v7512_v55  ;;  %v1587_v13 = vadd.f32 %v1564_v9, %v1528_v11  ;;  %v1623_v14 = vsel %vm968_vm1, %v1622_v42, %v7531_v50  ;;  %v3064_v24 = vsel %vm968_vm1, %v3063_v0, %v7575_v5  ;;  %v10019_v11 = vld [vmem:[#allocation42_spill] sm:$0xff]  ;;  %v10020_v9 = vld [vmem:[#allocation55_spill] sm:$0xff] }
 0x280   : > { %v3095_v48 = vadd.f32 %v3063_v0, %v3027_v2  ;;  %v1884_v53 = vadd.f32 %v1862_v58, %v1832_v63  ;;  %v1668_v40 = vmul.f32 %v7550_v7, %v7777_v51  ;;  %v1885_v10 = vadd.f32 %v1862_v58, %v1833_v44 }
 0x281   : > { %v1654_v35 = vadd.f32 %v1622_v42, %v1586_v8  ;;  %v1655_v20 = vadd.f32 %v1623_v14, %v1587_v13  ;;  %v1696_v27 = vmul.f32 %v7578_v4, %v7777_v51  ;;  %v1749_v55 = vmul.f32 %v7526_v25, %v7777_v51 }
 0x282   : > { %v1952_v17 = vadd.f32 %v1921_v15, %v1884_v53  ;;  %v3114_v50 = vmul.f32 %v7602_v57, %v2962_v1  ;;  %v3142_v21 = vmul.f32 %v7608_v54, %v2962_v1  ;;  %v1953_v30 = vadd.f32 %v1922_v23, %v1885_v10  ;;  %v10022_v23 = vld [vmem:[#allocation37_spill] sm:$0xff] }
 0x283   : > { %v1683_v22 = vadd.f32 %v7566_v41, %v1654_v35  ;;  %v1684_v6 = vadd.f32 %v1668_v40, %v1655_v20  ;;  %v1712_v62 = vrot.slane %v1696_v27, 1  ;;  %v1774_v58 = vrot.slane %v1749_v55, 2  ;;  %v10023_v35 = vld [vmem:[#allocation38_spill] sm:$0xff] }
 0x284   : > { %v1995_v7 = vrot.slane %v1952_v17, 7  ;;  %v3123_v19 = vadd.f32 %v3114_v50, %v7617_v18  ;;  %v3158_v37 = vrot.slane %v3142_v21, 1  ;;  %v1996_v12 = vrot.slane %v1953_v30, 7 }
 0x285   : > { %v1735_v4 = vadd.f32 %v1712_v62, %v1683_v22  ;;  %v1736_v15 = vadd.f32 %v1712_v62, %v1684_v6  ;;  %v3194_v3 = vmul.f32 %v7553_v16, %v2962_v1  ;;  %v3096_v25 = vadd.f32 %v3064_v24, %v3028_v60  ;;  %v10024_v6 = vld [vmem:[#allocation57_spill] sm:$0xff] }
 0x286   : > { %v1775_v51 = vsel %vm968_vm1, %v1774_v58, %v7591_v39  ;;  %v3174_v52 = vadd.f32 %v3158_v37, %v7728_v31  ;;  %v3175_v34 = vadd.f32 %v3158_v37, %v3123_v19  ;;  %v6033_v41 = vpop.f32.mrf.mxu0  ;;  %v1997_v0 = vsel %vm1336_vm2, %v1995_v7, %v1996_v12  ;;  %v10021_v39 = vld [vmem:[#allocation54_spill] sm:$0xff] }
 0x287   : > { %v1806_v29 = vadd.f32 %v1774_v58, %v1735_v4  ;;  %v1807_v38 = vadd.f32 %v1775_v51, %v1736_v15  ;;  %v3212_v49 = vrot.slane %v3194_v3, 2  ;;  %v2942_v18 = vmul.f32 %v6033_v41, %v7556_v59  ;;  %6021 = vmatprep.mubr.msk.f32.mxu1 %vm541_vm0, %v1997_v0 }
 0x288   : > { %v3266_v1 = vmul.f32 %v10019_v11, %v7811_v32  ;;  %v3293_v42 = vmul.f32 %v10020_v9, %v7811_v32  ;;  %v3345_v31 = vmul.f32 %v10021_v39, %v7811_v32  ;;  %v2906_v2 = vpop.f32.mrf.mxu0  ;;  %v3115_v53 = vmul.f32 %v7602_v57, %v7811_v32 }
 0x289   : > { %v1834_v60 = vadd.f32 %v7594_v61, %v1806_v29  ;;  %v1835_v63 = vadd.f32 %v7594_v61, %v1807_v38  ;;  %v3214_v44 = vsel %vm968_vm1, %v3212_v49, %v10022_v23  ;;  %v3245_v8 = vadd.f32 %v3212_v49, %v3174_v52 }
 0x28a   : > { %v2941_v13 = vmul.f32 %v7556_v59, %v2906_v2  ;;  %v3246_v14 = vadd.f32 %v3214_v44, %v3175_v34  ;;  %v3309_v24 = vrot.slane %v3293_v42, 1  ;;  %v3361_v61 = vrot.slane %v3345_v31, 2 }
 0x28b   : > { %v1886_v40 = vadd.f32 %v1863_v46, %v1834_v60  ;;  %v1887_v10 = vadd.f32 %v1863_v46, %v1835_v63  ;;  %v3273_v20 = vadd.f32 %v10023_v35, %v3245_v8  ;;  %v2954_v27 = vadd.f32 %v7562_v36, %v2942_v18 }
 0x28c   : > { %v2953_v17 = vadd.f32 %v7562_v36, %v2941_v13  ;;  %v3274_v55 = vadd.f32 %v3266_v1, %v3246_v14  ;;  %v3124_v50 = vadd.f32 %v7620_v26, %v3095_v48  ;;  %v3363_v62 = vsel %vm968_vm1, %v3361_v61, %v10024_v6 }
 0x28d   : > { %v1954_v21 = vadd.f32 %v7596_v45, %v1886_v40  ;;  %v1955_v30 = vadd.f32 %v7596_v45, %v1887_v10  ;;  %v3325_v22 = vadd.f32 %v3309_v24, %v3273_v20  ;;  %v3125_v7 = vadd.f32 %v3115_v53, %v3096_v25 }
 0x28e   : > { %v7877_v28 = vmax.f32 %v2953_v17, 0.0  ;;  %v3326_v46 = vadd.f32 %v3309_v24, %v3274_v55  ;;  %v3143_v58 = vmul.f32 %v7608_v54, %v7811_v32  ;;  %v3196_v48 = vmul.f32 %v7553_v16, %v7811_v32 }
 0x28f   : > { %v1998_v19 = vrot.slane %v1954_v21, 7  ;;  %v1999_v37 = vrot.slane %v1955_v30, 7  ;;  %v3393_v12 = vadd.f32 %v3361_v61, %v3325_v22  ;;  %v7883_v4 = vmax.f32 %v2954_v27, 0.0 }
 0x290   : > { %v3394_v45 = vadd.f32 %v3363_v62, %v3326_v46  ;;  %v3159_v15 = vrot.slane %v3143_v58, 1  ;;  %v3294_v3 = vmul.f32 %v10020_v9, %v7877_v28  ;;  %v3215_v25 = vrot.slane %v3196_v48, 2 }
 0x291   : > { %v2000_v51 = vsel %vm1336_vm2, %v1998_v19, %v1999_v37  ;;  %v3430_v52 = vrot.slane %v3393_v12, 7  ;;  %v3347_v34 = vmul.f32 %v10021_v39, %v7877_v28  ;;  %v3267_v38 = vmul.f32 %v10019_v11, %v7877_v28 }
 0x292   : > { %6022 = vmatmul.mubr.msk.f32.gmra.mxu1 %vm541_vm0, %v2000_v51  ;;  %v3431_v41 = vrot.slane %v3394_v45, 7  ;;  %v3176_v0 = vadd.f32 %v3159_v15, %v3124_v50  ;;  %v3177_v29 = vadd.f32 %v3159_v15, %v3125_v7  ;;  %v3216_v49 = vsel %vm968_vm1, %v3215_v25, %v10022_v23 }
 0x293   : > { %v3310_v18 = vrot.slane %v3294_v3, 1  ;;  %v3364_v1 = vrot.slane %v3347_v34, 2  ;;  %v2996_v42 = vmul.f32 %v7509_v43, %v7811_v32  ;;  %v3047_v63 = vmul.f32 %v7519_v33, %v7811_v32 }
 0x294   : > { %v3432_v31 = vsel %vm1336_vm2, %v3430_v52, %v3431_v41  ;;  %v3247_v2 = vadd.f32 %v3215_v25, %v3176_v0  ;;  %v3248_v60 = vadd.f32 %v3216_v49, %v3177_v29  ;;  %v2976_v8 = vmul.f32 %v7522_v56, %v7811_v32 }
 0x295   : > { %6044 = vmatprep.mubr.msk.f32.mxu1 %vm541_vm0, %v3432_v31  ;;  %v3365_v44 = vsel %vm968_vm1, %v3364_v1, %v10024_v6  ;;  %v3012_v13 = vrot.slane %v2996_v42, 1  ;;  %v3144_v14 = vmul.f32 %v7608_v54, %v7877_v28  ;;  %v3065_v40 = vrot.slane %v3047_v63, 2 }
 0x296   : > { %v3275_v24 = vadd.f32 %v10023_v35, %v3247_v2  ;;  %v3276_v53 = vadd.f32 %v3267_v38, %v3248_v60  ;;  %v3197_v10 = vmul.f32 %v7553_v16, %v7877_v28  ;;  %v3116_v27 = vmul.f32 %v7602_v57, %v7877_v28 }
 0x297   : > { %v3029_v20 = vadd.f32 %v3012_v13, %v7547_v47  ;;  %v3030_v61 = vadd.f32 %v3012_v13, %v2976_v8  ;;  %v3160_v17 = vrot.slane %v3144_v14, 1  ;;  %v3066_v50 = vsel %vm968_vm1, %v3065_v40, %v7575_v5 }
 0x298   : > { %v3327_v55 = vadd.f32 %v3310_v18, %v3275_v24  ;;  %v3328_v32 = vadd.f32 %v3310_v18, %v3276_v53  ;;  %v3217_v21 = vrot.slane %v3197_v10, 2  ;;  %v6036_v30 = vpop.f32.mrf.mxu0  ;;  %v3295_v46 = vmul.f32 %v10020_v9, %v7883_v4 }
 0x299   : > { %v3097_v22 = vadd.f32 %v3065_v40, %v3029_v20  ;;  %v3098_v62 = vadd.f32 %v3066_v50, %v3030_v61  ;;  %v3348_v7 = vmul.f32 %v10021_v39, %v7883_v4  ;;  %v2944_v58 = vmul.f32 %v6036_v30, %v7556_v59 }
 0x29a   : > { %v3395_v19 = vadd.f32 %v3364_v1, %v3327_v55  ;;  %v3396_v37 = vadd.f32 %v3365_v44, %v3328_v32  ;;  %v2916_v12 = vpop.f32.mrf.mxu0  ;;  %v3268_v15 = vmul.f32 %v10019_v11, %v7883_v4  ;;  %v3218_v34 = vsel %vm968_vm1, %v3217_v21, %v10022_v23 }
 0x29b   : > { %v3126_v48 = vadd.f32 %v7620_v26, %v3097_v22  ;;  %v3127_v45 = vadd.f32 %v3116_v27, %v3098_v62  ;;  %v3366_v3 = vrot.slane %v3348_v7, 2  ;;  %v2943_v51 = vmul.f32 %v7556_v59, %v2916_v12 }
 0x29c   : > { %v3433_v52 = vrot.slane %v3395_v19, 7  ;;  %v3434_v25 = vrot.slane %v3396_v37, 7  ;;  %v2956_v41 = vadd.f32 %v7562_v36, %v2944_v58  ;;  %v3311_v38 = vrot.slane %v3295_v46, 1 }
 0x29d   : > { %v3178_v0 = vadd.f32 %v3160_v17, %v3126_v48  ;;  %v3179_v29 = vadd.f32 %v3160_v17, %v3127_v45  ;;  %v2955_v49 = vadd.f32 %v7562_v36, %v2943_v51  ;;  %v3367_v1 = vsel %vm968_vm1, %v3366_v3, %v10024_v6 }
 0x29e   : > { %v3435_v18 = vsel %vm1336_vm2, %v3433_v52, %v3434_v25  ;;  %v2997_v42 = vmul.f32 %v7509_v43, %v7877_v28  ;;  %v2977_v60 = vmul.f32 %v7522_v56, %v7877_v28  ;;  %v3048_v63 = vmul.f32 %v7519_v33, %v7877_v28 }
 0x29f   : > { %6045 = vmatmul.mubr.msk.f32.vlgmr.msra.gmra.mxu1 %vm541_vm0, %v3435_v18  ;;  %v3249_v31 = vadd.f32 %v3217_v21, %v3178_v0  ;;  %v3250_v2 = vadd.f32 %v3218_v34, %v3179_v29  ;;  %v7938_v44 = vmax.f32 %v2955_v49, 0.0  ;;  %v3145_v13 = vmul.f32 %v7608_v54, %v7883_v4 }
 0x2a0   : > { %v3013_v8 = vrot.slane %v2997_v42, 1  ;;  %v3198_v14 = vmul.f32 %v7553_v16, %v7883_v4  ;;  %v7944_v24 = vmax.f32 %v2956_v41, 0.0  ;;  %v3067_v10 = vrot.slane %v3048_v63, 2 }
 0x2a1   : > { %v3277_v53 = vadd.f32 %v10023_v35, %v3249_v31  ;;  %v3278_v40 = vadd.f32 %v3268_v15, %v3250_v2  ;;  %v3117_v28 = vmul.f32 %v7602_v57, %v7883_v4  ;;  %v2978_v50 = vmul.f32 %v7522_v56, %v7883_v4 }
 0x2a2   : > { %v3031_v20 = vadd.f32 %v3013_v8, %v7547_v47  ;;  %v3032_v61 = vadd.f32 %v3013_v8, %v2977_v60  ;;  %v3219_v27 = vrot.slane %v3198_v14, 2  ;;  %v3068_v32 = vsel %vm968_vm1, %v3067_v10, %v7575_v5 }
 0x2a3   : > { %v3329_v17 = vadd.f32 %v3311_v38, %v3277_v53  ;;  %v3330_v55 = vadd.f32 %v3311_v38, %v3278_v40  ;;  %v3161_v22 = vrot.slane %v3145_v13, 1  ;;  %v3296_v62 = vmul.f32 %v10020_v9, %v7938_v44 }
 0x2a4   : > { %v3099_v21 = vadd.f32 %v3067_v10, %v3031_v20  ;;  %v3100_v30 = vadd.f32 %v3068_v32, %v3032_v61  ;;  %v3269_v58 = vmul.f32 %v10019_v11, %v7938_v44  ;;  %v2998_v19 = vmul.f32 %v7509_v43, %v7883_v4 }
 0x2a5   : > { %v3397_v46 = vadd.f32 %v3366_v3, %v3329_v17  ;;  %v3398_v7 = vadd.f32 %v3367_v1, %v3330_v55  ;;  %v3220_v48 = vsel %vm968_vm1, %v3219_v27, %v10022_v23  ;;  %v3049_v45 = vmul.f32 %v7519_v33, %v7883_v4 }
 0x2a6   : > { %v3128_v37 = vadd.f32 %v7620_v26, %v3099_v21  ;;  %v3129_v12 = vadd.f32 %v3117_v28, %v3100_v30  ;;  %v3349_v3 = vmul.f32 %v10021_v39, %v7938_v44  ;;  %v3014_v52 = vrot.slane %v2998_v19, 1 }
 0x2a7   : > { %v3436_v15 = vrot.slane %v3397_v46, 7  ;;  %v3437_v51 = vrot.slane %v3398_v7, 7  ;;  %v3312_v41 = vrot.slane %v3296_v62, 1  ;;  %v3069_v0 = vrot.slane %v3049_v45, 2 }
 0x2a8   : > { %v3180_v25 = vadd.f32 %v3161_v22, %v3128_v37  ;;  %v3181_v34 = vadd.f32 %v3161_v22, %v3129_v12  ;;  %v3033_v38 = vadd.f32 %v3014_v52, %v7547_v47  ;;  %v3034_v49 = vadd.f32 %v3014_v52, %v2978_v50 }
 0x2a9   : > { %v3438_v29 = vsel %vm1336_vm2, %v3436_v15, %v3437_v51  ;;  %v3118_v18 = vmul.f32 %v7602_v57, %v7938_v44  ;;  %v3070_v39 = vsel %vm968_vm1, %v3069_v0, %v7575_v5  ;;  %v3146_v42 = vmul.f32 %v7608_v54, %v7938_v44 }
 0x2aa   : > { %6047 = vmatprep.mubr.msk.f32.mxu1 %vm541_vm0, %v3438_v29  ;;  %v3251_v4 = vadd.f32 %v3219_v27, %v3180_v25  ;;  %v3252_v1 = vadd.f32 %v3220_v48, %v3181_v34  ;;  %v3368_v2 = vrot.slane %v3349_v3, 2  ;;  %v3101_v60 = vadd.f32 %v3069_v0, %v3033_v38 }
 0x2ab   : > { %v6039_v31 = vpop.f32.mrf.mxu0  ;;  %v3102_v63 = vadd.f32 %v3070_v39, %v3034_v49  ;;  %v3199_v8 = vmul.f32 %v7553_v16, %v7938_v44  ;;  %v3162_v40 = vrot.slane %v3146_v42, 1  ;;  %v3297_v27 = vmul.f32 %v10020_v9, %v7944_v24 }
 0x2ac   : > { %v2946_v13 = vmul.f32 %v6039_v31, %v7556_v59  ;;  %v3279_v14 = vadd.f32 %v10023_v35, %v3251_v4  ;;  %v3280_v53 = vadd.f32 %v3269_v58, %v3252_v1  ;;  %v3130_v20 = vadd.f32 %v7620_v26, %v3101_v60 }
 0x2ad   : > { %v2926_v10 = vpop.f32.mrf.mxu0  ;;  %v3131_v61 = vadd.f32 %v3118_v18, %v3102_v63  ;;  %v3221_v28 = vrot.slane %v3199_v8, 2  ;;  %v3369_v21 = vsel %vm968_vm1, %v3368_v2, %v10024_v6  ;;  %v3270_v12 = vmul.f32 %v10019_v11, %v7944_v24 }
 0x2ae   : > { %v2958_v17 = vadd.f32 %v7562_v36, %v2946_v13  ;;  %v2945_v55 = vmul.f32 %v7556_v59, %v2926_v10  ;;  %v3331_v32 = vadd.f32 %v3312_v41, %v3279_v14  ;;  %v3332_v50 = vadd.f32 %v3312_v41, %v3280_v53  ;;  %v7995_v59 = vld [vmem:[%s9768_s6 + $0x38] ss:$0 sm:$0xff] }
 0x2af   : > { %v3182_v30 = vadd.f32 %v3162_v40, %v3130_v20  ;;  %v3183_v22 = vadd.f32 %v3162_v40, %v3131_v61  ;;  %v3222_v62 = vsel %vm968_vm1, %v3221_v28, %v10022_v23  ;;  %v3350_v48 = vmul.f32 %v7995_v59, %v7944_v24 }
 0x2b0   : > { %v2957_v46 = vadd.f32 %v7562_v36, %v2945_v55  ;;  %v3399_v7 = vadd.f32 %v3368_v2, %v3331_v32  ;;  %v3400_v58 = vadd.f32 %v3369_v21, %v3332_v50  ;;  %v3313_v51 = vrot.slane %v3297_v27, 1 }
 0x2b1   : > { %v3253_v19 = vadd.f32 %v3221_v28, %v3182_v30  ;;  %v3254_v37 = vadd.f32 %v3222_v62, %v3183_v22  ;;  %v2999_v36 = vmul.f32 %v7509_v43, %v7938_v44  ;;  %v3370_v25 = vrot.slane %v3350_v48, 2 }
 0x2b2   : > { %v3439_v45 = vrot.slane %v3399_v7, 7  ;;  %v3440_v15 = vrot.slane %v3400_v58, 7  ;;  %v3050_v34 = vmul.f32 %v7519_v33, %v7938_v44  ;;  %v8004_v41 = vmax.f32 %v2957_v46, 0.0 }
 0x2b3   : > { %v3281_v3 = vadd.f32 %v10023_v35, %v3253_v19  ;;  %v3282_v52 = vadd.f32 %v3270_v12, %v3254_v37  ;;  %v2979_v29 = vmul.f32 %v7522_v56, %v7938_v44  ;;  %v3015_v38 = vrot.slane %v2999_v36, 1 }
 0x2b4   : > { %v3441_v0 = vsel %vm1336_vm2, %v3439_v45, %v3440_v15  ;;  %v3071_v4 = vrot.slane %v3050_v34, 2  ;;  %v3147_v1 = vmul.f32 %v7608_v54, %v7944_v24  ;;  %v3371_v39 = vsel %vm968_vm1, %v3370_v25, %v10024_v6 }
 0x2b5   : > { %6048 = vmatmul.mubr.msk.f32.gmra.mxu1 %vm541_vm0, %v3441_v0  ;;  %v3333_v49 = vadd.f32 %v3313_v51, %v3281_v3  ;;  %v3334_v18 = vadd.f32 %v3313_v51, %v3282_v52  ;;  %v3035_v42 = vadd.f32 %v3015_v38, %v7547_v47  ;;  %v3036_v31 = vadd.f32 %v3015_v38, %v2979_v29 }
 0x2b6   : > { %v3200_v2 = vmul.f32 %v7553_v16, %v7944_v24  ;;  %v8017_v60 = vmax.f32 %v2958_v17, 0.0  ;;  %v3072_v8 = vsel %vm968_vm1, %v3071_v4, %v7575_v5  ;;  %v3119_v53 = vmul.f32 %v7602_v57, %v7944_v24 }
 0x2b7   : > { %v3401_v44 = vadd.f32 %v3370_v25, %v3333_v49  ;;  %v3402_v63 = vadd.f32 %v3371_v39, %v3334_v18  ;;  %v3103_v13 = vadd.f32 %v3071_v4, %v3035_v42  ;;  %v3104_v14 = vadd.f32 %v3072_v8, %v3036_v31 }
 0x2b8   : > { %v3223_v40 = vrot.slane %v3200_v2, 2  ;;  %v3163_v61 = vrot.slane %v3147_v1, 1  ;;  %v3351_v28 = vmul.f32 %v7995_v59, %v8004_v41  ;;  %v3271_v55 = vmul.f32 %v10019_v11, %v8004_v41 }
 0x2b9   : > { %v3442_v10 = vrot.slane %v3401_v44, 7  ;;  %v3443_v20 = vrot.slane %v3402_v63, 7  ;;  %v3132_v27 = vadd.f32 %v7620_v26, %v3103_v13  ;;  %v3133_v17 = vadd.f32 %v3119_v53, %v3104_v14 }
 0x2ba   : > { %v3298_v32 = vmul.f32 %v10020_v9, %v8004_v41  ;;  %v2980_v21 = vmul.f32 %v7522_v56, %v7944_v24  ;;  %v3000_v30 = vmul.f32 %v7509_v43, %v7944_v24  ;;  %v3051_v22 = vmul.f32 %v7519_v33, %v7944_v24 }
 0x2bb   : > { %v3444_v50 = vsel %vm1336_vm2, %v3442_v10, %v3443_v20  ;;  %v3184_v62 = vadd.f32 %v3163_v61, %v3132_v27  ;;  %v3185_v46 = vadd.f32 %v3163_v61, %v3133_v17  ;;  %v3224_v7 = vsel %vm968_vm1, %v3223_v40, %v10022_v23 }
 0x2bc   : > { %6050 = vmatprep.mubr.msk.f32.mxu1 %vm541_vm0, %v3444_v50  ;;  %v3372_v58 = vrot.slane %v3351_v28, 2  ;;  %v3016_v19 = vrot.slane %v3000_v30, 1  ;;  %v3073_v37 = vrot.slane %v3051_v22, 2  ;;  %v3148_v12 = vmul.f32 %v7608_v54, %v8004_v41 }
 0x2bd   : > { %v3201_v48 = vmul.f32 %v7553_v16, %v8004_v41  ;;  %v3255_v45 = vadd.f32 %v3223_v40, %v3184_v62  ;;  %v3256_v15 = vadd.f32 %v3224_v7, %v3185_v46  ;;  %v3314_v51 = vrot.slane %v3298_v32, 1 }
 0x2be   : > { %v3120_v24 = vmul.f32 %v7602_v57, %v8004_v41  ;;  %v3037_v36 = vadd.f32 %v3016_v19, %v7547_v47  ;;  %v3038_v3 = vadd.f32 %v3016_v19, %v2980_v21  ;;  %v3074_v52 = vsel %vm968_vm1, %v3073_v37, %v7575_v5 }
 0x2bf   : > { %v3225_v25 = vrot.slane %v3201_v48, 2  ;;  %v3283_v34 = vadd.f32 %v10023_v35, %v3255_v45  ;;  %v3284_v0 = vadd.f32 %v3271_v55, %v3256_v15  ;;  %v3373_v29 = vsel %vm968_vm1, %v3372_v58, %v10024_v6 }
 0x2c0   : > { %v3299_v38 = vmul.f32 %v10020_v9, %v8017_v60  ;;  %v3105_v49 = vadd.f32 %v3073_v37, %v3037_v36  ;;  %v3106_v18 = vadd.f32 %v3074_v52, %v3038_v3  ;;  %v3164_v4 = vrot.slane %v3148_v12, 1 }
 0x2c1   : > { %v3272_v1 = vmul.f32 %v10019_v11, %v8017_v60  ;;  %v3335_v39 = vadd.f32 %v3314_v51, %v3283_v34  ;;  %v3336_v42 = vadd.f32 %v3314_v51, %v3284_v0  ;;  %v3226_v31 = vsel %vm968_vm1, %v3225_v25, %v10022_v23 }
 0x2c2   : > { %v3352_v2 = vmul.f32 %v7995_v59, %v8017_v60  ;;  %v3134_v44 = vadd.f32 %v7620_v26, %v3105_v49  ;;  %v3135_v63 = vadd.f32 %v3120_v24, %v3106_v18  ;;  %v3001_v8 = vmul.f32 %v7509_v43, %v8004_v41 }
 0x2c3   : > { %v3052_v13 = vmul.f32 %v7519_v33, %v8004_v41  ;;  %v3403_v14 = vadd.f32 %v3372_v58, %v3335_v39  ;;  %v3404_v53 = vadd.f32 %v3373_v29, %v3336_v42  ;;  %v3315_v11 = vrot.slane %v3299_v38, 1 }
 0x2c4   : > { %v2981_v40 = vmul.f32 %v7522_v56, %v8004_v41  ;;  %v3186_v10 = vadd.f32 %v3164_v4, %v3134_v44  ;;  %v3187_v20 = vadd.f32 %v3164_v4, %v3135_v63  ;;  %v3017_v61 = vrot.slane %v3001_v8, 1  ;;  %v10025_v4 = vld [vmem:[#allocation40_spill] sm:$0xff] }
 0x2c5   : > { %v3075_v28 = vrot.slane %v3052_v13, 2  ;;  %v3445_v59 = vrot.slane %v3403_v14, 7  ;;  %v3446_v27 = vrot.slane %v3404_v53, 7  ;;  %v3149_v17 = vmul.f32 %v7608_v54, %v8017_v60  ;;  %v10028_v53 = vld [vmem:[#allocation45_spill] sm:$0xff] }
 0x2c6   : > { %v3202_v43 = vmul.f32 %v7553_v16, %v8017_v60  ;;  %v3257_v55 = vadd.f32 %v3225_v25, %v3186_v10  ;;  %v3258_v33 = vadd.f32 %v3226_v31, %v3187_v20  ;;  %v3039_v32 = vadd.f32 %v3017_v61, %v7547_v47  ;;  %v10026_v31 = vld [vmem:[#allocation39_spill] sm:$0xff] }
 0x2c7   : > { %v3040_v50 = vadd.f32 %v3017_v61, %v2981_v40  ;;  %v3447_v21 = vsel %vm1336_vm2, %v3445_v59, %v3446_v27  ;;  %v3374_v56 = vrot.slane %v3352_v2, 2  ;;  %v3076_v41 = vsel %vm968_vm1, %v3075_v28, %v7575_v5 }
 0x2c8   : > { %v3121_v30 = vmul.f32 %v7602_v57, %v8017_v60  ;;  %6051 = vmatmul.mubr.msk.f32.gmra.mxu1 %vm541_vm0, %v3447_v21  ;;  %v3285_v54 = vadd.f32 %v10023_v35, %v3257_v55  ;;  %v3286_v22 = vadd.f32 %v3272_v1, %v3258_v33  ;;  %v3107_v16 = vadd.f32 %v3075_v28, %v3039_v32 }
 0x2c9   : > { %v3108_v62 = vadd.f32 %v3076_v41, %v3040_v50  ;;  %v3165_v46 = vrot.slane %v3149_v17, 1  ;;  %v3227_v7 = vrot.slane %v3202_v43, 2  ;;  %v3300_v47 = vmul.f32 0.0, %v10020_v9  ;;  %v10029_v50 = vld [vmem:[#allocation44_spill] sm:$0xff] }
 0x2ca   : > { %v3337_v58 = vadd.f32 %v3315_v11, %v3285_v54  ;;  %v3338_v19 = vadd.f32 %v3315_v11, %v3286_v22  ;;  %v3136_v37 = vadd.f32 %v7620_v26, %v3107_v16  ;;  %v3375_v5 = vsel %vm968_vm1, %v3374_v56, %v10024_v6 }
 0x2cb   : > { %v3137_v12 = vadd.f32 %v3121_v30, %v3108_v62  ;;  %v3228_v15 = vsel %vm968_vm1, %v3227_v7, %v10022_v23  ;;  %v3316_v51 = vrot.slane %v3300_v47, 1  ;;  %v8094_v1 = vrot.slane %v10025_v4, 1 }
 0x2cc   : > { %v3405_v57 = vadd.f32 %v3374_v56, %v3337_v58  ;;  %v3406_v60 = vadd.f32 %v3375_v5, %v3338_v19  ;;  %v3188_v48 = vadd.f32 %v3165_v46, %v3136_v37  ;;  %v2187_v39 = vrot.slane %v10025_v4, 2 }
 0x2cd   : > { %v3189_v45 = vadd.f32 %v3165_v46, %v3137_v12  ;;  %v8100_v2 = vrot.slane %v10026_v31, 1  ;;  %v8107_v63 = vrot.slane %v10026_v31, 2  ;;  %v8114_v11 = vrot.slane %v10028_v53, 1  ;;  %v10031_v46 = vld [vmem:[#allocation48_spill] sm:$0xff] }
 0x2ce   : > { %v3448_v24 = vrot.slane %v3405_v57, 7  ;;  %v3449_v36 = vrot.slane %v3406_v60, 7  ;;  %v3259_v3 = vadd.f32 %v3227_v7, %v3188_v48  ;;  %v8122_v10 = vrot.slane %v10028_v53, 2 }
 0x2cf   : > { %v3260_v9 = vadd.f32 %v3228_v15, %v3189_v45  ;;  %v2179_v14 = vmax.f32 %v10026_v31, %v8100_v2  ;;  %v6475_v61 = vmov 0.0   ;;  %v2180_v43 = vmax.f32 %v10028_v53, %v8114_v11  ;;  %v10033_v15 = vld [vmem:[#allocation46_spill] sm:$0xff] }
 0x2d0   : > { %v3450_v52 = vsel %vm1336_vm2, %v3448_v24, %v3449_v36  ;;  %v3287_v26 = vadd.f32 %v10023_v35, %v3259_v3  ;;  %v8128_v28 = vrot.slane %v6475_v61, 1  ;;  %v8130_v59 = vrot.slane %v6475_v61, 2 }
 0x2d1   : > { %v3288_v25 = vadd.f32 %v10023_v35, %v3260_v9  ;;  %6053 = vmatprep.mubr.msk.f32.mxu1 %vm541_vm0, %v3450_v52  ;;  %v6474_v35 = vmov -inf   ;;  %v2219_v55 = vmax.f32 %v8094_v1, %v2187_v39  ;;  %v8145_v21 = vrot.slane %v10029_v50, 1 }
 0x2d2   : > { %v3339_v34 = vadd.f32 %v3316_v51, %v3287_v26  ;;  %v8097_v42 = vrot.slane %v6474_v35, 2  ;;  %v8109_v8 = vrot.slane %v6474_v35, 1  ;;  %v8149_v56 = vadd.f32 %v8130_v59, %v8128_v28 }
 0x2d3   : > { %v3340_v0 = vadd.f32 %v3316_v51, %v3288_v25  ;;  %v2246_v22 = vmax.f32 %v2219_v55, %v8100_v2  ;;  %v8158_v62 = vrot.slane %v10029_v50, 2  ;;  %v8161_v7 = vrot.slane %v10031_v46, 1 }
 0x2d4   : > { %v3407_v29 = vadd.f32 %v10024_v6, %v3339_v34  ;;  %v2188_v44 = vsel %vm968_vm1, %v2187_v39, %v8097_v42  ;;  %10027 = vst [vmem:[#allocation30_spill] sm:$0xff] %v8109_v8  ;;  %v8119_v40 = vsel %vm968_vm1, %v8107_v63, %v8097_v42  ;;  %v8126_v20 = vmax.f32 %v8109_v8, %v8097_v42 }
 0x2d5   : > { %v3408_v38 = vadd.f32 %v10024_v6, %v3340_v0  ;;  %v2178_v6 = vmax.f32 %v10025_v4, %v8094_v1  ;;  %v2222_v27 = vmax.f32 %v2179_v14, %v8119_v40  ;;  %v8140_v33 = vsel %vm968_vm1, %v8122_v10, %v8097_v42  ;;  %10030 = vst [vmem:[#allocation28_spill] sm:$0xff] %v8158_v62 }
 0x2d6   : > { %v3451_v23 = vrot.slane %v3407_v29, 7  ;;  %v2233_v32 = vmax.f32 %v8126_v20, %v10025_v4  ;;  %v2224_v54 = vmax.f32 %v2180_v43, %v8140_v33  ;;  %v2244_v16 = vmax.f32 %v8126_v20, %v8094_v1 }
 0x2d7   : > { %v3452_v49 = vrot.slane %v3408_v38, 7  ;;  %v2220_v13 = vmax.f32 %v2178_v6, %v2188_v44  ;;  %v2235_v41 = vmax.f32 %v2222_v27, %v10028_v53  ;;  %v8165_v58 = vrot.slane %v10031_v46, 2  ;;  %v10038_v6 = vld [vmem:[#allocation52_spill] sm:$0xff] }
 0x2d8   : > { %v2245_v47 = vmax.f32 %v2233_v32, %v8094_v1  ;;  %v3760_v19 = vadd.f32 1.0, %v8149_v56  ;;  %v2181_v5 = vmax.f32 %v10029_v50, %v8145_v21  ;;  %v2236_v57 = vmax.f32 %v2224_v54, %v10029_v50 }
 0x2d9   : > { %v3453_v18 = vsel %vm1336_vm2, %v3451_v23, %v3452_v49  ;;  %v2234_v17 = vmax.f32 %v2220_v13, %v10026_v31  ;;  %10032 = vst [vmem:[#allocation31_spill] sm:$0xff] %v8165_v58  ;;  %v2249_v37 = vmax.f32 %v2235_v41, %v8114_v11  ;;  %v2266_v60 = vmax.f32 %v2246_v22, %v8107_v63  ;;  %v10035_v23 = vld [vmem:[#allocation50_spill] sm:$0xff] }
 0x2da   : > { %6054 = vmatmul.mubr.msk.f32.gmra.mxu1 %vm541_vm0, %v3453_v18  ;;  %v2264_v48 = vmax.f32 %v2244_v16, %v2187_v39  ;;  %v2194_v45 = vsel %vm968_vm1, %v8158_v62, %v8097_v42  ;;  %v8178_v51 = vrot.slane %v10033_v15, 1  ;;  %v6476_v24 = vmov 1.0  }
 0x2db   : > { %v2247_v30 = vmax.f32 %v2234_v17, %v8100_v2  ;;  %v8180_v36 = vrot.slane %v6476_v24, 1  ;;  %v2182_v3 = vmax.f32 %v10031_v46, %v8161_v7  ;;  %v8184_v9 = vrot.slane %v6476_v24, 2 }
 0x2dc   : > { %10034 = vst [vmem:[#allocation33_spill] sm:$0xff] %v8178_v51  ;;  %v2265_v52 = vmax.f32 %v2245_v47, %v2188_v44  ;;  %v8189_v26 = vsel %vm968_vm1, %v8165_v58, %v8097_v42  ;;  %v2223_v25 = vmax.f32 %v8114_v11, %v8122_v10  ;;  %v2269_v0 = vmax.f32 %v2249_v37, %v8140_v33 }
 0x2dd   : > { %v2267_v12 = vmax.f32 %v2247_v30, %v8119_v40  ;;  %v3783_v34 = vadd.f32 %v3760_v19, %v8180_v36  ;;  %v2226_v38 = vmax.f32 %v2181_v5, %v2194_v45  ;;  %v8197_v49 = vrot.slane %v10035_v23, 1 }
 0x2de   : > { %v8200_v18 = vmax.f32 %v2266_v60, %v8114_v11  ;;  %v2287_v4 = vmax.f32 %v2264_v48, %v8100_v2  ;;  %v2251_v39 = vmax.f32 %v2236_v57, %v8145_v21  ;;  %v8205_v35 = vrot.slane %v10035_v23, 2  ;;  %v5803_v57 = vld [vmem:[%s9770_s8 + $0x2] sm:$0x3] }
 0x2df   : > { %v2281_v29 = vmax.f32 %v2267_v12, %v10028_v53  ;;  %10036 = vst [vmem:[#allocation56_spill] sm:$0xff] %v8197_v49  ;;  %v8208_v44 = vrot.slane %v10038_v6, 1  ;;  %v3782_v13 = vadd.f32 %v8149_v56, %v8180_v36  ;;  %v2228_v14 = vmax.f32 %v2182_v3, %v8189_v26 }
 0x2e0   : > { %10037 = vst [vmem:[#allocation59_spill] sm:$0xff] %v8205_v35  ;;  %v8216_v53 = vsel %vm968_vm1, %v8184_v9, %v8130_v59  ;;  %v2280_v61 = vmax.f32 %v2265_v52, %v10026_v31  ;;  %v2250_v27 = vmax.f32 %v2223_v25, %v8145_v21  ;;  %v8221_v17 = vrot.slane %v10033_v15, 2 }
 0x2e1   : > { %10039 = vst [vmem:[#allocation58_spill] sm:$0xff] %v8208_v44  ;;  %v3807_v43 = vadd.f32 %v3783_v34, %v8216_v53  ;;  %v2290_v55 = vmax.f32 %v2281_v29, %v8114_v11  ;;  %v2237_v32 = vmax.f32 %v2226_v38, %v10031_v46  ;;  %v2282_v41 = vmax.f32 %v2269_v0, %v10029_v50 }
 0x2e2   : > { %10040 = vst [vmem:[#allocation62_spill] sm:$0xff] %v8221_v17  ;;  %v8230_v54 = vmax.f32 %v2287_v4, %v8107_v63  ;;  %v2271_v31 = vmax.f32 %v2251_v39, %v2194_v45  ;;  %v2221_v22 = vmax.f32 %v8100_v2, %v8107_v63  ;;  %v3806_v16 = vadd.f32 %v3782_v13, %v8184_v9  ;;  %v10042_v13 = vld [vmem:[#allocation27_spill] sm:$0xff] }
 0x2e3   : > { %v2238_v47 = vmax.f32 %v2228_v14, %v10033_v15  ;;  %v2183_v19 = vmax.f32 %v10033_v15, %v8178_v51  ;;  %v8239_v37 = vrot.slane %v10038_v6, 2  ;;  %v2288_v50 = vmax.f32 %v2280_v61, %v8100_v2 }
 0x2e4   : > { %v2270_v12 = vmax.f32 %v2250_v27, %v8158_v62  ;;  %v2248_v5 = vmax.f32 %v2221_v22, %v8114_v11  ;;  %v8247_v63 = vsel %vm968_vm1, %v8221_v17, %v8097_v42  ;;  %v3827_v60 = vadd.f32 1.0, %v3807_v43 }
 0x2e5   : > { %10041 = vst [vmem:[#allocation42_spill] sm:$0xff] %v8239_v37  ;;  %v2253_v48 = vmax.f32 %v2237_v32, %v8161_v7  ;;  %v2292_v24 = vmax.f32 %v2282_v41, %v8145_v21  ;;  %v2227_v3 = vmax.f32 %v8161_v7, %v8165_v58  ;;  %v3689_v52 = vadd.f32 1.0, %v8180_v36  ;;  %v10045_v41 = vld [vmem:[#allocation25_spill] sm:$0xff] }
 0x2e6   : > { %v8258_v25 = vmax.f32 %v2290_v55, %v8140_v33  ;;  %v2283_v34 = vmax.f32 %v2271_v31, %v10031_v46  ;;  %v2184_v0 = vmax.f32 %v10038_v6, %v8208_v44  ;;  %v3847_v29 = vadd.f32 %v3806_v16, %v8180_v36 }
 0x2e7   : > { %v8267_v38 = vsel %vm968_vm1, %v8239_v37, %v8097_v42  ;;  %v2230_v4 = vmax.f32 %v2183_v19, %v8247_v63  ;;  %v2255_v39 = vmax.f32 %v2238_v47, %v8178_v51  ;;  %v8272_v14 = vrot.slane %v5803_v57, %v10042_v13 }
 0x2e8   : > { %v8275_v33 = vmax.f32 %v2288_v50, %v8119_v40  ;;  %v8278_v46 = vmax.f32 %v2270_v12, %v8161_v7  ;;  %v2268_v61 = vmax.f32 %v2248_v5, %v8122_v10  ;;  %v3848_v27 = vadd.f32 %v3827_v60, %v8180_v36 }
 0x2e9   : > { %v2273_v43 = vmax.f32 %v2253_v48, %v8189_v26  ;;  %v8283_v55 = vmax.f32 %v2292_v24, %v2194_v45  ;;  %v2254_v32 = vmax.f32 %v2227_v3, %v8178_v51  ;;  %v8287_v31 = vrot.slane %v5803_v57, %v10045_v41  ;;  %v10047_v57 = vld [vmem:[#allocation43_spill] sm:$0xff] }
 0x2ea   : > { %10043 = vst [vmem:[#allocation55_spill] sm:$0xff] %v8278_v46  ;;  %v3743_v22 = vadd.f32 %v8216_v53, %v3689_v52  ;;  %v2294_v40 = vmax.f32 %v2283_v34, %v8161_v7  ;;  %v2232_v16 = vmax.f32 %v2184_v0, %v8267_v38  ;;  %v3869_v19 = vadd.f32 %v3847_v29, %v8184_v9 }
 0x2eb   : > { %10044 = vst [vmem:[#allocation54_spill] sm:$0xff] %v8283_v55  ;;  %v2239_v50 = vmax.f32 %v2230_v4, %v10038_v6  ;;  %v2275_v12 = vmax.f32 %v2255_v39, %v8247_v63  ;;  %v2225_v45 = vmax.f32 %v8145_v21, %v8158_v62  ;;  %v8301_v60 = vmax.f32 %v2268_v61, %v8145_v21 }
 0x2ec   : > { %v2231_v48 = vmax.f32 %v8208_v44, %v8239_v37  ;;  %v3870_v3 = vadd.f32 %v3848_v27, %v8216_v53  ;;  %v2274_v52 = vmax.f32 %v2254_v32, %v8221_v17  ;;  %v2284_v0 = vmax.f32 %v2273_v43, %v10033_v15 }
 0x2ed   : > { %10046 = vst [vmem:[#allocation37_spill] sm:$0xff] %v8301_v60  ;;  %v2252_v34 = vmax.f32 %v2225_v45, %v8161_v7  ;;  %v3742_v39 = vadd.f32 %v8184_v9, %v8180_v36  ;;  %v3762_v61 = vadd.f32 1.0, %v3743_v22  ;;  %6187 = vrcp.f32 %v3869_v19 }
 0x2ee   : > { %v2257_v27 = vmax.f32 %v2239_v50, %v8208_v44  ;;  %v2285_v32 = vmax.f32 %v2275_v12, %v10038_v6  ;;  %v8321_v43 = vmax.f32 %v2294_v40, %v8189_v26  ;;  %6189 = vrcp.f32 %v3870_v3  ;;  %v10050_v6 = vld [vmem:[#allocation41_spill] sm:$0xff] }
 0x2ef   : > { %v8325_v22 = vmax.f32 %v2274_v52, %v8208_v44  ;;  %v2296_v19 = vmax.f32 %v2284_v0, %v8178_v51  ;;  %v3784_v40 = vadd.f32 %v3742_v39, %v8180_v36  ;;  %v3785_v50 = vadd.f32 %v3762_v61, %v8180_v36 }
 0x2f0   : > { %10048 = vst [vmem:[#allocation38_spill] sm:$0xff] %v8321_v43  ;;  %v2229_v12 = vmax.f32 %v8178_v51, %v8221_v17 }
 0x2f1   : > { %10049 = vst [vmem:[#allocation57_spill] sm:$0xff] %v8325_v22  ;;  %v8364_v61 = vmax.f32 %v2296_v19, %v8247_v63 }
 0x2f3   : > { %10052 = vst [vmem:[#allocation39_spill] sm:$0xff] %v8364_v61 }
 0x315   : > { %v6014_v47 = vpop.f32.mrf.mxu1 }
 0x316   : > { %v2127_v5 = vmul.f32 %v6014_v47, %v8272_v14  ;;  %v2240_v47 = vmax.f32 %v2232_v16, %v10035_v23  ;;  %v2272_v16 = vmax.f32 %v2252_v34, %v8165_v58 }
 0x317   : > { %v2083_v24 = vpop.f32.mrf.mxu1 }
 0x318   : > { %v2139_v29 = vadd.f32 %v8287_v31, %v2127_v5  ;;  %v2126_v4 = vmul.f32 %v8272_v14, %v2083_v24  ;;  %v2258_v5 = vmax.f32 %v2231_v48, %v8197_v49  ;;  %v2277_v48 = vmax.f32 %v2257_v27, %v8267_v38 }
 0x319   : > { %v2298_v24 = vmax.f32 %v2285_v32, %v8208_v44  ;;  %v2259_v3 = vmax.f32 %v2240_v47, %v8197_v49  ;;  %v8361_v39 = vmax.f32 %v2272_v16, %v8178_v51  ;;  %v8369_v47 = vsel %vm968_vm1, %v8205_v35, %v8097_v42 }
 0x31a   : > { %v8317_v45 = vadd.f32 %v2139_v29, %v10047_v57  ;;  %v2138_v15 = vadd.f32 %v8287_v31, %v2126_v4  ;;  %v2278_v0 = vmax.f32 %v2258_v5, %v8205_v35  ;;  %v2256_v29 = vmax.f32 %v2229_v12, %v8208_v44 }
 0x31b   : > { %10051 = vst [vmem:[#allocation40_spill] sm:$0xff] %v8361_v39  ;;  %v3808_v32 = vadd.f32 %v3784_v40, %v8184_v9  ;;  %v2279_v19 = vmax.f32 %v2259_v3, %v8369_v47  ;;  %v8388_v40 = vmax.f32 %v2298_v24, %v8267_v38 }
 0x31c   : > { %5422 = vst.msk [vmem:[%s8330_s4 + $0x8] sm:$0xff] %vm541_vm0, %v8317_v45  ;;  %v8336_v26 = vadd.f32 %v2138_v15, %v10050_v6  ;;  %v3809_v15 = vadd.f32 %v3785_v50, %v8216_v53  ;;  %v8383_v6 = vmax.f32 %v2277_v48, %v10035_v23  ;;  %v8391_v50 = vmax.f32 %v2278_v0, %v8109_v8 }
 0x31d   : > { %10053 = vst [vmem:[#allocation45_spill] sm:$0xff] %v8388_v40  ;;  %v2276_v5 = vmax.f32 %v2256_v29, %v8239_v37  ;;  %v8401_v48 = vrot.slane %v8317_v45, 2  ;;  %v3849_v38 = vadd.f32 %v3808_v32, %v8180_v36  ;;  %v3851_v24 = vadd.f32 %v3808_v32, %v8128_v28  ;;  %v10057_v40 = vld [vmem:[#allocation26_spill] sm:$0xff] }
 0x31e   : > { %v8348_v52 = vrot.slane %v8336_v26, 1  ;;  %v8351_v34 = vrot.slane %v8336_v26, 2  ;;  %5421 = vst.msk [vmem:[%s8330_s4] sm:$0xff] %vm541_vm0, %v8336_v26  ;;  %v3745_v4 = vadd.f32 %v8149_v56, %v8336_v26  ;;  %10054 = vst [vmem:[#allocation44_spill] sm:$0xff] %v8391_v50  ;;  %v3829_v57 = vadd.f32 1.0, %v3809_v15 }
 0x31f   : > { %v8408_v30 = vmax.f32 %v2279_v19, %v8109_v8  ;;  %v3852_v61 = vadd.f32 %v3809_v15, %v8128_v28  ;;  %v8416_v39 = vmax.f32 %v2276_v5, %v8197_v49  ;;  %v8423_v19 = vld [vmem:[%s9768_s6 + $0x40] sm:$0xff]  ;;  %v3695_v15 = vsel %vm968_vm1, %v8401_v48, %v8130_v59 }
 0x320   : > { %v3693_v27 = vsel %vm968_vm1, %v8351_v34, %v8130_v59  ;;  %v3766_v63 = vadd.f32 %v8149_v56, %v8348_v52  ;;  %v3767_v16 = vadd.f32 %v3745_v4, %v8348_v52  ;;  %v3672_v12 = vadd.f32 %v8348_v52, %v8336_v26 }
 0x321   : > { %v8395_v56 = vrot.slane %v8317_v45, 1  ;;  %10055 = vst [vmem:[#allocation48_spill] sm:$0xff] %v8408_v30  ;;  %10056 = vst [vmem:[#allocation46_spill] sm:$0xff] %v8416_v39  ;;  %v3871_v5 = vadd.f32 %v3849_v38, %v8184_v9  ;;  %v8434_v37 = vrot.slane %v8423_v19, %v10057_v40  ;;  %v3724_v22 = vadd.f32 %v8351_v34, %v8348_v52 }
 0x322   : > { %v3790_v4 = vadd.f32 %v3766_v63, %v8351_v34  ;;  %v3791_v3 = vadd.f32 %v3767_v16, %v3693_v27  ;;  %v2300_v63 = vmax.f32 %v8383_v6, %v8197_v49  ;;  %v6188_v16 = vpop.eup %6187  ;;  %v3725_v23 = vadd.f32 %v3693_v27, %v3672_v12 }
 0x323   : > { %v6190_v27 = vpop.eup %6189  ;;  %v3850_v6 = vadd.f32 %v3829_v57, %v8180_v36  ;;  %v3873_v12 = vadd.f32 %v3851_v24, %v8130_v59  ;;  %10058 = vst [vmem:[#allocation50_spill] sm:$0xff] %v8434_v37  ;;  %v3874_v9 = vadd.f32 %v3852_v61, %v8130_v59  ;;  %v8442_v38 = vrot.slane %v8423_v19, %v10045_v41 }
 0x324   : > { %v3811_v0 = vadd.f32 %v3791_v3, %v8317_v45  ;;  %v3831_v29 = vadd.f32 %v3790_v4, %v8395_v56  ;;  %v3747_v36 = vadd.f32 %v3725_v23, %v8317_v45  ;;  %v3674_v23 = vadd.f32 %v8395_v56, %v8317_v45 }
 0x325   : > { %10059 = vst [vmem:[#allocation52_spill] sm:$0xff] %v8442_v38  ;;  %6191 = vrcp.f32 %v3871_v5  ;;  %v8452_v61 = vrot.slane %v8423_v19, %v10042_v13  ;;  %v5249_v39 = vmax.f32 %v8336_v26, %v8348_v52  ;;  %v5270_v30 = vmax.f32 %v8348_v52, %v8351_v34 }
 0x326   : > { %v3832_v32 = vadd.f32 %v3811_v0, %v8395_v56  ;;  %v3853_v4 = vadd.f32 %v3831_v29, %v8401_v48  ;;  %v4421_v0 = vld [vmem:[#allocation8 + $0x48] sm:$0xff]  ;;  %v4420_v29 = vld [vmem:[#allocation8 + $0x40] sm:$0xff]  ;;  %6193 = vrcp.f32 %v3873_v12  ;;  %v3727_v12 = vadd.f32 %v3695_v15, %v3674_v23 }
 0x327   : > { %6056 = vmatprep.subr.mxu0 %v4421_v0  ;;  %10060 = vst [vmem:[#allocation43_spill] sm:$0xff] %v8452_v61  ;;  %6195 = vrcp.f32 %v3874_v9  ;;  %v8498_v9 = vmul.f32 0.0, %v8452_v61  ;;  %v8579_v60 = vmax.f32 %v5270_v30, %v8395_v56 }
 0x328   : > { %v6017_v3 = vpop.f32.mrf.mxu1  ;;  %v3854_v17 = vadd.f32 %v3832_v32, %v3695_v15  ;;  %v3876_v8 = vmul.f32 %v6188_v16, %v3853_v4  ;;  %6057 = vmatpush3.msra.mxu0 %v4421_v0  ;;  %v8472_v0 = vmax.f32 %v2300_v63, %v8369_v47 }
 0x329   : > { %v2129_v50 = vmul.f32 %v6017_v3, %v8272_v14  ;;  %6058 = vmatprep.subr.mxu0 %v4420_v29  ;;  %v3872_v3 = vadd.f32 %v3850_v6, %v8216_v53  ;;  %v4055_v6 = vmul.f32 0.0, %v8434_v37  ;;  %v8624_v37 = vld [vmem:[%s9768_s6 + $0x48] ss:$0 sm:$0xff] }
 0x32a   : > { %v2093_v57 = vpop.f32.mrf.mxu1  ;;  %v3878_v24 = vmul.f32 %v6190_v27, %v3854_v17  ;;  %v3897_v16 = vadd.f32 %v3876_v8, %v8094_v1  ;;  %6059 = vmatpush3.msra.mxu0 %v4420_v29  ;;  %v10061_v8 = vld [vmem:[#allocation47_spill] sm:$0xff]  ;;  %10062 = vst [vmem:[#allocation41_spill] sm:$0xff] %v8472_v0  ;;  %v3768_v29 = vadd.f32 %v3724_v22, %v8395_v56  ;;  %v10075_v0 = vld [vmem:[#allocation36_spill] sm:$0xff]  ;;  %10079 = vst [vmem:[#allocation71_spill] sm:$0xff] %v8624_v37 }
 0x32b   : > { %v2141_v32 = vadd.f32 %v8287_v31, %v2129_v50  ;;  %v2128_v4 = vmul.f32 %v8272_v14, %v2093_v57  ;;  %v5827_v27 = vld [vmem:[%s9770_s8 + $0x6] sm:$0x3]  ;;  %v10063_v57 = vld [vmem:[#allocation49_spill] sm:$0xff]  ;;  %6197 = vrcp.f32 %v3872_v3  ;;  %v3726_v22 = vadd.f32 %v8401_v48, %v8395_v56  ;;  %10064 = vst [vmem:[#allocation47_spill] sm:$0xff] %v8498_v9 }
 0x32c   : > { %v3898_v17 = vadd.f32 %v3878_v24, %v8094_v1  ;;  %5447 = vst.msk [vmem:[%s8456_s7 - $0x7] sm:$0x80] %vm5429_vm3, %v3897_v16  ;;  %v3769_v1 = vadd.f32 %v3747_v36, %v8395_v56  ;;  %v4004_v36 = vmul.f32 0.0, %v8442_v38  ;;  %v8485_v16 = vrot.slane %v5827_v27, %v10042_v13 }
 0x32d   : > { %v8461_v50 = vadd.f32 %v2141_v32, %v10061_v8  ;;  %v2140_v53 = vadd.f32 %v8287_v31, %v2128_v4  ;;  %v8495_v63 = vrot.slane %v5827_v27, %v10045_v41  ;;  %v8500_v32 = vrot.slane %v4055_v6, 2  ;;  %v10071_v6 = vld [vmem:[#allocation29_spill] sm:$0xff] }
 0x32e   : > { %5448 = vst.msk [vmem:[%s8456_s7 + $0x1] sm:$0x7f] %vm5431_vm4, %v3898_v17  ;;  %v3793_v4 = vadd.f32 %v3769_v1, %v3695_v15  ;;  %v10067_v17 = vld [vmem:[#allocation32_spill] sm:$0xff]  ;;  %v4020_v27 = vrot.slane %v4004_v36, 1  ;;  %v8519_v15 = vrot.slane %v8423_v19, %v10071_v6  ;;  %v5250_v36 = vmax.f32 %v8317_v45, %v8395_v56 }
 0x32f   : > { %5424 = vst.msk [vmem:[%s8330_s4 + $0x18] sm:$0xff] %vm541_vm0, %v8461_v50  ;;  %v8481_v24 = vadd.f32 %v2140_v53, %v10063_v57  ;;  %v8503_v23 = vrot.slane %v8461_v50, 1  ;;  %v8506_v3 = vrot.slane %v8461_v50, 2  ;;  %v8510_v8 = vrot.slane %v8423_v19, %v10067_v17  ;;  %v10069_v57 = vld [vmem:[#allocation34_spill] sm:$0xff]  ;;  %v10073_v17 = vld [vmem:[#allocation35_spill] sm:$0xff] }
 0x330   : > { %v3792_v53 = vadd.f32 %v3768_v29, %v8401_v48  ;;  %v8515_v47 = vrot.slane %v8423_v19, %v10069_v57  ;;  %10072 = vst [vmem:[#allocation66_spill] sm:$0xff] %v8519_v15  ;;  %v8530_v29 = vrot.slane %v8423_v19, %v10073_v17  ;;  %v8537_v57 = vsel %vm968_vm1, %v8401_v48, %v8097_v42 }
 0x331   : > { %5423 = vst.msk [vmem:[%s8330_s4 + $0x10] sm:$0xff] %vm541_vm0, %v8481_v24  ;;  %10065 = vst [vmem:[#allocation49_spill] sm:$0xff] %v8503_v23  ;;  %v8522_v1 = vrot.slane %v8481_v24, 1  ;;  %v3749_v5 = vadd.f32 %v3727_v12, %v8481_v24  ;;  %v8526_v40 = vmul.f32 0.0, %v8510_v8  ;;  %v5284_v6 = vmax.f32 %v8126_v20, %v8336_v26 }
 0x332   : > { %10066 = vst [vmem:[#allocation63_spill] sm:$0xff] %v8506_v3  ;;  %10068 = vst [vmem:[#allocation64_spill] sm:$0xff] %v8510_v8  ;;  %v3678_v13 = vadd.f32 %v8503_v23, %v8461_v50  ;;  %v3813_v17 = vadd.f32 %v3793_v4, %v8481_v24  ;;  %v3699_v41 = vsel %vm968_vm1, %v8506_v3, %v8130_v59  ;;  %v8574_v55 = vrot.slane %v8481_v24, 2 }
 0x333   : > { %10070 = vst [vmem:[#allocation65_spill] sm:$0xff] %v8515_v47  ;;  %10074 = vst [vmem:[#allocation67_spill] sm:$0xff] %v8530_v29  ;;  %v8551_v35 = vrot.slane %v8423_v19, %v10075_v0  ;;  %v8558_v12 = vsel %vm968_vm1, %v8351_v34, %v8097_v42  ;;  %v5273_v4 = vmax.f32 %v5250_v36, %v8537_v57  ;;  %v8571_v0 = vpop.eup %6191 }
 0x334   : > { %v3676_v49 = vadd.f32 %v8522_v1, %v8481_v24  ;;  %v3771_v44 = vadd.f32 %v3749_v5, %v8522_v1  ;;  %v5292_v19 = vmax.f32 %v8126_v20, %v8348_v52  ;;  %v8569_v26 = vmax.f32 %v5284_v6, %v8348_v52  ;;  %v8589_v6 = vpop.eup %6193 }
 0x335   : > { %10076 = vst [vmem:[#allocation68_spill] sm:$0xff] %v8551_v35  ;;  %v5271_v62 = vmax.f32 %v5249_v39, %v8558_v12  ;;  %v5286_v36 = vmax.f32 %v5273_v4, %v8481_v24  ;;  %v3731_v43 = vadd.f32 %v3699_v41, %v3678_v13  ;;  %v8582_v5 = vadd.f32 %v4020_v27, %v8498_v9  ;;  %v8598_v4 = vpop.eup %6195 }
 0x336   : > { %v8585_v20 = vmax.f32 %v5292_v19, %v8351_v34  ;;  %10077 = vst [vmem:[#allocation69_spill] sm:$0xff] %v8589_v6  ;;  %v3834_v58 = vadd.f32 %v3813_v17, %v8522_v1  ;;  %v3697_v30 = vsel %vm968_vm1, %v8574_v55, %v8130_v59  ;;  %v3770_v13 = vadd.f32 %v3726_v22, %v8522_v1 }
 0x337   : > { %v5251_v27 = vmax.f32 %v8481_v24, %v8522_v1  ;;  %10078 = vst [vmem:[#allocation70_spill] sm:$0xff] %v8598_v4  ;;  %v8604_v19 = vsel %vm968_vm1, %v8574_v55, %v8097_v42  ;;  %v5285_v17 = vmax.f32 %v5271_v62, %v8317_v45  ;;  %v8608_v52 = vmax.f32 %v5286_v36, %v8522_v1 }
 0x338   : > { %v8610_v46 = vpop.eup %6197  ;;  %v3728_v9 = vadd.f32 %v8574_v55, %v8522_v1  ;;  %v3729_v61 = vadd.f32 %v3697_v30, %v3676_v49  ;;  %v3794_v4 = vadd.f32 %v3770_v13, %v8574_v55  ;;  %v3833_v62 = vadd.f32 %v3792_v53, %v8522_v1 }
 0x339   : > { %v8619_v36 = vmax.f32 %v5251_v27, %v8604_v19  ;;  %v3730_v35 = vadd.f32 %v8506_v3, %v8503_v23 }
 0x33a   : > { %v3751_v49 = vadd.f32 %v3729_v61, %v8461_v50  ;;  %v3855_v27 = vadd.f32 %v3833_v62, %v8574_v55  ;;  %v8652_v62 = vmul.f32 0.0, %v8530_v29 }
 0x33c   : > { %v3773_v6 = vadd.f32 %v3751_v49, %v8503_v23  ;;  %v8655_v49 = vmul.f32 0.0, %v8624_v37 }
 0x33d   : > { %v6020_v39 = vpop.f32.mrf.mxu1 }
 0x33e   : > { %v2131_v34 = vmul.f32 %v6020_v39, %v8272_v14  ;;  %v3795_v39 = vadd.f32 %v3771_v44, %v3697_v30  ;;  %v3835_v44 = vadd.f32 %v3794_v4, %v8503_v23  ;;  %v5312_v4 = vmax.f32 %v8579_v60, %v8401_v48 }
 0x33f   : > { %v2103_v22 = vpop.f32.mrf.mxu1 }
 0x340   : > { %v2143_v47 = vadd.f32 %v8287_v31, %v2131_v34  ;;  %v2130_v8 = vmul.f32 %v8272_v14, %v2103_v22  ;;  %v3815_v13 = vadd.f32 %v3795_v39, %v8461_v50  ;;  %v5295_v34 = vmax.f32 %v5285_v17, %v8395_v56  ;;  %v10080_v22 = vld [vmem:[#allocation51_spill] sm:$0xff] }
 0x341   : > { %v3857_v39 = vadd.f32 %v3835_v44, %v8506_v3  ;;  %v8649_v17 = vmul.f32 0.0, %v8519_v15  ;;  %10082 = vst [vmem:[#allocation51_spill] sm:$0xff] %v8652_v62 }
 0x342   : > { %v8631_v38 = vadd.f32 %v2143_v47, %v10080_v22  ;;  %v2142_v53 = vadd.f32 %v8287_v31, %v2130_v8  ;;  %v3836_v61 = vadd.f32 %v3815_v13, %v8503_v23  ;;  %v10081_v47 = vld [vmem:[#allocation53_spill] sm:$0xff]  ;;  %v3797_v13 = vadd.f32 %v3773_v6, %v3699_v41 }
 0x343   : > { %10083 = vst [vmem:[#allocation53_spill] sm:$0xff] %v8655_v49  ;;  %v3880_v22 = vmul.f32 %v8571_v0, %v3855_v27  ;;  %v5313_v60 = vmax.f32 %v5295_v34, %v8537_v57  ;;  %v3883_v62 = vmul.f32 %v8571_v0, %v3857_v39  ;;  %v3772_v6 = vadd.f32 %v3728_v9, %v8503_v23 }
 0x344   : > { %5426 = vst.msk [vmem:[%s8330_s4 + $0x28] sm:$0xff] %vm541_vm0, %v8631_v38  ;;  %v8646_v8 = vadd.f32 %v2142_v53, %v10081_v47  ;;  %v3858_v44 = vadd.f32 %v3836_v61, %v3699_v41  ;;  %v3856_v41 = vadd.f32 %v3834_v58, %v3697_v30  ;;  %v8675_v34 = vsel %vm968_vm1, %v8506_v3, %v8097_v42 }
 0x345   : > { %v8678_v61 = vrot.slane %v8631_v38, 1  ;;  %v3899_v15 = vadd.f32 %v3880_v22, %v8100_v2  ;;  %v3901_v37 = vadd.f32 %v3883_v62, %v8114_v11  ;;  %v5335_v49 = vmax.f32 %v5312_v4, %v8522_v1 }
 0x346   : > { %v8662_v53 = vrot.slane %v8646_v8, 1  ;;  %v3753_v47 = vadd.f32 %v3731_v43, %v8646_v8  ;;  %5425 = vst.msk [vmem:[%s8330_s4 + $0x20] sm:$0xff] %vm541_vm0, %v8646_v8  ;;  %v8681_v43 = vrot.slane %v8631_v38, 2  ;;  %v3817_v39 = vadd.f32 %v3797_v13, %v8646_v8 }
 0x347   : > { %v3884_v58 = vmul.f32 %v8610_v46, %v3858_v44  ;;  %v3882_v27 = vmul.f32 %v8610_v46, %v3856_v41  ;;  %v5315_v13 = vmax.f32 %v8608_v52, %v8604_v19  ;;  %v5327_v44 = vmax.f32 %v5313_v60, %v8481_v24  ;;  %5449 = vst.msk [vmem:[%s8456_s7 + $0x1] sm:$0x80] %vm5429_vm3, %v3899_v15 }
 0x348   : > { %10084 = vst [vmem:[#allocation72_spill] sm:$0xff] %v8681_v43  ;;  %v3680_v9 = vadd.f32 %v8662_v53, %v8646_v8  ;;  %v3775_v30 = vadd.f32 %v3753_v47, %v8662_v53  ;;  %v10085_v22 = vmax.f32 %v8569_v26, %v8558_v12  ;;  %5451 = vst.msk [vmem:[%s8456_s7 + $0x9] sm:$0x80] %vm5429_vm3, %v3901_v37 }
 0x349   : > { %v3902_v29 = vadd.f32 %v3884_v58, %v8114_v11  ;;  %v3900_v51 = vadd.f32 %v3882_v27, %v8100_v2  ;;  %v5333_v11 = vmax.f32 %v8585_v20, %v8395_v56  ;;  %v5336_v62 = vmax.f32 %v5327_v44, %v8522_v1 }
 0x34a   : > { %v5326_v47 = vmax.f32 %v10085_v22, %v8317_v45  ;;  %v8711_v2 = vrot.slane %v8646_v8, 2  ;;  %v3774_v24 = vadd.f32 %v3730_v35, %v8662_v53  ;;  %v3796_v15 = vadd.f32 %v3772_v6, %v8506_v3 }
 0x34b   : > { %5452 = vst.msk [vmem:[%s8456_s7 + $0x11] sm:$0x7f] %vm5431_vm4, %v3902_v29  ;;  %v3838_v4 = vadd.f32 %v3817_v39, %v8662_v53  ;;  %v5351_v45 = vmax.f32 %v5335_v49, %v8574_v55  ;;  %5450 = vst.msk [vmem:[%s8456_s7 + $0x9] sm:$0x7f] %vm5431_vm4, %v3900_v51  ;;  %v5349_v26 = vmax.f32 %v5333_v11, %v8401_v48 }
 0x34c   : > { %v5334_v12 = vmax.f32 %v5326_v47, %v8395_v56  ;;  %v3682_v37 = vadd.f32 %v8678_v61, %v8631_v38  ;;  %v5352_v29 = vmax.f32 %v5336_v62, %v8604_v19  ;;  %v3701_v35 = vsel %vm968_vm1, %v8711_v2, %v8130_v59 }
 0x34d   : > { %v3798_v20 = vadd.f32 %v3774_v24, %v8711_v2  ;;  %v3703_v49 = vsel %vm968_vm1, %v8681_v43, %v8130_v59  ;;  %v5384_v51 = vrot.slane %v5351_v45, 7  ;;  %v3733_v6 = vadd.f32 %v3701_v35, %v3680_v9 }
 0x34e   : > { %v5350_v60 = vmax.f32 %v5334_v12, %v8537_v57  ;;  %v5385_v41 = vrot.slane %v5352_v29, 7  ;;  %v5381_v27 = vrot.slane %v5349_v26, 7  ;;  %v3799_v39 = vadd.f32 %v3775_v30, %v3701_v35 }
 0x34f   : > { %v3837_v58 = vadd.f32 %v3796_v15, %v8662_v53  ;;  %v3755_v22 = vadd.f32 %v3733_v6, %v8631_v38  ;;  %v3839_v47 = vadd.f32 %v3798_v20, %v8678_v61  ;;  %v3860_v11 = vadd.f32 %v3838_v4, %v3701_v35 }
 0x350   : > { %v5382_v44 = vrot.slane %v5350_v60, 7  ;;  %v3735_v62 = vadd.f32 %v3703_v49, %v3682_v37  ;;  %v8736_v24 = vsel %vm1336_vm2, %v5384_v51, %v5385_v41  ;;  %v3819_v45 = vadd.f32 %v3799_v39, %v8631_v38 }
 0x351   : > { %v3859_v57 = vadd.f32 %v3837_v58, %v8711_v2  ;;  %v3777_v30 = vadd.f32 %v3755_v22, %v8678_v61  ;;  %v3861_v15 = vadd.f32 %v3839_v47, %v8681_v43  ;;  %v3886_v26 = vmul.f32 %v8610_v46, %v3860_v11 }
 0x352   : > { %v6023_v9 = vpop.f32.mrf.mxu1  ;;  %v8741_v12 = vsel %vm1336_vm2, %v5381_v27, %v5382_v44  ;;  %v3840_v37 = vadd.f32 %v3819_v45, %v8678_v61  ;;  %v5274_v35 = vmax.f32 %v8522_v1, %v8574_v55  ;;  %v3732_v51 = vadd.f32 %v8711_v2, %v8662_v53 }
 0x353   : > { %v2133_v4 = vmul.f32 %v6023_v9, %v8272_v14  ;;  %v3885_v29 = vmul.f32 %v8571_v0, %v3859_v57  ;;  %v3887_v60 = vmul.f32 %v8571_v0, %v3861_v15  ;;  %v3904_v6 = vadd.f32 %v3886_v26, %v8145_v21  ;;  %v10087_v9 = vld [vmem:[#allocation60_spill] sm:$0xff] }
 0x354   : > { %v2113_v20 = vpop.f32.mrf.mxu1  ;;  %v10086_v41 = vmax.f32 %v8461_v50, %v8503_v23  ;;  %v3862_v44 = vadd.f32 %v3840_v37, %v3703_v49  ;;  %v3801_v47 = vadd.f32 %v3777_v30, %v3703_v49  ;;  %v5298_v57 = vmax.f32 %v5274_v35, %v8503_v23  ;;  %v10092_v35 = vld [vmem:[#allocation61_spill] sm:$0xff] }
 0x355   : > { %v2145_v39 = vadd.f32 %v8287_v31, %v2133_v4  ;;  %v2132_v58 = vmul.f32 %v8272_v14, %v2113_v20  ;;  %v3903_v22 = vadd.f32 %v3885_v29, %v8145_v21  ;;  %v3905_v11 = vadd.f32 %v3887_v60, %v8161_v7  ;;  %5454 = vst.msk [vmem:[%s8456_s7 + $0x19] sm:$0x7f] %vm5431_vm4, %v3904_v6 }
 0x356   : > { %v8759_v27 = vmax.f32 %v10086_v41, %v8675_v34  ;;  %v3888_v26 = vmul.f32 %v8610_v46, %v3862_v44  ;;  %v10089_v21 = vmax.f32 %v8619_v36, %v8461_v50  ;;  %v3734_v30 = vadd.f32 %v8681_v43, %v8678_v61 }
 0x357   : > { %v8771_v15 = vadd.f32 %v2145_v39, %v10087_v9  ;;  %v2144_v14 = vadd.f32 %v8287_v31, %v2132_v58  ;;  %5453 = vst.msk [vmem:[%s8456_s7 + $0x11] sm:$0x80] %vm5429_vm3, %v3903_v22  ;;  %v3776_v4 = vadd.f32 %v3732_v51, %v8678_v61  ;;  %v5316_v37 = vmax.f32 %v5298_v57, %v8506_v3 }
 0x358   : > { %v5299_v49 = vmax.f32 %v10089_v21, %v8503_v23  ;;  %5455 = vst.msk [vmem:[%s8456_s7 + $0x19] sm:$0x80] %vm5429_vm3, %v3905_v11  ;;  %v10090_v31 = vmax.f32 %v8395_v56, %v8401_v48  ;;  %v3906_v51 = vadd.f32 %v3888_v26, %v8161_v7  ;;  %v8804_v60 = vsel %vm968_vm1, %v8711_v2, %v8097_v42 }
 0x359   : > { %10088 = vst [vmem:[#allocation60_spill] sm:$0xff] %v8771_v15  ;;  %v8792_v36 = vrot.slane %v8771_v15, 2  ;;  %5428 = vst.msk [vmem:[%s8330_s4 + $0x38] sm:$0xff] %vm541_vm0, %v8771_v15  ;;  %v8798_v20 = vadd.f32 %v2144_v14, %v10092_v35  ;;  %v8807_v56 = vrot.slane %v8771_v15, 1  ;;  %v5328_v22 = vmax.f32 %v5315_v13, %v8461_v50 }
 0x35a   : > { %v5296_v29 = vmax.f32 %v10090_v31, %v8522_v1  ;;  %v5317_v48 = vmax.f32 %v5299_v49, %v8675_v34  ;;  %v5339_v1 = vmax.f32 %v5316_v37, %v8662_v53  ;;  %5456 = vst.msk [vmem:[%s8456_s7 + $0x21] sm:$0x7f] %vm5431_vm4, %v3906_v51  ;;  %v3800_v37 = vadd.f32 %v3776_v4, %v8681_v43 }
 0x35b   : > { %10091 = vst [vmem:[#allocation73_spill] sm:$0xff] %v8792_v36  ;;  %10093 = vst [vmem:[#allocation61_spill] sm:$0xff] %v8798_v20  ;;  %v8815_v41 = vsel %vm968_vm1, %v8792_v36, %v8130_v59  ;;  %v8818_v7 = vrot.slane %v8798_v20, 1  ;;  %v3757_v39 = vadd.f32 %v3735_v62, %v8798_v20  ;;  %v3821_v58 = vadd.f32 %v3801_v47, %v8798_v20 }
 0x35c   : > { %10094 = vst [vmem:[#allocation74_spill] sm:$0xff] %v8807_v56  ;;  %v5314_v6 = vmax.f32 %v5296_v29, %v8574_v55  ;;  %5427 = vst.msk [vmem:[%s8330_s4 + $0x30] sm:$0xff] %vm541_vm0, %v8798_v20  ;;  %v5329_v44 = vmax.f32 %v5317_v48, %v8646_v8  ;;  %v5355_v55 = vmax.f32 %v5339_v1, %v8711_v2  ;;  %v8839_v9 = vrot.slane %v8798_v20, 2 }
 0x35d   : > { %10095 = vst [vmem:[#allocation75_spill] sm:$0xff] %v8818_v7  ;;  %v3684_v62 = vadd.f32 %v8818_v7, %v8798_v20  ;;  %v3779_v57 = vadd.f32 %v3757_v39, %v8818_v7  ;;  %v3842_v47 = vadd.f32 %v3821_v58, %v8818_v7  ;;  %v5338_v21 = vmax.f32 %v5328_v22, %v8503_v23 }
 0x35e   : > { %v5337_v11 = vmax.f32 %v5314_v6, %v8503_v23  ;;  %10096 = vst [vmem:[#allocation76_spill] sm:$0xff] %v8839_v9  ;;  %v5340_v14 = vmax.f32 %v5329_v44, %v8662_v53  ;;  %v5390_v26 = vrot.slane %v5355_v55, 7  ;;  %v3705_v19 = vsel %vm968_vm1, %v8839_v9, %v8130_v59 }
 0x35f   : > { %v6046_v50 = vpop.f32.mrf.mxu1  ;;  %v3736_v13 = vadd.f32 %v8839_v9, %v8818_v7  ;;  %v3778_v49 = vadd.f32 %v3734_v30, %v8818_v7  ;;  %v5354_v35 = vmax.f32 %v5338_v21, %v8675_v34  ;;  %v3737_v1 = vadd.f32 %v3705_v19, %v3684_v62 }
 0x360   : > { %v5353_v52 = vmax.f32 %v5337_v11, %v8506_v3  ;;  %v3580_v31 = vmul.f32 %v6046_v50, %v8485_v16  ;;  %v5356_v29 = vmax.f32 %v5340_v14, %v8804_v60  ;;  %v3803_v58 = vadd.f32 %v3779_v57, %v3705_v19 }
 0x361   : > { %v3536_v48 = vpop.f32.mrf.mxu1  ;;  %v3780_v6 = vadd.f32 %v8807_v56, %v3736_v13  ;;  %v3802_v39 = vadd.f32 %v3778_v49, %v8839_v9  ;;  %v5388_v4 = vrot.slane %v5354_v35, 7  ;;  %v3759_v22 = vadd.f32 %v3737_v1, %v8771_v15 }
 0x362   : > { %v5387_v51 = vrot.slane %v5353_v52, 7  ;;  %v3592_v44 = vadd.f32 %v8495_v63, %v3580_v31  ;;  %v3579_v30 = vmul.f32 %v8485_v16, %v3536_v48  ;;  %v5391_v55 = vrot.slane %v5356_v29, 7 }
 0x363   : > { %v3804_v11 = vadd.f32 %v8792_v36, %v3780_v6  ;;  %v3823_v34 = vadd.f32 %v3803_v58, %v8771_v15  ;;  %v3841_v14 = vadd.f32 %v3800_v37, %v8818_v7  ;;  %v3781_v50 = vadd.f32 %v8807_v56, %v3759_v22 }
 0x364   : > { %v3608_v62 = vrot.slane %v3592_v44, 1  ;;  %v3591_v21 = vadd.f32 %v8495_v63, %v3579_v30  ;;  %v8864_v52 = vsel %vm1336_vm2, %v5390_v26, %v5391_v55  ;;  %v8867_v57 = vsel %vm1336_vm2, %v5387_v51, %v5388_v4 }
 0x365   : > { %10097 = vst [vmem:[#allocation77_spill] sm:$0xff] %v8864_v52  ;;  %10098 = vst [vmem:[#allocation78_spill] sm:$0xff] %v8867_v57  ;;  %v3843_v13 = vadd.f32 %v3802_v39, %v8807_v56  ;;  %v3844_v49 = vadd.f32 %v3823_v34, %v8807_v56  ;;  %v3845_v31 = vadd.f32 %v3804_v11, %v8128_v28  ;;  %v10112_v56 = vld [vmem:[#allocation47_spill] sm:$0xff] }
 0x366   : > { %v10099_v37 = vmax.f32 %v8200_v18, %v8122_v10  ;;  %v3626_v35 = vadd.f32 %v3608_v62, %v8258_v25  ;;  %v3607_v26 = vrot.slane %v3591_v21, 1  ;;  %v3863_v48 = vadd.f32 %v3841_v14, %v8839_v9  ;;  %v10101_v21 = vld [vmem:[#allocation33_spill] sm:$0xff] }
 0x367   : > { %v4103_v51 = vadd.f32 %v8500_v32, %v8582_v5  ;;  %v3805_v1 = vadd.f32 %v8815_v41, %v3781_v50  ;;  %v3864_v6 = vadd.f32 %v3842_v47, %v3705_v19  ;;  %v3865_v39 = vadd.f32 %v3843_v13, %v8792_v36 }
 0x368   : > { %v3625_v29 = vadd.f32 %v3608_v62, %v10099_v37  ;;  %v3919_v44 = vmax.f32 %v3626_v35, 0.0  ;;  %5434 = vst.msk [vmem:[%s8883_s16 + $0x9] sm:$0x7f] %vm5431_vm4, %v3626_v35  ;;  %v3623_v10 = vadd.f32 %v3607_v26, %v8230_v54  ;;  %v3624_v18 = vadd.f32 %v3607_v26, %v8275_v33  ;;  %v10103_v35 = vld [vmem:[#allocation67_spill] sm:$0xff] }
 0x369   : > { %v3846_v25 = vadd.f32 %v3805_v1, %v8128_v28  ;;  %v3866_v5 = vadd.f32 %v3844_v49, %v8815_v41  ;;  %v3867_v47 = vadd.f32 %v3845_v31, %v8130_v59  ;;  %v3889_v19 = vmul.f32 %v8571_v0, %v3863_v48  ;;  %v10100_v28 = vld [vmem:[#allocation53_spill] sm:$0xff]  ;;  %v10104_v48 = vld [vmem:[#allocation68_spill] sm:$0xff] }
 0x36a   : > { %v3918_v58 = vmax.f32 %v3625_v29, 0.0  ;;  %5433 = vst.msk [vmem:[%s8883_s16 + $0x1] sm:$0x80] %vm5429_vm3, %v3625_v29  ;;  %v3952_v55 = vrot.slane %v3919_v44, 7  ;;  %v3916_v4 = vmax.f32 %v3623_v10, 0.0  ;;  %v3917_v22 = vmax.f32 %v3624_v18, 0.0 }
 0x36b   : > { %5430 = vst.msk [vmem:[%s8883_s16 - $0x7] sm:$0x80] %vm5429_vm3, %v3623_v10  ;;  %v4132_v54 = vadd.f32 %v8526_v40, %v4103_v51  ;;  %v8901_v33 = vrot.slane %v8649_v17, 2  ;;  %v8904_v41 = vrot.slane %v10100_v28, 2  ;;  %v3890_v11 = vmul.f32 %v8610_v46, %v3864_v6  ;;  %v10102_v17 = vld [vmem:[#allocation69_spill] sm:$0xff]  ;;  %v10105_v6 = vld [vmem:[#allocation71_spill] sm:$0xff] }
 0x36c   : > { %v3951_v30 = vrot.slane %v3918_v58, 7  ;;  %5432 = vst.msk [vmem:[%s8883_s16 + $0x1] sm:$0x7f] %vm5431_vm4, %v3624_v18  ;;  %v3948_v14 = vrot.slane %v3916_v4, 7  ;;  %v3949_v62 = vrot.slane %v3917_v22, 7  ;;  %v3907_v50 = vadd.f32 %v3889_v19, %v10101_v21  ;;  %v10108_v10 = vld [vmem:[#allocation64_spill] sm:$0xff] }
 0x36d   : > { %v3868_v13 = vadd.f32 %v3846_v25, %v8130_v59  ;;  %v8911_v49 = vmul.f32 %v8571_v0, %v3865_v39  ;;  %v8914_v31 = vmul.f32 %v8610_v46, %v3866_v5  ;;  %v8917_v37 = vmul.f32 %v10102_v17, %v3867_v47  ;;  %v10106_v59 = vld [vmem:[#allocation52_spill] sm:$0xff]  ;;  %v10107_v0 = vld [vmem:[#allocation50_spill] sm:$0xff]  ;;  %v10109_v25 = vld [vmem:[#allocation65_spill] sm:$0xff] }
 0x36e   : > { %v3953_v34 = vsel %vm1336_vm2, %v3951_v30, %v3952_v55  ;;  %v3950_v29 = vsel %vm1336_vm2, %v3948_v14, %v3949_v62  ;;  %5457 = vst.msk [vmem:[%s8456_s7 + $0x21] sm:$0x80] %vm5429_vm3, %v3907_v50  ;;  %v10110_v47 = vld [vmem:[#allocation66_spill] sm:$0xff]  ;;  %v10111_v4 = vld [vmem:[#allocation43_spill] sm:$0xff] }
 0x36f   : > { %v4276_v26 = vmul.f32 %v10103_v35, %v3953_v34  ;;  %v4303_v1 = vmul.f32 %v10104_v48, %v3953_v34  ;;  %v4355_v58 = vmul.f32 %v10105_v6, %v3953_v34  ;;  %v4005_v44 = vmul.f32 %v10106_v59, %v3950_v29 }
 0x370   : > { %v4056_v39 = vmul.f32 %v10107_v0, %v3950_v29  ;;  %v4124_v46 = vmul.f32 %v10108_v10, %v3950_v29  ;;  %v4125_v18 = vmul.f32 %v10108_v10, %v3953_v34  ;;  %v4152_v5 = vmul.f32 %v10109_v25, %v3950_v29 }
 0x371   : > { %v4204_v19 = vmul.f32 %v10110_v47, %v3950_v29  ;;  %v4153_v30 = vmul.f32 %v10109_v25, %v3953_v34  ;;  %v4206_v55 = vmul.f32 %v10110_v47, %v3953_v34  ;;  %v3985_v22 = vmul.f32 %v10111_v4, %v3950_v29 }
 0x372   : > { %v4021_v28 = vrot.slane %v4005_v44, 1  ;;  %v4073_v14 = vrot.slane %v4056_v39, 2  ;;  %v4133_v62 = vadd.f32 %v4124_v46, %v4103_v51  ;;  %v4168_v50 = vrot.slane %v4152_v5, 1 }
 0x373   : > { %v4222_v17 = vrot.slane %v4204_v19, 2  ;;  %v4371_v45 = vrot.slane %v4355_v58, 2  ;;  %v3986_v36 = vmul.f32 %v10111_v4, %v3953_v34  ;;  %v4006_v57 = vmul.f32 %v10106_v59, %v3953_v34 }
 0x374   : > { %v4037_v15 = vadd.f32 %v4021_v28, %v10112_v56  ;;  %v4038_v9 = vadd.f32 %v4021_v28, %v3985_v22  ;;  %v4074_v7 = vsel %vm968_vm1, %v4073_v14, %v8500_v32  ;;  %v4184_v20 = vadd.f32 %v4168_v50, %v4132_v54 }
 0x375   : > { %v4185_v52 = vadd.f32 %v4168_v50, %v4133_v62  ;;  %v4224_v29 = vsel %vm968_vm1, %v4222_v17, %v8901_v33  ;;  %v4319_v44 = vrot.slane %v4303_v1, 1  ;;  %v6049_v46 = vpop.f32.mrf.mxu1  ;;  %v4022_v58 = vrot.slane %v4006_v57, 1 }
 0x376   : > { %v4105_v51 = vadd.f32 %v4073_v14, %v4037_v15  ;;  %v4106_v39 = vadd.f32 %v4074_v7, %v4038_v9  ;;  %v4057_v5 = vmul.f32 %v10107_v0, %v3953_v34  ;;  %v3582_v19 = vmul.f32 %v6049_v46, %v8485_v16  ;;  %v10113_v9 = vld [vmem:[#allocation51_spill] sm:$0xff] }
 0x377   : > { %v4255_v22 = vadd.f32 %v4222_v17, %v4184_v20  ;;  %v4256_v28 = vadd.f32 %v4224_v29, %v4185_v52  ;;  %v4169_v23 = vrot.slane %v4153_v30, 1  ;;  %v3546_v3 = vpop.f32.mrf.mxu1  ;;  %v4373_v54 = vsel %vm968_vm1, %v4371_v45, %v8904_v41  ;;  %v10115_v46 = vld [vmem:[#allocation55_spill] sm:$0xff] }
 0x378   : > { %v4134_v62 = vadd.f32 %v8526_v40, %v4105_v51  ;;  %v4135_v50 = vadd.f32 %v4125_v18, %v4106_v39  ;;  %v4225_v43 = vrot.slane %v4206_v55, 2  ;;  %v3594_v15 = vadd.f32 %v8495_v63, %v3582_v19  ;;  %v10114_v39 = vld [vmem:[#allocation70_spill] sm:$0xff] }
 0x379   : > { %v3581_v7 = vmul.f32 %v8485_v16, %v3546_v3  ;;  %v4283_v57 = vadd.f32 %v10113_v9, %v4255_v22  ;;  %v4284_v34 = vadd.f32 %v4276_v26, %v4256_v28  ;;  %v4039_v20 = vadd.f32 %v4022_v58, %v10112_v56 }
 0x37a   : > { %v4186_v1 = vadd.f32 %v4169_v23, %v4134_v62  ;;  %v4075_v52 = vrot.slane %v4057_v5, 2  ;;  %v3908_v30 = vadd.f32 %v3890_v11, %v10101_v21  ;;  %v3610_v14 = vrot.slane %v3594_v15, 1  ;;  %v10116_v5 = vld [vmem:[#allocation31_spill] sm:$0xff]  ;;  %v10118_v21 = vld [vmem:[#allocation38_spill] sm:$0xff] }
 0x37b   : > { %v3593_v17 = vadd.f32 %v8495_v63, %v3581_v7  ;;  %v4335_v29 = vadd.f32 %v4319_v44, %v4283_v57  ;;  %v4336_v18 = vadd.f32 %v4319_v44, %v4284_v34  ;;  %v4187_v55 = vadd.f32 %v4169_v23, %v4135_v50  ;;  %v10120_v7 = vld [vmem:[#allocation28_spill] sm:$0xff] }
 0x37c   : > { %v4226_v3 = vsel %vm968_vm1, %v4225_v43, %v8901_v33  ;;  %v4040_v51 = vadd.f32 %v4022_v58, %v3986_v36  ;;  %v3896_v26 = vmul.f32 %v10114_v39, %v3868_v13  ;;  %5458 = vst.msk [vmem:[%s8456_s7 + $0x29] sm:$0x7f] %vm5431_vm4, %v3908_v30  ;;  %v10117_v19 = vmax.f32 %v10115_v46, %v10116_v5  ;;  %v10119_v58 = vld [vmem:[#allocation37_spill] sm:$0xff]  ;;  %v10122_v30 = vld [vmem:[#allocation54_spill] sm:$0xff]  ;;  %v10124_v5 = vld [vmem:[#allocation56_spill] sm:$0xff] }
 0x37d   : > { %v3630_v22 = vadd.f32 %v3610_v14, %v10118_v21  ;;  %v3609_v28 = vrot.slane %v3593_v17, 1  ;;  %v4403_v62 = vadd.f32 %v4371_v45, %v4335_v29  ;;  %v4404_v44 = vadd.f32 %v4373_v54, %v4336_v18 }
 0x37e   : > { %v3629_v11 = vadd.f32 %v3610_v14, %v10117_v19  ;;  %v4257_v15 = vadd.f32 %v4225_v43, %v4186_v1  ;;  %v4076_v23 = vsel %vm968_vm1, %v4075_v52, %v8500_v32  ;;  %v4107_v50 = vadd.f32 %v4075_v52, %v4039_v20  ;;  %v10123_v1 = vld [vmem:[#allocation58_spill] sm:$0xff] }
 0x37f   : > { %v3923_v13 = vmax.f32 %v3630_v22, 0.0  ;;  %5438 = vst.msk [vmem:[%s8883_s16 + $0x19] sm:$0x7f] %vm5431_vm4, %v3630_v22  ;;  %v10121_v57 = vmax.f32 %v10119_v58, %v10120_v7  ;;  %v3628_v45 = vadd.f32 %v3609_v28, %v10122_v30  ;;  %v4440_v43 = vrot.slane %v4403_v62, 7 }
 0x380   : > { %v3922_v36 = vmax.f32 %v3629_v11, 0.0  ;;  %5437 = vst.msk [vmem:[%s8883_s16 + $0x11] sm:$0x80] %vm5429_vm3, %v3629_v11  ;;  %v4441_v54 = vrot.slane %v4404_v44, 7  ;;  %v3909_v20 = vadd.f32 %v8911_v49, %v10123_v1  ;;  %v3910_v52 = vadd.f32 %v8914_v31, %v10123_v1 }
 0x381   : > { %v3627_v34 = vadd.f32 %v3609_v28, %v10121_v57  ;;  %v3958_v17 = vrot.slane %v3923_v13, 7  ;;  %v3921_v18 = vmax.f32 %v3628_v45, 0.0  ;;  %5436 = vst.msk [vmem:[%s8883_s16 + $0x11] sm:$0x7f] %vm5431_vm4, %v3628_v45  ;;  %v4258_v46 = vadd.f32 %v4226_v3, %v4187_v55 }
 0x382   : > { %v3957_v14 = vrot.slane %v3922_v36, 7  ;;  %v4442_v39 = vsel %vm1336_vm2, %v4440_v43, %v4441_v54  ;;  %v3911_v19 = vadd.f32 %v8917_v37, %v10124_v5  ;;  %v3912_v49 = vadd.f32 %v3896_v26, %v10124_v5  ;;  %5459 = vst.msk [vmem:[%s8456_s7 + $0x29] sm:$0x80] %vm5429_vm3, %v3909_v20 }
 0x383   : > { %v3920_v29 = vmax.f32 %v3627_v34, 0.0  ;;  %5435 = vst.msk [vmem:[%s8883_s16 + $0x9] sm:$0x80] %vm5429_vm3, %v3627_v34  ;;  %v3955_v21 = vrot.slane %v3921_v18, 7  ;;  %6060 = vmatprep.mubr.msk.f32.mxu0 %vm541_vm0, %v4442_v39  ;;  %v4285_v22 = vadd.f32 %v10113_v9, %v4257_v15  ;;  %v4108_v28 = vadd.f32 %v4076_v23, %v4040_v51 }
 0x384   : > { %5460 = vst.msk [vmem:[%s8456_s7 + $0x31] sm:$0x7f] %vm5431_vm4, %v3910_v52  ;;  %v8988_v31 = vsel %vm1336_vm2, %v3957_v14, %v3958_v17  ;;  %v4136_v55 = vadd.f32 %v8526_v40, %v4107_v50  ;;  %5462 = vst.msk [vmem:[%s8456_s7 + $0x39] sm:$0x7f] %vm5431_vm4, %v3912_v49 }
 0x385   : > { %v3954_v11 = vrot.slane %v3920_v29, 7  ;;  %v4278_v37 = vmul.f32 %v10103_v35, %v8988_v31  ;;  %v8997_v3 = vmul.f32 %v10105_v6, %v8988_v31  ;;  %5461 = vst.msk [vmem:[%s8456_s7 + $0x31] sm:$0x80] %vm5429_vm3, %v3911_v19  ;;  %v4305_v62 = vmul.f32 %v10104_v48, %v8988_v31 }
 0x386   : > { %v9008_v51 = vmul.f32 %v10108_v10, %v8988_v31  ;;  %v9012_v44 = vmul.f32 %v10109_v25, %v8988_v31  ;;  %v9023_v57 = vmul.f32 %v10110_v47, %v8988_v31 }
 0x387   : > { %v3956_v26 = vsel %vm1336_vm2, %v3954_v11, %v3955_v21  ;;  %v4376_v7 = vrot.slane %v8997_v3, 2  ;;  %v4321_v20 = vrot.slane %v4305_v62, 1 }
 0x388   : > { %v4277_v15 = vmul.f32 %v10103_v35, %v3956_v26  ;;  %v4304_v23 = vmul.f32 %v10104_v48, %v3956_v26  ;;  %v4357_v50 = vmul.f32 %v10105_v6, %v3956_v26  ;;  %v4126_v36 = vmul.f32 %v10108_v10, %v3956_v26  ;;  %v6052_v14 = vpop.f32.mrf.mxu1 }
 0x389   : > { %v4154_v13 = vmul.f32 %v10109_v25, %v3956_v26  ;;  %v4207_v58 = vmul.f32 %v10110_v47, %v3956_v26  ;;  %v4377_v52 = vsel %vm968_vm1, %v4376_v7, %v8904_v41  ;;  %v4007_v39 = vmul.f32 %v10106_v59, %v3956_v26 }
 0x38a   : > { %v4286_v34 = vadd.f32 %v4277_v15, %v4258_v46  ;;  %v4320_v30 = vrot.slane %v4304_v23, 1  ;;  %v4374_v45 = vrot.slane %v4357_v50, 2  ;;  %v4137_v43 = vadd.f32 %v4126_v36, %v4108_v28  ;;  %v3556_v11 = vpop.f32.mrf.mxu1 }
 0x38b   : > { %v4170_v54 = vrot.slane %v4154_v13, 1  ;;  %v4227_v1 = vrot.slane %v4207_v58, 2  ;;  %v3584_v5 = vmul.f32 %v6052_v14, %v8485_v16  ;;  %v4023_v3 = vrot.slane %v4007_v39, 1 }
 0x38c   : > { %v4337_v17 = vadd.f32 %v4320_v30, %v4285_v22  ;;  %v4338_v29 = vadd.f32 %v4320_v30, %v4286_v34  ;;  %v4375_v18 = vsel %vm968_vm1, %v4374_v45, %v8904_v41  ;;  %v4058_v62 = vmul.f32 %v10107_v0, %v3956_v26 }
 0x38d   : > { %v4188_v46 = vadd.f32 %v4170_v54, %v4136_v55  ;;  %v4189_v19 = vadd.f32 %v4170_v54, %v4137_v43  ;;  %v4228_v49 = vsel %vm968_vm1, %v4227_v1, %v8901_v33  ;;  %v3596_v22 = vadd.f32 %v8495_v63, %v3584_v5  ;;  %v10128_v5 = vld [vmem:[#allocation45_spill] sm:$0xff] }
 0x38e   : > { %v4405_v21 = vadd.f32 %v4374_v45, %v4337_v17  ;;  %v4406_v28 = vadd.f32 %v4375_v18, %v4338_v29  ;;  %v3583_v15 = vmul.f32 %v8485_v16, %v3556_v11  ;;  %v3987_v55 = vmul.f32 %v10111_v4, %v3956_v26  ;;  %v10125_v29 = vld [vmem:[#allocation57_spill] sm:$0xff]  ;;  %v10126_v18 = vld [vmem:[#allocation42_spill] sm:$0xff] }
 0x38f   : > { %v4259_v23 = vadd.f32 %v4227_v1, %v4188_v46  ;;  %v4260_v50 = vadd.f32 %v4228_v49, %v4189_v19  ;;  %v4041_v58 = vadd.f32 %v4023_v3, %v10112_v56  ;;  %v3612_v34 = vrot.slane %v3596_v22, 1  ;;  %v10130_v22 = vld [vmem:[#allocation62_spill] sm:$0xff] }
 0x390   : > { %v4443_v36 = vrot.slane %v4405_v21, 7  ;;  %v4444_v13 = vrot.slane %v4406_v28, 7  ;;  %v3595_v30 = vadd.f32 %v8495_v63, %v3583_v15  ;;  %v4042_v14 = vadd.f32 %v4023_v3, %v3987_v55 }
 0x391   : > { %v4287_v45 = vadd.f32 %v10113_v9, %v4259_v23  ;;  %v4288_v43 = vadd.f32 %v4278_v37, %v4260_v50  ;;  %v4077_v17 = vrot.slane %v4058_v62, 2  ;;  %v4171_v1 = vrot.slane %v9012_v44, 1  ;;  %v10129_v62 = vld [vmem:[#allocation40_spill] sm:$0xff]  ;;  %v10132_v50 = vld [vmem:[#allocation39_spill] sm:$0xff] }
 0x392   : > { %v4445_v54 = vsel %vm1336_vm2, %v4443_v36, %v4444_v13  ;;  %v10127_v39 = vmax.f32 %v10125_v29, %v10126_v18  ;;  %v3634_v46 = vadd.f32 %v3612_v34, %v10128_v5  ;;  %v3611_v19 = vrot.slane %v3595_v30, 1 }
 0x393   : > { %6061 = vmatmul.mubr.msk.f32.vlgmr.msra.gmra.mxu0 %vm541_vm0, %v4445_v54  ;;  %v4339_v49 = vadd.f32 %v4321_v20, %v4287_v45  ;;  %v4340_v11 = vadd.f32 %v4321_v20, %v4288_v43  ;;  %v4078_v37 = vsel %vm968_vm1, %v4077_v17, %v8500_v32  ;;  %v4109_v21 = vadd.f32 %v4077_v17, %v4041_v58 }
 0x394   : > { %v3633_v26 = vadd.f32 %v3612_v34, %v10127_v39  ;;  %v4229_v28 = vrot.slane %v9023_v57, 2  ;;  %v3927_v3 = vmax.f32 %v3634_v46, 0.0  ;;  %5442 = vst.msk [vmem:[%s8883_s16 + $0x29] sm:$0x7f] %vm5431_vm4, %v3634_v46  ;;  %v10131_v15 = vmax.f32 %v10129_v62, %v10130_v22 }
 0x395   : > { %v3632_v20 = vadd.f32 %v3611_v19, %v10132_v50  ;;  %v4407_v36 = vadd.f32 %v4376_v7, %v4339_v49  ;;  %v4408_v13 = vadd.f32 %v4377_v52, %v4340_v11  ;;  %v4110_v55 = vadd.f32 %v4078_v37, %v4042_v14 }
 0x396   : > { %v3926_v44 = vmax.f32 %v3633_v26, 0.0  ;;  %5441 = vst.msk [vmem:[%s8883_s16 + $0x21] sm:$0x80] %vm5429_vm3, %v3633_v26  ;;  %v3631_v23 = vadd.f32 %v3611_v19, %v10131_v15  ;;  %v4138_v58 = vadd.f32 %v8526_v40, %v4109_v21  ;;  %v3964_v57 = vrot.slane %v3927_v3, 7 }
 0x397   : > { %v3925_v45 = vmax.f32 %v3632_v20, 0.0  ;;  %5440 = vst.msk [vmem:[%s8883_s16 + $0x21] sm:$0x7f] %vm5431_vm4, %v3632_v20  ;;  %v4446_v43 = vrot.slane %v4407_v36, 7  ;;  %v4447_v54 = vrot.slane %v4408_v13, 7  ;;  %v4139_v17 = vadd.f32 %v9008_v51, %v4110_v55 }
 0x398   : > { %v3963_v34 = vrot.slane %v3926_v44, 7  ;;  %v3924_v30 = vmax.f32 %v3631_v23, 0.0  ;;  %5439 = vst.msk [vmem:[%s8883_s16 + $0x19] sm:$0x80] %vm5429_vm3, %v3631_v23  ;;  %v4190_v29 = vadd.f32 %v4171_v1, %v4138_v58  ;;  %v3988_v7 = vmul.f32 %v10111_v4, %v8988_v31 }
 0x399   : > { %v3961_v39 = vrot.slane %v3925_v45, 7  ;;  %v4008_v52 = vmul.f32 %v10106_v59, %v8988_v31  ;;  %v4448_v14 = vsel %vm1336_vm2, %v4446_v43, %v4447_v54  ;;  %v4191_v26 = vadd.f32 %v4171_v1, %v4139_v17 }
 0x39a   : > { %v3960_v18 = vrot.slane %v3924_v30, 7  ;;  %v4261_v5 = vadd.f32 %v4229_v28, %v4190_v29  ;;  %v4059_v46 = vmul.f32 %v10107_v0, %v8988_v31  ;;  %v9072_v19 = vsel %vm1336_vm2, %v3963_v34, %v3964_v57  ;;  %6063 = vmatprep.mubr.msk.f32.mxu0 %vm541_vm0, %v4448_v14  ;;  %v6055_v44 = vpop.f32.mrf.mxu1 }
 0x39b   : > { %v4230_v49 = vsel %vm968_vm1, %v4229_v28, %v8901_v33  ;;  %v4024_v11 = vrot.slane %v4008_v52, 1  ;;  %v3586_v28 = vmul.f32 %v6055_v44, %v8485_v16 }
 0x39c   : > { %v9075_v51 = vsel %vm1336_vm2, %v3960_v18, %v3961_v39  ;;  %v4262_v37 = vadd.f32 %v4230_v49, %v4191_v26  ;;  %v4289_v21 = vadd.f32 %v10113_v9, %v4261_v5  ;;  %v4079_v15 = vrot.slane %v4059_v46, 2  ;;  %v3566_v36 = vpop.f32.mrf.mxu1  ;;  %v10133_v49 = vld [vmem:[#allocation44_spill] sm:$0xff] }
 0x39d   : > { %v4279_v1 = vmul.f32 %v10103_v35, %v9075_v51  ;;  %v4306_v31 = vmul.f32 %v10104_v48, %v9075_v51  ;;  %v4359_v3 = vmul.f32 %v10105_v6, %v9075_v51  ;;  %v4043_v62 = vadd.f32 %v4024_v11, %v10112_v56 }
 0x39e   : > { %v4044_v22 = vadd.f32 %v4024_v11, %v3988_v7  ;;  %v4128_v20 = vmul.f32 %v10108_v10, %v9075_v51  ;;  %v4080_v55 = vsel %vm968_vm1, %v4079_v15, %v8500_v32  ;;  %v4156_v34 = vmul.f32 %v10109_v25, %v9075_v51 }
 0x39f   : > { %v4290_v23 = vadd.f32 %v4279_v1, %v4262_v37  ;;  %v4322_v50 = vrot.slane %v4306_v31, 1  ;;  %v4378_v13 = vrot.slane %v4359_v3, 2  ;;  %v4111_v58 = vadd.f32 %v4079_v15, %v4043_v62  ;;  %v10135_v1 = vld [vmem:[#allocation48_spill] sm:$0xff] }
 0x3a0   : > { %v3598_v57 = vadd.f32 %v8495_v63, %v3586_v28  ;;  %v3585_v30 = vmul.f32 %v8485_v16, %v3566_v36  ;;  %v4112_v17 = vadd.f32 %v4080_v55, %v4044_v22  ;;  %v4172_v18 = vrot.slane %v4156_v34, 1  ;;  %v10140_v55 = vld [vmem:[#allocation41_spill] sm:$0xff] }
 0x3a1   : > { %v4341_v45 = vadd.f32 %v4322_v50, %v4289_v21  ;;  %v4342_v43 = vadd.f32 %v4322_v50, %v4290_v23  ;;  %v4379_v54 = vsel %vm968_vm1, %v4378_v13, %v8904_v41  ;;  %v4140_v29 = vadd.f32 %v8526_v40, %v4111_v58  ;;  %v10137_v50 = vld [vmem:[#allocation46_spill] sm:$0xff] }
 0x3a2   : > { %v3614_v39 = vrot.slane %v3598_v57, 1  ;;  %v3597_v7 = vadd.f32 %v8495_v63, %v3585_v30  ;;  %v4141_v26 = vadd.f32 %v4128_v20, %v4112_v17  ;;  %v4209_v16 = vmul.f32 %v10110_v47, %v9075_v51  ;;  %v10138_v20 = vld [vmem:[#allocation59_spill] sm:$0xff] }
 0x3a3   : > { %v4409_v52 = vadd.f32 %v4378_v13, %v4341_v45  ;;  %v4410_v14 = vadd.f32 %v4379_v54, %v4342_v43  ;;  %v4192_v5 = vadd.f32 %v4172_v18, %v4140_v29  ;;  %v4307_v46 = vmul.f32 %v10104_v48, %v9072_v19 }
 0x3a4   : > { %v10134_v11 = vmax.f32 %v10133_v49, %v8097_v42  ;;  %v10136_v21 = vmax.f32 %v10135_v1, %v8097_v42  ;;  %v3613_v31 = vrot.slane %v3597_v7, 1  ;;  %v4193_v62 = vadd.f32 %v4172_v18, %v4141_v26 }
 0x3a5   : > { %v4449_v44 = vrot.slane %v4409_v52, 7  ;;  %v4450_v3 = vrot.slane %v4410_v14, 7  ;;  %v4231_v22 = vrot.slane %v4209_v16, 2  ;;  %v4360_v15 = vmul.f32 %v10105_v6, %v9072_v19 }
 0x3a6   : > { %v3637_v37 = vadd.f32 %v3614_v39, %v10134_v11  ;;  %v3638_v63 = vadd.f32 %v3614_v39, %v10136_v21  ;;  %v10139_v36 = vmax.f32 %v10137_v50, %v10138_v20  ;;  %v3636_v58 = vadd.f32 %v3613_v31, %v10140_v55 }
 0x3a7   : > { %v4451_v34 = vsel %vm1336_vm2, %v4449_v44, %v4450_v3  ;;  %v4232_v57 = vsel %vm968_vm1, %v4231_v22, %v8901_v33  ;;  %v4263_v30 = vadd.f32 %v4231_v22, %v4192_v5  ;;  %v4380_v45 = vrot.slane %v4360_v15, 2 }
 0x3a8   : > { %v3930_v28 = vmax.f32 %v3637_v37, 0.0  ;;  %v3931_v23 = vmax.f32 %v3638_v63, 0.0  ;;  %5445 = vst.msk [vmem:[%s8883_s16 + $0x31] sm:$0x80] %vm5429_vm3, %v3637_v37  ;;  %v3635_v13 = vadd.f32 %v3613_v31, %v10139_v36  ;;  %v3929_v29 = vmax.f32 %v3636_v58, 0.0  ;;  %6064 = vmatmul.mubr.msk.f32.gmra.mxu0 %vm541_vm0, %v4451_v34 }
 0x3a9   : > { %5446 = vst.msk [vmem:[%s8883_s16 + $0x39] sm:$0x7f] %vm5431_vm4, %v3638_v63  ;;  %5444 = vst.msk [vmem:[%s8883_s16 + $0x31] sm:$0x7f] %vm5431_vm4, %v3636_v58  ;;  %v4264_v18 = vadd.f32 %v4232_v57, %v4193_v62  ;;  %v4280_v39 = vmul.f32 %v10103_v35, %v9072_v19  ;;  %v4291_v7 = vadd.f32 %v10113_v9, %v4263_v30  ;;  %v4323_v52 = vrot.slane %v4307_v46, 1 }
 0x3aa   : > { %v3969_v43 = vrot.slane %v3930_v28, 7  ;;  %v3970_v54 = vrot.slane %v3931_v23, 7  ;;  %v3928_v17 = vmax.f32 %v3635_v13, 0.0  ;;  %5443 = vst.msk [vmem:[%s8883_s16 + $0x29] sm:$0x80] %vm5429_vm3, %v3635_v13  ;;  %v3967_v26 = vrot.slane %v3929_v29, 7 }
 0x3ab   : > { %v4381_v5 = vsel %vm968_vm1, %v4380_v45, %v8904_v41  ;;  %v4009_v16 = vmul.f32 %v10106_v59, %v9075_v51  ;;  %v4292_v49 = vadd.f32 %v4280_v39, %v4264_v18  ;;  %v4343_v11 = vadd.f32 %v4323_v52, %v4291_v7  ;;  %s6314_s16 = scalar_lea.vmem %s6313_s26, 2048 }
 0x3ac   : > { %v3966_v14 = vrot.slane %v3928_v17, 7  ;;  %v3989_v37 = vmul.f32 %v10111_v4, %v9075_v51  ;;  %v4060_v1 = vmul.f32 %v10107_v0, %v9075_v51  ;;  %v9141_v21 = vsel %vm1336_vm2, %v3969_v43, %v3970_v54  ;;  %p6316_p2 = scmp.lt.s32.totalorder %s6314_s16, %s6308_s29 }
 0x3ad   : > { %v4025_v63 = vrot.slane %v4009_v16, 1  ;;  %v4210_v31 = vmul.f32 %v10110_v47, %v9072_v19  ;;  %v4344_v44 = vadd.f32 %v4323_v52, %v4292_v49  ;;  %v4411_v3 = vadd.f32 %v4380_v45, %v4343_v11 }
 0x3ae   : > { %v9144_v46 = vsel %vm1336_vm2, %v3966_v14, %v3967_v26  ;;  %v4081_v62 = vrot.slane %v4060_v1, 2  ;;  %v4157_v22 = vmul.f32 %v10109_v25, %v9072_v19  ;;  %v4129_v51 = vmul.f32 %v10108_v10, %v9072_v19  ;;  %p6317_p6 = por %p6316_p2, %p6315_p0 }
 0x3af   : > { %v4045_v15 = vadd.f32 %v4025_v63, %v10112_v56  ;;  %v4046_v28 = vadd.f32 %v4025_v63, %v3989_v37  ;;  %v4233_v23 = vrot.slane %v4210_v31, 2  ;;  %v4412_v50 = vadd.f32 %v4381_v5, %v4344_v44 }
 0x3b0   : > { %v4452_v20 = vrot.slane %v4411_v3, 7  ;;  %v4082_v36 = vsel %vm968_vm1, %v4081_v62, %v8500_v32  ;;  %v4308_v13 = vmul.f32 %v10104_v48, %v9144_v46  ;;  %v4281_v34 = vmul.f32 %v10103_v35, %v9144_v46  ;;  %p6318_p4 = pnand %p6317_p6, %p6311_p13 }
 0x3b1   : > { %v4113_v55 = vadd.f32 %v4081_v62, %v4045_v15  ;;  %v4114_v58 = vadd.f32 %v4082_v36, %v4046_v28  ;;  %v4361_v57 = vmul.f32 %v10105_v6, %v9144_v46  ;;  %v4453_v30 = vrot.slane %v4412_v50, 7 }
 0x3b2   : > { %v4173_v45 = vrot.slane %v4157_v22, 1  ;;  %v4234_v43 = vsel %vm968_vm1, %v4233_v23, %v8901_v33  ;;  %v4010_v54 = vmul.f32 %v10106_v59, %v9072_v19  ;;  %v4324_v18 = vrot.slane %v4308_v13, 1 }
 0x3b3   : > { %v4142_v17 = vadd.f32 %v8526_v40, %v4113_v55  ;;  %v4143_v29 = vadd.f32 %v4129_v51, %v4114_v58  ;;  %v4061_v39 = vmul.f32 %v10107_v0, %v9072_v19  ;;  %v4454_v7 = vsel %vm1336_vm2, %v4452_v20, %v4453_v30 }
 0x3b4   : > { %v3990_v6 = vmul.f32 %v10111_v4, %v9072_v19  ;;  %v4026_v52 = vrot.slane %v4010_v54, 1  ;;  %v4158_v14 = vmul.f32 %v10109_v25, %v9144_v46  ;;  %6066 = vmatprep.mubr.msk.f32.mxu0 %vm541_vm0, %v4454_v7  ;;  %v4382_v16 = vrot.slane %v4361_v57, 2 }
 0x3b5   : > { %v4194_v26 = vadd.f32 %v4173_v45, %v4142_v17  ;;  %v4195_v5 = vadd.f32 %v4173_v45, %v4143_v29  ;;  %v4083_v49 = vrot.slane %v4061_v39, 2  ;;  %v4130_v1 = vmul.f32 %v10108_v10, %v9144_v46 }
 0x3b6   : > { %v4047_v11 = vadd.f32 %v4026_v52, %v10112_v56  ;;  %v4048_v37 = vadd.f32 %v4026_v52, %v3990_v6  ;;  %v4211_v63 = vmul.f32 %v10110_v47, %v9144_v46  ;;  %v4174_v3 = vrot.slane %v4158_v14, 1 }
 0x3b7   : > { %v4265_v19 = vadd.f32 %v4233_v23, %v4194_v26  ;;  %v4266_v31 = vadd.f32 %v4234_v43, %v4195_v5  ;;  %v4084_v44 = vsel %vm968_vm1, %v4083_v49, %v8500_v32  ;;  %v4309_v28 = vmul.f32 %v10104_v48, %v9141_v21  ;;  %v6201_v23 = vld [vmem:[%s9768_s6 + $0x48] ss:$0 sm:$0xff] }
 0x3b8   : > { %v4115_v62 = vadd.f32 %v4083_v49, %v4047_v11  ;;  %v4116_v22 = vadd.f32 %v4084_v44, %v4048_v37  ;;  %v4235_v15 = vrot.slane %v4211_v63, 2  ;;  %v4383_v20 = vsel %vm968_vm1, %v4382_v16, %v8904_v41 }
 0x3b9   : > { %v4293_v51 = vadd.f32 %v10113_v9, %v4265_v19  ;;  %v4294_v50 = vadd.f32 %v4281_v34, %v4266_v31  ;;  %v4362_v36 = vmul.f32 %v6201_v23, %v9141_v21  ;;  %v4282_v58 = vmul.f32 %v10103_v35, %v9141_v21 }
 0x3ba   : > { %v4144_v13 = vadd.f32 %v8526_v40, %v4115_v62  ;;  %v4145_v55 = vadd.f32 %v4130_v1, %v4116_v22  ;;  %v3991_v57 = vmul.f32 %v10111_v4, %v9144_v46  ;;  %v4236_v45 = vsel %vm968_vm1, %v4235_v15, %v8901_v33 }
 0x3bb   : > { %v4345_v30 = vadd.f32 %v4324_v18, %v4293_v51  ;;  %v4346_v34 = vadd.f32 %v4324_v18, %v4294_v50  ;;  %v4011_v43 = vmul.f32 %v10106_v59, %v9144_v46  ;;  %v4325_v29 = vrot.slane %v4309_v28, 1 }
 0x3bc   : > { %v4196_v54 = vadd.f32 %v4174_v3, %v4144_v13  ;;  %v4197_v17 = vadd.f32 %v4174_v3, %v4145_v55  ;;  %v4062_v39 = vmul.f32 %v10107_v0, %v9144_v46  ;;  %v4384_v35 = vrot.slane %v4362_v36, 2 }
 0x3bd   : > { %v4413_v7 = vadd.f32 %v4382_v16, %v4345_v30  ;;  %v4414_v6 = vadd.f32 %v4383_v20, %v4346_v34  ;;  %v4027_v52 = vrot.slane %v4011_v43, 1  ;;  %v4159_v18 = vmul.f32 %v10109_v25, %v9141_v21 }
 0x3be   : > { %v4267_v14 = vadd.f32 %v4235_v15, %v4196_v54  ;;  %v4268_v4 = vadd.f32 %v4236_v45, %v4197_v17  ;;  %v4085_v26 = vrot.slane %v4062_v39, 2  ;;  %v4131_v46 = vmul.f32 %v10108_v10, %v9141_v21  ;;  %v5061_v54 = vld [vmem:[#allocation8 + $0x58] sm:$0xff]  ;;  %v5060_v17 = vld [vmem:[#allocation8 + $0x50] sm:$0xff] }
 0x3bf   : > { %v4455_v5 = vrot.slane %v4413_v7, 7  ;;  %v4456_v49 = vrot.slane %v4414_v6, 7  ;;  %v4049_v59 = vadd.f32 %v4027_v52, %v10112_v56  ;;  %v4050_v11 = vadd.f32 %v4027_v52, %v3991_v57  ;;  %6072 = vmatprep.subr.mxu1 %v5061_v54  ;;  %v10142_v7 = vld [vmem:[#allocation27_spill] sm:$0xff] }
 0x3c0   : > { %v4295_v37 = vadd.f32 %v10113_v9, %v4267_v14  ;;  %v4296_v1 = vadd.f32 %v4282_v58, %v4268_v4  ;;  %v4086_v0 = vsel %vm968_vm1, %v4085_v26, %v8500_v32  ;;  %v4212_v25 = vmul.f32 %v10110_v47, %v9141_v21  ;;  %6073 = vmatpush3.msra.mxu1 %v5061_v54 }
 0x3c1   : > { %v4457_v16 = vsel %vm1336_vm2, %v4455_v5, %v4456_v49  ;;  %v4117_v63 = vadd.f32 %v4085_v26, %v4049_v59  ;;  %v4118_v19 = vadd.f32 %v4086_v0, %v4050_v11  ;;  %v4385_v44 = vsel %vm968_vm1, %v4384_v35, %v8904_v41  ;;  %6074 = vmatprep.subr.mxu1 %v5060_v17 }
 0x3c2   : > { %6067 = vmatmul.mubr.msk.f32.gmra.mxu0 %vm541_vm0, %v4457_v16  ;;  %v4347_v56 = vadd.f32 %v4325_v29, %v4295_v37  ;;  %v4348_v31 = vadd.f32 %v4325_v29, %v4296_v1  ;;  %v4310_v3 = vmul.f32 0.0, %v10104_v48  ;;  %v4175_v10 = vrot.slane %v4159_v18, 1  ;;  %6075 = vmatpush3.msra.mxu1 %v5060_v17  ;;  %v10141_v29 = vld [vmem:[#allocation25_spill] sm:$0xff] }
 0x3c3   : > { %v4146_v32 = vadd.f32 %v8526_v40, %v4117_v63  ;;  %v4147_v62 = vadd.f32 %v4131_v46, %v4118_v19  ;;  %v4237_v22 = vrot.slane %v4212_v25, 2  ;;  %v10144_v63 = vld [vmem:[#allocation32_spill] sm:$0xff]  ;;  %v10145_v25 = vld [vmem:[#allocation29_spill] sm:$0xff] }
 0x3c4   : > { %v4415_v15 = vadd.f32 %v4384_v35, %v4347_v56  ;;  %v4416_v28 = vadd.f32 %v4385_v44, %v4348_v31  ;;  %v4326_v13 = vrot.slane %v4310_v3, 1  ;;  %v10143_v35 = vld [vmem:[#allocation26_spill] sm:$0xff]  ;;  %v9269_v44 = vld [vmem:[%s9768_s6 + $0x58] ss:$0 sm:$0xff] }
 0x3c5   : > { %v4198_v51 = vadd.f32 %v4175_v10, %v4146_v32  ;;  %v4199_v50 = vadd.f32 %v4175_v10, %v4147_v62  ;;  %v4238_v21 = vsel %vm968_vm1, %v4237_v22, %v8901_v33  ;;  %v10146_v10 = vld [vmem:[#allocation34_spill] sm:$0xff] }
 0x3c6   : > { %v4458_v20 = vrot.slane %v4415_v15, 7  ;;  %v4459_v47 = vrot.slane %v4416_v28, 7 }
 0x3c7   : > { %v4269_v23 = vadd.f32 %v4237_v22, %v4198_v51  ;;  %v4270_v36 = vadd.f32 %v4238_v21, %v4199_v50  ;;  %v10147_v51 = vld [vmem:[#allocation35_spill] sm:$0xff] }
 0x3c8   : > { %v4460_v55 = vsel %vm1336_vm2, %v4458_v20, %v4459_v47  ;;  %v10148_v20 = vld [vmem:[#allocation36_spill] sm:$0xff] }
 0x3c9   : > { %6069 = vmatprep.mubr.msk.f32.mxu0 %vm541_vm0, %v4460_v55  ;;  %v4297_v40 = vadd.f32 %v10113_v9, %v4269_v23  ;;  %v4298_v48 = vadd.f32 %v10113_v9, %v4270_v36  ;;  %v5848_v9 = vld [vmem:[%s9768_s6 + $0x50] sm:$0xff] }
 0x3ca   : > { %v9231_v39 = vrot.slane %v5848_v9, %v10141_v29  ;;  %v9237_v6 = vrot.slane %v5848_v9, %v10142_v7  ;;  %v9240_v52 = vrot.slane %v5848_v9, %v10143_v35  ;;  %v9260_v19 = vrot.slane %v5848_v9, %v10144_v63 }
 0x3cb   : > { %v4349_v58 = vadd.f32 %v4326_v13, %v4297_v40  ;;  %v4350_v57 = vadd.f32 %v4326_v13, %v4298_v48  ;;  %v9263_v56 = vrot.slane %v5848_v9, %v10145_v25  ;;  %v9276_v22 = vrot.slane %v5848_v9, %v10146_v10 }
 0x3cc   : > { %v4644_v14 = vmul.f32 0.0, %v9231_v39  ;;  %v9247_v26 = vmul.f32 0.0, %v9237_v6  ;;  %v4695_v18 = vmul.f32 0.0, %v9240_v52  ;;  %v9273_v32 = vmul.f32 0.0, %v9260_v19 }
 0x3cd   : > { %v4417_v30 = vadd.f32 %v8904_v41, %v4349_v58  ;;  %v4418_v34 = vadd.f32 %v8904_v41, %v4350_v57  ;;  %v5839_v41 = vld [vmem:[%s9770_s8 + $0x8] sm:$0x3]  ;;  %v4845_v28 = vmul.f32 0.0, %v9263_v56  ;;  %v9280_v50 = vrot.slane %v5848_v9, %v10147_v51 }
 0x3ce   : > { %v9244_v4 = vrot.slane %v5839_v41, %v10142_v7  ;;  %v4660_v5 = vrot.slane %v4644_v14, 1  ;;  %v9251_v59 = vrot.slane %v5839_v41, %v10141_v29  ;;  %v9254_v1 = vrot.slane %v4695_v18, 2 }
 0x3cf   : > { %v4461_v45 = vrot.slane %v4417_v30, 7  ;;  %v4462_v43 = vrot.slane %v4418_v34, 7  ;;  %v9283_v47 = vrot.slane %v5848_v9, %v10148_v20  ;;  %v4996_v13 = vmul.f32 0.0, %v9269_v44 }
 0x3d0   : > { %v4676_v0 = vadd.f32 %v4660_v5, %v9247_v26  ;;  %v9293_v58 = vmul.f32 0.0, %v9280_v50  ;;  %v9296_v54 = vrot.slane %v4845_v28, 2 }
 0x3d1   : > { %v4463_v33 = vsel %vm1336_vm2, %v4461_v45, %v4462_v43 }
 0x3d2   : > { %6070 = vmatmul.mubr.msk.f32.gmra.mxu0 %vm541_vm0, %v4463_v33  ;;  %v4743_v3 = vadd.f32 %v9254_v1, %v4676_v0 }
 0x3d4   : > { %v4772_v55 = vadd.f32 %v9273_v32, %v4743_v3 }
 0x453   : > { %v6062_v49 = vpop.f32.mrf.mxu0 }
 0x454   : > { %v4590_v11 = vmul.f32 %v6062_v49, %v9244_v4 }
 0x455   : > { %v4546_v37 = vpop.f32.mrf.mxu0 }
 0x456   : > { %v4589_v46 = vmul.f32 %v9244_v4, %v4546_v37  ;;  %v4602_v16 = vadd.f32 %v9251_v59, %v4590_v11 }
 0x458   : > { %v4601_v31 = vadd.f32 %v9251_v59, %v4589_v46  ;;  %v4613_v15 = vmax.f32 %v4602_v16, 0.0  ;;  %v9306_v46 = vrot.slane %v4996_v13, 2 }
 0x45a   : > { %v4612_v62 = vmax.f32 %v4601_v31, 0.0  ;;  %v4995_v17 = vmul.f32 %v9269_v44, %v4613_v15  ;;  %v4646_v14 = vmul.f32 %v9231_v39, %v4613_v15  ;;  %v4943_v11 = vmul.f32 %v9283_v47, %v4613_v15 }
 0x45b   : > { %v4793_v16 = vmul.f32 %v9276_v22, %v4613_v15  ;;  %v4916_v31 = vmul.f32 %v9280_v50, %v4613_v15  ;;  %v4697_v51 = vmul.f32 %v9240_v52, %v4613_v15 }
 0x45c   : > { %v4645_v21 = vmul.f32 %v9231_v39, %v4612_v62  ;;  %v4696_v23 = vmul.f32 %v9240_v52, %v4612_v62  ;;  %v4764_v36 = vmul.f32 %v9260_v19, %v4612_v62  ;;  %v4792_v40 = vmul.f32 %v9276_v22, %v4612_v62 }
 0x45d   : > { %v4844_v48 = vmul.f32 %v9263_v56, %v4612_v62  ;;  %v4625_v57 = vmul.f32 %v9237_v6, %v4612_v62  ;;  %v5011_v62 = vrot.slane %v4995_v17, 2  ;;  %v4662_v28 = vrot.slane %v4646_v14, 1 }
 0x45e   : > { %v4661_v30 = vrot.slane %v4645_v21, 1  ;;  %v4713_v34 = vrot.slane %v4696_v23, 2  ;;  %v4773_v45 = vadd.f32 %v4764_v36, %v4743_v3  ;;  %v4808_v43 = vrot.slane %v4792_v40, 1 }
 0x45f   : > { %v4862_v33 = vrot.slane %v4844_v48, 2  ;;  %v4765_v3 = vmul.f32 %v9260_v19, %v4613_v15  ;;  %v4959_v23 = vrot.slane %v4943_v11, 1  ;;  %v4809_v13 = vrot.slane %v4793_v16, 1 }
 0x460   : > { %v4677_v9 = vadd.f32 %v4661_v30, %v9247_v26  ;;  %v4678_v41 = vadd.f32 %v4661_v30, %v4625_v57  ;;  %v4714_v35 = vsel %vm968_vm1, %v4713_v34, %v9254_v1  ;;  %v4824_v18 = vadd.f32 %v4808_v43, %v4772_v55 }
 0x461   : > { %v4825_v5 = vadd.f32 %v4808_v43, %v4773_v45  ;;  %v4864_v49 = vsel %vm968_vm1, %v4862_v33, %v9296_v54  ;;  %v4846_v55 = vmul.f32 %v9263_v56, %v4613_v15  ;;  %v4626_v57 = vmul.f32 %v9237_v6, %v4613_v15 }
 0x462   : > { %v4745_v37 = vadd.f32 %v4713_v34, %v4677_v9  ;;  %v4746_v0 = vadd.f32 %v4714_v35, %v4678_v41  ;;  %v4895_v63 = vadd.f32 %v4862_v33, %v4824_v18  ;;  %v5013_v34 = vsel %vm968_vm1, %v5011_v62, %v9306_v46 }
 0x463   : > { %v4896_v25 = vadd.f32 %v4864_v49, %v4825_v5  ;;  %v4679_v43 = vadd.f32 %v4662_v28, %v9247_v26  ;;  %v4715_v33 = vrot.slane %v4697_v51, 2  ;;  %v4865_v18 = vrot.slane %v4846_v55, 2 }
 0x464   : > { %v4774_v10 = vadd.f32 %v9273_v32, %v4745_v37  ;;  %v4923_v20 = vadd.f32 %v9293_v58, %v4895_v63  ;;  %v4775_v36 = vadd.f32 %v4765_v3, %v4746_v0  ;;  %v4680_v5 = vadd.f32 %v4662_v28, %v4626_v57 }
 0x465   : > { %v4924_v21 = vadd.f32 %v4916_v31, %v4896_v25  ;;  %v4716_v16 = vsel %vm968_vm1, %v4715_v33, %v9254_v1  ;;  %v4747_v63 = vadd.f32 %v4715_v33, %v4679_v43 }
 0x466   : > { %v4975_v40 = vadd.f32 %v4959_v23, %v4923_v20  ;;  %v4826_v45 = vadd.f32 %v4809_v13, %v4774_v10  ;;  %v4827_v14 = vadd.f32 %v4809_v13, %v4775_v36  ;;  %v4748_v51 = vadd.f32 %v4716_v16, %v4680_v5 }
 0x467   : > { %v4976_v48 = vadd.f32 %v4959_v23, %v4924_v21  ;;  %v4776_v21 = vadd.f32 %v9273_v32, %v4747_v63 }
 0x468   : > { %v6065_v30 = vpop.f32.mrf.mxu0  ;;  %v5043_v9 = vadd.f32 %v5011_v62, %v4975_v40  ;;  %v4897_v0 = vadd.f32 %v4865_v18, %v4826_v45  ;;  %v4866_v62 = vsel %vm968_vm1, %v4865_v18, %v9296_v54 }
 0x469   : > { %v4592_v17 = vmul.f32 %v6065_v30, %v9244_v4  ;;  %v5044_v41 = vadd.f32 %v5013_v34, %v4976_v48  ;;  %v4898_v28 = vadd.f32 %v4866_v62, %v4827_v14 }
 0x46a   : > { %v4556_v35 = vpop.f32.mrf.mxu0  ;;  %v5080_v11 = vrot.slane %v5043_v9, 7  ;;  %v4925_v20 = vadd.f32 %v9293_v58, %v4897_v0 }
 0x46b   : > { %v4604_v49 = vadd.f32 %v9251_v59, %v4592_v17  ;;  %v4591_v15 = vmul.f32 %v9244_v4, %v4556_v35  ;;  %v5081_v37 = vrot.slane %v5044_v41, 7 }
 0x46d   : > { %v9324_v25 = vmax.f32 %v4604_v49, 0.0  ;;  %v4603_v31 = vadd.f32 %v9251_v59, %v4591_v15  ;;  %v5082_v3 = vsel %vm1336_vm2, %v5080_v11, %v5081_v37 }
 0x46e   : > { %6076 = vmatprep.mubr.msk.f32.mxu1 %vm541_vm0, %v5082_v3 }
 0x46f   : > { %v4614_v10 = vmax.f32 %v4603_v31, 0.0  ;;  %v4918_v23 = vmul.f32 %v9280_v50, %v9324_v25  ;;  %v4945_v30 = vmul.f32 %v9283_v47, %v9324_v25  ;;  %v4998_v34 = vmul.f32 %v9269_v44, %v9324_v25 }
 0x470   : > { %v4767_v35 = vmul.f32 %v9260_v19, %v9324_v25  ;;  %v4795_v14 = vmul.f32 %v9276_v22, %v9324_v25 }
 0x471   : > { %v4917_v36 = vmul.f32 %v9280_v50, %v4614_v10  ;;  %v4944_v13 = vmul.f32 %v9283_v47, %v4614_v10  ;;  %v4997_v55 = vmul.f32 %v9269_v44, %v4614_v10  ;;  %v4766_v40 = vmul.f32 %v9260_v19, %v4614_v10 }
 0x472   : > { %v4794_v48 = vmul.f32 %v9276_v22, %v4614_v10  ;;  %v4847_v57 = vmul.f32 %v9263_v56, %v4614_v10  ;;  %v4647_v15 = vmul.f32 %v9231_v39, %v4614_v10  ;;  %v4698_v16 = vmul.f32 %v9240_v52, %v4614_v10 }
 0x473   : > { %v4926_v45 = vadd.f32 %v4917_v36, %v4898_v28  ;;  %v4960_v43 = vrot.slane %v4944_v13, 1  ;;  %v5014_v33 = vrot.slane %v4997_v55, 2  ;;  %v4777_v17 = vadd.f32 %v4766_v40, %v4748_v51 }
 0x474   : > { %v4810_v9 = vrot.slane %v4794_v48, 1  ;;  %v4867_v41 = vrot.slane %v4847_v57, 2  ;;  %v4627_v3 = vmul.f32 %v9237_v6, %v4614_v10  ;;  %v4663_v62 = vrot.slane %v4647_v15, 1 }
 0x475   : > { %v4977_v18 = vadd.f32 %v4960_v43, %v4925_v20  ;;  %v4978_v5 = vadd.f32 %v4960_v43, %v4926_v45  ;;  %v5015_v49 = vsel %vm968_vm1, %v5014_v33, %v9306_v46  ;;  %v5016_v20 = vrot.slane %v4998_v34, 2 }
 0x476   : > { %v4828_v11 = vadd.f32 %v4810_v9, %v4776_v21  ;;  %v4829_v37 = vadd.f32 %v4810_v9, %v4777_v17  ;;  %v4868_v0 = vsel %vm968_vm1, %v4867_v41, %v9296_v54  ;;  %v4717_v36 = vrot.slane %v4698_v16, 2 }
 0x477   : > { %v5045_v63 = vadd.f32 %v5014_v33, %v4977_v18  ;;  %v5046_v31 = vadd.f32 %v5015_v49, %v4978_v5  ;;  %v4681_v40 = vadd.f32 %v4663_v62, %v9247_v26  ;;  %v4682_v21 = vadd.f32 %v4663_v62, %v4627_v3 }
 0x478   : > { %v4899_v28 = vadd.f32 %v4867_v41, %v4828_v11  ;;  %v4900_v51 = vadd.f32 %v4868_v0, %v4829_v37  ;;  %v4961_v45 = vrot.slane %v4945_v30, 1  ;;  %v4718_v43 = vsel %vm968_vm1, %v4717_v36, %v9254_v1 }
 0x479   : > { %v5083_v13 = vrot.slane %v5045_v63, 7  ;;  %v5084_v55 = vrot.slane %v5046_v31, 7  ;;  %v4749_v10 = vadd.f32 %v4717_v36, %v4681_v40  ;;  %v4750_v17 = vadd.f32 %v4718_v43, %v4682_v21 }
 0x47a   : > { %v4927_v48 = vadd.f32 %v9293_v58, %v4899_v28  ;;  %v4928_v57 = vadd.f32 %v4918_v23, %v4900_v51  ;;  %v4648_v34 = vmul.f32 %v9231_v39, %v9324_v25  ;;  %v4848_v18 = vmul.f32 %v9263_v56, %v9324_v25 }
 0x47b   : > { %v5085_v33 = vsel %vm1336_vm2, %v5083_v13, %v5084_v55  ;;  %v4699_v23 = vmul.f32 %v9240_v52, %v9324_v25  ;;  %v5017_v30 = vsel %vm968_vm1, %v5016_v20, %v9306_v46  ;;  %v4778_v5 = vadd.f32 %v9273_v32, %v4749_v10 }
 0x47c   : > { %6077 = vmatmul.mubr.msk.f32.vlgmr.msra.gmra.mxu1 %vm541_vm0, %v5085_v33  ;;  %v4979_v9 = vadd.f32 %v4961_v45, %v4927_v48  ;;  %v4980_v41 = vadd.f32 %v4961_v45, %v4928_v57  ;;  %v4811_v49 = vrot.slane %v4795_v14, 1  ;;  %v4664_v15 = vrot.slane %v4648_v34, 1 }
 0x47d   : > { %v4779_v0 = vadd.f32 %v4767_v35, %v4750_v17  ;;  %v4719_v62 = vrot.slane %v4699_v23, 2  ;;  %v4869_v51 = vrot.slane %v4848_v18, 2  ;;  %v4628_v36 = vmul.f32 %v9237_v6, %v9324_v25 }
 0x47e   : > { %v5047_v11 = vadd.f32 %v5016_v20, %v4979_v9  ;;  %v5048_v37 = vadd.f32 %v5017_v30, %v4980_v41  ;;  %v4830_v16 = vadd.f32 %v4811_v49, %v4778_v5  ;;  %v4683_v3 = vadd.f32 %v4664_v15, %v9247_v26 }
 0x47f   : > { %v4831_v20 = vadd.f32 %v4811_v49, %v4779_v0  ;;  %v4684_v40 = vadd.f32 %v4664_v15, %v4628_v36  ;;  %v4720_v57 = vsel %vm968_vm1, %v4719_v62, %v9254_v1  ;;  %v4870_v33 = vsel %vm968_vm1, %v4869_v51, %v9296_v54 }
 0x480   : > { %v5086_v63 = vrot.slane %v5047_v11, 7  ;;  %v5087_v31 = vrot.slane %v5048_v37, 7  ;;  %v4901_v35 = vadd.f32 %v4869_v51, %v4830_v16  ;;  %v4751_v45 = vadd.f32 %v4719_v62, %v4683_v3 }
 0x481   : > { %v4902_v10 = vadd.f32 %v4870_v33, %v4831_v20  ;;  %v4752_v34 = vadd.f32 %v4720_v57, %v4684_v40 }
 0x482   : > { %v6068_v28 = vpop.f32.mrf.mxu0  ;;  %v5088_v55 = vsel %vm1336_vm2, %v5086_v63, %v5087_v31  ;;  %v4929_v17 = vadd.f32 %v9293_v58, %v4901_v35  ;;  %v4780_v41 = vadd.f32 %v9273_v32, %v4751_v45 }
 0x483   : > { %v4594_v13 = vmul.f32 %v6068_v28, %v9244_v4  ;;  %6079 = vmatprep.mubr.msk.f32.mxu1 %vm541_vm0, %v5088_v55 }
 0x484   : > { %v4566_v14 = vpop.f32.mrf.mxu0 }
 0x485   : > { %v4606_v21 = vadd.f32 %v9251_v59, %v4594_v13  ;;  %v4593_v48 = vmul.f32 %v9244_v4, %v4566_v14 }
 0x487   : > { %v9381_v43 = vmax.f32 %v4606_v21, 0.0  ;;  %v4605_v25 = vadd.f32 %v9251_v59, %v4593_v48 }
 0x489   : > { %v4616_v9 = vmax.f32 %v4605_v25, 0.0  ;;  %v4920_v18 = vmul.f32 %v9280_v50, %v9381_v43  ;;  %v5000_v23 = vmul.f32 %v9269_v44, %v9381_v43  ;;  %v4947_v30 = vmul.f32 %v9283_v47, %v9381_v43 }
 0x48a   : > { %v4769_v5 = vmul.f32 %v9260_v19, %v9381_v43  ;;  %v9398_v49 = vmul.f32 %v9276_v22, %v9381_v43  ;;  %v9402_v15 = vmul.f32 %v9263_v56, %v9381_v43  ;;  %v9412_v62 = vmul.f32 %v9237_v6, %v9381_v43 }
 0x48b   : > { %v4919_v11 = vmul.f32 %v9280_v50, %v4616_v9  ;;  %v4946_v37 = vmul.f32 %v9283_v47, %v4616_v9  ;;  %v4999_v0 = vmul.f32 %v9269_v44, %v4616_v9  ;;  %v4768_v16 = vmul.f32 %v9260_v19, %v4616_v9 }
 0x48c   : > { %v4796_v63 = vmul.f32 %v9276_v22, %v4616_v9  ;;  %v4849_v31 = vmul.f32 %v9263_v56, %v4616_v9  ;;  %v5020_v3 = vrot.slane %v5000_v23, 2  ;;  %v4963_v20 = vrot.slane %v4947_v30, 1 }
 0x48d   : > { %v4930_v28 = vadd.f32 %v4919_v11, %v4902_v10  ;;  %v4962_v51 = vrot.slane %v4946_v37, 1  ;;  %v5018_v36 = vrot.slane %v4999_v0, 2  ;;  %v4781_v13 = vadd.f32 %v4768_v16, %v4752_v34 }
 0x48e   : > { %v4812_v55 = vrot.slane %v4796_v63, 1  ;;  %v4871_v14 = vrot.slane %v4849_v31, 2  ;;  %v5021_v35 = vsel %vm968_vm1, %v5020_v3, %v9306_v46  ;;  %v4649_v57 = vmul.f32 %v9231_v39, %v4616_v9 }
 0x48f   : > { %v4981_v40 = vadd.f32 %v4962_v51, %v4929_v17  ;;  %v4982_v21 = vadd.f32 %v4962_v51, %v4930_v28  ;;  %v5019_v48 = vsel %vm968_vm1, %v5018_v36, %v9306_v46  ;;  %v4700_v10 = vmul.f32 %v9240_v52, %v4616_v9 }
 0x490   : > { %v4832_v45 = vadd.f32 %v4812_v55, %v4780_v41  ;;  %v4833_v25 = vadd.f32 %v4812_v55, %v4781_v13  ;;  %v4872_v33 = vsel %vm968_vm1, %v4871_v14, %v9296_v54  ;;  %v4629_v30 = vmul.f32 %v9237_v6, %v4616_v9 }
 0x491   : > { %v5049_v34 = vadd.f32 %v5018_v36, %v4981_v40  ;;  %v5050_v23 = vadd.f32 %v5019_v48, %v4982_v21  ;;  %v4665_v11 = vrot.slane %v4649_v57, 1  ;;  %v4721_v16 = vrot.slane %v4700_v10, 2 }
 0x492   : > { %v6071_v37 = vpop.f32.mrf.mxu0  ;;  %v4903_v17 = vadd.f32 %v4871_v14, %v4832_v45  ;;  %v4904_v0 = vadd.f32 %v4872_v33, %v4833_v25  ;;  %v4873_v63 = vrot.slane %v9402_v15, 2  ;;  %v4813_v33 = vrot.slane %v9398_v49, 1 }
 0x493   : > { %v4596_v31 = vmul.f32 %v6071_v37, %v9244_v4  ;;  %v5089_v41 = vrot.slane %v5049_v34, 7  ;;  %v5090_v28 = vrot.slane %v5050_v23, 7  ;;  %v4685_v51 = vadd.f32 %v4665_v11, %v9247_v26 }
 0x494   : > { %v4576_v13 = vpop.f32.mrf.mxu0  ;;  %v4931_v55 = vadd.f32 %v9293_v58, %v4903_v17  ;;  %v4932_v36 = vadd.f32 %v4920_v18, %v4904_v0  ;;  %v4686_v40 = vadd.f32 %v4665_v11, %v4629_v30  ;;  %v4722_v9 = vsel %vm968_vm1, %v4721_v16, %v9254_v1 }
 0x495   : > { %v4608_v14 = vadd.f32 %v9251_v59, %v4596_v31  ;;  %v4595_v21 = vmul.f32 %v9244_v4, %v4576_v13  ;;  %v5091_v15 = vsel %vm1336_vm2, %v5089_v41, %v5090_v28  ;;  %v4753_v48 = vadd.f32 %v4721_v16, %v4685_v51 }
 0x496   : > { %6080 = vmatmul.mubr.msk.f32.gmra.mxu1 %vm541_vm0, %v5091_v15  ;;  %v4983_v57 = vadd.f32 %v4963_v20, %v4931_v55  ;;  %v4984_v45 = vadd.f32 %v4963_v20, %v4932_v36  ;;  %v4754_v25 = vadd.f32 %v4722_v9, %v4686_v40  ;;  %v4874_v34 = vsel %vm968_vm1, %v4873_v63, %v9296_v54 }
 0x497   : > { %v4607_v18 = vadd.f32 %v9251_v59, %v4595_v21  ;;  %v4782_v10 = vadd.f32 %v9273_v32, %v4753_v48  ;;  %v4650_v4 = vmul.f32 %v9231_v39, %v9381_v43  ;;  %v4701_v37 = vmul.f32 %v9240_v52, %v9381_v43 }
 0x498   : > { %v5051_v23 = vadd.f32 %v5020_v3, %v4983_v57  ;;  %v5052_v30 = vadd.f32 %v5021_v35, %v4984_v45  ;;  %v4783_v11 = vadd.f32 %v4769_v5, %v4754_v25  ;;  %v9442_v20 = vmax.f32 %v4608_v14, 0.0 }
 0x499   : > { %v4618_v17 = vmax.f32 %v4607_v18, 0.0  ;;  %v4834_v49 = vadd.f32 %v4813_v33, %v4782_v10  ;;  %v4666_v0 = vrot.slane %v4650_v4, 1  ;;  %v4723_v41 = vrot.slane %v4701_v37, 2 }
 0x49a   : > { %v5092_v59 = vrot.slane %v5051_v23, 7  ;;  %v5093_v16 = vrot.slane %v5052_v30, 7  ;;  %v4835_v31 = vadd.f32 %v4813_v33, %v4783_v11  ;;  %v5002_v30 = vmul.f32 %v9269_v44, %v9442_v20 }
 0x49b   : > { %v4905_v28 = vadd.f32 %v4873_v63, %v4834_v49  ;;  %v4921_v51 = vmul.f32 %v9280_v50, %v4618_v17  ;;  %v4948_v13 = vmul.f32 %v9283_v47, %v4618_v17  ;;  %v5001_v3 = vmul.f32 %v9269_v44, %v4618_v17 }
 0x49c   : > { %v5094_v5 = vsel %vm1336_vm2, %v5092_v59, %v5093_v16  ;;  %v4906_v35 = vadd.f32 %v4874_v34, %v4835_v31  ;;  %v4687_v43 = vadd.f32 %v4666_v0, %v9247_v26  ;;  %v4688_v55 = vadd.f32 %v4666_v0, %v9412_v62 }
 0x49d   : > { %6082 = vmatprep.mubr.msk.f32.mxu1 %vm541_vm0, %v5094_v5  ;;  %v4933_v36 = vadd.f32 %v9293_v58, %v4905_v28  ;;  %v4964_v40 = vrot.slane %v4948_v13, 1  ;;  %v5022_v9 = vrot.slane %v5001_v3, 2  ;;  %v4724_v63 = vsel %vm968_vm1, %v4723_v41, %v9254_v1 }
 0x49e   : > { %v4934_v14 = vadd.f32 %v4921_v51, %v4906_v35  ;;  %v4755_v21 = vadd.f32 %v4723_v41, %v4687_v43  ;;  %v4756_v15 = vadd.f32 %v4724_v63, %v4688_v55  ;;  %v4770_v48 = vmul.f32 %v9260_v19, %v4618_v17 }
 0x49f   : > { %v4985_v57 = vadd.f32 %v4964_v40, %v4933_v36  ;;  %v4798_v45 = vmul.f32 %v9276_v22, %v4618_v17  ;;  %v4851_v25 = vmul.f32 %v9263_v56, %v4618_v17  ;;  %v5023_v33 = vsel %vm968_vm1, %v5022_v9, %v9306_v46 }
 0x4a0   : > { %v4986_v62 = vadd.f32 %v4964_v40, %v4934_v14  ;;  %v4784_v18 = vadd.f32 %v9273_v32, %v4755_v21  ;;  %v4785_v10 = vadd.f32 %v4770_v48, %v4756_v15  ;;  %v4949_v37 = vmul.f32 %v9283_v47, %v9442_v20 }
 0x4a1   : > { %v5053_v34 = vadd.f32 %v5022_v9, %v4985_v57  ;;  %v4814_v4 = vrot.slane %v4798_v45, 1  ;;  %v4875_v23 = vrot.slane %v4851_v25, 2  ;;  %v4651_v49 = vmul.f32 %v9231_v39, %v4618_v17 }
 0x4a2   : > { %v5054_v11 = vadd.f32 %v5023_v33, %v4986_v62  ;;  %v4631_v28 = vmul.f32 %v9237_v6, %v4618_v17  ;;  %v4702_v13 = vmul.f32 %v9240_v52, %v4618_v17  ;;  %v4922_v5 = vmul.f32 %v9280_v50, %v9442_v20 }
 0x4a3   : > { %v5095_v0 = vrot.slane %v5053_v34, 7  ;;  %v4836_v59 = vadd.f32 %v4814_v4, %v4784_v18  ;;  %v4837_v16 = vadd.f32 %v4814_v4, %v4785_v10  ;;  %v4876_v31 = vsel %vm968_vm1, %v4875_v23, %v9296_v54 }
 0x4a4   : > { %v5096_v41 = vrot.slane %v5054_v11, 7  ;;  %v4667_v51 = vrot.slane %v4651_v49, 1  ;;  %v5024_v35 = vrot.slane %v5002_v30, 2  ;;  %v4799_v36 = vmul.f32 %v9276_v22, %v9442_v20 }
 0x4a5   : > { %v4907_v3 = vadd.f32 %v4875_v23, %v4836_v59  ;;  %v4908_v44 = vadd.f32 %v4876_v31, %v4837_v16  ;;  %v4965_v52 = vrot.slane %v4949_v37, 1  ;;  %v4725_v17 = vrot.slane %v4702_v13, 2 }
 0x4a6   : > { %v5097_v39 = vsel %vm1336_vm2, %v5095_v0, %v5096_v41  ;;  %v4689_v43 = vadd.f32 %v4667_v51, %v9247_v26  ;;  %v4690_v55 = vadd.f32 %v4667_v51, %v4631_v28  ;;  %v4852_v9 = vmul.f32 %v9263_v56, %v9442_v20 }
 0x4a7   : > { %6083 = vmatmul.mubr.msk.f32.gmra.mxu1 %vm541_vm0, %v5097_v39  ;;  %v4935_v6 = vadd.f32 %v9293_v58, %v4907_v3  ;;  %v4936_v40 = vadd.f32 %v4922_v5, %v4908_v44  ;;  %v4950_v50 = vmul.f32 0.0, %v9283_v47  ;;  %v4726_v26 = vsel %vm968_vm1, %v4725_v17, %v9254_v1 }
 0x4a8   : > { %v4757_v21 = vadd.f32 %v4725_v17, %v4689_v43  ;;  %v5025_v22 = vsel %vm968_vm1, %v5024_v35, %v9306_v46  ;;  %v4758_v15 = vadd.f32 %v4726_v26, %v4690_v55  ;;  %v4771_v48 = vmul.f32 %v9260_v19, %v9442_v20 }
 0x4a9   : > { %v4987_v63 = vadd.f32 %v4965_v52, %v4935_v6  ;;  %v4988_v14 = vadd.f32 %v4965_v52, %v4936_v40  ;;  %v4815_v57 = vrot.slane %v4799_v36, 1  ;;  %v4877_v62 = vrot.slane %v4852_v9, 2 }
 0x4aa   : > { %v4786_v56 = vadd.f32 %v9273_v32, %v4757_v21  ;;  %v4787_v47 = vadd.f32 %v4771_v48, %v4758_v15  ;;  %v4966_v19 = vrot.slane %v4950_v50, 1 }
 0x4ab   : > { %v5055_v45 = vadd.f32 %v5024_v35, %v4987_v63  ;;  %v5056_v25 = vadd.f32 %v5025_v22, %v4988_v14  ;;  %v4878_v4 = vsel %vm968_vm1, %v4877_v62, %v9296_v54 }
 0x4ac   : > { %v4838_v10 = vadd.f32 %v4815_v57, %v4786_v56  ;;  %v4839_v34 = vadd.f32 %v4815_v57, %v4787_v47 }
 0x4ad   : > { %v5098_v33 = vrot.slane %v5055_v45, 7  ;;  %v5099_v18 = vrot.slane %v5056_v25, 7 }
 0x4ae   : > { %v4909_v23 = vadd.f32 %v4877_v62, %v4838_v10  ;;  %v4910_v20 = vadd.f32 %v4878_v4, %v4839_v34 }
 0x4af   : > { %v5100_v1 = vsel %vm1336_vm2, %v5098_v33, %v5099_v18 }
 0x4b0   : > { %6085 = vmatprep.mubr.msk.f32.mxu1 %vm541_vm0, %v5100_v1  ;;  %v4937_v32 = vadd.f32 %v9293_v58, %v4909_v23  ;;  %v4938_v30 = vadd.f32 %v9293_v58, %v4910_v20 }
 0x4b2   : > { %v4989_v11 = vadd.f32 %v4966_v19, %v4937_v32  ;;  %v4990_v37 = vadd.f32 %v4966_v19, %v4938_v30 }
 0x4b4   : > { %v5057_v49 = vadd.f32 %v9306_v46, %v4989_v11  ;;  %v5058_v0 = vadd.f32 %v9306_v46, %v4990_v37 }
 0x4b6   : > { %v5101_v59 = vrot.slane %v5057_v49, 7  ;;  %v5102_v54 = vrot.slane %v5058_v0, 7 }
 0x4b8   : > { %v5103_v16 = vsel %vm1336_vm2, %v5101_v59, %v5102_v54 }
 0x4b9   : > { %6086 = vmatmul.mubr.msk.f32.gmra.mxu1 %vm541_vm0, %v5103_v16 }
 0x4ba   : > { %6321 = shalt.err (!%p6318_p4)
}
 0x4bb   : > { %s6322_s20 = scalar_lea.hbm %s9505_s30, 1024  ;;  %s6326_s13 = scalar_lea.hbm %s9772_s10, 2048 }
 0x4bc   : > { %p6323_p1 = scmp.ne.s32.totalorder %s9505_s30, %s6322_s20  ;;  %p6327_p9 = scmp.lt.s32.totalorder %s9505_s30, %s9772_s10 }
 0x4bd   : > { %p6328_p3 = scmp.lt.s32.totalorder %s6326_s13, %s6322_s20 }
 0x4be   : > { %p6324_p11 = pnand %p6323_p1, %p10149_p7 }
 0x4bf   : > { %p6329_p12 = por %p6328_p3, %p6327_p9 }
 0x4c0   : > { %p6325_p8 = pneg %p6324_p11 }
 0x4c2   : > { %p6330_p5 = pnand %p6329_p12, %p6325_p8 }
 0x4c4   : > { %6333 = shalt.err (!%p6330_p5)
}
 0x4c5   : > { %s9916_s29 = smov 128   ;;  %s6479_s26 = smov 8  }
 0x4c6   : > { %6103 = dma.vmem_to_hbm [thread:$0]  (%p10149_p7), %s9514_s17, 1024, %s9505_s30, %s9516_s25, %s9916_s29, %s9916_s29, %s6479_s26  }
 0x4c7   : > { %s9546_s16 = scalar_lea.hbm %s9771_s9, %s9499_s18  ;;  %s5500_s20 = sshll.u32 %s8330_s4, 4  ;;  %s9549_s20 = int_to_ptr.vmem [resolvable:$true] %s5500_s20 }
 0x4c8   : > { %s5472_s3 = scalar_lea.sflag [#allocation4], %s6694_s23  ;;  %s6334_s13 = scalar_lea.vmem %s9549_s20, 1024 }
 0x4c9   : > { %p6335_p10 = scmp.ne.s32.totalorder %s9549_s20, %s6334_s13  ;;  %s6480_s2 = smov [#allocation10]  }
 0x4ca   : > { %s6338_s30 = sshll.u32 %s6480_s2, 4  ;;  %s6339_s30 = int_to_ptr.vmem [resolvable:$false] %s6338_s30 }
 0x4cb   : > { %p6336_p13 = pnand %p6335_p10, %p10149_p7  ;;  %s6340_s17 = scalar_lea.vmem %s6339_s30, 2048 }
 0x4cc   : > { %p6341_p2 = scmp.lt.s32.totalorder %s9549_s20, %s6339_s30  ;;  %p6342_p6 = scmp.lt.s32.totalorder %s6340_s17, %s6334_s13 }
 0x4cd   : > { %p6337_p0 = pneg %p6336_p13 }
 0x4ce   : > { %p6343_p4 = por %p6342_p6, %p6341_p2 }
 0x4d0   : > { %p6344_p1 = pnand %p6343_p4, %p6337_p0 }
 0x4d2   : > { %6347 = shalt.err (!%p6344_p1)
}
 0x4d3   : > { %s6348_s4 = scalar_lea.hbm %s9546_s16, 1024  ;;  %s6352_s2 = scalar_lea.hbm %s9771_s9, 2048 }
 0x4d4   : > { %p6349_p11 = scmp.ne.s32.totalorder %s9546_s16, %s6348_s4  ;;  %p6353_p3 = scmp.lt.s32.totalorder %s9546_s16, %s9771_s9 }
 0x4d5   : > { %p6354_p12 = scmp.lt.s32.totalorder %s6352_s2, %s6348_s4 }
 0x4d6   : > { %p6350_p8 = pnand %p6349_p11, %p10149_p7 }
 0x4d7   : > { %p6355_p5 = por %p6354_p12, %p6353_p3 }
 0x4d8   : > { %p6351_p9 = pneg %p6350_p8 }
 0x4da   : > { %p6356_p10 = pnand %p6355_p5, %p6351_p9 }
 0x4dc   : > { %6359 = shalt.err (!%p6356_p10)
}
 0x4dd   : > { %s10150_s13 = smov 128   ;;  %s10151_s30 = sshll.u32 %s8456_s7, 4  ;;  %s5533_s30 = int_to_ptr.vmem [resolvable:$true] %s10151_s30 }
 0x4de   : > { %6102 = dma.vmem_to_hbm [thread:$0]  (%p10149_p7), %s9549_s20, 1024, %s9546_s16, %s5472_s3, %s10150_s13, %s10150_s13, %s6479_s26  }
 0x4df   : > { %s6360_s17 = scalar_lea.vmem %s5533_s30, 1024  ;;  %s6481_s29 = smov [#allocation13]  }
 0x4e0   : > { %p6361_p13 = scmp.ne.s32.totalorder %s5533_s30, %s6360_s17  ;;  %s6364_s19 = sshll.u32 %s6481_s29, 4  ;;  %s6365_s19 = int_to_ptr.vmem [resolvable:$false] %s6364_s19 }
 0x4e1   : > { %s6366_s4 = scalar_lea.vmem %s6365_s19, 2048  ;;  %p6367_p6 = scmp.lt.s32.totalorder %s5533_s30, %s6365_s19 }
 0x4e2   : > { %p6362_p0 = pnand %p6361_p13, %p10149_p7  ;;  %p6368_p4 = scmp.lt.s32.totalorder %s6366_s4, %s6360_s17 }
 0x4e4   : > { %p6363_p2 = pneg %p6362_p0  ;;  %p6369_p1 = por %p6368_p4, %p6367_p6 }
 0x4e6   : > { %p6370_p11 = pnand %p6369_p1, %p6363_p2 }
 0x4e8   : > { %6373 = shalt.err (!%p6370_p11)
}
 0x4e9   : > { %s6374_s7 = scalar_lea.hbm %s9512_s27, 1024  ;;  %s6378_s3 = scalar_lea.hbm %s9773_s11, 2048 }
 0x4ea   : > { %p6375_p8 = scmp.ne.s32.totalorder %s9512_s27, %s6374_s7  ;;  %p6379_p12 = scmp.lt.s32.totalorder %s9512_s27, %s9773_s11 }
 0x4eb   : > { %p6380_p5 = scmp.lt.s32.totalorder %s6378_s3, %s6374_s7 }
 0x4ec   : > { %p6376_p9 = pnand %p6375_p8, %p10149_p7 }
 0x4ed   : > { %p6381_p10 = por %p6380_p5, %p6379_p12 }
 0x4ee   : > { %p6377_p3 = pneg %p6376_p9 }
 0x4f0   : > { %p6382_p13 = pnand %p6381_p10, %p6377_p3 }
 0x4f2   : > { %6385 = shalt.err (!%p6382_p13)
}
 0x4f3   : > { %6104 = dma.vmem_to_hbm [thread:$0]  (%p10149_p7), %s5533_s30, 1024, %s9512_s27, %s9516_s25, %s10150_s13, %s10150_s13, %s6479_s26   ;;  %v10152_v43 = vmax.f32 %v8759_v27, %v8646_v8  ;;  %v10153_v6 = vld [vmem:[#allocation72_spill] sm:$0xff]  ;;  %v10154_v14 = vld [vmem:[#allocation63_spill] sm:$0xff]  ;;  %v10155_v26 = vld [vmem:[#allocation49_spill] sm:$0xff]  ;;  %v5254_v62 = vmax.f32 %v8631_v38, %v8678_v61 }
 0x4f4   : > { %v5851_v58 = vld [vmem:[%s9770_s8 + $0xa] sm:$0x3]  ;;  %s9613_s27 = scalar_lea.vmem [#allocation14], %s6697_s15  ;;  %v5261_v40 = vsel %vm968_vm1, %v10153_v6, %v8097_v42  ;;  %v5276_v21 = vmax.f32 %v10155_v26, %v10154_v14  ;;  %v10156_v22 = vld [vmem:[#allocation77_spill] sm:$0xff]  ;;  %v10159_v18 = vld [vmem:[#allocation75_spill] sm:$0xff]  ;;  %s9712_s29 = scalar_lea.hbm %s9774_s12, %s9499_s18 }
 0x4f5   : > { %v9602_v46 = vrot.slane %v5851_v58, %v10142_v7  ;;  %v9605_v31 = vrot.slane %v5851_v58, %v10141_v29  ;;  %v5253_v7 = vmax.f32 %v8646_v8, %v8662_v53  ;;  %v5301_v55 = vmax.f32 %v10152_v43, %v8662_v53  ;;  %v10157_v57 = vld [vmem:[#allocation61_spill] sm:$0xff]  ;;  %v10160_v1 = vld [vmem:[#allocation76_spill] sm:$0xff]  ;;  %v10164_v14 = vld [vmem:[#allocation30_spill] sm:$0xff]  ;;  %s5548_s15 = sshll.u32 %s9613_s27, 4  ;;  %s5487_s19 = scalar_lea.sflag [#allocation15], %s6694_s23  ;;  %s9714_s15 = int_to_ptr.vmem [resolvable:$true] %s5548_s15 }
 0x4f6   : > { %v5300_v25 = vmax.f32 %v5276_v21, %v8662_v53  ;;  %v5255_v10 = vmax.f32 %v10157_v57, %v10159_v18  ;;  %v5262_v4 = vsel %vm968_vm1, %v10160_v1, %v8097_v42  ;;  %v5281_v23 = vmax.f32 %v5254_v62, %v5261_v40  ;;  %s6386_s4 = scalar_lea.vmem %s9714_s15, 1024  ;;  %s6482_s7 = smov [#allocation14]  }
 0x4f7   : > { %v5279_v35 = vmax.f32 %v5253_v7, %v8804_v60  ;;  %v5319_v9 = vmax.f32 %v5301_v55, %v8804_v60  ;;  %v10158_v60 = vld [vmem:[#allocation78_spill] sm:$0xff]  ;;  %p6387_p0 = scmp.ne.s32.totalorder %s9714_s15, %s6386_s4  ;;  %s6390_s16 = sshll.u32 %s6482_s7, 4  ;;  %s6391_s16 = int_to_ptr.vmem [resolvable:$false] %s6390_s16 }
 0x4f8   : > { %v5283_v32 = vmax.f32 %v5255_v10, %v5262_v4  ;;  %v5290_v11 = vmax.f32 %v5281_v23, %v10157_v57  ;;  %s6392_s20 = scalar_lea.vmem %s6391_s16, 2048  ;;  %p6393_p4 = scmp.lt.s32.totalorder %s9714_s15, %s6391_s16 }
 0x4f9   : > { %v5289_v39 = vmax.f32 %v5279_v35, %v8631_v38  ;;  %v5330_v33 = vmax.f32 %v5319_v9, %v8631_v38  ;;  %v10162_v35 = vld [vmem:[#allocation74_spill] sm:$0xff]  ;;  %p6388_p2 = pnand %p6387_p0, %p10149_p7  ;;  %p6394_p1 = scmp.lt.s32.totalorder %s6392_s20, %s6386_s4 }
 0x4fb   : > { %v5342_v20 = vmax.f32 %v5330_v33, %v8678_v61  ;;  %p6389_p6 = pneg %p6388_p2  ;;  %p6395_p11 = por %p6394_p1, %p6393_p4 }
 0x4fd   : > { %v5358_v49 = vmax.f32 %v5342_v20, %v5261_v40  ;;  %p6396_p8 = pnand %p6395_p11, %p6389_p6 }
 0x53c   : > { %v6078_v41 = vpop.f32.mrf.mxu1 }
 0x53d   : > { %v5230_v28 = vmul.f32 %v6078_v41, %v9602_v46  ;;  %v5305_v41 = vmax.f32 %v5290_v11, %v10159_v18 }
 0x53e   : > { %v5186_v51 = vpop.f32.mrf.mxu1 }
 0x53f   : > { %v5242_v13 = vadd.f32 %v9605_v31, %v5230_v28  ;;  %v5229_v3 = vmul.f32 %v9602_v46, %v5186_v51  ;;  %v5323_v55 = vmax.f32 %v5305_v41, %v5262_v4 }
 0x541   : > { %v5414_v44 = vadd.f32 %v8736_v24, %v5242_v13  ;;  %v5241_v5 = vadd.f32 %v9605_v31, %v5229_v3  ;;  %v5303_v24 = vmax.f32 %v5289_v39, %v8678_v61  ;;  %v5394_v13 = vrot.slane %v5358_v49, 7 }
 0x542   : > { %v5282_v3 = vmax.f32 %v10159_v18, %v10160_v1 }
 0x543   : > { %5464 = vst.msk [vmem:[%s9613_s27 + $0x8] sm:$0xff] %vm541_vm0, %v5414_v44  ;;  %v5413_v29 = vadd.f32 %v8741_v12, %v5241_v5  ;;  %v5278_v12 = vmax.f32 %v8662_v53, %v8711_v2  ;;  %v5321_v17 = vmax.f32 %v5303_v24, %v5261_v40  ;;  %v5318_v53 = vmax.f32 %v5300_v25, %v8711_v2  ;;  %v10161_v2 = vld [vmem:[#allocation60_spill] sm:$0xff] }
 0x544   : > { %v5291_v59 = vmax.f32 %v5283_v32, %v10161_v2  ;;  %v5280_v40 = vmax.f32 %v8678_v61, %v10153_v6 }
 0x545   : > { %5463 = vst.msk [vmem:[%s9613_s27] sm:$0xff] %vm541_vm0, %v5413_v29  ;;  %v5302_v27 = vmax.f32 %v5278_v12, %v8678_v61  ;;  %v5331_v45 = vmax.f32 %v5321_v17, %v10157_v57  ;;  %v5341_v30 = vmax.f32 %v5318_v53, %v8678_v61  ;;  %v10163_v17 = vld [vmem:[#allocation73_spill] sm:$0xff] }
 0x546   : > { %v5307_v39 = vmax.f32 %v5291_v59, %v10162_v35  ;;  %v5308_v9 = vsel %vm968_vm1, %v10163_v17, %v8097_v42 }
 0x547   : > { %v5320_v47 = vmax.f32 %v5302_v27, %v10153_v6  ;;  %v5344_v34 = vmax.f32 %v5331_v45, %v10159_v18  ;;  %v5357_v16 = vmax.f32 %v5341_v30, %v10153_v6  ;;  %v5332_v27 = vmax.f32 %v5323_v55, %v10161_v2 }
 0x549   : > { %v5343_v19 = vmax.f32 %v5320_v47, %v10159_v18  ;;  %v5360_v38 = vmax.f32 %v5344_v34, %v5262_v4  ;;  %v5393_v7 = vrot.slane %v5357_v16, 7  ;;  %v5346_v21 = vmax.f32 %v5332_v27, %v10162_v35 }
 0x54b   : > { %v5359_v37 = vmax.f32 %v5343_v19, %v10160_v1  ;;  %v5397_v54 = vrot.slane %v5360_v38, 7  ;;  %v5395_v12 = vsel %vm1336_vm2, %v5393_v7, %v5394_v13  ;;  %v5362_v57 = vmax.f32 %v5346_v21, %v5308_v9 }
 0x54d   : > { %v5396_v28 = vrot.slane %v5359_v37, 7  ;;  %v5400_v33 = vrot.slane %v5362_v57, 7 }
 0x54f   : > { %v5398_v29 = vsel %vm1336_vm2, %v5396_v28, %v5397_v54 }
 0x556   : > { %v6081_v36 = vpop.f32.mrf.mxu1 }
 0x557   : > { %v5232_v52 = vmul.f32 %v6081_v36, %v9602_v46  ;;  %v5306_v36 = vmax.f32 %v5282_v3, %v10162_v35 }
 0x558   : > { %v5196_v50 = vpop.f32.mrf.mxu1 }
 0x559   : > { %v5244_v63 = vadd.f32 %v9605_v31, %v5232_v52  ;;  %v5231_v8 = vmul.f32 %v9602_v46, %v5196_v50  ;;  %v5325_v50 = vmax.f32 %v5307_v39, %v5308_v9 }
 0x55b   : > { %v5416_v15 = vadd.f32 %v10156_v22, %v5244_v63  ;;  %v5243_v48 = vadd.f32 %v9605_v31, %v5231_v8  ;;  %v5304_v63 = vmax.f32 %v5280_v40, %v10159_v18  ;;  %v5324_v8 = vmax.f32 %v5306_v36, %v10163_v17 }
 0x55c   : > { %v5348_v26 = vmax.f32 %v5325_v50, %v10164_v14 }
 0x55d   : > { %5466 = vst.msk [vmem:[%s9613_s27 + $0x18] sm:$0xff] %vm541_vm0, %v5416_v15  ;;  %v5415_v56 = vadd.f32 %v10158_v60, %v5243_v48  ;;  %v5322_v61 = vmax.f32 %v5304_v63, %v10160_v1  ;;  %v5347_v6 = vmax.f32 %v5324_v8, %v10164_v14 }
 0x55e   : > { %v5364_v22 = vmax.f32 %v5348_v26, %v8097_v42 }
 0x55f   : > { %5465 = vst.msk [vmem:[%s9613_s27 + $0x10] sm:$0xff] %vm541_vm0, %v5415_v56  ;;  %v5345_v15 = vmax.f32 %v5322_v61, %v10162_v35  ;;  %v5363_v48 = vmax.f32 %v5347_v6, %v8097_v42 }
 0x560   : > { %v5403_v25 = vrot.slane %v5364_v22, 7 }
 0x561   : > { %v5361_v60 = vmax.f32 %v5345_v15, %v10163_v17  ;;  %v5402_v62 = vrot.slane %v5363_v48, 7 }
 0x563   : > { %v5404_v42 = vsel %vm1336_vm2, %v5402_v62, %v5403_v25  ;;  %v5399_v34 = vrot.slane %v5361_v60, 7 }
 0x565   : > { %v5401_v4 = vsel %vm1336_vm2, %v5399_v34, %v5400_v33 }
 0x567   : > { %v6084_v0 = vpop.f32.mrf.mxu1 }
 0x568   : > { %v5234_v58 = vmul.f32 %v6084_v0, %v9602_v46 }
 0x569   : > { %v5206_v51 = vpop.f32.mrf.mxu1 }
 0x56a   : > { %v5246_v44 = vadd.f32 %v9605_v31, %v5234_v58  ;;  %v5233_v5 = vmul.f32 %v9602_v46, %v5206_v51 }
 0x56c   : > { %v5418_v24 = vadd.f32 %v5398_v29, %v5246_v44  ;;  %v5245_v43 = vadd.f32 %v9605_v31, %v5233_v5 }
 0x56e   : > { %5468 = vst.msk [vmem:[%s9613_s27 + $0x28] sm:$0xff] %vm541_vm0, %v5418_v24  ;;  %v5417_v52 = vadd.f32 %v5395_v12, %v5245_v43 }
 0x570   : > { %5467 = vst.msk [vmem:[%s9613_s27 + $0x20] sm:$0xff] %vm541_vm0, %v5417_v52 }
 0x579   : > { %v6087_v45 = vpop.f32.mrf.mxu1 }
 0x57a   : > { %v5236_v56 = vmul.f32 %v6087_v45, %v9602_v46 }
 0x57b   : > { %v5216_v47 = vpop.f32.mrf.mxu1 }
 0x57c   : > { %v5248_v18 = vadd.f32 %v9605_v31, %v5236_v56  ;;  %v5235_v10 = vmul.f32 %v9602_v46, %v5216_v47 }
 0x57e   : > { %v5420_v53 = vadd.f32 %v5404_v42, %v5248_v18  ;;  %v5247_v1 = vadd.f32 %v9605_v31, %v5235_v10 }
 0x580   : > { %5470 = vst.msk [vmem:[%s9613_s27 + $0x38] sm:$0xff] %vm541_vm0, %v5420_v53  ;;  %v5419_v23 = vadd.f32 %v5401_v4, %v5247_v1 }
 0x582   : > { %5469 = vst.msk [vmem:[%s9613_s27 + $0x30] sm:$0xff] %vm541_vm0, %v5419_v23 }
 0x583   : > { %6399 = shalt.err (!%p6396_p8)
}
 0x584   : > { %s6400_s18 = scalar_lea.hbm %s9712_s29, 1024  ;;  %s6404_s0 = scalar_lea.hbm %s9774_s12, 2048 }
 0x585   : > { %p6401_p9 = scmp.ne.s32.totalorder %s9712_s29, %s6400_s18  ;;  %p6405_p5 = scmp.lt.s32.totalorder %s9712_s29, %s9774_s12 }
 0x586   : > { %p6406_p10 = scmp.lt.s32.totalorder %s6404_s0, %s6400_s18 }
 0x587   : > { %p6402_p3 = pnand %p6401_p9, %p10149_p7 }
 0x588   : > { %p6407_p13 = por %p6406_p10, %p6405_p5 }
 0x589   : > { %p6403_p12 = pneg %p6402_p3 }
 0x58b   : > { %p6408_p0 = pnand %p6407_p13, %p6403_p12 }
 0x58d   : > { %6411 = shalt.err (!%p6408_p0)
}
 0x58e   : > { %6105 = dma.vmem_to_hbm [thread:$0]  (%p10149_p7), %s9714_s15, 1024, %s9712_s29, %s5487_s19, %s10150_s13, %s10150_s13, %s6479_s26  }
 0x58f PF: > { %s5563_s17 = sand.u32 1, %s6454_s21   ;;  %p10165_p2 = scmp.ne.s32.totalorder %s9926_s28, 0 }
 0x590   : > { %p10166_p6 = scmp.ge.s32.totalorder %s6466_s24, 2  ;;  %s5564_s27 = scalar_lea.sflag [#allocation4], %s5563_s17 }
 0x592   : > { %p6125_p4 = pnand %p10166_p6, %p10165_p2 }
 0x594   : > { %p6126_p1 = pneg %p6125_p4 }
 0x596   : > { %6441 = dma.done.wait (%p6126_p1), %s5564_s27, 1024  }
 0x597   : > { %6443 = vsyncadd (%p6126_p1), %s5564_s27, 4294966272  ;;  %s10167_s14 = sadd.s32 4294967294, %s6466_s24  }
 0x598   : > { %s5572_s25 = sand.u32 1, %s10167_s14  }
 0x599   : > { %s5573_s30 = scalar_lea.sflag [#allocation12], %s5572_s25 }
 0x59a   : > { %6445 = dma.done.wait (%p6126_p1), %s5573_s30, 2048  }
 0x59b   : > { %6447 = vsyncadd (%p6126_p1), %s5573_s30, 4294965248  ;;  %s5591_s4 = scalar_lea.sflag [#allocation15], %s5563_s17 }
 0x59c   : > { %6449 = dma.done.wait (%p6126_p1), %s5591_s4, 1024  }
 0x59d   : > { %6451 = vsyncadd (%p6126_p1), %s5591_s4, 4294966272  ;;  %s10168_s24 = sld [smem:[#allocation23_spill]]  ;;  %s10171_s21 = smov %s6458_s22 }
 0x59e   : > { %s10169_s26 = sld [smem:[#allocation22_spill]] }
 0x59f   : > { %s10170_s23 = sld [smem:[#allocation24_spill]] }
 0x5a3   : > { %p34_p7 = scmp.ge.s32.totalorder %s10168_s24, 4  }
 0x5a4   : > { %s10172_s22 = smov %s10169_s26 }
 0x5a5   :  { %36 = sbr.rel (!%p34_p7) target bundleno = 18 (0x12), region = 180 }
 0x5aa   :  { %5596 = vsyncpa [#allocation3], 1 }
 0x5ab   :  { %5598 = vsyncpa [#allocation3 + $0x1], 1 }
 0x5ac   :  { %5599 = vsyncpa [#allocation6], 1 }
 0x5ad   :  { %5600 = vsyncpa [#allocation9], 1 }
 0x5ae   :  { %5601 = vsyncpa [#allocation4], 1 }
 0x5af   :  { %5603 = vsyncpa [#allocation4 + $0x1], 1 }
 0x5b0   :  { %5604 = vsyncpa [#allocation12], 1 }
 0x5b1   :  { %5606 = vsyncpa [#allocation12 + $0x1], 1 }
 0x5b2   :  { %5607 = vsyncpa [#allocation15], 1 }
 0x5b3   :  { %5609 = vsyncpa [#allocation15 + $0x1], 1 }

</bundles_post_ra>
